<compile_context>
chip_gen: v7x
topology: tpu7x:2x2x1
jax: 0.10.0
libtpu: 0.0.40
codegen_flags: <defaults>
</compile_context>

<pallas_src>
import functools

import jax
import jax.numpy as jnp
from jax.experimental import pallas as pl
from jax.experimental.pallas import tpu as pltpu


# =============================================================================
# Fused forward kernel (one batch element per grid step)
# =============================================================================
def _cnn_fused_kernel(x_ref, w1_ref, b1_ref, w2_ref, b2_ref,
                      w3_ref, b3_ref, w4_ref, b4_ref,
                      out_ref, buf1, buf2, *, H, W, base):
    HW = H * W

    # Per-output-column masks for the "shifted flattened slice" conv trick:
    # a tap with kw == 0 must not read across the left image edge (it would
    # pick up the last pixel of the previous row), kw == 2 the right edge.
    p_idx = jax.lax.broadcasted_iota(jnp.int32, (HW, 1), 0)
    wcol = jnp.bitwise_and(p_idx, W - 1)            # p % W  (W is a power of 2)
    mask_l = wcol != 0
    mask_r = wcol != (W - 1)

    def conv3x3_relu(buf_ref, w_ref, b_ref, cin, cout):
        # buf_ref: (rows, cin) flattened activation; the image occupies rows
        #          [base, base + HW); everything else is zero (vertical pad).
        # w_ref:   (9*cin, cout), rows ordered (kh, kw, ci).
        acc = jnp.zeros((HW, cout), jnp.float32)
        for kh in range(3):
            for kw in range(3):
                s = base + (kh - 1) * W + (kw - 1)
                xs = buf_ref[s:s + HW, :]                      # (HW, cin)
                if kw == 0:
                    xs = jnp.where(mask_l, xs, 0.0)
                elif kw == 2:
                    xs = jnp.where(mask_r, xs, 0.0)
                t = kh * 3 + kw
                wt = w_ref[t * cin:(t + 1) * cin, :]           # (cin, cout)
                if cin == 1:
                    acc = acc + xs * wt                        # outer product (VPU)
                else:
                    acc = acc + jnp.dot(                       # MXU
                        xs, wt, preferred_element_type=jnp.float32)
        return jnp.maximum(acc + b_ref[...], 0.0)              # (HW, cout)

    # ---- conv1: 1 -> 8 channels --------------------------------------------
    buf1[...] = jnp.zeros_like(buf1)
    buf1[base:base + HW, :] = x_ref[0]
    a1 = conv3x3_relu(buf1, w1_ref, b1_ref, 1, 8)              # (HW, 8)

    # ---- conv2: 8 -> 16 channels -------------------------------------------
    buf2[...] = jnp.zeros_like(buf2)
    buf2[base:base + HW, :] = a1
    a2 = conv3x3_relu(buf2, w2_ref, b2_ref, 8, 16)             # (HW, 16)

    # ---- fc1 -----------------------------------------------------------------
    # torch flattens NCHW, i.e. feature index = c*H*W + h*W + w, which is the
    # row order of a2.T.  fc1 weight is pre-shaped (16, HW, 512), so no
    # in-kernel flatten is needed:  h1 = sum_c a2.T[c] @ w3[c]
    a2t = a2.T.astype(jnp.bfloat16)                            # (16, HW)
    hid = w3_ref.shape[-1]
    h1 = jnp.zeros((1, hid), jnp.float32)
    for c in range(w3_ref.shape[0]):
        h1 = h1 + jnp.dot(a2t[c:c + 1, :], w3_ref[c],          # bf16 MXU, f32 acc
                          preferred_element_type=jnp.float32)
    h1 = jnp.maximum(h1 + b3_ref[...], 0.0)                    # (1, 512); padded
                                                               # hiddens stay 0
    # ---- fc2 -----------------------------------------------------------------
    y = jnp.dot(h1, w4_ref[...], preferred_element_type=jnp.float32) + b4_ref[...]
    out_ref[0] = y.astype(out_ref.dtype)


# =============================================================================
# Wrapper
# =============================================================================
@jax.jit
def cnn_forward(x_nchw, kp):
    """x_nchw: (N, 1, H, W) float32; kp: prepared params (see prepare_params)."""
    N, C, H, W = x_nchw.shape
    assert C == 1
    assert (W & (W - 1)) == 0, "edge masks assume W is a power of two"
    HW = H * W
    base = -(-(W + 1) // 8) * 8                 # first image row in padded buffer
    rows = -(-(base + HW + W + 1) // 8) * 8     # padded-buffer length
    hid = kp["fc1_w"].shape[-1]

    x_flat = x_nchw.reshape(N, HW, 1)           # C == 1: NCHW flatten == h*W + w

    kernel = functools.partial(_cnn_fused_kernel, H=H, W=W, base=base)
    out = pl.pallas_call(
        kernel,
        out_shape=jax.ShapeDtypeStruct((N, 1, 2), jnp.float32),
        grid=(N,),
        in_specs=[
            pl.BlockSpec((1, HW, 1), lambda n: (n, 0, 0)),          # x
            pl.BlockSpec((9, 8), lambda n: (0, 0)),                 # conv1 w
            pl.BlockSpec((1, 8), lambda n: (0, 0)),                 # conv1 b
            pl.BlockSpec((72, 16), lambda n: (0, 0)),               # conv2 w
            pl.BlockSpec((1, 16), lambda n: (0, 0)),                # conv2 b
            pl.BlockSpec((16, HW, hid), lambda n: (0, 0, 0)),       # fc1 w (bf16)
            pl.BlockSpec((1, hid), lambda n: (0, 0)),               # fc1 b
            pl.BlockSpec((hid, 2), lambda n: (0, 0)),               # fc2 w
            pl.BlockSpec((1, 2), lambda n: (0, 0)),                 # fc2 b
        ],
        out_specs=pl.BlockSpec((1, 1, 2), lambda n: (n, 0, 0)),
        scratch_shapes=[
            pltpu.VMEM((rows, 1), jnp.float32),    # zero-margin conv1 input
            pltpu.VMEM((rows, 8), jnp.float32),    # zero-margin conv2 input
        ],
        compiler_params=pltpu.CompilerParams(
            dimension_semantics=("parallel",),     # shard batch across TCs (v7x)
            vmem_limit_bytes=32 << 20,             # ~9 MiB actually used
        ),
    )(x_flat, kp["conv1_w"], kp["conv1_b"], kp["conv2_w"], kp["conv2_b"],
      kp["fc1_w"], kp["fc1_b"], kp["fc2_w"], kp["fc2_b"])
    return out.reshape(N, 2)


# =============================================================================
# Parameters
# =============================================================================
def init_params(key, H, W):
    """Random params in a torch-equivalent layout:
       conv w: (kh, kw, cin, cout)  == torch_w.transpose(2, 3, 1, 0)
       fc   w: (in, out)            == torch_w.T  (fc1 'in' index = c*H*W+h*W+w)
    """
    ks = jax.random.split(key, 8)
    s = 0.05
    return {
        "conv1_w": s * jax.random.normal(ks[0], (3, 3, 1, 8), jnp.float32),
        "conv1_b": s * jax.random.normal(ks[1], (8,), jnp.float32),
        "conv2_w": s * jax.random.normal(ks[2], (3, 3, 8, 16), jnp.float32),
        "conv2_b": s * jax.random.normal(ks[3], (16,), jnp.float32),
        "fc1_w": s * jax.random.normal(ks[4], (16 * H * W, 500), jnp.float32),
        "fc1_b": s * jax.random.normal(ks[5], (500,), jnp.float32),
        "fc2_w": s * jax.random.normal(ks[6], (500, 2), jnp.float32),
        "fc2_b": s * jax.random.normal(ks[7], (2,), jnp.float32),
    }


def prepare_params(params, H, W):
    """One-time repack into the kernel's layout (outside the hot path)."""
    HW = H * W
    hid = 512                                  # fc1 hidden padded 500 -> 512
    c1w = params["conv1_w"].reshape(9 * 1, 8)
    c2w = params["conv2_w"].reshape(9 * 8, 16)
    f1w = jnp.pad(params["fc1_w"], ((0, 0), (0, hid - 500)))
    f1w = f1w.reshape(16, HW, hid).astype(jnp.bfloat16)        # (c, h*w, out)
    f1b = jnp.pad(params["fc1_b"], (0, hid - 500)).reshape(1, hid)
    f2w = jnp.pad(params["fc2_w"], ((0, hid - 500), (0, 0)))   # padded rows -> 0
    return {
        "conv1_w": c1w, "conv1_b": params["conv1_b"].reshape(1, 8),
        "conv2_w": c2w, "conv2_b": params["conv2_b"].reshape(1, 16),
        "fc1_w": f1w, "fc1_b": f1b,
        "fc2_w": f2w, "fc2_b": params["fc2_b"].reshape(1, 2),
    }


# =============================================================================
# Pure-JAX reference (matches the PyTorch module semantics)
# =============================================================================
@jax.jit
def reference_forward(x_nchw, params):
    dn = ("NHWC", "HWIO", "NHWC")
    x = jnp.transpose(x_nchw, (0, 2, 3, 1))
    y = jax.lax.conv_general_dilated(x, params["conv1_w"], (1, 1), "SAME",
                                     dimension_numbers=dn) + params["conv1_b"]
    y = jax.nn.relu(y)
    y = jax.lax.conv_general_dilated(y, params["conv2_w"], (1, 1), "SAME",
                                     dimension_numbers=dn) + params["conv2_b"]
    y = jax.nn.relu(y)
    y = jnp.transpose(y, (0, 3, 1, 2)).reshape(x_nchw.shape[0], -1)  # NCHW flatten
    y = jax.nn.relu(y @ params["fc1_w"] + params["fc1_b"])
    return y @ params["fc2_w"] + params["fc2_b"]


if __name__ == "__main__":
    key = jax.random.PRNGKey(0)
    k_x, k_p = jax.random.split(key)
    N, C, H, W = 2, 1, 16, 16
    x = jax.random.normal(k_x, (N, C, H, W), jnp.float32)

    params = init_params(k_p, H, W)
    kparams = prepare_params(params, H, W)

    out = cnn_forward(x, kparams)
    out = jax.block_until_ready(out)
    assert out.shape == (N, 2), out.shape

    ref = reference_forward(x, params)
    assert jnp.allclose(out, ref, rtol=5e-2, atol=5e-3), (
        "kernel output mismatch vs pure-JAX reference")

    print("KERNEL_OK")
</pallas_src>

<mosaic_0001>
module attributes {stable_mosaic.version = 11 : i64} {
  func.func @_cnn_fused_kernel(%arg0: i32, %arg1: memref<1x256x1xf32, #tpu.memory_space<vmem>>, %arg2: memref<9x8xf32, #tpu.memory_space<vmem>>, %arg3: memref<1x8xf32, #tpu.memory_space<vmem>>, %arg4: memref<72x16xf32, #tpu.memory_space<vmem>>, %arg5: memref<1x16xf32, #tpu.memory_space<vmem>>, %arg6: memref<16x256x512xbf16, #tpu.memory_space<vmem>>, %arg7: memref<1x512xf32, #tpu.memory_space<vmem>>, %arg8: memref<512x2xf32, #tpu.memory_space<vmem>>, %arg9: memref<1x2xf32, #tpu.memory_space<vmem>>, %arg10: memref<1x1x2xf32, #tpu.memory_space<vmem>>, %arg11: memref<304x1xf32, #tpu.memory_space<vmem>>, %arg12: memref<304x8xf32, #tpu.memory_space<vmem>>) attributes {dimension_semantics = [#tpu.dimension_semantics<parallel>], iteration_bounds = array<i64: 2>, scalar_prefetch = 0 : i64, scratch_operands = 2 : i64, tpu.core_type = #tpu.core_type<tc>, window_params = [{transform_indices = @transform_0, window_bounds = array<i64: 1, 256, 1>}, {pipeline_mode = #tpu.pipeline_mode<synchronous>, transform_indices = @transform_1, window_bounds = array<i64: 9, 8>}, {pipeline_mode = #tpu.pipeline_mode<synchronous>, transform_indices = @transform_2, window_bounds = array<i64: 1, 8>}, {pipeline_mode = #tpu.pipeline_mode<synchronous>, transform_indices = @transform_3, window_bounds = array<i64: 72, 16>}, {pipeline_mode = #tpu.pipeline_mode<synchronous>, transform_indices = @transform_4, window_bounds = array<i64: 1, 16>}, {pipeline_mode = #tpu.pipeline_mode<synchronous>, transform_indices = @transform_5, window_bounds = array<i64: 16, 256, 512>}, {pipeline_mode = #tpu.pipeline_mode<synchronous>, transform_indices = @transform_6, window_bounds = array<i64: 1, 512>}, {pipeline_mode = #tpu.pipeline_mode<synchronous>, transform_indices = @transform_7, window_bounds = array<i64: 512, 2>}, {pipeline_mode = #tpu.pipeline_mode<synchronous>, transform_indices = @transform_8, window_bounds = array<i64: 1, 2>}, {transform_indices = @transform_9, window_bounds = array<i64: 1, 1, 2>}]} {
    %0 = tpu.iota {dimensions = array<i32: 0>} : vector<256x1xi32>
    %c15_i32 = arith.constant 15 : i32
    %1 = vector.broadcast %c15_i32 : i32 to vector<256x1xi32>
    %2 = arith.andi %0, %1 : vector<256x1xi32>
    %c0_i32 = arith.constant 0 : i32
    %3 = vector.broadcast %c0_i32 : i32 to vector<256x1xi32>
    %4 = arith.cmpi ne, %2, %3 : vector<256x1xi32>
    %c15_i32_0 = arith.constant 15 : i32
    %5 = vector.broadcast %c15_i32_0 : i32 to vector<256x1xi32>
    %6 = arith.cmpi ne, %2, %5 : vector<256x1xi32>
    %cst = arith.constant 0.000000e+00 : f32
    %7 = vector.broadcast %cst : f32 to vector<304x1xf32>
    %c0 = arith.constant 0 : index
    %c0_1 = arith.constant 0 : index
    %8 = vector.load %arg11[%c0, %c0_1] : memref<304x1xf32, #tpu.memory_space<vmem>>, vector<304x1xf32>
    tpu.vector_store %arg11[%c0, %c0_1], %7 {strides = array<i32>} : memref<304x1xf32, #tpu.memory_space<vmem>>, vector<304x1xf32>,
    %c0_2 = arith.constant 0 : index
    %c0_3 = arith.constant 0 : index
    %c0_4 = arith.constant 0 : index
    %9 = vector.load %arg1[%c0_2, %c0_3, %c0_4] : memref<1x256x1xf32, #tpu.memory_space<vmem>>, vector<1x256x1xf32>
    %10 = vector.shape_cast %9 : vector<1x256x1xf32> to vector<256x1xf32>
    %c24 = arith.constant 24 : index
    %c0_5 = arith.constant 0 : index
    %11 = vector.load %arg11[%c24, %c0_5] : memref<304x1xf32, #tpu.memory_space<vmem>>, vector<256x1xf32>
    tpu.vector_store %arg11[%c24, %c0_5], %10 {strides = array<i32>} : memref<304x1xf32, #tpu.memory_space<vmem>>, vector<256x1xf32>,
    %cst_6 = arith.constant 0.000000e+00 : f32
    %12 = vector.broadcast %cst_6 : f32 to vector<256x8xf32>
    %c7 = arith.constant 7 : index
    %c0_7 = arith.constant 0 : index
    %13 = vector.load %arg11[%c7, %c0_7] : memref<304x1xf32, #tpu.memory_space<vmem>>, vector<256x1xf32>
    %cst_8 = arith.constant 0.000000e+00 : f32
    %14 = vector.broadcast %cst_8 : f32 to vector<256x1xf32>
    %15 = arith.select %4, %13, %14 : vector<256x1xi1>, vector<256x1xf32>
    %c0_9 = arith.constant 0 : index
    %c0_10 = arith.constant 0 : index
    %16 = vector.load %arg2[%c0_9, %c0_10] : memref<9x8xf32, #tpu.memory_space<vmem>>, vector<1x8xf32>
    %17 = vector.broadcast %15 : vector<256x1xf32> to vector<256x8xf32>
    %18 = vector.broadcast %16 : vector<1x8xf32> to vector<256x8xf32>
    %19 = arith.mulf %17, %18 : vector<256x8xf32>
    %20 = arith.addf %12, %19 : vector<256x8xf32>
    %c8 = arith.constant 8 : index
    %c0_11 = arith.constant 0 : index
    %21 = vector.load %arg11[%c8, %c0_11] : memref<304x1xf32, #tpu.memory_space<vmem>>, vector<256x1xf32>
    %c1 = arith.constant 1 : index
    %c0_12 = arith.constant 0 : index
    %22 = vector.load %arg2[%c1, %c0_12] : memref<9x8xf32, #tpu.memory_space<vmem>>, vector<1x8xf32>
    %23 = vector.broadcast %21 : vector<256x1xf32> to vector<256x8xf32>
    %24 = vector.broadcast %22 : vector<1x8xf32> to vector<256x8xf32>
    %25 = arith.mulf %23, %24 : vector<256x8xf32>
    %26 = arith.addf %20, %25 : vector<256x8xf32>
    %c9 = arith.constant 9 : index
    %c0_13 = arith.constant 0 : index
    %27 = vector.load %arg11[%c9, %c0_13] : memref<304x1xf32, #tpu.memory_space<vmem>>, vector<256x1xf32>
    %cst_14 = arith.constant 0.000000e+00 : f32
    %28 = vector.broadcast %cst_14 : f32 to vector<256x1xf32>
    %29 = arith.select %6, %27, %28 : vector<256x1xi1>, vector<256x1xf32>
    %c2 = arith.constant 2 : index
    %c0_15 = arith.constant 0 : index
    %30 = vector.load %arg2[%c2, %c0_15] : memref<9x8xf32, #tpu.memory_space<vmem>>, vector<1x8xf32>
    %31 = vector.broadcast %29 : vector<256x1xf32> to vector<256x8xf32>
    %32 = vector.broadcast %30 : vector<1x8xf32> to vector<256x8xf32>
    %33 = arith.mulf %31, %32 : vector<256x8xf32>
    %34 = arith.addf %26, %33 : vector<256x8xf32>
    %c23 = arith.constant 23 : index
    %c0_16 = arith.constant 0 : index
    %35 = vector.load %arg11[%c23, %c0_16] : memref<304x1xf32, #tpu.memory_space<vmem>>, vector<256x1xf32>
    %cst_17 = arith.constant 0.000000e+00 : f32
    %36 = vector.broadcast %cst_17 : f32 to vector<256x1xf32>
    %37 = arith.select %4, %35, %36 : vector<256x1xi1>, vector<256x1xf32>
    %c3 = arith.constant 3 : index
    %c0_18 = arith.constant 0 : index
    %38 = vector.load %arg2[%c3, %c0_18] : memref<9x8xf32, #tpu.memory_space<vmem>>, vector<1x8xf32>
    %39 = vector.broadcast %37 : vector<256x1xf32> to vector<256x8xf32>
    %40 = vector.broadcast %38 : vector<1x8xf32> to vector<256x8xf32>
    %41 = arith.mulf %39, %40 : vector<256x8xf32>
    %42 = arith.addf %34, %41 : vector<256x8xf32>
    %c24_19 = arith.constant 24 : index
    %c0_20 = arith.constant 0 : index
    %43 = vector.load %arg11[%c24_19, %c0_20] : memref<304x1xf32, #tpu.memory_space<vmem>>, vector<256x1xf32>
    %c4 = arith.constant 4 : index
    %c0_21 = arith.constant 0 : index
    %44 = vector.load %arg2[%c4, %c0_21] : memref<9x8xf32, #tpu.memory_space<vmem>>, vector<1x8xf32>
    %45 = vector.broadcast %43 : vector<256x1xf32> to vector<256x8xf32>
    %46 = vector.broadcast %44 : vector<1x8xf32> to vector<256x8xf32>
    %47 = arith.mulf %45, %46 : vector<256x8xf32>
    %48 = arith.addf %42, %47 : vector<256x8xf32>
    %c25 = arith.constant 25 : index
    %c0_22 = arith.constant 0 : index
    %49 = vector.load %arg11[%c25, %c0_22] : memref<304x1xf32, #tpu.memory_space<vmem>>, vector<256x1xf32>
    %cst_23 = arith.constant 0.000000e+00 : f32
    %50 = vector.broadcast %cst_23 : f32 to vector<256x1xf32>
    %51 = arith.select %6, %49, %50 : vector<256x1xi1>, vector<256x1xf32>
    %c5 = arith.constant 5 : index
    %c0_24 = arith.constant 0 : index
    %52 = vector.load %arg2[%c5, %c0_24] : memref<9x8xf32, #tpu.memory_space<vmem>>, vector<1x8xf32>
    %53 = vector.broadcast %51 : vector<256x1xf32> to vector<256x8xf32>
    %54 = vector.broadcast %52 : vector<1x8xf32> to vector<256x8xf32>
    %55 = arith.mulf %53, %54 : vector<256x8xf32>
    %56 = arith.addf %48, %55 : vector<256x8xf32>
    %c39 = arith.constant 39 : index
    %c0_25 = arith.constant 0 : index
    %57 = vector.load %arg11[%c39, %c0_25] : memref<304x1xf32, #tpu.memory_space<vmem>>, vector<256x1xf32>
    %cst_26 = arith.constant 0.000000e+00 : f32
    %58 = vector.broadcast %cst_26 : f32 to vector<256x1xf32>
    %59 = arith.select %4, %57, %58 : vector<256x1xi1>, vector<256x1xf32>
    %c6 = arith.constant 6 : index
    %c0_27 = arith.constant 0 : index
    %60 = vector.load %arg2[%c6, %c0_27] : memref<9x8xf32, #tpu.memory_space<vmem>>, vector<1x8xf32>
    %61 = vector.broadcast %59 : vector<256x1xf32> to vector<256x8xf32>
    %62 = vector.broadcast %60 : vector<1x8xf32> to vector<256x8xf32>
    %63 = arith.mulf %61, %62 : vector<256x8xf32>
    %64 = arith.addf %56, %63 : vector<256x8xf32>
    %c40 = arith.constant 40 : index
    %c0_28 = arith.constant 0 : index
    %65 = vector.load %arg11[%c40, %c0_28] : memref<304x1xf32, #tpu.memory_space<vmem>>, vector<256x1xf32>
    %c7_29 = arith.constant 7 : index
    %c0_30 = arith.constant 0 : index
    %66 = vector.load %arg2[%c7_29, %c0_30] : memref<9x8xf32, #tpu.memory_space<vmem>>, vector<1x8xf32>
    %67 = vector.broadcast %65 : vector<256x1xf32> to vector<256x8xf32>
    %68 = vector.broadcast %66 : vector<1x8xf32> to vector<256x8xf32>
    %69 = arith.mulf %67, %68 : vector<256x8xf32>
    %70 = arith.addf %64, %69 : vector<256x8xf32>
    %c41 = arith.constant 41 : index
    %c0_31 = arith.constant 0 : index
    %71 = vector.load %arg11[%c41, %c0_31] : memref<304x1xf32, #tpu.memory_space<vmem>>, vector<256x1xf32>
    %cst_32 = arith.constant 0.000000e+00 : f32
    %72 = vector.broadcast %cst_32 : f32 to vector<256x1xf32>
    %73 = arith.select %6, %71, %72 : vector<256x1xi1>, vector<256x1xf32>
    %c8_33 = arith.constant 8 : index
    %c0_34 = arith.constant 0 : index
    %74 = vector.load %arg2[%c8_33, %c0_34] : memref<9x8xf32, #tpu.memory_space<vmem>>, vector<1x8xf32>
    %75 = vector.broadcast %73 : vector<256x1xf32> to vector<256x8xf32>
    %76 = vector.broadcast %74 : vector<1x8xf32> to vector<256x8xf32>
    %77 = arith.mulf %75, %76 : vector<256x8xf32>
    %78 = arith.addf %70, %77 : vector<256x8xf32>
    %c0_35 = arith.constant 0 : index
    %c0_36 = arith.constant 0 : index
    %79 = vector.load %arg3[%c0_35, %c0_36] : memref<1x8xf32, #tpu.memory_space<vmem>>, vector<1x8xf32>
    %80 = vector.broadcast %79 : vector<1x8xf32> to vector<256x8xf32>
    %81 = arith.addf %78, %80 : vector<256x8xf32>
    %cst_37 = arith.constant 0.000000e+00 : f32
    %82 = vector.broadcast %cst_37 : f32 to vector<256x8xf32>
    %83 = arith.maximumf %81, %82 : vector<256x8xf32>
    %cst_38 = arith.constant 0.000000e+00 : f32
    %84 = vector.broadcast %cst_38 : f32 to vector<304x8xf32>
    %c0_39 = arith.constant 0 : index
    %c0_40 = arith.constant 0 : index
    %85 = vector.load %arg12[%c0_39, %c0_40] : memref<304x8xf32, #tpu.memory_space<vmem>>, vector<304x8xf32>
    tpu.vector_store %arg12[%c0_39, %c0_40], %84 {strides = array<i32>} : memref<304x8xf32, #tpu.memory_space<vmem>>, vector<304x8xf32>,
    %c24_41 = arith.constant 24 : index
    %c0_42 = arith.constant 0 : index
    %86 = vector.load %arg12[%c24_41, %c0_42] : memref<304x8xf32, #tpu.memory_space<vmem>>, vector<256x8xf32>
    tpu.vector_store %arg12[%c24_41, %c0_42], %83 {strides = array<i32>} : memref<304x8xf32, #tpu.memory_space<vmem>>, vector<256x8xf32>,
    %cst_43 = arith.constant 0.000000e+00 : f32
    %87 = vector.broadcast %cst_43 : f32 to vector<256x16xf32>
    %c7_44 = arith.constant 7 : index
    %c0_45 = arith.constant 0 : index
    %88 = vector.load %arg12[%c7_44, %c0_45] : memref<304x8xf32, #tpu.memory_space<vmem>>, vector<256x8xf32>
    %cst_46 = arith.constant 0.000000e+00 : f32
    %89 = vector.shape_cast %4 : vector<256x1xi1> to vector<256x1xi1>
    %90 = vector.broadcast %89 : vector<256x1xi1> to vector<256x8xi1>
    %91 = vector.broadcast %cst_46 : f32 to vector<256x8xf32>
    %92 = arith.select %90, %88, %91 : vector<256x8xi1>, vector<256x8xf32>
    %c0_47 = arith.constant 0 : index
    %c0_48 = arith.constant 0 : index
    %93 = vector.load %arg4[%c0_47, %c0_48] : memref<72x16xf32, #tpu.memory_space<vmem>>, vector<8x16xf32>
    %cst_49 = arith.constant dense<0.000000e+00> : vector<256x16xf32>
    %94 = tpu.matmul %92, %93, %cst_49 {dimension_numbers = #tpu.dot_dimension_numbers<[1], [0], [0], [1], [0, 0, 1, 1], [], []>} : vector<256x8xf32>, vector<8x16xf32>, vector<256x16xf32> -> vector<256x16xf32>
    %95 = arith.addf %87, %94 : vector<256x16xf32>
    %c8_50 = arith.constant 8 : index
    %c0_51 = arith.constant 0 : index
    %96 = vector.load %arg12[%c8_50, %c0_51] : memref<304x8xf32, #tpu.memory_space<vmem>>, vector<256x8xf32>
    %c8_52 = arith.constant 8 : index
    %c0_53 = arith.constant 0 : index
    %97 = vector.load %arg4[%c8_52, %c0_53] : memref<72x16xf32, #tpu.memory_space<vmem>>, vector<8x16xf32>
    %cst_54 = arith.constant dense<0.000000e+00> : vector<256x16xf32>
    %98 = tpu.matmul %96, %97, %cst_54 {dimension_numbers = #tpu.dot_dimension_numbers<[1], [0], [0], [1], [0, 0, 1, 1], [], []>} : vector<256x8xf32>, vector<8x16xf32>, vector<256x16xf32> -> vector<256x16xf32>
    %99 = arith.addf %95, %98 : vector<256x16xf32>
    %c9_55 = arith.constant 9 : index
    %c0_56 = arith.constant 0 : index
    %100 = vector.load %arg12[%c9_55, %c0_56] : memref<304x8xf32, #tpu.memory_space<vmem>>, vector<256x8xf32>
    %cst_57 = arith.constant 0.000000e+00 : f32
    %101 = vector.shape_cast %6 : vector<256x1xi1> to vector<256x1xi1>
    %102 = vector.broadcast %101 : vector<256x1xi1> to vector<256x8xi1>
    %103 = vector.broadcast %cst_57 : f32 to vector<256x8xf32>
    %104 = arith.select %102, %100, %103 : vector<256x8xi1>, vector<256x8xf32>
    %c16 = arith.constant 16 : index
    %c0_58 = arith.constant 0 : index
    %105 = vector.load %arg4[%c16, %c0_58] : memref<72x16xf32, #tpu.memory_space<vmem>>, vector<8x16xf32>
    %cst_59 = arith.constant dense<0.000000e+00> : vector<256x16xf32>
    %106 = tpu.matmul %104, %105, %cst_59 {dimension_numbers = #tpu.dot_dimension_numbers<[1], [0], [0], [1], [0, 0, 1, 1], [], []>} : vector<256x8xf32>, vector<8x16xf32>, vector<256x16xf32> -> vector<256x16xf32>
    %107 = arith.addf %99, %106 : vector<256x16xf32>
    %c23_60 = arith.constant 23 : index
    %c0_61 = arith.constant 0 : index
    %108 = vector.load %arg12[%c23_60, %c0_61] : memref<304x8xf32, #tpu.memory_space<vmem>>, vector<256x8xf32>
    %cst_62 = arith.constant 0.000000e+00 : f32
    %109 = vector.shape_cast %4 : vector<256x1xi1> to vector<256x1xi1>
    %110 = vector.broadcast %109 : vector<256x1xi1> to vector<256x8xi1>
    %111 = vector.broadcast %cst_62 : f32 to vector<256x8xf32>
    %112 = arith.select %110, %108, %111 : vector<256x8xi1>, vector<256x8xf32>
    %c24_63 = arith.constant 24 : index
    %c0_64 = arith.constant 0 : index
    %113 = vector.load %arg4[%c24_63, %c0_64] : memref<72x16xf32, #tpu.memory_space<vmem>>, vector<8x16xf32>
    %cst_65 = arith.constant dense<0.000000e+00> : vector<256x16xf32>
    %114 = tpu.matmul %112, %113, %cst_65 {dimension_numbers = #tpu.dot_dimension_numbers<[1], [0], [0], [1], [0, 0, 1, 1], [], []>} : vector<256x8xf32>, vector<8x16xf32>, vector<256x16xf32> -> vector<256x16xf32>
    %115 = arith.addf %107, %114 : vector<256x16xf32>
    %c24_66 = arith.constant 24 : index
    %c0_67 = arith.constant 0 : index
    %116 = vector.load %arg12[%c24_66, %c0_67] : memref<304x8xf32, #tpu.memory_space<vmem>>, vector<256x8xf32>
    %c32 = arith.constant 32 : index
    %c0_68 = arith.constant 0 : index
    %117 = vector.load %arg4[%c32, %c0_68] : memref<72x16xf32, #tpu.memory_space<vmem>>, vector<8x16xf32>
    %cst_69 = arith.constant dense<0.000000e+00> : vector<256x16xf32>
    %118 = tpu.matmul %116, %117, %cst_69 {dimension_numbers = #tpu.dot_dimension_numbers<[1], [0], [0], [1], [0, 0, 1, 1], [], []>} : vector<256x8xf32>, vector<8x16xf32>, vector<256x16xf32> -> vector<256x16xf32>
    %119 = arith.addf %115, %118 : vector<256x16xf32>
    %c25_70 = arith.constant 25 : index
    %c0_71 = arith.constant 0 : index
    %120 = vector.load %arg12[%c25_70, %c0_71] : memref<304x8xf32, #tpu.memory_space<vmem>>, vector<256x8xf32>
    %cst_72 = arith.constant 0.000000e+00 : f32
    %121 = vector.shape_cast %6 : vector<256x1xi1> to vector<256x1xi1>
    %122 = vector.broadcast %121 : vector<256x1xi1> to vector<256x8xi1>
    %123 = vector.broadcast %cst_72 : f32 to vector<256x8xf32>
    %124 = arith.select %122, %120, %123 : vector<256x8xi1>, vector<256x8xf32>
    %c40_73 = arith.constant 40 : index
    %c0_74 = arith.constant 0 : index
    %125 = vector.load %arg4[%c40_73, %c0_74] : memref<72x16xf32, #tpu.memory_space<vmem>>, vector<8x16xf32>
    %cst_75 = arith.constant dense<0.000000e+00> : vector<256x16xf32>
    %126 = tpu.matmul %124, %125, %cst_75 {dimension_numbers = #tpu.dot_dimension_numbers<[1], [0], [0], [1], [0, 0, 1, 1], [], []>} : vector<256x8xf32>, vector<8x16xf32>, vector<256x16xf32> -> vector<256x16xf32>
    %127 = arith.addf %119, %126 : vector<256x16xf32>
    %c39_76 = arith.constant 39 : index
    %c0_77 = arith.constant 0 : index
    %128 = vector.load %arg12[%c39_76, %c0_77] : memref<304x8xf32, #tpu.memory_space<vmem>>, vector<256x8xf32>
    %cst_78 = arith.constant 0.000000e+00 : f32
    %129 = vector.shape_cast %4 : vector<256x1xi1> to vector<256x1xi1>
    %130 = vector.broadcast %129 : vector<256x1xi1> to vector<256x8xi1>
    %131 = vector.broadcast %cst_78 : f32 to vector<256x8xf32>
    %132 = arith.select %130, %128, %131 : vector<256x8xi1>, vector<256x8xf32>
    %c48 = arith.constant 48 : index
    %c0_79 = arith.constant 0 : index
    %133 = vector.load %arg4[%c48, %c0_79] : memref<72x16xf32, #tpu.memory_space<vmem>>, vector<8x16xf32>
    %cst_80 = arith.constant dense<0.000000e+00> : vector<256x16xf32>
    %134 = tpu.matmul %132, %133, %cst_80 {dimension_numbers = #tpu.dot_dimension_numbers<[1], [0], [0], [1], [0, 0, 1, 1], [], []>} : vector<256x8xf32>, vector<8x16xf32>, vector<256x16xf32> -> vector<256x16xf32>
    %135 = arith.addf %127, %134 : vector<256x16xf32>
    %c40_81 = arith.constant 40 : index
    %c0_82 = arith.constant 0 : index
    %136 = vector.load %arg12[%c40_81, %c0_82] : memref<304x8xf32, #tpu.memory_space<vmem>>, vector<256x8xf32>
    %c56 = arith.constant 56 : index
    %c0_83 = arith.constant 0 : index
    %137 = vector.load %arg4[%c56, %c0_83] : memref<72x16xf32, #tpu.memory_space<vmem>>, vector<8x16xf32>
    %cst_84 = arith.constant dense<0.000000e+00> : vector<256x16xf32>
    %138 = tpu.matmul %136, %137, %cst_84 {dimension_numbers = #tpu.dot_dimension_numbers<[1], [0], [0], [1], [0, 0, 1, 1], [], []>} : vector<256x8xf32>, vector<8x16xf32>, vector<256x16xf32> -> vector<256x16xf32>
    %139 = arith.addf %135, %138 : vector<256x16xf32>
    %c41_85 = arith.constant 41 : index
    %c0_86 = arith.constant 0 : index
    %140 = vector.load %arg12[%c41_85, %c0_86] : memref<304x8xf32, #tpu.memory_space<vmem>>, vector<256x8xf32>
    %cst_87 = arith.constant 0.000000e+00 : f32
    %141 = vector.shape_cast %6 : vector<256x1xi1> to vector<256x1xi1>
    %142 = vector.broadcast %141 : vector<256x1xi1> to vector<256x8xi1>
    %143 = vector.broadcast %cst_87 : f32 to vector<256x8xf32>
    %144 = arith.select %142, %140, %143 : vector<256x8xi1>, vector<256x8xf32>
    %c64 = arith.constant 64 : index
    %c0_88 = arith.constant 0 : index
    %145 = vector.load %arg4[%c64, %c0_88] : memref<72x16xf32, #tpu.memory_space<vmem>>, vector<8x16xf32>
    %cst_89 = arith.constant dense<0.000000e+00> : vector<256x16xf32>
    %146 = tpu.matmul %144, %145, %cst_89 {dimension_numbers = #tpu.dot_dimension_numbers<[1], [0], [0], [1], [0, 0, 1, 1], [], []>} : vector<256x8xf32>, vector<8x16xf32>, vector<256x16xf32> -> vector<256x16xf32>
    %147 = arith.addf %139, %146 : vector<256x16xf32>
    %c0_90 = arith.constant 0 : index
    %c0_91 = arith.constant 0 : index
    %148 = vector.load %arg5[%c0_90, %c0_91] : memref<1x16xf32, #tpu.memory_space<vmem>>, vector<1x16xf32>
    %149 = vector.broadcast %148 : vector<1x16xf32> to vector<256x16xf32>
    %150 = arith.addf %147, %149 : vector<256x16xf32>
    %cst_92 = arith.constant 0.000000e+00 : f32
    %151 = vector.broadcast %cst_92 : f32 to vector<256x16xf32>
    %152 = arith.maximumf %150, %151 : vector<256x16xf32>
    %153 = tpu.transpose %152, [1, 0] : vector<256x16xf32> -> vector<16x256xf32>
    %154 = arith.truncf %153 : vector<16x256xf32> to vector<16x256xbf16>
    %cst_93 = arith.constant 0.000000e+00 : f32
    %155 = vector.broadcast %cst_93 : f32 to vector<1x512xf32>
    %156 = vector.extract_strided_slice %154 {offsets = [0, 0], sizes = [1, 256], strides = [1, 1]} : vector<16x256xbf16> to vector<1x256xbf16>
    %c0_94 = arith.constant 0 : index
    %c0_95 = arith.constant 0 : index
    %c0_96 = arith.constant 0 : index
    %157 = vector.load %arg6[%c0_94, %c0_95, %c0_96] : memref<16x256x512xbf16, #tpu.memory_space<vmem>>, vector<1x256x512xbf16>
    %158 = vector.shape_cast %157 : vector<1x256x512xbf16> to vector<256x512xbf16>
    %cst_97 = arith.constant dense<0.000000e+00> : vector<1x512xf32>
    %159 = tpu.matmul %156, %158, %cst_97 {dimension_numbers = #tpu.dot_dimension_numbers<[1], [0], [0], [1], [0, 0, 1, 1], [], []>} : vector<1x256xbf16>, vector<256x512xbf16>, vector<1x512xf32> -> vector<1x512xf32>
    %160 = arith.addf %155, %159 : vector<1x512xf32>
    %161 = vector.extract_strided_slice %154 {offsets = [1, 0], sizes = [1, 256], strides = [1, 1]} : vector<16x256xbf16> to vector<1x256xbf16>
    %c1_98 = arith.constant 1 : index
    %c0_99 = arith.constant 0 : index
    %c0_100 = arith.constant 0 : index
    %162 = vector.load %arg6[%c1_98, %c0_99, %c0_100] : memref<16x256x512xbf16, #tpu.memory_space<vmem>>, vector<1x256x512xbf16>
    %163 = vector.shape_cast %162 : vector<1x256x512xbf16> to vector<256x512xbf16>
    %cst_101 = arith.constant dense<0.000000e+00> : vector<1x512xf32>
    %164 = tpu.matmul %161, %163, %cst_101 {dimension_numbers = #tpu.dot_dimension_numbers<[1], [0], [0], [1], [0, 0, 1, 1], [], []>} : vector<1x256xbf16>, vector<256x512xbf16>, vector<1x512xf32> -> vector<1x512xf32>
    %165 = arith.addf %160, %164 : vector<1x512xf32>
    %166 = vector.extract_strided_slice %154 {offsets = [2, 0], sizes = [1, 256], strides = [1, 1]} : vector<16x256xbf16> to vector<1x256xbf16>
    %c2_102 = arith.constant 2 : index
    %c0_103 = arith.constant 0 : index
    %c0_104 = arith.constant 0 : index
    %167 = vector.load %arg6[%c2_102, %c0_103, %c0_104] : memref<16x256x512xbf16, #tpu.memory_space<vmem>>, vector<1x256x512xbf16>
    %168 = vector.shape_cast %167 : vector<1x256x512xbf16> to vector<256x512xbf16>
    %cst_105 = arith.constant dense<0.000000e+00> : vector<1x512xf32>
    %169 = tpu.matmul %166, %168, %cst_105 {dimension_numbers = #tpu.dot_dimension_numbers<[1], [0], [0], [1], [0, 0, 1, 1], [], []>} : vector<1x256xbf16>, vector<256x512xbf16>, vector<1x512xf32> -> vector<1x512xf32>
    %170 = arith.addf %165, %169 : vector<1x512xf32>
    %171 = vector.extract_strided_slice %154 {offsets = [3, 0], sizes = [1, 256], strides = [1, 1]} : vector<16x256xbf16> to vector<1x256xbf16>
    %c3_106 = arith.constant 3 : index
    %c0_107 = arith.constant 0 : index
    %c0_108 = arith.constant 0 : index
    %172 = vector.load %arg6[%c3_106, %c0_107, %c0_108] : memref<16x256x512xbf16, #tpu.memory_space<vmem>>, vector<1x256x512xbf16>
    %173 = vector.shape_cast %172 : vector<1x256x512xbf16> to vector<256x512xbf16>
    %cst_109 = arith.constant dense<0.000000e+00> : vector<1x512xf32>
    %174 = tpu.matmul %171, %173, %cst_109 {dimension_numbers = #tpu.dot_dimension_numbers<[1], [0], [0], [1], [0, 0, 1, 1], [], []>} : vector<1x256xbf16>, vector<256x512xbf16>, vector<1x512xf32> -> vector<1x512xf32>
    %175 = arith.addf %170, %174 : vector<1x512xf32>
    %176 = vector.extract_strided_slice %154 {offsets = [4, 0], sizes = [1, 256], strides = [1, 1]} : vector<16x256xbf16> to vector<1x256xbf16>
    %c4_110 = arith.constant 4 : index
    %c0_111 = arith.constant 0 : index
    %c0_112 = arith.constant 0 : index
    %177 = vector.load %arg6[%c4_110, %c0_111, %c0_112] : memref<16x256x512xbf16, #tpu.memory_space<vmem>>, vector<1x256x512xbf16>
    %178 = vector.shape_cast %177 : vector<1x256x512xbf16> to vector<256x512xbf16>
    %cst_113 = arith.constant dense<0.000000e+00> : vector<1x512xf32>
    %179 = tpu.matmul %176, %178, %cst_113 {dimension_numbers = #tpu.dot_dimension_numbers<[1], [0], [0], [1], [0, 0, 1, 1], [], []>} : vector<1x256xbf16>, vector<256x512xbf16>, vector<1x512xf32> -> vector<1x512xf32>
    %180 = arith.addf %175, %179 : vector<1x512xf32>
    %181 = vector.extract_strided_slice %154 {offsets = [5, 0], sizes = [1, 256], strides = [1, 1]} : vector<16x256xbf16> to vector<1x256xbf16>
    %c5_114 = arith.constant 5 : index
    %c0_115 = arith.constant 0 : index
    %c0_116 = arith.constant 0 : index
    %182 = vector.load %arg6[%c5_114, %c0_115, %c0_116] : memref<16x256x512xbf16, #tpu.memory_space<vmem>>, vector<1x256x512xbf16>
    %183 = vector.shape_cast %182 : vector<1x256x512xbf16> to vector<256x512xbf16>
    %cst_117 = arith.constant dense<0.000000e+00> : vector<1x512xf32>
    %184 = tpu.matmul %181, %183, %cst_117 {dimension_numbers = #tpu.dot_dimension_numbers<[1], [0], [0], [1], [0, 0, 1, 1], [], []>} : vector<1x256xbf16>, vector<256x512xbf16>, vector<1x512xf32> -> vector<1x512xf32>
    %185 = arith.addf %180, %184 : vector<1x512xf32>
    %186 = vector.extract_strided_slice %154 {offsets = [6, 0], sizes = [1, 256], strides = [1, 1]} : vector<16x256xbf16> to vector<1x256xbf16>
    %c6_118 = arith.constant 6 : index
    %c0_119 = arith.constant 0 : index
    %c0_120 = arith.constant 0 : index
    %187 = vector.load %arg6[%c6_118, %c0_119, %c0_120] : memref<16x256x512xbf16, #tpu.memory_space<vmem>>, vector<1x256x512xbf16>
    %188 = vector.shape_cast %187 : vector<1x256x512xbf16> to vector<256x512xbf16>
    %cst_121 = arith.constant dense<0.000000e+00> : vector<1x512xf32>
    %189 = tpu.matmul %186, %188, %cst_121 {dimension_numbers = #tpu.dot_dimension_numbers<[1], [0], [0], [1], [0, 0, 1, 1], [], []>} : vector<1x256xbf16>, vector<256x512xbf16>, vector<1x512xf32> -> vector<1x512xf32>
    %190 = arith.addf %185, %189 : vector<1x512xf32>
    %191 = vector.extract_strided_slice %154 {offsets = [7, 0], sizes = [1, 256], strides = [1, 1]} : vector<16x256xbf16> to vector<1x256xbf16>
    %c7_122 = arith.constant 7 : index
    %c0_123 = arith.constant 0 : index
    %c0_124 = arith.constant 0 : index
    %192 = vector.load %arg6[%c7_122, %c0_123, %c0_124] : memref<16x256x512xbf16, #tpu.memory_space<vmem>>, vector<1x256x512xbf16>
    %193 = vector.shape_cast %192 : vector<1x256x512xbf16> to vector<256x512xbf16>
    %cst_125 = arith.constant dense<0.000000e+00> : vector<1x512xf32>
    %194 = tpu.matmul %191, %193, %cst_125 {dimension_numbers = #tpu.dot_dimension_numbers<[1], [0], [0], [1], [0, 0, 1, 1], [], []>} : vector<1x256xbf16>, vector<256x512xbf16>, vector<1x512xf32> -> vector<1x512xf32>
    %195 = arith.addf %190, %194 : vector<1x512xf32>
    %196 = vector.extract_strided_slice %154 {offsets = [8, 0], sizes = [1, 256], strides = [1, 1]} : vector<16x256xbf16> to vector<1x256xbf16>
    %c8_126 = arith.constant 8 : index
    %c0_127 = arith.constant 0 : index
    %c0_128 = arith.constant 0 : index
    %197 = vector.load %arg6[%c8_126, %c0_127, %c0_128] : memref<16x256x512xbf16, #tpu.memory_space<vmem>>, vector<1x256x512xbf16>
    %198 = vector.shape_cast %197 : vector<1x256x512xbf16> to vector<256x512xbf16>
    %cst_129 = arith.constant dense<0.000000e+00> : vector<1x512xf32>
    %199 = tpu.matmul %196, %198, %cst_129 {dimension_numbers = #tpu.dot_dimension_numbers<[1], [0], [0], [1], [0, 0, 1, 1], [], []>} : vector<1x256xbf16>, vector<256x512xbf16>, vector<1x512xf32> -> vector<1x512xf32>
    %200 = arith.addf %195, %199 : vector<1x512xf32>
    %201 = vector.extract_strided_slice %154 {offsets = [9, 0], sizes = [1, 256], strides = [1, 1]} : vector<16x256xbf16> to vector<1x256xbf16>
    %c9_130 = arith.constant 9 : index
    %c0_131 = arith.constant 0 : index
    %c0_132 = arith.constant 0 : index
    %202 = vector.load %arg6[%c9_130, %c0_131, %c0_132] : memref<16x256x512xbf16, #tpu.memory_space<vmem>>, vector<1x256x512xbf16>
    %203 = vector.shape_cast %202 : vector<1x256x512xbf16> to vector<256x512xbf16>
    %cst_133 = arith.constant dense<0.000000e+00> : vector<1x512xf32>
    %204 = tpu.matmul %201, %203, %cst_133 {dimension_numbers = #tpu.dot_dimension_numbers<[1], [0], [0], [1], [0, 0, 1, 1], [], []>} : vector<1x256xbf16>, vector<256x512xbf16>, vector<1x512xf32> -> vector<1x512xf32>
    %205 = arith.addf %200, %204 : vector<1x512xf32>
    %206 = vector.extract_strided_slice %154 {offsets = [10, 0], sizes = [1, 256], strides = [1, 1]} : vector<16x256xbf16> to vector<1x256xbf16>
    %c10 = arith.constant 10 : index
    %c0_134 = arith.constant 0 : index
    %c0_135 = arith.constant 0 : index
    %207 = vector.load %arg6[%c10, %c0_134, %c0_135] : memref<16x256x512xbf16, #tpu.memory_space<vmem>>, vector<1x256x512xbf16>
    %208 = vector.shape_cast %207 : vector<1x256x512xbf16> to vector<256x512xbf16>
    %cst_136 = arith.constant dense<0.000000e+00> : vector<1x512xf32>
    %209 = tpu.matmul %206, %208, %cst_136 {dimension_numbers = #tpu.dot_dimension_numbers<[1], [0], [0], [1], [0, 0, 1, 1], [], []>} : vector<1x256xbf16>, vector<256x512xbf16>, vector<1x512xf32> -> vector<1x512xf32>
    %210 = arith.addf %205, %209 : vector<1x512xf32>
    %211 = vector.extract_strided_slice %154 {offsets = [11, 0], sizes = [1, 256], strides = [1, 1]} : vector<16x256xbf16> to vector<1x256xbf16>
    %c11 = arith.constant 11 : index
    %c0_137 = arith.constant 0 : index
    %c0_138 = arith.constant 0 : index
    %212 = vector.load %arg6[%c11, %c0_137, %c0_138] : memref<16x256x512xbf16, #tpu.memory_space<vmem>>, vector<1x256x512xbf16>
    %213 = vector.shape_cast %212 : vector<1x256x512xbf16> to vector<256x512xbf16>
    %cst_139 = arith.constant dense<0.000000e+00> : vector<1x512xf32>
    %214 = tpu.matmul %211, %213, %cst_139 {dimension_numbers = #tpu.dot_dimension_numbers<[1], [0], [0], [1], [0, 0, 1, 1], [], []>} : vector<1x256xbf16>, vector<256x512xbf16>, vector<1x512xf32> -> vector<1x512xf32>
    %215 = arith.addf %210, %214 : vector<1x512xf32>
    %216 = vector.extract_strided_slice %154 {offsets = [12, 0], sizes = [1, 256], strides = [1, 1]} : vector<16x256xbf16> to vector<1x256xbf16>
    %c12 = arith.constant 12 : index
    %c0_140 = arith.constant 0 : index
    %c0_141 = arith.constant 0 : index
    %217 = vector.load %arg6[%c12, %c0_140, %c0_141] : memref<16x256x512xbf16, #tpu.memory_space<vmem>>, vector<1x256x512xbf16>
    %218 = vector.shape_cast %217 : vector<1x256x512xbf16> to vector<256x512xbf16>
    %cst_142 = arith.constant dense<0.000000e+00> : vector<1x512xf32>
    %219 = tpu.matmul %216, %218, %cst_142 {dimension_numbers = #tpu.dot_dimension_numbers<[1], [0], [0], [1], [0, 0, 1, 1], [], []>} : vector<1x256xbf16>, vector<256x512xbf16>, vector<1x512xf32> -> vector<1x512xf32>
    %220 = arith.addf %215, %219 : vector<1x512xf32>
    %221 = vector.extract_strided_slice %154 {offsets = [13, 0], sizes = [1, 256], strides = [1, 1]} : vector<16x256xbf16> to vector<1x256xbf16>
    %c13 = arith.constant 13 : index
    %c0_143 = arith.constant 0 : index
    %c0_144 = arith.constant 0 : index
    %222 = vector.load %arg6[%c13, %c0_143, %c0_144] : memref<16x256x512xbf16, #tpu.memory_space<vmem>>, vector<1x256x512xbf16>
    %223 = vector.shape_cast %222 : vector<1x256x512xbf16> to vector<256x512xbf16>
    %cst_145 = arith.constant dense<0.000000e+00> : vector<1x512xf32>
    %224 = tpu.matmul %221, %223, %cst_145 {dimension_numbers = #tpu.dot_dimension_numbers<[1], [0], [0], [1], [0, 0, 1, 1], [], []>} : vector<1x256xbf16>, vector<256x512xbf16>, vector<1x512xf32> -> vector<1x512xf32>
    %225 = arith.addf %220, %224 : vector<1x512xf32>
    %226 = vector.extract_strided_slice %154 {offsets = [14, 0], sizes = [1, 256], strides = [1, 1]} : vector<16x256xbf16> to vector<1x256xbf16>
    %c14 = arith.constant 14 : index
    %c0_146 = arith.constant 0 : index
    %c0_147 = arith.constant 0 : index
    %227 = vector.load %arg6[%c14, %c0_146, %c0_147] : memref<16x256x512xbf16, #tpu.memory_space<vmem>>, vector<1x256x512xbf16>
    %228 = vector.shape_cast %227 : vector<1x256x512xbf16> to vector<256x512xbf16>
    %cst_148 = arith.constant dense<0.000000e+00> : vector<1x512xf32>
    %229 = tpu.matmul %226, %228, %cst_148 {dimension_numbers = #tpu.dot_dimension_numbers<[1], [0], [0], [1], [0, 0, 1, 1], [], []>} : vector<1x256xbf16>, vector<256x512xbf16>, vector<1x512xf32> -> vector<1x512xf32>
    %230 = arith.addf %225, %229 : vector<1x512xf32>
    %231 = vector.extract_strided_slice %154 {offsets = [15, 0], sizes = [1, 256], strides = [1, 1]} : vector<16x256xbf16> to vector<1x256xbf16>
    %c15 = arith.constant 15 : index
    %c0_149 = arith.constant 0 : index
    %c0_150 = arith.constant 0 : index
    %232 = vector.load %arg6[%c15, %c0_149, %c0_150] : memref<16x256x512xbf16, #tpu.memory_space<vmem>>, vector<1x256x512xbf16>
    %233 = vector.shape_cast %232 : vector<1x256x512xbf16> to vector<256x512xbf16>
    %cst_151 = arith.constant dense<0.000000e+00> : vector<1x512xf32>
    %234 = tpu.matmul %231, %233, %cst_151 {dimension_numbers = #tpu.dot_dimension_numbers<[1], [0], [0], [1], [0, 0, 1, 1], [], []>} : vector<1x256xbf16>, vector<256x512xbf16>, vector<1x512xf32> -> vector<1x512xf32>
    %235 = arith.addf %230, %234 : vector<1x512xf32>
    %c0_152 = arith.constant 0 : index
    %c0_153 = arith.constant 0 : index
    %236 = vector.load %arg7[%c0_152, %c0_153] : memref<1x512xf32, #tpu.memory_space<vmem>>, vector<1x512xf32>
    %237 = arith.addf %235, %236 : vector<1x512xf32>
    %cst_154 = arith.constant 0.000000e+00 : f32
    %238 = vector.broadcast %cst_154 : f32 to vector<1x512xf32>
    %239 = arith.maximumf %237, %238 : vector<1x512xf32>
    %c0_155 = arith.constant 0 : index
    %c0_156 = arith.constant 0 : index
    %240 = vector.load %arg8[%c0_155, %c0_156] : memref<512x2xf32, #tpu.memory_space<vmem>>, vector<512x2xf32>
    %cst_157 = arith.constant dense<0.000000e+00> : vector<1x2xf32>
    %241 = tpu.matmul %239, %240, %cst_157 {dimension_numbers = #tpu.dot_dimension_numbers<[1], [0], [0], [1], [0, 0, 1, 1], [], []>} : vector<1x512xf32>, vector<512x2xf32>, vector<1x2xf32> -> vector<1x2xf32>
    %c0_158 = arith.constant 0 : index
    %c0_159 = arith.constant 0 : index
    %242 = vector.load %arg9[%c0_158, %c0_159] : memref<1x2xf32, #tpu.memory_space<vmem>>, vector<1x2xf32>
    %243 = arith.addf %241, %242 : vector<1x2xf32>
    %c0_160 = arith.constant 0 : index
    %c0_161 = arith.constant 0 : index
    %c0_162 = arith.constant 0 : index
    %244 = vector.load %arg10[%c0_160, %c0_161, %c0_162] : memref<1x1x2xf32, #tpu.memory_space<vmem>>, vector<1x1x2xf32>
    %245 = vector.shape_cast %244 : vector<1x1x2xf32> to vector<1x2xf32>
    %246 = vector.shape_cast %243 : vector<1x2xf32> to vector<1x1x2xf32>
    tpu.vector_store %arg10[%c0_160, %c0_161, %c0_162], %246 {strides = array<i32>} : memref<1x1x2xf32, #tpu.memory_space<vmem>>, vector<1x1x2xf32>,
    return
  }
  func.func @transform_0(%arg0: i32) -> (i32, i32, i32) {
    %c0_i32 = arith.constant 0 : i32
    %c0_i32_0 = arith.constant 0 : i32
    %c0_i32_1 = arith.constant 0 : i32
    return %arg0, %c0_i32, %c0_i32_0 : i32, i32, i32
  }
  func.func @transform_1(%arg0: i32) -> (i32, i32) {
    %c0_i32 = arith.constant 0 : i32
    %c0_i32_0 = arith.constant 0 : i32
    %c0_i32_1 = arith.constant 0 : i32
    return %c0_i32, %c0_i32_0 : i32, i32
  }
  func.func @transform_2(%arg0: i32) -> (i32, i32) {
    %c0_i32 = arith.constant 0 : i32
    %c0_i32_0 = arith.constant 0 : i32
    %c0_i32_1 = arith.constant 0 : i32
    return %c0_i32, %c0_i32_0 : i32, i32
  }
  func.func @transform_3(%arg0: i32) -> (i32, i32) {
    %c0_i32 = arith.constant 0 : i32
    %c0_i32_0 = arith.constant 0 : i32
    %c0_i32_1 = arith.constant 0 : i32
    return %c0_i32, %c0_i32_0 : i32, i32
  }
  func.func @transform_4(%arg0: i32) -> (i32, i32) {
    %c0_i32 = arith.constant 0 : i32
    %c0_i32_0 = arith.constant 0 : i32
    %c0_i32_1 = arith.constant 0 : i32
    return %c0_i32, %c0_i32_0 : i32, i32
  }
  func.func @transform_5(%arg0: i32) -> (i32, i32, i32) {
    %c0_i32 = arith.constant 0 : i32
    %c0_i32_0 = arith.constant 0 : i32
    %c0_i32_1 = arith.constant 0 : i32
    %c0_i32_2 = arith.constant 0 : i32
    return %c0_i32, %c0_i32_0, %c0_i32_1 : i32, i32, i32
  }
  func.func @transform_6(%arg0: i32) -> (i32, i32) {
    %c0_i32 = arith.constant 0 : i32
    %c0_i32_0 = arith.constant 0 : i32
    %c0_i32_1 = arith.constant 0 : i32
    return %c0_i32, %c0_i32_0 : i32, i32
  }
  func.func @transform_7(%arg0: i32) -> (i32, i32) {
    %c0_i32 = arith.constant 0 : i32
    %c0_i32_0 = arith.constant 0 : i32
    %c0_i32_1 = arith.constant 0 : i32
    return %c0_i32, %c0_i32_0 : i32, i32
  }
  func.func @transform_8(%arg0: i32) -> (i32, i32) {
    %c0_i32 = arith.constant 0 : i32
    %c0_i32_0 = arith.constant 0 : i32
    %c0_i32_1 = arith.constant 0 : i32
    return %c0_i32, %c0_i32_0 : i32, i32
  }
  func.func @transform_9(%arg0: i32) -> (i32, i32, i32) {
    %c0_i32 = arith.constant 0 : i32
    %c0_i32_0 = arith.constant 0 : i32
    %c0_i32_1 = arith.constant 0 : i32
    return %arg0, %c0_i32, %c0_i32_0 : i32, i32, i32
  }
}

</mosaic_0001>

<bundles_post_ra>
// kernel: cnn_forward.1
= control target key start
LH: loop header
LB: loop body
LE: loop exit
PB: predicated region body
PF: predicated region fallthrough
CT: control target
= control target key end

     0   :  { %s23426_s0 = inlined_call_operand.vmem [shape: f32[2,256,1], index: 0, kind: input, shape index: {}]   ;;  %s23427_s1 = inlined_call_operand.vmem [shape: f32[9,8], index: 1, kind: input, shape index: {}]   ;;  %s23428_s2 = inlined_call_operand.hbm [shape: f32[1,8], index: 2, kind: input, shape index: {}]   ;;  %s23429_s3 = inlined_call_operand.vmem [shape: f32[72,16], index: 3, kind: input, shape index: {}]   ;;  %s23430_s4 = inlined_call_operand.hbm [shape: f32[1,16], index: 4, kind: input, shape index: {}]   ;;  %s23431_s5 = inlined_call_operand.hbm [shape: bf16[16,256,512], index: 5, kind: input, shape index: {}]   ;;  %s23432_s6 = inlined_call_operand.hbm [shape: f32[1,512], index: 6, kind: input, shape index: {}]   ;;  %s23433_s7 = inlined_call_operand.vmem [shape: f32[512,2], index: 7, kind: input, shape index: {}]   ;;  %s23434_s8 = inlined_call_operand.hbm [shape: f32[1,2], index: 8, kind: input, shape index: {}]   ;;  %s23435_s9 = inlined_call_operand.hbm [shape: f32[2,1,2], index: 9, kind: output, shape index: {}]  }
   0x1   :  { %23640 = sst [smem:[#allocation85_spill]] %s23428_s2 }
   0x2   :  { %23641 = sst [smem:[#allocation86_spill]] %s23430_s4 }
   0x3   :  { %14 = vsyncpa [#allocation5], 0 }
   0x4   :  { %15 = vsyncpa [#allocation8], 0 }
   0x5   :  { %16 = vsyncpa [#allocation11], 0 }
   0x6   :  { %17 = vsyncpa [#allocation6], 0 }
   0x7   :  { %19 = vsyncpa [#allocation6 + $0x1], 0  ;;  %s19585_s30 = smov 0   ;;  %s19587_s10 = smov 0  }
   0x8   :  { %s19589_s11 = smov 0   ;;  %s19591_s12 = smov 0  }
   0x9 LB: > { %23642 = sst [smem:[#allocation18_spill]] %s19519_s11  ;;  %s19606_s13 = sadd.s32 4294967295, %s19523_s12   ;;  %s19523_s12 = sphi %s19591_s12, %s24307_s12   ;;  %s19519_s11 = sphi %s19589_s11, %s24309_s11   ;;  %s19515_s10 = sphi %s19587_s10, %s24311_s10   ;;  %s19511_s30 = sphi %s19585_s30, %s24310_s30  }
   0xa   : > { %s15125_s14 = sadd.s32 4294967294, %s19523_s12   ;;  %s19610_s15 = sadd.s32 1, %s19523_s12  }
   0xb   : > { %23643 = sst [smem:[#allocation19_spill]] %s19610_s15  ;;  %s226_s16 = sadd.s32 1, %s19519_s11 }
   0xc   : > { %s223_s17 = ssub.s32 %s19523_s12, %s19610_s15  ;;  %p236_p0 = scmp.ne.s32.totalorder %s19519_s11, %s19515_s10 }
   0xd   : > { %p224_p1 = scmp.eq.s32.totalorder %s223_s17, 0  ;;  %p237_p2 = scmp.eq.s32.totalorder %s19606_s13, 1 }
   0xe   : > { %p242_p3 = scmp.ne.s32.totalorder %s19515_s10, %s19511_s30  ;;  %p243_p4 = scmp.eq.s32.totalorder %s15125_s14, 1 }
   0xf   : > { %s19621_s18 = scalar_select %p224_p1, %s19519_s11, %s226_s16  }
  0x10   : > { %p19623_p5 = por %p237_p2, %p236_p0  ;;  %p19627_p6 = por %p243_p4, %p242_p3 }
  0x11   : > { %23644 = sst [smem:[#allocation20_spill]] %s19621_s18  ;;  %p15126_p7 = scmp.ge.s32.totalorder %s19523_s12, 1 }
  0x12   : > { %s23645_s19 = scalar_select %p19623_p5, 1, 0 }
  0x13   : > { %s23646_s20 = scalar_select %p19627_p6, 1, 0 }
  0x14   : > { %p250_p8 = scmp.lt.s32.totalorder %s19523_s12, 3  ;;  %p23436_p9 = scmp.eq.s32.totalorder %s19606_s13, 0 }
  0x15   : > { %s19525_s22 = smov [#allocation7]   ;;  %s19526_s24 = smov [#allocation10]  }
  0x16   : > { %p19634_p10 = pnand %p15126_p7, %p250_p8  ;;  %s280_s23 = sshll.u32 %s19525_s22, 4  ;;  %s281_s23 = int_to_ptr.vmem [resolvable:$true] %s280_s23 }
  0x17   : > { %s304_s25 = sshll.u32 %s19526_s24, 4  ;;  %s19527_s27 = smov [#allocation4]   ;;  %s19646_s25 = int_to_ptr.vmem [resolvable:$true] %s304_s25 }
  0x18   : > { %s23647_s21 = scalar_select %p19634_p10, 1, 0 }
  0x19   : > { %p17627_p11 = pneg %p19634_p10  ;;  %s266_s28 = sshll.u32 %s19527_s27, 4  ;;  %s19648_s28 = int_to_ptr.vmem [resolvable:$true] %s266_s28 }
  0x1a   : > { %s23649_s4 = sld [smem:[#allocation86_spill]] }
  0x1b   : > { %p19642_p12 = pnand %p23436_p9, %p17627_p11 }
  0x1d   : > { %p19658_p0 = pneg %p19642_p12 }
  0x20   : > { %s19309_s16 = scalar_lea.hbm %s23649_s4, 16 }
  0x21   : > { %p19310_p13 = scmp.ne.s32.totalorder %s23649_s4, %s19309_s16  ;;  %p19316_p3 = scmp.lt.u32.totalorder %s19309_s16, %s23649_s4 }
  0x23   : > { %p19312_p1 = pnand %p19658_p0, %p19310_p13 }
  0x25   : > { %p19313_p2 = pneg %p19312_p1 }
  0x27   : > { %p19318_p4 = pnand %p19316_p3, %p19313_p2 }
  0x29   : > { %19321 = shalt.err (!%p19318_p4)
}
  0x2a   : > { %s19322_s29 = scalar_lea.vmem %s281_s23, 16  ;;  %s19329_s14 = scalar_lea.vmem %s281_s23, 32 }
  0x2b   : > { %p19323_p7 = scmp.ne.s32.totalorder %s281_s23, %s19322_s29  ;;  %p19330_p9 = scmp.lt.s32.totalorder %s281_s23, %s281_s23 }
  0x2c   : > { %p19331_p6 = scmp.lt.s32.totalorder %s19329_s14, %s19322_s29 }
  0x2d   : > { %p19325_p8 = pnand %p19323_p7, %p19658_p0 }
  0x2e   : > { %p19332_p5 = por %p19331_p6, %p19330_p9 }
  0x2f   : > { %p19326_p11 = pneg %p19325_p8 }
  0x31   : > { %p19333_p10 = pnand %p19332_p5, %p19326_p11 }
  0x33   : > { %19336 = shalt.err (!%p19333_p10)
}
  0x34   : > { %17633 = dma.hbm_to_vmem [thread:$0]  (!%p19642_p12), %s23649_s4, 16, %s281_s23, [#allocation8]  }
  0x35   : > { %s19337_s27 = scalar_lea.hbm %s23432_s6, 64 }
  0x36   : > { %p19338_p13 = scmp.ne.s32.totalorder %s23432_s6, %s19337_s27  ;;  %p19344_p5 = scmp.lt.u32.totalorder %s19337_s27, %s23432_s6 }
  0x38   : > { %p19340_p1 = pnand %p19338_p13, %p19658_p0 }
  0x3a   : > { %p19341_p6 = pneg %p19340_p1 }
  0x3c   : > { %p19346_p9 = pnand %p19344_p5, %p19341_p6 }
  0x3e   : > { %19349 = shalt.err (!%p19346_p9)
}
  0x3f   : > { %s19350_s23 = scalar_lea.vmem %s19646_s25, 64  ;;  %p19358_p4 = scmp.lt.s32.totalorder %s19646_s25, %s19646_s25 }
  0x40   : > { %p19351_p10 = scmp.ne.s32.totalorder %s19646_s25, %s19350_s23  ;;  %p19359_p7 = scmp.lt.s32.totalorder %s19350_s23, %s19350_s23 }
  0x42   : > { %p19353_p2 = pnand %p19351_p10, %p19658_p0  ;;  %p19360_p8 = por %p19359_p7, %p19358_p4 }
  0x44   : > { %p19354_p3 = pneg %p19353_p2 }
  0x46   : > { %p19361_p11 = pnand %p19360_p8, %p19354_p3 }
  0x48   : > { %19364 = shalt.err (!%p19361_p11)
}
  0x49   : > { %17639 = dma.hbm_to_vmem [thread:$0]  (!%p19642_p12), %s23432_s6, 64, %s19646_s25, [#allocation11]  }
  0x4a   : > { %s23651_s2 = sld [smem:[#allocation85_spill]] }
  0x50   : > { %s19365_s18 = scalar_lea.hbm %s23651_s2, 16 }
  0x51   : > { %p19366_p13 = scmp.ne.s32.totalorder %s23651_s2, %s19365_s18  ;;  %p19372_p5 = scmp.lt.u32.totalorder %s19365_s18, %s23651_s2 }
  0x53   : > { %p19368_p1 = pnand %p19366_p13, %p19658_p0 }
  0x55   : > { %p19369_p6 = pneg %p19368_p1 }
  0x57   : > { %p19374_p9 = pnand %p19372_p5, %p19369_p6 }
  0x59   : > { %19377 = shalt.err (!%p19374_p9)
}
  0x5a   : > { %s19378_s25 = scalar_lea.vmem %s19648_s28, 16  ;;  %s19385_s23 = scalar_lea.vmem %s19648_s28, 32 }
  0x5b   : > { %p19379_p10 = scmp.ne.s32.totalorder %s19648_s28, %s19378_s25  ;;  %p19386_p4 = scmp.lt.s32.totalorder %s19648_s28, %s19648_s28 }
  0x5c   : > { %p19387_p7 = scmp.lt.s32.totalorder %s19385_s23, %s19378_s25 }
  0x5d   : > { %p19381_p2 = pnand %p19379_p10, %p19658_p0 }
  0x5e   : > { %p19388_p8 = por %p19387_p7, %p19386_p4 }
  0x5f   : > { %p19382_p3 = pneg %p19381_p2 }
  0x61   : > { %p19389_p11 = pnand %p19388_p8, %p19382_p3 }
  0x63   : > { %19392 = shalt.err (!%p19389_p11)
}
  0x64   : > { %17630 = dma.hbm_to_vmem [thread:$0]  (!%p19642_p12), %s23651_s2, 16, %s19648_s28, [#allocation5]  }
  0x65   : > { %s19528_s17 = smov [#allocation9]   ;;  %s19393_s27 = scalar_lea.hbm %s23431_s5, 131072 }
  0x66   : > { %s290_s22 = sshll.u32 %s19528_s17, 4  ;;  %p19394_p13 = scmp.ne.s32.totalorder %s23431_s5, %s19393_s27  ;;  %s291_s22 = int_to_ptr.vmem [resolvable:$true] %s290_s22 }
  0x67   : > { %p19400_p5 = scmp.lt.u32.totalorder %s19393_s27, %s23431_s5 }
  0x68   : > { %p19396_p1 = pnand %p19394_p13, %p19658_p0 }
  0x6a   : > { %p19397_p6 = pneg %p19396_p1 }
  0x6c   : > { %p19402_p9 = pnand %p19400_p5, %p19397_p6 }
  0x6e   : > { %19405 = shalt.err (!%p19402_p9)
}
  0x6f   : > { %s19406_s28 = scalar_lea.vmem %s291_s22, 131072  ;;  %p19414_p4 = scmp.lt.s32.totalorder %s291_s22, %s291_s22 }
  0x70   : > { %p19407_p10 = scmp.ne.s32.totalorder %s291_s22, %s19406_s28  ;;  %p19415_p7 = scmp.lt.s32.totalorder %s19406_s28, %s19406_s28 }
  0x72   : > { %p19409_p2 = pnand %p19407_p10, %p19658_p0  ;;  %p19416_p8 = por %p19415_p7, %p19414_p4 }
  0x74   : > { %p19410_p3 = pneg %p19409_p2 }
  0x76   : > { %p19417_p11 = pnand %p19416_p8, %p19410_p3 }
  0x78   : > { %19420 = shalt.err (!%p19417_p11)
}
  0x79   : > { %s19529_s11 = smov 256   ;;  %s19530_s15 = smov 16  }
  0x7a   : > { %17636 = dma.hbm_to_vmem [thread:$0]  (!%p19642_p12), %s23431_s5, 131072, %s291_s22, [#allocation8], %s19529_s11, %s19529_s11, %s19530_s15  }
  0x7b   : > { %s19531_s16 = smov [#allocation12]   ;;  %s19421_s25 = scalar_lea.hbm %s23434_s8, 16 }
  0x7c   : > { %s318_s27 = sshll.u32 %s19531_s16, 4  ;;  %p19422_p13 = scmp.ne.s32.totalorder %s23434_s8, %s19421_s25  ;;  %s319_s27 = int_to_ptr.vmem [resolvable:$true] %s318_s27 }
  0x7d   : > { %p19428_p5 = scmp.lt.u32.totalorder %s19421_s25, %s23434_s8 }
  0x7e   : > { %p19424_p1 = pnand %p19422_p13, %p19658_p0 }
  0x80   : > { %p19425_p6 = pneg %p19424_p1 }
  0x82   : > { %p19430_p9 = pnand %p19428_p5, %p19425_p6 }
  0x84   : > { %19433 = shalt.err (!%p19430_p9)
}
  0x85   : > { %s19434_s22 = scalar_lea.vmem %s319_s27, 16  ;;  %s19441_s11 = scalar_lea.vmem %s319_s27, 32 }
  0x86   : > { %p19435_p10 = scmp.ne.s32.totalorder %s319_s27, %s19434_s22  ;;  %p19442_p4 = scmp.lt.s32.totalorder %s319_s27, %s319_s27 }
  0x87   : > { %p19443_p7 = scmp.lt.s32.totalorder %s19441_s11, %s19434_s22 }
  0x88   : > { %p19437_p2 = pnand %p19435_p10, %p19658_p0 }
  0x89   : > { %p19444_p8 = por %p19443_p7, %p19442_p4 }
  0x8a   : > { %p19438_p3 = pneg %p19437_p2 }
  0x8c   : > { %p19445_p11 = pnand %p19444_p8, %p19438_p3 }
  0x8e   : > { %19448 = shalt.err (!%p19445_p11)
}
  0x8f   : > { %17642 = dma.hbm_to_vmem [thread:$0]  (!%p19642_p12), %s23434_s8, 16, %s319_s27, [#allocation11]  }
  0x90   : > { %p23652_p13 = scmp.ne.s32.totalorder %s23647_s21, 0 }
  0x92   : > { %339 = sbr.rel (%p23652_p13) target bundleno = 3375 (0xd2f), region = 56 }
  0x99   : > { %p23653_p1 = scmp.eq.s32.totalorder %s19606_s13, 0 }
  0x9b   : > { %19494 = dma.done.wait (%p23653_p1), [#allocation5], 16   ;;  %p23654_p0 = pmov %p23653_p1 }
  0x9d   : > { %19496 = vsyncadd (%p23654_p0), [#allocation5], 4294967280  ;;  %p23655_p6 = pmov %p23654_p0 }
  0x9e   : > { %p23656_p5 = pmov %p23654_p0 }
  0x9f   : > { %19498 = dma.done.wait (%p23655_p6), [#allocation8], 131088  }
  0xa0   : > { %19500 = vsyncadd (%p23656_p5), [#allocation8], 4294836208  ;;  %p23657_p9 = pmov %p23654_p0 }
  0xa1   : > { %p23658_p12 = pmov %p23654_p0 }
  0xa2   : > { %19502 = dma.done.wait (%p23657_p9), [#allocation11], 80  }
  0xa3   : > { %19504 = vsyncadd (%p23658_p12), [#allocation11], 4294967216  ;;  %vm23461_vm0 = vcmask 7168   ;;  %p390_p10 = scmp.lt.s32.totalorder %s19606_s13, 1  ;;  %v395_v0 = vlaneseq  ;;  %v19532_v1 = vmov 0   ;;  %v19533_v2 = vmov 0.0  }
  0xa4   : > { %17700 = vset.pattern.permute.xlu1 %v19532_v1  ;;  %17699 = vset.pattern.permute.xlu0 %v19532_v1  ;;  %526 = vst.msk [vmem:[#allocation2 + $0x8] sm:$0xff] %vm23461_vm0, %v19533_v2  ;;  %525 = vst.msk [vmem:[#allocation2] sm:$0xff] %vm23461_vm0, %v19533_v2  ;;  %v23660_v17 = vmov 0  ;;  %v23663_v26 = vmov 0  ;;  %v23666_v31 = vmov 0  ;;  %v23669_v40 = vmov 0 }
  0xa5   : > { %527 = vst.msk [vmem:[#allocation2 + $0x10] sm:$0xff] %vm23461_vm0, %v19533_v2  ;;  %528 = vst.msk [vmem:[#allocation2 + $0x18] sm:$0xff] %vm23461_vm0, %v19533_v2  ;;  %s391_s2 = scalar_select %p390_p10, %s19606_s13, 1  ;;  %v19851_v3 = vshrl.u32 %v395_v0, 7  ;;  %v23672_v46 = vmov 0  ;;  %v23675_v58 = vmov 0 }
  0xa6   : > { %529 = vst.msk [vmem:[#allocation2 + $0x20] sm:$0xff] %vm23461_vm0, %v19533_v2  ;;  %530 = vst.msk [vmem:[#allocation2 + $0x28] sm:$0xff] %vm23461_vm0, %v19533_v2  ;;  %v23678_v0 = vmov 0  ;;  %vm23450_vm9 = vcmask 64512   ;;  %s388_s26 = sand.u32 1, %s19515_s10   ;;  %s16464_s18 = sshll.u32 %s19606_s13, 4 }
  0xa7   : > { %531 = vst.msk [vmem:[#allocation2 + $0x30] sm:$0xff] %vm23461_vm0, %v19533_v2  ;;  %532 = vst.msk [vmem:[#allocation2 + $0x38] sm:$0xff] %vm23461_vm0, %v19533_v2  ;;  %s16467_s4 = sshll.u32 %s391_s2, 8  ;;  %v428_v5 = vand.u32 15, %v19851_v3  ;;  %v398_v7 = vadd.s32 16, %v19851_v3  ;;  %v397_v20 = vadd.s32 8, %v19851_v3  ;;  %s23384_s25 = scalar_lea.hbm %s23435_s9, %s16464_s18 }
  0xa8   : > { %533 = vst.msk [vmem:[#allocation2 + $0x40] sm:$0xff] %vm23461_vm0, %v19533_v2  ;;  %534 = vst.msk [vmem:[#allocation2 + $0x48] sm:$0xff] %vm23461_vm0, %v19533_v2  ;;  %s19856_s24 = scalar_lea.vmem %s23426_s0, %s16467_s4  ;;  %v399_v35 = vadd.s32 24, %v19851_v3  ;;  %v400_v38 = vadd.s32 32, %v19851_v3  ;;  %v401_v52 = vadd.s32 40, %v19851_v3  ;;  %v402_v59 = vadd.s32 48, %v19851_v3 }
  0xa9   : > { %535 = vst.msk [vmem:[#allocation2 + $0x50] sm:$0xff] %vm23461_vm0, %v19533_v2  ;;  %536 = vst.msk [vmem:[#allocation2 + $0x58] sm:$0xff] %vm23461_vm0, %v19533_v2  ;;  %v563_v4 = vld [vmem:[%s19856_s24] sm:$0xff]  ;;  %v564_v6 = vld [vmem:[%s19856_s24 + $0x8] sm:$0xff]  ;;  %vm19871_vm1 = vcmp.ne.s32.totalorder %v428_v5, 0  ;;  %v430_v19 = vand.u32 15, %v398_v7 }
  0xaa   : > { %537 = vst.msk [vmem:[#allocation2 + $0x60] sm:$0xff] %vm23461_vm0, %v19533_v2  ;;  %538 = vst.msk [vmem:[#allocation2 + $0x68] sm:$0xff] %vm23461_vm0, %v19533_v2  ;;  %v565_v8 = vld [vmem:[%s19856_s24 + $0x10] sm:$0xff]  ;;  %v566_v13 = vld [vmem:[%s19856_s24 + $0x18] sm:$0xff]  ;;  %v23661_v17 = vsel %vm19871_vm1, 4294967295, %v23660_v17  ;;  %v429_v28 = vand.u32 15, %v397_v20 }
  0xab   : > { %539 = vst.msk [vmem:[#allocation2 + $0x70] sm:$0xff] %vm23461_vm0, %v19533_v2  ;;  %540 = vst.msk [vmem:[#allocation2 + $0x78] sm:$0xff] %vm23461_vm0, %v19533_v2  ;;  %v920_v9 = vld [vmem:[#allocation2 + $0x8] sm:$0xff]  ;;  %v567_v14 = vld [vmem:[%s19856_s24 + $0x20] sm:$0xff]  ;;  %vm19887_vm2 = vcmp.ne.s32.totalorder %v430_v19, 0  ;;  %v431_v37 = vand.u32 15, %v399_v35 }
  0xac   : > { %541 = vst.msk [vmem:[#allocation2 + $0x80] sm:$0xff] %vm23461_vm0, %v19533_v2  ;;  %542 = vst.msk [vmem:[#allocation2 + $0x88] sm:$0xff] %vm23461_vm0, %v19533_v2  ;;  %v628_v10 = vld [vmem:[#allocation2 + $0xf] sm:$0xff]  ;;  %955 = vperm.xlu0 %17699, %v920_v9   ;;  %v627_v18 = vld [vmem:[#allocation2 + $0x7] sm:$0xff]  ;;  %v23664_v26 = vsel %vm19887_vm2, 4294967295, %v23663_v26  ;;  %vm19893_vm3 = vcmp.ne.s32.totalorder %v429_v28, 15 }
  0xad   : > { %543 = vst.msk [vmem:[#allocation2 + $0x90] sm:$0xff] %vm23461_vm0, %v19533_v2  ;;  %544 = vst.msk [vmem:[#allocation2 + $0x98] sm:$0xff] %vm23461_vm0, %v19533_v2  ;;  %699 = vperm.xlu1 %17700, %v628_v10   ;;  %v1181_v11 = vld [vmem:[#allocation2 + $0x9] sm:$0xff]  ;;  %v570_v21 = vld [vmem:[%s19856_s24 + $0x38] sm:$0xff]  ;;  %v659_v24 = vsel %vm19871_vm1, %v627_v18, 0.0  ;;  %v23667_v31 = vsel %vm19893_vm3, 4294967295, %v23666_v31 }
  0xae   : > { %545 = vst.msk [vmem:[#allocation2 + $0xa0] sm:$0xff] %vm23461_vm0, %v19533_v2  ;;  %546 = vst.msk [vmem:[#allocation2 + $0xa8] sm:$0xff] %vm23461_vm0, %v19533_v2  ;;  %v921_v12 = vld [vmem:[#allocation2 + $0x10] sm:$0xff]  ;;  %v568_v15 = vld [vmem:[%s19856_s24 + $0x28] sm:$0xff]  ;;  %vm19903_vm4 = vcmp.ne.s32.totalorder %v431_v37, 15  ;;  %v432_v42 = vand.u32 15, %v400_v38 }
  0xaf   : > { %547 = vst.msk [vmem:[#allocation2 + $0xb0] sm:$0xff] %vm23461_vm0, %v19533_v2  ;;  %548 = vst.msk [vmem:[#allocation2 + $0xb8] sm:$0xff] %vm23461_vm0, %v19533_v2  ;;  %v569_v16 = vld [vmem:[%s19856_s24 + $0x30] sm:$0xff]  ;;  %v571_v22 = vld [vmem:[%s19856_s24 + $0x40] sm:$0xff]  ;;  %v23670_v40 = vsel %vm19903_vm4, 4294967295, %v23669_v40  ;;  %v433_v55 = vand.u32 15, %v401_v52 }
  0xb0   : > { %549 = vst.msk [vmem:[#allocation2 + $0xc0] sm:$0xff] %vm23461_vm0, %v19533_v2  ;;  %550 = vst.msk [vmem:[#allocation2 + $0xc8] sm:$0xff] %vm23461_vm0, %v19533_v2  ;;  %1248 = vperm.xlu0 %17699, %v1181_v11   ;;  %v572_v23 = vld [vmem:[%s19856_s24 + $0x48] sm:$0xff]  ;;  %v573_v43 = vld [vmem:[%s19856_s24 + $0x50] sm:$0xff]  ;;  %vm19911_vm5 = vcmp.ne.s32.totalorder %v432_v42, 0  ;;  %v434_v62 = vand.u32 15, %v402_v59 }
  0xb1   : > { %551 = vst.msk [vmem:[#allocation2 + $0xd0] sm:$0xff] %vm23461_vm0, %v19533_v2  ;;  %552 = vst.msk [vmem:[#allocation2 + $0xd8] sm:$0xff] %vm23461_vm0, %v19533_v2  ;;  %960 = vperm.xlu1 %17700, %v921_v12   ;;  %v23673_v46 = vsel %vm19911_vm5, 4294967295, %v23672_v46  ;;  %v574_v53 = vld [vmem:[%s19856_s24 + $0x58] sm:$0xff]  ;;  %vm19928_vm6 = vcmp.ne.s32.totalorder %v433_v55, 15  ;;  %v575_v5 = vld [vmem:[%s19856_s24 + $0x60] sm:$0xff] }
  0xb2   : > { %553 = vst.msk [vmem:[#allocation2 + $0xe0] sm:$0xff] %vm23461_vm0, %v19533_v2  ;;  %554 = vst.msk [vmem:[#allocation2 + $0xe8] sm:$0xff] %vm23461_vm0, %v19533_v2  ;;  %v23676_v58 = vsel %vm19928_vm6, 4294967295, %v23675_v58  ;;  %vm19941_vm7 = vcmp.ne.s32.totalorder %v434_v62, 0  ;;  %v403_v10 = vadd.s32 56, %v19851_v3  ;;  %v576_v12 = vld [vmem:[%s19856_s24 + $0x68] sm:$0xff] }
  0xb3   : > { %555 = vst.msk [vmem:[#allocation2 + $0xf0] sm:$0xff] %vm23461_vm0, %v19533_v2  ;;  %556 = vst.msk [vmem:[#allocation2 + $0xf8] sm:$0xff] %vm23461_vm0, %v19533_v2  ;;  %v23679_v0 = vsel %vm19941_vm7, 4294967295, %v23678_v0  ;;  %v404_v18 = vadd.s32 64, %v19851_v3  ;;  %v405_v35 = vadd.s32 72, %v19851_v3  ;;  %v578_v37 = vld [vmem:[%s19856_s24 + $0x78] sm:$0xff] }
  0xb4   : > { %557 = vst.msk [vmem:[#allocation2 + $0x100] sm:$0xff] %vm23461_vm0, %v19533_v2  ;;  %558 = vst.msk [vmem:[#allocation2 + $0x108] sm:$0xff] %vm23461_vm0, %v19533_v2  ;;  %694 = vperm.xlu0 %17699, %v659_v24   ;;  %v23687_v42 = vmov 0  ;;  %s389_s16 = scalar_lea.vmem [#allocation13], %s388_s26  ;;  %p24305_p3 = scmp.ne.s32.totalorder %s23645_s19, 0 }
  0xb5   : > { %559 = vst.msk [vmem:[#allocation2 + $0x110] sm:$0xff] %vm23461_vm0, %v19533_v2  ;;  %560 = vst.msk [vmem:[#allocation2 + $0x118] sm:$0xff] %vm23461_vm0, %v19533_v2  ;;  %v436_v20 = vand.u32 15, %v404_v18  ;;  %v437_v38 = vand.u32 15, %v405_v35  ;;  %s15020_s27 = sshll.u32 %s389_s16, 4  ;;  %s19534_s13 = smov [#allocation13]   ;;  %s23386_s27 = int_to_ptr.vmem [resolvable:$true] %s15020_s27 }
  0xb6   : > { %561 = vst.msk [vmem:[#allocation2 + $0x120] sm:$0xff] %vm23461_vm0, %v19533_v2  ;;  %562 = vst.msk [vmem:[#allocation2 + $0x128] sm:$0xff] %vm23461_vm0, %v19533_v2  ;;  %s19449_s23 = scalar_lea.vmem %s23386_s27, 16  ;;  %s19453_s28 = sshll.u32 %s19534_s13, 4  ;;  %s19454_s28 = int_to_ptr.vmem [resolvable:$false] %s19453_s28 }
  0xb7   : > { %23659 = vst [vmem:[#allocation21_spill] sm:$0xff] %v19851_v3  ;;  %595 = vst.msk [vmem:[#allocation2 + $0x18] sm:$0xff] %vm23461_vm0, %v563_v4  ;;  %vm20068_vm10 = vcmp.ne.s32.totalorder %v436_v20, 0  ;;  %vm20104_vm11 = vcmp.ne.s32.totalorder %v437_v38, 15  ;;  %v408_v20 = vadd.s32 96, %v19851_v3  ;;  %v581_v38 = vld [vmem:[%s19856_s24 + $0x90] sm:$0xff]  ;;  %p19450_p2 = scmp.ne.s32.totalorder %s23386_s27, %s19449_s23  ;;  %p19456_p8 = scmp.lt.s32.totalorder %s23386_s27, %s19454_s28 }
  0xb8   : > { %596 = vst.msk [vmem:[#allocation2 + $0x20] sm:$0xff] %vm23461_vm0, %v564_v6  ;;  %597 = vst.msk [vmem:[#allocation2 + $0x28] sm:$0xff] %vm23461_vm0, %v565_v8  ;;  %v23688_v42 = vsel %vm20104_vm11, 4294967295, %v23687_v42  ;;  %s19455_s22 = scalar_lea.vmem %s19454_s28, 32 }
  0xb9   : > { %598 = vst.msk [vmem:[#allocation2 + $0x30] sm:$0xff] %vm23461_vm0, %v566_v13  ;;  %23662 = vst [vmem:[#allocation22_spill] sm:$0xff] %v23661_v17  ;;  %v435_v13 = vand.u32 15, %v403_v10  ;;  %p19451_p4 = pnand %p19450_p2, %p24305_p3  ;;  %p19457_p11 = scmp.lt.s32.totalorder %s19455_s22, %s19449_s23 }
  0xba   : > { %599 = vst.msk [vmem:[#allocation2 + $0x38] sm:$0xff] %vm23461_vm0, %v567_v14  ;;  %600 = vst.msk [vmem:[#allocation2 + $0x40] sm:$0xff] %vm23461_vm0, %v568_v15  ;;  %v23681_v15 = vmov 0 }
  0xbb   : > { %601 = vst.msk [vmem:[#allocation2 + $0x48] sm:$0xff] %vm23461_vm0, %v569_v16  ;;  %602 = vst.msk [vmem:[#allocation2 + $0x50] sm:$0xff] %vm23461_vm0, %v570_v21  ;;  %vm19977_vm8 = vcmp.ne.s32.totalorder %v435_v13, 15  ;;  %p19452_p7 = pneg %p19451_p4  ;;  %p19458_p13 = por %p19457_p11, %p19456_p8 }
  0xbc   : > { %603 = vst.msk [vmem:[#allocation2 + $0x58] sm:$0xff] %vm23461_vm0, %v571_v22  ;;  %604 = vst.msk [vmem:[#allocation2 + $0x60] sm:$0xff] %vm23461_vm0, %v572_v23  ;;  %v23682_v15 = vsel %vm19977_vm8, 4294967295, %v23681_v15  ;;  %v23684_v23 = vmov 0 }
  0xbd   : > { %23665 = vst [vmem:[#allocation23_spill] sm:$0xff] %v23664_v26  ;;  %23668 = vst [vmem:[#allocation24_spill] sm:$0xff] %v23667_v31  ;;  %v23685_v23 = vsel %vm20068_vm10, 4294967295, %v23684_v23  ;;  %p19459_p1 = pnand %p19458_p13, %p19452_p7 }
  0xbe   : > { %v922_v25 = vld [vmem:[#allocation2 + $0x18] sm:$0xff]  ;;  %23671 = vst [vmem:[#allocation25_spill] sm:$0xff] %v23670_v40  ;;  %605 = vst.msk [vmem:[#allocation2 + $0x68] sm:$0xff] %vm23461_vm0, %v573_v43  ;;  %v406_v43 = vadd.s32 80, %v19851_v3 }
  0xbf   : > { %v629_v27 = vld [vmem:[#allocation2 + $0x17] sm:$0xff]  ;;  %965 = vperm.xlu1 %17700, %v922_v25   ;;  %v630_v29 = vld [vmem:[#allocation2 + $0x1f] sm:$0xff]  ;;  %v631_v44 = vld [vmem:[#allocation2 + $0x27] sm:$0xff]  ;;  %23674 = vst [vmem:[#allocation26_spill] sm:$0xff] %v23673_v46 }
  0xc0   : > { %v661_v30 = vsel %vm19887_vm2, %v629_v27, 0.0  ;;  %v1182_v32 = vld [vmem:[#allocation2 + $0x11] sm:$0xff]  ;;  %v1506_v34 = vsel %vm19871_vm1, %v629_v27, 0.0  ;;  %v923_v36 = vld [vmem:[#allocation2 + $0x20] sm:$0xff]  ;;  %v924_v47 = vld [vmem:[#allocation2 + $0x28] sm:$0xff]  ;;  %v663_v48 = vsel %vm19911_vm5, %v631_v44, 0.0 }
  0xc1   : > { %704 = vperm.xlu0 %17699, %v661_v30   ;;  %v1214_v33 = vsel %vm19893_vm3, %v1182_v32, 0.0  ;;  %v1183_v39 = vld [vmem:[#allocation2 + $0x19] sm:$0xff]  ;;  %v1184_v41 = vld [vmem:[#allocation2 + $0x21] sm:$0xff]  ;;  %v1508_v49 = vsel %vm19887_vm2, %v631_v44, 0.0  ;;  %v925_v50 = vld [vmem:[#allocation2 + $0x30] sm:$0xff]  ;;  %606 = vst.msk [vmem:[#allocation2 + $0x70] sm:$0xff] %vm23461_vm0, %v574_v53 }
  0xc2   : > { %v1216_v45 = vsel %vm19903_vm4, %v1184_v41, 0.0  ;;  %v632_v51 = vld [vmem:[#allocation2 + $0x2f] sm:$0xff]  ;;  %v2061_v54 = vsel %vm19893_vm3, %v1184_v41, 0.0  ;;  %23677 = vst [vmem:[#allocation27_spill] sm:$0xff] %v23676_v58  ;;  %v2353_v61 = vsel %vm19871_vm1, %v631_v44, 0.0  ;;  %v19939_v63 = vld [vmem:[#allocation2 + $0x37] sm:$0xff] }
  0xc3   : > { %709 = vperm.xlu1 %17700, %v630_v29   ;;  %v19924_v56 = vld [vmem:[#allocation2 + $0x29] sm:$0xff]  ;;  %v19926_v57 = vld [vmem:[#allocation2 + $0x31] sm:$0xff]  ;;  %23680 = vst [vmem:[#allocation28_spill] sm:$0xff] %v23679_v0  ;;  %v665_v4 = vsel %vm19941_vm7, %v19939_v63, 0.0  ;;  %607 = vst.msk [vmem:[#allocation2 + $0x78] sm:$0xff] %vm23461_vm0, %v575_v5  ;;  %v1510_v6 = vsel %vm19911_vm5, %v19939_v63, 0.0 }
  0xc4   : > { %v1218_v60 = vsel %vm19928_vm6, %v19926_v57, 0.0  ;;  %v19945_v1 = vld [vmem:[#allocation2 + $0x38] sm:$0xff]  ;;  %v19959_v8 = vld [vmem:[#allocation2 + $0x40] sm:$0xff]  ;;  %v2063_v9 = vsel %vm19903_vm4, %v19926_v57, 0.0  ;;  %608 = vst.msk [vmem:[#allocation2 + $0x80] sm:$0xff] %vm23461_vm0, %v576_v12  ;;  %v2355_v14 = vsel %vm19887_vm2, %v19939_v63, 0.0 }
  0xc5   : > { %1541 = vperm.xlu0 %17699, %v1506_v34   ;;  %v19956_v7 = vld [vmem:[#allocation2 + $0x3f] sm:$0xff]  ;;  %23683 = vst [vmem:[#allocation29_spill] sm:$0xff] %v23682_v15  ;;  %3243 = vst.msk [vmem:[#allocation3 + $0x18] sm:$0xff] %vm23450_vm9, %v19533_v2  ;;  %v635_v21 = vld [vmem:[#allocation2 + $0x47] sm:$0xff]  ;;  %v2908_v22 = vsel %vm19893_vm3, %v19926_v57, 0.0  ;;  %v23706_v0 = vmov 0 }
  0xc6   : > { %v19968_v11 = vld [vmem:[#allocation2 + $0x39] sm:$0xff]  ;;  %v19981_v16 = vld [vmem:[#allocation2 + $0x41] sm:$0xff]  ;;  %3240 = vst.msk [vmem:[#allocation3] sm:$0xff] %vm23450_vm9, %v19533_v2  ;;  %3241 = vst.msk [vmem:[#allocation3 + $0x8] sm:$0xff] %vm23450_vm9, %v19533_v2  ;;  %v667_v24 = vsel %vm20068_vm10, %v635_v21, 0.0  ;;  %v1512_v28 = vsel %vm19941_vm7, %v635_v21, 0.0 }
  0xc7   : > { %1253 = vperm.xlu1 %17700, %v1214_v33   ;;  %3242 = vst.msk [vmem:[#allocation3 + $0x10] sm:$0xff] %vm23450_vm9, %v19533_v2  ;;  %3244 = vst.msk [vmem:[#allocation3 + $0x20] sm:$0xff] %vm23450_vm9, %v19533_v2  ;;  %v1220_v19 = vsel %vm19977_vm8, %v19981_v16, 0.0  ;;  %v3471_v27 = vld [vmem:[%s23429_s3 + $0x8] sm:$0xff]  ;;  %v929_v33 = vld [vmem:[#allocation2 + $0x50] sm:$0xff]  ;;  %v2065_v34 = vsel %vm19928_vm6, %v19981_v16, 0.0 }
  0xc8   : > { %3245 = vst.msk [vmem:[#allocation3 + $0x28] sm:$0xff] %vm23450_vm9, %v19533_v2  ;;  %3246 = vst.msk [vmem:[#allocation3 + $0x30] sm:$0xff] %vm23450_vm9, %v19533_v2  ;;  %16835 = vmatprep.subr.mxu0 %v3471_v27  ;;  %v636_v32 = vld [vmem:[#allocation2 + $0x4f] sm:$0xff]  ;;  %v2357_v41 = vsel %vm19911_vm5, %v635_v21, 0.0  ;;  %v20124_v52 = vld [vmem:[#allocation2 + $0x58] sm:$0xff] }
  0xc9   : > { %970 = vperm.xlu0 %17699, %v923_v36   ;;  %3247 = vst.msk [vmem:[#allocation3 + $0x38] sm:$0xff] %vm23450_vm9, %v19533_v2  ;;  %3248 = vst.msk [vmem:[#allocation3 + $0x40] sm:$0xff] %vm23450_vm9, %v19533_v2  ;;  %16836 = vmatpush3.msra.mxu0 %v3471_v27  ;;  %v20162_v10 = vld [vmem:[#allocation2 + $0x59] sm:$0xff]  ;;  %v20291_v58 = vld [vmem:[%s23427_s1 + $0x3] ss:$0 sm:$0xff] }
  0xca   : > { %3249 = vst.msk [vmem:[#allocation3 + $0x48] sm:$0xff] %vm23450_vm9, %v19533_v2  ;;  %3250 = vst.msk [vmem:[#allocation3 + $0x50] sm:$0xff] %vm23450_vm9, %v19533_v2  ;;  %v20321_v26 = vld [vmem:[#allocation2 + $0x78] sm:$0xff] }
  0xcb   : > { %1546 = vperm.xlu1 %17700, %v630_v29   ;;  %3251 = vst.msk [vmem:[#allocation3 + $0x58] sm:$0xff] %vm23450_vm9, %v19533_v2  ;;  %3252 = vst.msk [vmem:[#allocation3 + $0x60] sm:$0xff] %vm23450_vm9, %v19533_v2 }
  0xcc   : > { %3253 = vst.msk [vmem:[#allocation3 + $0x68] sm:$0xff] %vm23450_vm9, %v19533_v2  ;;  %3254 = vst.msk [vmem:[#allocation3 + $0x70] sm:$0xff] %vm23450_vm9, %v19533_v2 }
  0xcd   : > { %1258 = vperm.xlu0 %17699, %v1183_v39   ;;  %3255 = vst.msk [vmem:[#allocation3 + $0x78] sm:$0xff] %vm23450_vm9, %v19533_v2  ;;  %3256 = vst.msk [vmem:[#allocation3 + $0x80] sm:$0xff] %vm23450_vm9, %v19533_v2  ;;  %v3439_v29 = vld [vmem:[#allocation3 + $0x8] sm:$0xff] }
  0xce   : > { %3257 = vst.msk [vmem:[#allocation3 + $0x88] sm:$0xff] %vm23450_vm9, %v19533_v2  ;;  %3258 = vst.msk [vmem:[#allocation3 + $0x90] sm:$0xff] %vm23450_vm9, %v19533_v2  ;;  %16837 = vmatprep.mubr.msk.f32.mxu0 %vm23450_vm9, %v3439_v29  ;;  %v3440_v30 = vld [vmem:[#allocation3 + $0x10] sm:$0xff] }
  0xcf   : > { %1802 = vperm.xlu1 %17700, %v922_v25   ;;  %3259 = vst.msk [vmem:[#allocation3 + $0x98] sm:$0xff] %vm23450_vm9, %v19533_v2  ;;  %3260 = vst.msk [vmem:[#allocation3 + $0xa0] sm:$0xff] %vm23450_vm9, %v19533_v2  ;;  %v577_v25 = vld [vmem:[%s19856_s24 + $0x70] sm:$0xff]  ;;  %16838 = vmatmul.mubr.msk.f32.vlgmr.msra.gmra.mrb[0].mxu0 %vm23450_vm9, %v3440_v30  ;;  %v23696_v30 = vmov 0 }
  0xd0   : > { %3261 = vst.msk [vmem:[#allocation3 + $0xa8] sm:$0xff] %vm23450_vm9, %v19533_v2  ;;  %3262 = vst.msk [vmem:[#allocation3 + $0xb0] sm:$0xff] %vm23450_vm9, %v19533_v2 }
  0xd1   : > { %1263 = vperm.xlu0 %17699, %v1216_v45   ;;  %3263 = vst.msk [vmem:[#allocation3 + $0xb8] sm:$0xff] %vm23450_vm9, %v19533_v2  ;;  %3264 = vst.msk [vmem:[#allocation3 + $0xc0] sm:$0xff] %vm23450_vm9, %v19533_v2  ;;  %v438_v45 = vand.u32 15, %v406_v43 }
  0xd2   : > { %3265 = vst.msk [vmem:[#allocation3 + $0xc8] sm:$0xff] %vm23450_vm9, %v19533_v2  ;;  %3266 = vst.msk [vmem:[#allocation3 + $0xd0] sm:$0xff] %vm23450_vm9, %v19533_v2 }
  0xd3   : > { %1807 = vperm.xlu1 %17700, %v923_v36   ;;  %3267 = vst.msk [vmem:[#allocation3 + $0xd8] sm:$0xff] %vm23450_vm9, %v19533_v2  ;;  %3268 = vst.msk [vmem:[#allocation3 + $0xe0] sm:$0xff] %vm23450_vm9, %v19533_v2  ;;  %v20094_v36 = vld [vmem:[#allocation2 + $0x49] sm:$0xff]  ;;  %vm20116_vm12 = vcmp.ne.s32.totalorder %v438_v45, 0 }
  0xd4   : > { %3269 = vst.msk [vmem:[#allocation3 + $0xe8] sm:$0xff] %vm23450_vm9, %v19533_v2  ;;  %3270 = vst.msk [vmem:[#allocation3 + $0xf0] sm:$0xff] %vm23450_vm9, %v19533_v2 }
  0xd5   : > { %714 = vperm.xlu0 %17699, %v663_v48   ;;  %3271 = vst.msk [vmem:[#allocation3 + $0xf8] sm:$0xff] %vm23450_vm9, %v19533_v2  ;;  %3272 = vst.msk [vmem:[#allocation3 + $0x100] sm:$0xff] %vm23450_vm9, %v19533_v2  ;;  %v2910_v48 = vsel %vm19903_vm4, %v19981_v16, 0.0  ;;  %v20172_v16 = vld [vmem:[#allocation2 + $0x61] sm:$0xff] }
  0xd6   : > { %3273 = vst.msk [vmem:[#allocation3 + $0x108] sm:$0xff] %vm23450_vm9, %v19533_v2  ;;  %3274 = vst.msk [vmem:[#allocation3 + $0x110] sm:$0xff] %vm23450_vm9, %v19533_v2  ;;  %v2914_v31 = vsel %vm19977_vm8, %v20172_v16, 0.0 }
  0xd7   : > { %975 = vperm.xlu1 %17700, %v924_v47   ;;  %3275 = vst.msk [vmem:[#allocation3 + $0x118] sm:$0xff] %vm23450_vm9, %v19533_v2  ;;  %3276 = vst.msk [vmem:[#allocation3 + $0x120] sm:$0xff] %vm23450_vm9, %v19533_v2 }
  0xd8   : > { %3277 = vst.msk [vmem:[#allocation3 + $0x128] sm:$0xff] %vm23450_vm9, %v19533_v2  ;;  %23686 = vst [vmem:[#allocation30_spill] sm:$0xff] %v23685_v23  ;;  %v20072_v2 = vld [vmem:[#allocation2 + $0x48] sm:$0xff] }
  0xd9   : > { %1551 = vperm.xlu0 %17699, %v1508_v49   ;;  %609 = vst.msk [vmem:[#allocation2 + $0x88] sm:$0xff] %vm23461_vm0, %v577_v25  ;;  %610 = vst.msk [vmem:[#allocation2 + $0x90] sm:$0xff] %vm23461_vm0, %v578_v37  ;;  %v23690_v49 = vmov 0 }
  0xda   : > { %23689 = vst [vmem:[#allocation31_spill] sm:$0xff] %v23688_v42  ;;  %v23691_v49 = vsel %vm20116_vm12, 4294967295, %v23690_v49  ;;  %613 = vst.msk [vmem:[#allocation2 + $0xa8] sm:$0xff] %vm23461_vm0, %v581_v38 }
  0xdb   : > { %2095 = vperm.xlu1 %17700, %v1183_v39   ;;  %v20100_v39 = vld [vmem:[#allocation2 + $0x51] sm:$0xff]  ;;  %23692 = vst [vmem:[#allocation32_spill] sm:$0xff] %v23691_v49 }
  0xdc   : > { %v1222_v44 = vsel %vm20104_vm11, %v20100_v39, 0.0  ;;  %v2912_v29 = vsel %vm19928_vm6, %v20100_v39, 0.0 }
  0xdd   : > { %719 = vperm.xlu0 %17699, %v632_v51  }
  0xdf   : > { %980 = vperm.xlu1 %17700, %v925_v50  }
  0xe0   : > { %v20503_v49 = vld [vmem:[#allocation2 + $0x90] sm:$0xff] }
  0xe1   : > { %1556 = vperm.xlu0 %17699, %v632_v51  }
  0xe3   : > { %2100 = vperm.xlu1 %17700, %v2061_v54  }
  0xe5   : > { %1268 = vperm.xlu0 %17699, %v19924_v56  }
  0xe7   : > { %1812 = vperm.xlu1 %17700, %v924_v47  }
  0xe9   : > { %2388 = vperm.xlu0 %17699, %v2353_v61   ;;  %v638_v61 = vld [vmem:[#allocation2 + $0x5f] sm:$0xff] }
  0xeb   : > { %1273 = vperm.xlu1 %17700, %v1218_v60  }
  0xed   : > { %1817 = vperm.xlu0 %17699, %v925_v50  }
  0xef   : > { %2393 = vperm.xlu1 %17700, %v632_v51  }
  0xf1   : > { %724 = vperm.xlu0 %17699, %v665_v4  }
  0xf3   : > { %985 = vperm.xlu1 %17700, %v19945_v1  }
  0xf5   : > { %1561 = vperm.xlu0 %17699, %v1510_v6   ;;  %v2067_v6 = vsel %vm19977_vm8, %v20100_v39, 0.0  ;;  %vm23713_vm8 = vcmask 7168  }
  0xf7   : > { %2105 = vperm.xlu1 %17700, %v19924_v56  }
  0xf9   : > { %2649 = vperm.xlu0 %17699, %v924_v47   ;;  %v637_v47 = vld [vmem:[#allocation2 + $0x57] sm:$0xff] }
  0xfa   : > { %v669_v53 = vsel %vm20116_vm12, %v637_v47, 0.0  ;;  %v1514_v57 = vsel %vm20068_vm10, %v637_v47, 0.0  ;;  %v2359_v18 = vsel %vm19941_vm7, %v637_v47, 0.0 }
  0xfb   : > { %729 = vperm.xlu1 %17700, %v19956_v7  }
  0xfd   : > { %990 = vperm.xlu0 %17699, %v19959_v8  }
  0xff   : > { %1566 = vperm.xlu1 %17700, %v19956_v7  }
 0x101   : > { %2110 = vperm.xlu0 %17699, %v2063_v9  }
 0x103   : > { %2654 = vperm.xlu1 %17700, %v925_v50  }
 0x105   : > { %1278 = vperm.xlu0 %17699, %v19968_v11  }
 0x107   : > { %1822 = vperm.xlu1 %17700, %v19945_v1  }
 0x109   : > { %2398 = vperm.xlu0 %17699, %v2355_v14  }
 0x10b   : > { %2942 = vperm.xlu1 %17700, %v19924_v56   ;;  %v579_v56 = vld [vmem:[%s19856_s24 + $0x80] sm:$0xff] }
 0x10c   : > { %611 = vst.msk [vmem:[#allocation2 + $0x98] sm:$0xff] %vm23461_vm0, %v579_v56 }
 0x10d   : > { %1283 = vperm.xlu0 %17699, %v1220_v19   ;;  %v23693_v19 = vmov 0 }
 0x10f   : > { %1827 = vperm.xlu1 %17700, %v19959_v8  }
 0x111   : > { %2403 = vperm.xlu0 %17699, %v19956_v7   ;;  %v407_v7 = vadd.s32 88, %v19851_v3 }
 0x113   : > { %2947 = vperm.xlu1 %17700, %v2908_v22   ;;  %v439_v12 = vand.u32 15, %v407_v7 }
 0x115   : > { %734 = vperm.xlu0 %17699, %v667_v24   ;;  %vm20176_vm13 = vcmp.ne.s32.totalorder %v439_v12, 15  ;;  %v440_v24 = vand.u32 15, %v408_v20 }
 0x116   : > { %v23694_v19 = vsel %vm20176_vm13, 4294967295, %v23693_v19 }
 0x117   : > { %995 = vperm.xlu1 %17700, %v20072_v2   ;;  %23695 = vst [vmem:[#allocation33_spill] sm:$0xff] %v23694_v19  ;;  %vm20197_vm14 = vcmp.ne.s32.totalorder %v440_v24, 0  ;;  %v23702_v24 = vmov 0 }
 0x118   : > { %v23697_v30 = vsel %vm20197_vm14, 4294967295, %v23696_v30 }
 0x119   : > { %1571 = vperm.xlu0 %17699, %v1512_v28   ;;  %v639_v28 = vld [vmem:[#allocation2 + $0x67] sm:$0xff]  ;;  %23698 = vst [vmem:[#allocation34_spill] sm:$0xff] %v23697_v30 }
 0x11a   : > { %v671_v35 = vsel %vm20197_vm14, %v639_v28, 0.0  ;;  %v1516_v39 = vsel %vm20116_vm12, %v639_v28, 0.0 }
 0x11b   : > { %2115 = vperm.xlu1 %17700, %v19968_v11  }
 0x11d   : > { %2659 = vperm.xlu0 %17699, %v19945_v1   ;;  %v20146_v1 = vld [vmem:[#allocation2 + $0x60] sm:$0xff] }
 0x11f   : > { %739 = vperm.xlu1 %17700, %v636_v32  }
 0x121   : > { %1000 = vperm.xlu0 %17699, %v929_v33  }
 0x123   : > { %1576 = vperm.xlu1 %17700, %v636_v32  }
 0x125   : > { %2120 = vperm.xlu0 %17699, %v2065_v34   ;;  %v20205_v34 = vld [vmem:[#allocation2 + $0x68] sm:$0xff] }
 0x127   : > { %2664 = vperm.xlu1 %17700, %v19959_v8  }
 0x129   : > { %1288 = vperm.xlu0 %17699, %v20094_v36  }
 0x12b   : > { %1832 = vperm.xlu1 %17700, %v20072_v2   ;;  %v20120_v50 = vpop.permute.xlu0 %955 }
 0x12c   : > { %v20122_v51 = vpop.permute.xlu1 %699 }
 0x12d   : > { %2408 = vperm.xlu0 %17699, %v2357_v41  }
 0x12f   : > { %2952 = vperm.xlu1 %17700, %v19968_v11   ;;  %v20128_v54 = vpop.permute.xlu0 %1248  ;;  %v580_v11 = vld [vmem:[%s19856_s24 + $0x88] sm:$0xff] }
 0x130   : > { %v20130_v55 = vpop.permute.xlu1 %960  ;;  %612 = vst.msk [vmem:[#allocation2 + $0xa0] sm:$0xff] %vm23461_vm0, %v580_v11  ;;  %v582_v11 = vld [vmem:[%s19856_s24 + $0x98] sm:$0xff] }
 0x131   : > { %1293 = vperm.xlu0 %17699, %v1222_v44   ;;  %v640_v44 = vld [vmem:[#allocation2 + $0x6f] sm:$0xff]  ;;  %614 = vst.msk [vmem:[#allocation2 + $0xb0] sm:$0xff] %vm23461_vm0, %v582_v11 }
 0x133   : > { %1837 = vperm.xlu1 %17700, %v929_v33   ;;  %v20139_v60 = vpop.permute.xlu0 %694 }
 0x135   : > { %2413 = vperm.xlu0 %17699, %v636_v32  }
 0x137   : > { %2957 = vperm.xlu1 %17700, %v2910_v48   ;;  %v20227_v48 = vld [vmem:[#allocation2 + $0x70] sm:$0xff] }
 0x138   : > { %v20774_v30 = vld [vmem:[#allocation2 + $0xaf] sm:$0xff] }
 0x139   : > { %744 = vperm.xlu0 %17699, %v669_v53  }
 0x13b   : > { %1005 = vperm.xlu1 %17700, %v20124_v52  }
 0x13d   : > { %1581 = vperm.xlu0 %17699, %v1514_v57   ;;  %v2069_v57 = vsel %vm20104_vm11, %v20172_v16, 0.0 }
 0x13e   : > { %v20137_v59 = vpop.permute.xlu1 %965 }
 0x13f   : > { %2125 = vperm.xlu1 %17700, %v20094_v36  }
 0x140   : > { %v20144_v63 = vpop.permute.xlu0 %704 }
 0x141   : > { %2669 = vperm.xlu0 %17699, %v20072_v2   ;;  %v1224_v2 = vsel %vm20176_vm13, %v20172_v16, 0.0 }
 0x142   : > { %v20142_v62 = vpop.permute.xlu1 %709 }
 0x143   : > { %749 = vperm.xlu1 %17700, %v638_v61  }
 0x144   : > { %v20151_v5 = vpop.permute.xlu0 %1541 }
 0x145   : > { %1010 = vperm.xlu0 %17699, %v20146_v1  }
 0x146   : > { %v20149_v4 = vpop.permute.xlu1 %1253 }
 0x147   : > { %1586 = vperm.xlu1 %17700, %v638_v61  }
 0x148   : > { %v20160_v9 = vpop.permute.xlu0 %970 }
 0x149   : > { %2130 = vperm.xlu0 %17699, %v2067_v6  }
 0x14a   : > { %v20158_v8 = vpop.permute.xlu1 %1546 }
 0x14b   : > { %2674 = vperm.xlu1 %17700, %v929_v33  }
 0x14c   : > { %v20168_v14 = vpop.permute.xlu0 %1258 }
 0x14d   : > { %1298 = vperm.xlu0 %17699, %v20162_v10  }
 0x14e   : > { %v20166_v13 = vpop.permute.xlu1 %1802 }
 0x14f   : > { %1842 = vperm.xlu1 %17700, %v20124_v52  }
 0x150   : > { %v20183_v22 = vpop.permute.xlu0 %1263 }
 0x151   : > { %2418 = vperm.xlu0 %17699, %v2359_v18  }
 0x152   : > { %v20181_v21 = vpop.permute.xlu1 %1807 }
 0x153   : > { %2962 = vperm.xlu1 %17700, %v20094_v36  }
 0x154   : > { %v20191_v27 = vpop.permute.xlu0 %714 }
 0x155   : > { %1303 = vperm.xlu0 %17699, %v1224_v2   ;;  %v20254_v2 = vld [vmem:[#allocation2 + $0x71] sm:$0xff] }
 0x156   : > { %v20189_v25 = vpop.permute.xlu1 %975 }
 0x157   : > { %1847 = vperm.xlu1 %17700, %v20146_v1  }
 0x158   : > { %v20203_v33 = vpop.permute.xlu0 %1551 }
 0x159   : > { %2423 = vperm.xlu0 %17699, %v638_v61   ;;  %v409_v61 = vadd.s32 104, %v19851_v3 }
 0x15a   : > { %v20201_v32 = vpop.permute.xlu1 %2095 }
 0x15b   : > { %2967 = vperm.xlu1 %17700, %v2912_v29   ;;  %v441_v12 = vand.u32 15, %v409_v61  ;;  %v410_v29 = vadd.s32 112, %v19851_v3 }
 0x15c   : > { %v20211_v37 = vpop.permute.xlu0 %719 }
 0x15d   : > { %754 = vperm.xlu0 %17699, %v671_v35   ;;  %vm20258_vm15 = vcmp.ne.s32.totalorder %v441_v12, 15  ;;  %v20266_v35 = vld [vmem:[%s23427_s1 + $0x1] ss:$0 sm:$0xff]  ;;  %v442_v11 = vand.u32 15, %v410_v29  ;;  %v20286_v12 = vld [vmem:[%s23427_s1 + $0x2] ss:$0 sm:$0xff] }
 0x15e   : > { %v20209_v36 = vpop.permute.xlu1 %980  ;;  %v23703_v24 = vsel %vm20258_vm15, 4294967295, %v23702_v24  ;;  %v1117_v40 = vmul.f32 %v20266_v35, %v20120_v50  ;;  %v20303_v29 = vld [vmem:[%s23427_s1 + $0x4] ss:$0 sm:$0xff]  ;;  %v20315_v50 = vld [vmem:[%s23427_s1 + $0x5] ss:$0 sm:$0xff]  ;;  %v1410_v16 = vmul.f32 %v20286_v12, %v20128_v54  ;;  %v1118_v54 = vmul.f32 %v20266_v35, %v20130_v55 }
 0x15f   : > { %1015 = vperm.xlu1 %17700, %v20205_v34   ;;  %23704 = vst [vmem:[#allocation38_spill] sm:$0xff] %v23703_v24  ;;  %vm20308_vm9 = vcmp.ne.s32.totalorder %v442_v11, 0  ;;  %v1964_v17 = vmul.f32 %v20303_v29, %v20166_v13  ;;  %v1411_v55 = vmul.f32 %v20286_v12, %v20149_v4  ;;  %v20371_v4 = vld [vmem:[#allocation2 + $0x7f] sm:$0xff] }
 0x160   : > { %v20220_v43 = vpop.permute.xlu0 %1556  ;;  %v23707_v0 = vsel %vm20308_vm9, 4294967295, %v23706_v0 }
 0x161   : > { %1591 = vperm.xlu0 %17699, %v1516_v39   ;;  %23708 = vst [vmem:[#allocation40_spill] sm:$0xff] %v23707_v0 }
 0x162   : > { %v20218_v41 = vpop.permute.xlu1 %2100 }
 0x163   : > { %2135 = vperm.xlu1 %17700, %v20162_v10  }
 0x164   : > { %v20225_v47 = vpop.permute.xlu0 %1268 }
 0x165   : > { %2679 = vperm.xlu0 %17699, %v20124_v52   ;;  %v20244_v52 = vld [vmem:[#allocation2 + $0x69] sm:$0xff] }
 0x166   : > { %v20223_v45 = vpop.permute.xlu1 %1812 }
 0x167   : > { %759 = vperm.xlu1 %17700, %v640_v44  }
 0x168   : > { %v20232_v56 = vpop.permute.xlu0 %2388 }
 0x169   : > { %1020 = vperm.xlu0 %17699, %v20227_v48  }
 0x16a   : > { %v20230_v53 = vpop.permute.xlu1 %1273 }
 0x16b   : > { %23699 = vst [vmem:[#allocation35_spill] sm:$0xff] %v20230_v53  ;;  %1596 = vperm.xlu1 %17700, %v640_v44   ;;  %v20381_v53 = vld [vmem:[#allocation2 + $0x80] sm:$0xff] }
 0x16c   : > { %v20241_v7 = vpop.permute.xlu0 %1817 }
 0x16d   : > { %2140 = vperm.xlu0 %17699, %v2069_v57   ;;  %v20275_v57 = vld [vmem:[%s23427_s1] ss:$0 sm:$0xff] }
 0x16e   : > { %v20239_v6 = vpop.permute.xlu1 %2393  ;;  %v856_v61 = vmul.f32 %v20275_v57, %v20139_v60  ;;  %v20298_v60 = vld [vmem:[#allocation2 + $0x77] sm:$0xff] }
 0x16f   : > { %2684 = vperm.xlu1 %17700, %v20146_v1   ;;  %v2361_v1 = vsel %vm20068_vm10, %v639_v28, 0.0  ;;  %v1226_v28 = vsel %vm20258_vm15, %v20254_v2, 0.0  ;;  %v673_v11 = vsel %vm20308_vm9, %v20298_v60, 0.0 }
 0x170   : > { %v20250_v20 = vpop.permute.xlu0 %724  ;;  %v1149_v23 = vadd.f32 %v1117_v40, %v856_v61  ;;  %v1703_v40 = vmul.f32 %v20291_v58, %v20151_v5  ;;  %v20330_v61 = vld [vmem:[%s23427_s1 + $0x6] ss:$0 sm:$0xff] }
 0x171   : > { %23701 = vst [vmem:[#allocation37_spill] sm:$0xff] %v20250_v20  ;;  %1308 = vperm.xlu0 %17699, %v20244_v52   ;;  %v20347_v20 = vld [vmem:[%s23427_s1 + $0x7] ss:$0 sm:$0xff] }
 0x172   : > { %v20248_v18 = vpop.permute.xlu1 %985  ;;  %v1442_v15 = vadd.f32 %v1410_v16, %v1149_v23  ;;  %v857_v23 = vmul.f32 %v20275_v57, %v20122_v51  ;;  %v20369_v51 = vld [vmem:[%s23427_s1 + $0x8] ss:$0 sm:$0xff] }
 0x173   : > { %23700 = vst [vmem:[#allocation36_spill] sm:$0xff] %v20248_v18  ;;  %1852 = vperm.xlu1 %17700, %v20205_v34  }
 0x174   : > { %v20270_v39 = vpop.permute.xlu0 %1561  ;;  %v1150_v16 = vadd.f32 %v1118_v54, %v857_v23  ;;  %v20377_v23 = vld [vmem:[#allocation4] ss:$0 sm:$0xff] }
 0x175   : > { %2428 = vperm.xlu0 %17699, %v2361_v1  }
 0x176   : > { %v20268_v38 = vpop.permute.xlu1 %2105 }
 0x177   : > { %2972 = vperm.xlu1 %17700, %v20162_v10   ;;  %v2259_v42 = vmul.f32 %v20315_v50, %v20268_v38 }
 0x178   : > { %v2650_v1 = vpop.permute.xlu0 %2649 }
 0x179   : > { %1313 = vperm.xlu0 %17699, %v1226_v28  }
 0x17a   : > { %v20293_v10 = vpop.permute.xlu1 %729 }
 0x17b   : > { %23705 = vst [vmem:[#allocation39_spill] sm:$0xff] %v20293_v10  ;;  %1857 = vperm.xlu1 %17700, %v20227_v48  }
 0x17c   : > { %v20319_v46 = vpop.permute.xlu0 %990 }
 0x17d   : > { %23710 = vst [vmem:[#allocation42_spill] sm:$0xff] %v20319_v46  ;;  %2433 = vperm.xlu0 %17699, %v640_v44   ;;  %v1735_v44 = vadd.f32 %v1703_v40, %v1442_v15  ;;  %v2257_v46 = vmul.f32 %v20315_v50, %v20201_v32  ;;  %v1518_v15 = vsel %vm20197_vm14, %v20298_v60, 0.0  ;;  %v2550_v32 = vmul.f32 %v20330_v61, %v20232_v56 }
 0x17e   : > { %v20317_v28 = vpop.permute.xlu1 %1566  ;;  %v1704_v40 = vmul.f32 %v20291_v58, %v20158_v8  ;;  %v1443_v56 = vadd.f32 %v1411_v55, %v1150_v16  ;;  %v1965_v8 = vmul.f32 %v20303_v29, %v20181_v21 }
 0x17f   : > { %23709 = vst [vmem:[#allocation41_spill] sm:$0xff] %v20317_v28  ;;  %2977 = vperm.xlu1 %17700, %v2914_v31   ;;  %v583_v31 = vld [vmem:[%s19856_s24 + $0xa0] sm:$0xff]  ;;  %v1996_v13 = vadd.f32 %v1964_v17, %v1735_v44  ;;  %v2811_v17 = vmul.f32 %v20347_v20, %v2650_v1 }
 0x180   : > { %v20339_v5 = vpop.permute.xlu0 %2110  ;;  %615 = vst.msk [vmem:[#allocation2 + $0xb8] sm:$0xff] %vm23461_vm0, %v583_v31  ;;  %v1736_v44 = vadd.f32 %v1704_v40, %v1443_v56  ;;  %vm23712_vm0 = vcmask 64512  }
 0x181   : > { %764 = vperm.xlu0 %17699, %v673_v11   ;;  %v2289_v18 = vadd.f32 %v2257_v46, %v1996_v13  ;;  %v2258_v46 = vmul.f32 %v20315_v50, %v20218_v41 }
 0x182   : > { %v2655_v10 = vpop.permute.xlu1 %2654  ;;  %v1997_v21 = vadd.f32 %v1965_v8, %v1736_v44  ;;  %v20407_v44 = vld [vmem:[#allocation2 + $0x79] sm:$0xff] }
 0x183   : > { %1025 = vperm.xlu1 %17700, %v20321_v26   ;;  %v2582_v54 = vadd.f32 %v2550_v32, %v2289_v18  ;;  %v2551_v18 = vmul.f32 %v20330_v61, %v20239_v6  ;;  %v2812_v40 = vmul.f32 %v20347_v20, %v2655_v10 }
 0x184   : > { %v20364_v31 = vpop.permute.xlu0 %1278  ;;  %v2290_v16 = vadd.f32 %v2258_v46, %v1997_v21  ;;  %v584_v46 = vld [vmem:[%s19856_s24 + $0xa8] sm:$0xff] }
 0x185   : > { %23711 = vst [vmem:[#allocation43_spill] sm:$0xff] %v20364_v31  ;;  %1601 = vperm.xlu0 %17699, %v1518_v15   ;;  %v2843_v1 = vadd.f32 %v2811_v17, %v2582_v54  ;;  %v411_v17 = vadd.s32 120, %v19851_v3  ;;  %616 = vst.msk [vmem:[#allocation2 + $0xc0] sm:$0xff] %vm23713_vm8, %v584_v46  ;;  %vm23717_vm8 = vcmask 64512   ;;  %v858_v46 = vmul.f32 %v20275_v57, %v20144_v63 }
 0x186   : > { %v20362_v11 = vpop.permute.xlu1 %1822  ;;  %v2583_v6 = vadd.f32 %v2551_v18, %v2290_v16  ;;  %v20418_v16 = vld [vmem:[#allocation2 + $0x81] sm:$0xff]  ;;  %vm23718_vm6 = vmmov %vm23717_vm8 }
 0x187   : > { %2145 = vperm.xlu1 %17700, %v20244_v52  }
 0x188   : > { %v20379_v28 = vpop.permute.xlu0 %2398  ;;  %v2844_v54 = vadd.f32 %v2812_v40, %v2583_v6 }
 0x189   : > { %2689 = vperm.xlu0 %17699, %v20205_v34   ;;  %v2071_v34 = vsel %vm20176_vm13, %v20254_v2, 0.0 }
 0x18a   : > { %v2943_v31 = vpop.permute.xlu1 %2942 }
 0x18b   : > { %v3104_v13 = vmul.f32 %v20369_v51, %v2943_v31  ;;  %769 = vperm.xlu1 %17700, %v20371_v4  }
 0x18c   : > { %v20392_v32 = vpop.permute.xlu0 %1283 }
 0x18d   : > { %v3136_v55 = vadd.f32 %v3104_v13, %v2843_v1  ;;  %1030 = vperm.xlu0 %17699, %v20381_v53   ;;  %v443_v13 = vand.u32 15, %v411_v17 }
 0x18e   : > { %v20390_v15 = vpop.permute.xlu1 %1827 }
 0x18f   : > { %v3175_v41 = vadd.f32 %v20377_v23, %v3136_v55  ;;  %1606 = vperm.xlu1 %17700, %v20371_v4  }
 0x190   : > { %v20402_v8 = vpop.permute.xlu0 %2403 }
 0x191   : > { %v3207_v31 = vmax.f32 %v3175_v41, 0.0  ;;  %2150 = vperm.xlu0 %17699, %v2071_v34   ;;  %v23714_v41 = vmov 0  ;;  %v412_v34 = vadd.s32 128, %v19851_v3 }
 0x192   : > { %v2948_v56 = vpop.permute.xlu1 %2947 }
 0x193   : > { %3278 = vst.msk [vmem:[#allocation3 + $0x18] sm:$0xff] %vm23712_vm0, %v3207_v31  ;;  %v3105_v10 = vmul.f32 %v20369_v51, %v2948_v56  ;;  %2694 = vperm.xlu1 %17700, %v20227_v48   ;;  %v2363_v48 = vsel %vm20116_vm12, %v20298_v60, 0.0  ;;  %vm20423_vm0 = vcmp.ne.s32.totalorder %v443_v13, 15  ;;  %v444_v56 = vand.u32 15, %v412_v34 }
 0x194   : > { %v20413_v18 = vpop.permute.xlu0 %734  ;;  %v23715_v41 = vsel %vm20423_vm0, 4294967295, %v23714_v41  ;;  %v1228_v60 = vsel %vm20423_vm0, %v20418_v16, 0.0  ;;  %v1119_v13 = vmul.f32 %v20266_v35, %v20137_v59  ;;  %v20463_v59 = vld [vmem:[#allocation2 + $0x88] sm:$0xff] }
 0x195   : > { %v3137_v1 = vadd.f32 %v3105_v10, %v2844_v54  ;;  %1318 = vperm.xlu0 %17699, %v20407_v44   ;;  %23716 = vst [vmem:[#allocation44_spill] sm:$0xff] %v23715_v41 }
 0x196   : > { %v20411_v21 = vpop.permute.xlu1 %995 }
 0x197   : > { %v3176_v55 = vadd.f32 %v20377_v23, %v3137_v1  ;;  %1862 = vperm.xlu1 %17700, %v20321_v26   ;;  %v20443_v1 = vld [vmem:[#allocation2 + $0x87] sm:$0xff] }
 0x198   : > { %v20430_v31 = vpop.permute.xlu0 %1571 }
 0x199   : > { %v3208_v40 = vmax.f32 %v3176_v55, 0.0  ;;  %2438 = vperm.xlu0 %17699, %v2363_v48   ;;  %v1412_v55 = vmul.f32 %v20286_v12, %v20168_v14  ;;  %v23720_v48 = vmov 0 }
 0x19a   : > { %v20428_v6 = vpop.permute.xlu1 %2115  ;;  %v3441_v17 = vld [vmem:[#allocation3 + $0x18] sm:$0xff] }
 0x19b   : > { %3279 = vst.msk [vmem:[#allocation3 + $0x20] sm:$0xff] %vm23717_vm8, %v3208_v40  ;;  %2982 = vperm.xlu1 %17700, %v20244_v52   ;;  %16840 = vmatprep.mubr.msk.f32.mxu0 %vm23718_vm6, %v3441_v17  ;;  %v2916_v52 = vsel %vm20104_vm11, %v20254_v2, 0.0  ;;  %vm20452_vm6 = vcmp.ne.s32.totalorder %v444_v56, 0  ;;  %v1151_v17 = vadd.f32 %v1119_v13, %v858_v46  ;;  %v1705_v2 = vmul.f32 %v20291_v58, %v20203_v33 }
 0x19c   : > { %v2660_v10 = vpop.permute.xlu0 %2659  ;;  %v23721_v48 = vsel %vm20452_vm6, 4294967295, %v23720_v48  ;;  %v675_v14 = vsel %vm20452_vm6, %v20443_v1, 0.0  ;;  %v1966_v56 = vmul.f32 %v20303_v29, %v20223_v45  ;;  %v1120_v46 = vmul.f32 %v20266_v35, %v20160_v9 }
 0x19d   : > { %1323 = vperm.xlu0 %17699, %v1228_v60   ;;  %23722 = vst [vmem:[#allocation46_spill] sm:$0xff] %v23721_v48  ;;  %v1444_v60 = vadd.f32 %v1412_v55, %v1151_v17  ;;  %v859_v55 = vmul.f32 %v20275_v57, %v20142_v62  ;;  %v1413_v45 = vmul.f32 %v20286_v12, %v20183_v22  ;;  %v1520_v9 = vsel %vm20308_vm9, %v20443_v1, 0.0  ;;  %v20495_v62 = vld [vmem:[#allocation2 + $0x8f] sm:$0xff] }
 0x19e   : > { %v20438_v54 = vpop.permute.xlu1 %739  ;;  %v2552_v17 = vmul.f32 %v20330_v61, %v20379_v28  ;;  %v2813_v22 = vmul.f32 %v20347_v20, %v2660_v10  ;;  %v1967_v28 = vmul.f32 %v20303_v29, %v20241_v7  ;;  %v2553_v7 = vmul.f32 %v20330_v61, %v20402_v8 }
 0x19f   : > { %23719 = vst [vmem:[#allocation45_spill] sm:$0xff] %v20438_v54  ;;  %1867 = vperm.xlu1 %17700, %v20381_v53   ;;  %v1152_v38 = vadd.f32 %v1120_v46, %v859_v55  ;;  %v2260_v54 = vmul.f32 %v20315_v50, %v20339_v5  ;;  %vm23725_vm11 = vcmask 7168  }
 0x1a0   : > { %v20458_v40 = vpop.permute.xlu0 %1000 }
 0x1a1   : > { %2443 = vperm.xlu0 %17699, %v20371_v4   ;;  %v1737_v4 = vadd.f32 %v1705_v2, %v1444_v60  ;;  %v1706_v2 = vmul.f32 %v20291_v58, %v20220_v43 }
 0x1a2   : > { %v20456_v63 = vpop.permute.xlu1 %1576  ;;  %v3442_v34 = vld [vmem:[#allocation3 + $0x20] sm:$0xff] }
 0x1a3   : > { %2987 = vperm.xlu1 %17700, %v2916_v52   ;;  %16841 = vmatmul.mubr.msk.f32.gmra.mrb[2].mxu0 %vm23717_vm8, %v3442_v34  ;;  %v585_v52 = vld [vmem:[%s19856_s24 + $0xb0] sm:$0xff]  ;;  %vm23723_vm8 = vcmask 7168   ;;  %v1998_v34 = vadd.f32 %v1966_v56, %v1737_v4  ;;  %v1445_v56 = vadd.f32 %v1413_v45, %v1152_v38 }
 0x1a4   : > { %v20473_v33 = vpop.permute.xlu0 %2120  ;;  %617 = vst.msk [vmem:[#allocation2 + $0xc8] sm:$0xff] %vm23723_vm8, %v585_v52  ;;  %vm23724_vm8 = vcmask 64512  }
 0x1a5   : > { %774 = vperm.xlu0 %17699, %v675_v14   ;;  %v2291_v52 = vadd.f32 %v2259_v42, %v1998_v34  ;;  %v1738_v4 = vadd.f32 %v1706_v2, %v1445_v56  ;;  %vm23729_vm4 = vmmov %vm23724_vm8 }
 0x1a6   : > { %v2665_v13 = vpop.permute.xlu1 %2664 }
 0x1a7   : > { %1035 = vperm.xlu1 %17700, %v20463_v59   ;;  %v2584_v46 = vadd.f32 %v2552_v17, %v2291_v52  ;;  %v1999_v45 = vadd.f32 %v1967_v28, %v1738_v4  ;;  %v2814_v2 = vmul.f32 %v20347_v20, %v2665_v13  ;;  %v586_v4 = vld [vmem:[%s19856_s24 + $0xb8] sm:$0xff] }
 0x1a8   : > { %v20493_v60 = vpop.permute.xlu0 %1288  ;;  %618 = vst.msk [vmem:[#allocation2 + $0xd0] sm:$0xff] %vm23725_vm11, %v586_v4  ;;  %v860_v4 = vmul.f32 %v20275_v57, %v20191_v27 }
 0x1a9   : > { %1611 = vperm.xlu0 %17699, %v1520_v9   ;;  %v2845_v42 = vadd.f32 %v2813_v22, %v2584_v46  ;;  %v2292_v38 = vadd.f32 %v2260_v54, %v1999_v45  ;;  %v413_v22 = vadd.s32 136, %v19851_v3  ;;  %v20529_v46 = vld [vmem:[#allocation2 + $0x89] sm:$0xff] }
 0x1aa   : > { %v20491_v14 = vpop.permute.xlu1 %1832 }
 0x1ab   : > { %2155 = vperm.xlu1 %17700, %v20407_v44   ;;  %v2585_v8 = vadd.f32 %v2553_v7, %v2292_v38 }
 0x1ac   : > { %v20501_v43 = vpop.permute.xlu0 %2408 }
 0x1ad   : > { %2699 = vperm.xlu0 %17699, %v20321_v26   ;;  %v2073_v26 = vsel %vm20258_vm15, %v20418_v16, 0.0  ;;  %v2846_v54 = vadd.f32 %v2814_v2, %v2585_v8  ;;  %v23726_v2 = vmov 0 }
 0x1ae   : > { %v2953_v55 = vpop.permute.xlu1 %2952 }
 0x1af   : > { %v3106_v10 = vmul.f32 %v20369_v51, %v2953_v55  ;;  %779 = vperm.xlu1 %17700, %v20495_v62  }
 0x1b0   : > { %v20514_v17 = vpop.permute.xlu0 %1293 }
 0x1b1   : > { %v3138_v9 = vadd.f32 %v3106_v10, %v2845_v42  ;;  %1040 = vperm.xlu0 %17699, %v20503_v49   ;;  %v445_v42 = vand.u32 15, %v413_v22 }
 0x1b2   : > { %v20512_v34 = vpop.permute.xlu1 %1837 }
 0x1b3   : > { %v3177_v5 = vadd.f32 %v20377_v23, %v3138_v9  ;;  %1616 = vperm.xlu1 %17700, %v20495_v62   ;;  %v20540_v9 = vld [vmem:[#allocation2 + $0x91] sm:$0xff]  ;;  %vm20545_vm11 = vcmp.ne.s32.totalorder %v445_v42, 15  ;;  %v1414_v42 = vmul.f32 %v20286_v12, %v20225_v47 }
 0x1b4   : > { %v20524_v28 = vpop.permute.xlu0 %2413  ;;  %v23727_v2 = vsel %vm20545_vm11, 4294967295, %v23726_v2 }
 0x1b5   : > { %v3209_v52 = vmax.f32 %v3177_v5, 0.0  ;;  %2160 = vperm.xlu0 %17699, %v2073_v26   ;;  %23728 = vst [vmem:[#allocation47_spill] sm:$0xff] %v23727_v2  ;;  %v414_v5 = vadd.s32 144, %v19851_v3 }
 0x1b6   : > { %v2958_v56 = vpop.permute.xlu1 %2957 }
 0x1b7   : > { %3280 = vst.msk [vmem:[#allocation3 + $0x28] sm:$0xff] %vm23724_vm8, %v3209_v52  ;;  %v3107_v13 = vmul.f32 %v20369_v51, %v2958_v56  ;;  %2704 = vperm.xlu1 %17700, %v20381_v53   ;;  %v2365_v53 = vsel %vm20197_vm14, %v20443_v1, 0.0  ;;  %v1230_v1 = vsel %vm20545_vm11, %v20540_v9, 0.0  ;;  %v446_v22 = vand.u32 15, %v414_v5 }
 0x1b8   : > { %v20535_v45 = vpop.permute.xlu0 %744  ;;  %v1707_v5 = vmul.f32 %v20291_v58, %v20270_v39  ;;  %v861_v39 = vmul.f32 %v20275_v57, %v20211_v37 }
 0x1b9   : > { %v3139_v55 = vadd.f32 %v3107_v13, %v2846_v54  ;;  %1328 = vperm.xlu0 %17699, %v20529_v46   ;;  %v1121_v13 = vmul.f32 %v20266_v35, %v20189_v25 }
 0x1ba   : > { %v20533_v10 = vpop.permute.xlu1 %1005 }
 0x1bb   : > { %v3178_v7 = vadd.f32 %v20377_v23, %v3139_v55  ;;  %1872 = vperm.xlu1 %17700, %v20463_v59   ;;  %v2918_v55 = vsel %vm20176_vm13, %v20418_v16, 0.0  ;;  %v20585_v16 = vld [vmem:[#allocation2 + $0x98] sm:$0xff]  ;;  %vm23737_vm13 = vcmask 7168  }
 0x1bc   : > { %v20552_v8 = vpop.permute.xlu0 %1581 }
 0x1bd   : > { %v3210_v38 = vmax.f32 %v3178_v7, 0.0  ;;  %2448 = vperm.xlu0 %17699, %v2365_v53   ;;  %v23730_v7 = vmov 0 }
 0x1be   : > { %v20550_v26 = vpop.permute.xlu1 %2125  ;;  %v3443_v52 = vld [vmem:[#allocation3 + $0x28] sm:$0xff] }
 0x1bf   : > { %3281 = vst.msk [vmem:[#allocation3 + $0x30] sm:$0xff] %vm23724_vm8, %v3210_v38  ;;  %2992 = vperm.xlu1 %17700, %v20407_v44   ;;  %16843 = vmatprep.mubr.msk.f32.mxu0 %vm23729_vm4, %v3443_v52  ;;  %v20567_v44 = vld [vmem:[#allocation2 + $0x97] sm:$0xff]  ;;  %vm20574_vm4 = vcmp.ne.s32.totalorder %v446_v22, 0  ;;  %v1153_v38 = vadd.f32 %v1121_v13, %v860_v4  ;;  %v1122_v22 = vmul.f32 %v20266_v35, %v20209_v36  ;;  %v587_v4 = vld [vmem:[%s19856_s24 + $0xc0] sm:$0xff] }
 0x1c0   : > { %v2670_v54 = vpop.permute.xlu0 %2669  ;;  %v23731_v7 = vsel %vm20574_vm4, 4294967295, %v23730_v7  ;;  %v677_v47 = vsel %vm20574_vm4, %v20567_v44, 0.0  ;;  %v1522_v36 = vsel %vm20452_vm6, %v20567_v44, 0.0  ;;  %v2554_v35 = vmul.f32 %v20330_v61, %v20501_v43 }
 0x1c1   : > { %1333 = vperm.xlu0 %17699, %v1230_v1   ;;  %23732 = vst [vmem:[#allocation48_spill] sm:$0xff] %v23731_v7  ;;  %v1446_v52 = vadd.f32 %v1414_v42, %v1153_v38  ;;  %v1968_v1 = vmul.f32 %v20303_v29, %v20362_v11  ;;  %v23734_v11 = vld [vmem:[#allocation35_spill] sm:$0xff]  ;;  %v1154_v57 = vadd.f32 %v1122_v22, %v861_v39  ;;  %v23735_v38 = vld [vmem:[#allocation41_spill] sm:$0xff] }
 0x1c2   : > { %v20560_v56 = vpop.permute.xlu1 %749  ;;  %v1415_v42 = vmul.f32 %v20286_v12, %v23734_v11  ;;  %v2815_v12 = vmul.f32 %v20347_v20, %v2670_v54  ;;  %v1969_v43 = vmul.f32 %v20303_v29, %v20390_v15  ;;  %v20625_v11 = vld [vmem:[#allocation2 + $0xa0] sm:$0xff]  ;;  %v2555_v29 = vmul.f32 %v20330_v61, %v20524_v28 }
 0x1c3   : > { %1877 = vperm.xlu1 %17700, %v20503_v49   ;;  %v415_v28 = vadd.s32 152, %v19851_v3 }
 0x1c4   : > { %v20580_v27 = vpop.permute.xlu0 %1010 }
 0x1c5   : > { %2453 = vperm.xlu0 %17699, %v20495_v62  }
 0x1c6   : > { %v20578_v25 = vpop.permute.xlu1 %1586  ;;  %v3444_v53 = vld [vmem:[#allocation3 + $0x30] sm:$0xff] }
 0x1c7   : > { %2997 = vperm.xlu1 %17700, %v2918_v55   ;;  %16844 = vmatmul.mubr.msk.f32.gmra.mrb[4].mxu0 %vm23724_vm8, %v3444_v53  ;;  %v1739_v55 = vadd.f32 %v1707_v5, %v1446_v52  ;;  %v2261_v53 = vmul.f32 %v20315_v50, %v20428_v6  ;;  %vm23733_vm8 = vcmask 7168   ;;  %v1708_v6 = vmul.f32 %v20291_v58, %v23735_v38  ;;  %v20617_v52 = vld [vmem:[#allocation2 + $0x9f] sm:$0xff] }
 0x1c8   : > { %v20597_v62 = vpop.permute.xlu0 %2130  ;;  %619 = vst.msk [vmem:[#allocation2 + $0xd8] sm:$0xff] %vm23733_vm8, %v587_v4  ;;  %v2262_v38 = vmul.f32 %v20315_v50, %v20473_v33  ;;  %vm23736_vm8 = vcmask 64512  }
 0x1c9   : > { %784 = vperm.xlu0 %17699, %v677_v47   ;;  %v2000_v37 = vadd.f32 %v1968_v1, %v1739_v55  ;;  %v1447_v1 = vadd.f32 %v1415_v42, %v1154_v57  ;;  %vm23742_vm3 = vmmov %vm23736_vm8 }
 0x1ca   : > { %v2675_v13 = vpop.permute.xlu1 %2674 }
 0x1cb   : > { %1045 = vperm.xlu1 %17700, %v20585_v16   ;;  %v2293_v4 = vadd.f32 %v2261_v53, %v2000_v37  ;;  %v1740_v39 = vadd.f32 %v1708_v6, %v1447_v1  ;;  %v2816_v57 = vmul.f32 %v20347_v20, %v2675_v13  ;;  %v20651_v13 = vld [vmem:[#allocation2 + $0x99] sm:$0xff]  ;;  %v588_v1 = vld [vmem:[%s19856_s24 + $0xc8] sm:$0xff] }
 0x1cc   : > { %v20615_v47 = vpop.permute.xlu0 %1298  ;;  %620 = vst.msk [vmem:[#allocation2 + $0xe0] sm:$0xff] %vm23737_vm13, %v588_v1  ;;  %v20707_v1 = vld [vmem:[%s23427_s1 + $0x2] ss:$0 sm:$0xff] }
 0x1cd   : > { %1621 = vperm.xlu0 %17699, %v1522_v36   ;;  %v2586_v22 = vadd.f32 %v2554_v35, %v2293_v4  ;;  %v2001_v42 = vadd.f32 %v1969_v43, %v1740_v39  ;;  %v1417_v19 = vmul.f32 %v20707_v1, %v20392_v32 }
 0x1ce   : > { %v20613_v5 = vpop.permute.xlu1 %1842 }
 0x1cf   : > { %2165 = vperm.xlu1 %17700, %v20529_v46   ;;  %v2847_v53 = vadd.f32 %v2815_v12, %v2586_v22  ;;  %v2294_v35 = vadd.f32 %v2262_v38, %v2001_v42  ;;  %v447_v22 = vand.u32 15, %v415_v28  ;;  %v416_v42 = vadd.s32 160, %v19851_v3  ;;  %v23745_v28 = vld [vmem:[#allocation37_spill] sm:$0xff] }
 0x1d0   : > { %v20623_v58 = vpop.permute.xlu0 %2418 }
 0x1d1   : > { %2709 = vperm.xlu0 %17699, %v20463_v59   ;;  %v2075_v59 = vsel %vm20423_vm0, %v20540_v9, 0.0  ;;  %v2587_v61 = vadd.f32 %v2555_v29, %v2294_v35  ;;  %vm20667_vm13 = vcmp.ne.s32.totalorder %v447_v22, 15  ;;  %v448_v35 = vand.u32 15, %v416_v42 }
 0x1d2   : > { %v2963_v55 = vpop.permute.xlu1 %2962 }
 0x1d3   : > { %v3108_v54 = vmul.f32 %v20369_v51, %v2963_v55  ;;  %789 = vperm.xlu1 %17700, %v20617_v52   ;;  %v2848_v12 = vadd.f32 %v2816_v57, %v2587_v61  ;;  %v23744_v61 = vld [vmem:[#allocation36_spill] sm:$0xff] }
 0x1d4   : > { %v20636_v37 = vpop.permute.xlu0 %1303 }
 0x1d5   : > { %v3140_v15 = vadd.f32 %v3108_v54, %v2847_v53  ;;  %1050 = vperm.xlu0 %17699, %v20625_v11   ;;  %v23739_v54 = vmov 0 }
 0x1d6   : > { %v20634_v36 = vpop.permute.xlu1 %1847  ;;  %v23740_v54 = vsel %vm20667_vm13, 4294967295, %v23739_v54 }
 0x1d7   : > { %v3179_v50 = vadd.f32 %v20377_v23, %v3140_v15  ;;  %1626 = vperm.xlu1 %17700, %v20617_v52   ;;  %23741 = vst [vmem:[#allocation41_spill] sm:$0xff] %v23740_v54 }
 0x1d8   : > { %v20646_v4 = vpop.permute.xlu0 %2423 }
 0x1d9   : > { %v3211_v33 = vmax.f32 %v3179_v50, 0.0  ;;  %2170 = vperm.xlu0 %17699, %v2075_v59   ;;  %v20687_v59 = vld [vmem:[%s23427_s1 + $0x1] ss:$0 sm:$0xff] }
 0x1da   : > { %v2968_v6 = vpop.permute.xlu1 %2967 }
 0x1db   : > { %3282 = vst.msk [vmem:[#allocation3 + $0x38] sm:$0xff] %vm23736_vm8, %v3211_v33  ;;  %v3109_v20 = vmul.f32 %v20369_v51, %v2968_v6  ;;  %2714 = vperm.xlu1 %17700, %v20503_v49   ;;  %v20662_v51 = vld [vmem:[#allocation2 + $0xa1] sm:$0xff]  ;;  %v2367_v49 = vsel %vm20308_vm9, %v20567_v44, 0.0  ;;  %v1123_v33 = vmul.f32 %v20687_v59, %v23744_v61 }
 0x1dc   : > { %v20657_v55 = vpop.permute.xlu0 %754  ;;  %v1232_v44 = vsel %vm20667_vm13, %v20662_v51, 0.0 }
 0x1dd   : > { %v3141_v43 = vadd.f32 %v3109_v20, %v2848_v12  ;;  %23738 = vst [vmem:[#allocation35_spill] sm:$0xff] %v20657_v55  ;;  %1338 = vperm.xlu0 %17699, %v20651_v13   ;;  %v20699_v12 = vld [vmem:[#allocation2 + $0xa7] sm:$0xff]  ;;  %v2920_v20 = vsel %vm20258_vm15, %v20540_v9, 0.0  ;;  %v20722_v9 = vld [vmem:[%s23427_s1 + $0x3] ss:$0 sm:$0xff]  ;;  %vm23756_vm15 = vcmask 7168  }
 0x1de   : > { %v20655_v39 = vpop.permute.xlu1 %1015  ;;  %v1711_v48 = vmul.f32 %v20722_v9, %v20552_v8 }
 0x1df   : > { %v3180_v38 = vadd.f32 %v20377_v23, %v3141_v43  ;;  %1882 = vperm.xlu1 %17700, %v20585_v16   ;;  %v23746_v43 = vld [vmem:[#allocation43_spill] sm:$0xff] }
 0x1e0   : > { %v20674_v23 = vpop.permute.xlu0 %1591  ;;  %v1416_v22 = vmul.f32 %v20707_v1, %v23746_v43 }
 0x1e1   : > { %v3212_v53 = vmax.f32 %v3180_v38, 0.0  ;;  %2458 = vperm.xlu0 %17699, %v2367_v49   ;;  %v23747_v38 = vmov 0 }
 0x1e2   : > { %v20672_v29 = vpop.permute.xlu1 %2135  ;;  %v3445_v15 = vld [vmem:[#allocation3 + $0x38] sm:$0xff] }
 0x1e3   : > { %3283 = vst.msk [vmem:[#allocation3 + $0x40] sm:$0xff] %vm23736_vm8, %v3212_v53  ;;  %3002 = vperm.xlu1 %17700, %v20529_v46   ;;  %16846 = vmatprep.mubr.msk.f32.mxu0 %vm23742_vm3, %v3445_v15  ;;  %v20694_v46 = vld [vmem:[%s23427_s1] ss:$0 sm:$0xff]  ;;  %vm20711_vm3 = vcmp.ne.s32.totalorder %v448_v35, 0  ;;  %v20727_v35 = vld [vmem:[#allocation2 + $0xa8] sm:$0xff] }
 0x1e4   : > { %v2680_v50 = vpop.permute.xlu0 %2679  ;;  %v862_v6 = vmul.f32 %v20694_v46, %v23745_v28  ;;  %v23748_v38 = vsel %vm20711_vm3, 4294967295, %v23747_v38  ;;  %v679_v61 = vsel %vm20711_vm3, %v20699_v12, 0.0  ;;  %v20736_v28 = vld [vmem:[%s23427_s1 + $0x4] ss:$0 sm:$0xff] }
 0x1e5   : > { %1343 = vperm.xlu0 %17699, %v1232_v44   ;;  %23749 = vst [vmem:[#allocation36_spill] sm:$0xff] %v23748_v38  ;;  %v1709_v44 = vmul.f32 %v20722_v9, %v20430_v31  ;;  %v1970_v31 = vmul.f32 %v20736_v28, %v20491_v14  ;;  %v23753_v14 = vld [vmem:[#allocation39_spill] sm:$0xff]  ;;  %v1972_v41 = vmul.f32 %v20736_v28, %v20613_v5 }
 0x1e6   : > { %v20682_v57 = vpop.permute.xlu1 %759  ;;  %v1155_v15 = vadd.f32 %v1123_v33, %v862_v6  ;;  %v23751_v6 = vld [vmem:[#allocation42_spill] sm:$0xff]  ;;  %v1419_v5 = vmul.f32 %v20707_v1, %v20514_v17 }
 0x1e7   : > { %23743 = vst [vmem:[#allocation49_spill] sm:$0xff] %v20682_v57  ;;  %1887 = vperm.xlu1 %17700, %v20625_v11  }
 0x1e8   : > { %v20717_v53 = vpop.permute.xlu0 %1020  ;;  %v1448_v33 = vadd.f32 %v1416_v22, %v1155_v15  ;;  %v20748_v22 = vld [vmem:[%s23427_s1 + $0x5] ss:$0 sm:$0xff] }
 0x1e9   : > { %23750 = vst [vmem:[#allocation37_spill] sm:$0xff] %v20717_v53  ;;  %2463 = vperm.xlu0 %17699, %v20617_v52   ;;  %v1124_v52 = vmul.f32 %v20687_v59, %v23751_v6  ;;  %v2263_v15 = vmul.f32 %v20748_v22, %v20550_v26  ;;  %v863_v6 = vmul.f32 %v20694_v46, %v23753_v14  ;;  %v20764_v26 = vld [vmem:[%s23427_s1 + $0x6] ss:$0 sm:$0xff] }
 0x1ea   : > { %v20715_v49 = vpop.permute.xlu1 %1596  ;;  %v3446_v42 = vld [vmem:[#allocation3 + $0x40] sm:$0xff]  ;;  %v1741_v24 = vadd.f32 %v1709_v44, %v1448_v33  ;;  %v1524_v44 = vsel %vm20574_vm4, %v20699_v12, 0.0  ;;  %v1710_v14 = vmul.f32 %v20722_v9, %v20456_v63  ;;  %v1971_v63 = vmul.f32 %v20736_v28, %v20512_v34 }
 0x1eb   : > { %3007 = vperm.xlu1 %17700, %v2920_v20   ;;  %16847 = vmatmul.mubr.msk.f32.gmra.mrb[6].mxu0 %vm23736_vm8, %v3446_v42  ;;  %v589_v42 = vld [vmem:[%s19856_s24 + $0xd0] sm:$0xff]  ;;  %vm23752_vm8 = vcmask 7168  }
 0x1ec   : > { %v20742_v43 = vpop.permute.xlu0 %2140  ;;  %621 = vst.msk [vmem:[#allocation2 + $0xe8] sm:$0xff] %vm23752_vm8, %v589_v42  ;;  %v2002_v33 = vadd.f32 %v1970_v31, %v1741_v24  ;;  %v1156_v42 = vadd.f32 %v1124_v52, %v863_v6  ;;  %v20779_v24 = vld [vmem:[%s23427_s1 + $0x7] ss:$0 sm:$0xff]  ;;  %vm23755_vm8 = vcmask 64512  }
 0x1ed   : > { %794 = vperm.xlu0 %17699, %v679_v61   ;;  %v2556_v61 = vmul.f32 %v20764_v26, %v20623_v58  ;;  %v2817_v31 = vmul.f32 %v20779_v24, %v2680_v50  ;;  %v20794_v50 = vld [vmem:[%s23427_s1 + $0x8] ss:$0 sm:$0xff]  ;;  %vm23761_vm9 = vmmov %vm23755_vm8 }
 0x1ee   : > { %v2685_v20 = vpop.permute.xlu1 %2684  ;;  %v2295_v57 = vadd.f32 %v2263_v15, %v2002_v33  ;;  %v1449_v58 = vadd.f32 %v1417_v19, %v1156_v42  ;;  %v20787_v15 = vld [vmem:[#allocation2 + $0xb0] sm:$0xff]  ;;  %v2264_v33 = vmul.f32 %v20748_v22, %v20597_v62 }
 0x1ef   : > { %1055 = vperm.xlu1 %17700, %v20727_v35  }
 0x1f0   : > { %v20772_v32 = vpop.permute.xlu0 %1308  ;;  %v2588_v52 = vadd.f32 %v2556_v61, %v2295_v57  ;;  %v1742_v6 = vadd.f32 %v1710_v14, %v1449_v58  ;;  %v2557_v57 = vmul.f32 %v20764_v26, %v20646_v4  ;;  %v2818_v14 = vmul.f32 %v20779_v24, %v2685_v20 }
 0x1f1   : > { %23754 = vst [vmem:[#allocation43_spill] sm:$0xff] %v20772_v32  ;;  %1631 = vperm.xlu0 %17699, %v1524_v44   ;;  %v417_v58 = vadd.s32 168, %v19851_v3 }
 0x1f2   : > { %v20770_v0 = vpop.permute.xlu1 %1852  ;;  %v2849_v55 = vadd.f32 %v2817_v31, %v2588_v52  ;;  %v2003_v34 = vadd.f32 %v1971_v63, %v1742_v6  ;;  %v20806_v31 = vld [vmem:[#allocation4] ss:$0 sm:$0xff] }
 0x1f3   : > { %2175 = vperm.xlu1 %17700, %v20651_v13  }
 0x1f4   : > { %v20785_v32 = vpop.permute.xlu0 %2428  ;;  %v2296_v42 = vadd.f32 %v2264_v33, %v2003_v34  ;;  %v20820_v33 = vld [vmem:[#allocation2 + $0xa9] sm:$0xff] }
 0x1f5   : > { %2719 = vperm.xlu0 %17699, %v20585_v16   ;;  %v2077_v16 = vsel %vm20545_vm11, %v20662_v51, 0.0 }
 0x1f6   : > { %v2973_v53 = vpop.permute.xlu1 %2972  ;;  %v2589_v4 = vadd.f32 %v2557_v57, %v2296_v42  ;;  %v449_v57 = vand.u32 15, %v417_v58 }
 0x1f7   : > { %v3110_v19 = vmul.f32 %v20794_v50, %v2973_v53  ;;  %799 = vperm.xlu1 %17700, %v20774_v30  }
 0x1f8   : > { %v20803_v62 = vpop.permute.xlu0 %1313  ;;  %v2850_v20 = vadd.f32 %v2818_v14, %v2589_v4  ;;  %v23758_v4 = vmov 0 }
 0x1f9   : > { %v3142_v44 = vadd.f32 %v3110_v19, %v2849_v55  ;;  %1060 = vperm.xlu0 %17699, %v20787_v15   ;;  %v590_v19 = vld [vmem:[%s19856_s24 + $0xd8] sm:$0xff] }
 0x1fa   : > { %v20801_v61 = vpop.permute.xlu1 %1857  ;;  %622 = vst.msk [vmem:[#allocation2 + $0xf0] sm:$0xff] %vm23756_vm15, %v590_v19  ;;  %vm20836_vm15 = vcmp.ne.s32.totalorder %v449_v57, 15  ;;  %v1125_v57 = vmul.f32 %v20687_v59, %v20411_v21 }
 0x1fb   : > { %v3181_v53 = vadd.f32 %v20806_v31, %v3142_v44  ;;  %1636 = vperm.xlu1 %17700, %v20774_v30   ;;  %v23759_v4 = vsel %vm20836_vm15, 4294967295, %v23758_v4 }
 0x1fc   : > { %v20815_v52 = vpop.permute.xlu0 %2433  ;;  %23760 = vst [vmem:[#allocation39_spill] sm:$0xff] %v23759_v4 }
 0x1fd   : > { %v3213_v55 = vmax.f32 %v3181_v53, 0.0  ;;  %2180 = vperm.xlu0 %17699, %v2077_v16   ;;  %v20831_v53 = vld [vmem:[#allocation2 + $0xb1] sm:$0xff] }
 0x1fe   : > { %v2978_v63 = vpop.permute.xlu1 %2977 }
 0x1ff   : > { %3284 = vst.msk [vmem:[#allocation3 + $0x48] sm:$0xff] %vm23755_vm8, %v3213_v55  ;;  %v3111_v6 = vmul.f32 %v20794_v50, %v2978_v63  ;;  %2724 = vperm.xlu1 %17700, %v20625_v11   ;;  %v2369_v11 = vsel %vm20452_vm6, %v20699_v12, 0.0  ;;  %v418_v55 = vadd.s32 176, %v19851_v3  ;;  %v1234_v12 = vsel %vm20836_vm15, %v20831_v53, 0.0 }
 0x200   : > { %v20826_v42 = vpop.permute.xlu0 %764 }
 0x201   : > { %v3143_v34 = vadd.f32 %v3111_v6, %v2850_v20  ;;  %23757 = vst [vmem:[#allocation42_spill] sm:$0xff] %v20826_v42  ;;  %1348 = vperm.xlu0 %17699, %v20820_v33   ;;  %v450_v6 = vand.u32 15, %v418_v55  ;;  %v23763_v55 = vmov 0  ;;  %v20916_v42 = vld [vmem:[#allocation2 + $0xc0] sm:$0xff] }
 0x202   : > { %v20824_v44 = vpop.permute.xlu1 %1025 }
 0x203   : > { %v3182_v14 = vadd.f32 %v20806_v31, %v3143_v34  ;;  %1892 = vperm.xlu1 %17700, %v20727_v35  }
 0x204   : > { %v20843_v63 = vpop.permute.xlu0 %1601 }
 0x205   : > { %v3214_v16 = vmax.f32 %v3182_v14, 0.0  ;;  %2468 = vperm.xlu0 %17699, %v2369_v11   ;;  %v864_v14 = vmul.f32 %v20694_v46, %v20413_v18  ;;  %v2922_v11 = vsel %vm20423_vm0, %v20662_v51, 0.0  ;;  %v20876_v51 = vld [vmem:[#allocation2 + $0xb8] sm:$0xff]  ;;  %vm23769_vm0 = vcmask 64512  }
 0x206   : > { %v20841_v58 = vpop.permute.xlu1 %2145  ;;  %v3447_v20 = vld [vmem:[#allocation3 + $0x48] sm:$0xff] }
 0x207   : > { %3285 = vst.msk [vmem:[#allocation3 + $0x50] sm:$0xff] %vm23755_vm8, %v3214_v16  ;;  %3012 = vperm.xlu1 %17700, %v20651_v13   ;;  %16849 = vmatprep.mubr.msk.f32.mxu0 %vm23761_vm9, %v3447_v20  ;;  %v20858_v13 = vld [vmem:[#allocation2 + $0xb7] sm:$0xff]  ;;  %v1418_v16 = vmul.f32 %v20707_v1, %v20493_v60  ;;  %vm20865_vm9 = vcmp.ne.s32.totalorder %v450_v6, 0  ;;  %v2267_v2 = vmul.f32 %v20748_v22, %v20841_v58 }
 0x208   : > { %v2690_v34 = vpop.permute.xlu0 %2689  ;;  %v23764_v55 = vsel %vm20865_vm9, 4294967295, %v23763_v55  ;;  %v681_v60 = vsel %vm20865_vm9, %v20858_v13, 0.0 }
 0x209   : > { %1353 = vperm.xlu0 %17699, %v1234_v12   ;;  %23765 = vst [vmem:[#allocation51_spill] sm:$0xff] %v23764_v55  ;;  %v1157_v12 = vadd.f32 %v1125_v57, %v864_v14  ;;  %v1126_v57 = vmul.f32 %v20687_v59, %v20458_v40  ;;  %v1526_v40 = vsel %vm20711_vm3, %v20858_v13, 0.0  ;;  %v2819_v17 = vmul.f32 %v20779_v24, %v2690_v34 }
 0x20a   : > { %v20851_v19 = vpop.permute.xlu1 %769 }
 0x20b   : > { %23762 = vst [vmem:[#allocation50_spill] sm:$0xff] %v20851_v19  ;;  %1897 = vperm.xlu1 %17700, %v20787_v15   ;;  %v1450_v6 = vadd.f32 %v1418_v16, %v1157_v12  ;;  %v2265_v19 = vmul.f32 %v20748_v22, %v20672_v29  ;;  %v23768_v16 = vld [vmem:[#allocation45_spill] sm:$0xff] }
 0x20c   : > { %v20871_v18 = vpop.permute.xlu0 %1030 }
 0x20d   : > { %23766 = vst [vmem:[#allocation52_spill] sm:$0xff] %v20871_v18  ;;  %2473 = vperm.xlu0 %17699, %v20774_v30   ;;  %v1743_v30 = vadd.f32 %v1711_v48, %v1450_v6  ;;  %v2558_v48 = vmul.f32 %v20764_v26, %v20785_v32  ;;  %v1973_v32 = vmul.f32 %v20736_v28, %v20634_v36 }
 0x20e   : > { %v20869_v21 = vpop.permute.xlu1 %1606  ;;  %v3448_v20 = vld [vmem:[#allocation3 + $0x50] sm:$0xff]  ;;  %v2559_v36 = vmul.f32 %v20764_v26, %v20815_v52 }
 0x20f   : > { %3017 = vperm.xlu1 %17700, %v2922_v11   ;;  %16850 = vmatmul.mubr.msk.f32.gmra.mrb[8].mxu0 %vm23755_vm8, %v3448_v20  ;;  %v591_v11 = vld [vmem:[%s19856_s24 + $0xe0] sm:$0xff]  ;;  %vm23767_vm8 = vcmask 7168   ;;  %v865_v20 = vmul.f32 %v20694_v46, %v23768_v16  ;;  %v2004_v12 = vadd.f32 %v1972_v41, %v1743_v30 }
 0x210   : > { %v20886_v8 = vpop.permute.xlu0 %2150  ;;  %623 = vst.msk [vmem:[#allocation2 + $0xf8] sm:$0xff] %vm23767_vm8, %v591_v11  ;;  %v20908_v16 = vld [vmem:[#allocation2 + $0xbf] sm:$0xff] }
 0x211   : > { %804 = vperm.xlu0 %17699, %v681_v60   ;;  %v1158_v29 = vadd.f32 %v1126_v57, %v865_v20  ;;  %v1712_v60 = vmul.f32 %v20722_v9, %v20578_v25  ;;  %v2297_v18 = vadd.f32 %v2265_v19, %v2004_v12  ;;  %v2266_v19 = vmul.f32 %v20748_v22, %v20742_v43 }
 0x212   : > { %v2695_v14 = vpop.permute.xlu1 %2694 }
 0x213   : > { %1065 = vperm.xlu1 %17700, %v20876_v51   ;;  %v1451_v41 = vadd.f32 %v1419_v5, %v1158_v29  ;;  %v2590_v57 = vadd.f32 %v2558_v48, %v2297_v18 }
 0x214   : > { %v20906_v11 = vpop.permute.xlu0 %1318 }
 0x215   : > { %1641 = vperm.xlu0 %17699, %v1526_v40   ;;  %v1744_v30 = vadd.f32 %v1712_v60, %v1451_v41  ;;  %v2851_v12 = vadd.f32 %v2819_v17, %v2590_v57  ;;  %v2820_v60 = vmul.f32 %v20779_v24, %v2695_v14  ;;  %v592_v17 = vld [vmem:[%s19856_s24 + $0xe8] sm:$0xff]  ;;  %v20941_v14 = vld [vmem:[#allocation2 + $0xb9] sm:$0xff] }
 0x216   : > { %v20904_v6 = vpop.permute.xlu1 %1862  ;;  %624 = vst.msk [vmem:[#allocation2 + $0x100] sm:$0xff] %vm23767_vm8, %v592_v17  ;;  %v420_v17 = vadd.s32 192, %v19851_v3  ;;  %vm23773_vm8 = vcmask 64512  }
 0x217   : > { %2185 = vperm.xlu1 %17700, %v20820_v33   ;;  %v2005_v5 = vadd.f32 %v1973_v32, %v1744_v30  ;;  %v419_v32 = vadd.s32 184, %v19851_v3  ;;  %vm23774_vm6 = vmmov %vm23773_vm8 }
 0x218   : > { %v20914_v25 = vpop.permute.xlu0 %2438 }
 0x219   : > { %2729 = vperm.xlu0 %17699, %v20727_v35   ;;  %v2298_v29 = vadd.f32 %v2266_v19, %v2005_v5  ;;  %v2079_v35 = vsel %vm20667_vm13, %v20831_v53, 0.0 }
 0x21a   : > { %v2983_v20 = vpop.permute.xlu1 %2982 }
 0x21b   : > { %v3112_v34 = vmul.f32 %v20794_v50, %v2983_v20  ;;  %809 = vperm.xlu1 %17700, %v20908_v16   ;;  %v2591_v52 = vadd.f32 %v2559_v36, %v2298_v29  ;;  %v20953_v29 = vld [vmem:[#allocation2 + $0xc1] sm:$0xff] }
 0x21c   : > { %v20927_v48 = vpop.permute.xlu0 %1323 }
 0x21d   : > { %v3144_v18 = vadd.f32 %v3112_v34, %v2851_v12  ;;  %1070 = vperm.xlu0 %17699, %v20916_v42   ;;  %v2852_v20 = vadd.f32 %v2820_v60, %v2591_v52  ;;  %v451_v34 = vand.u32 15, %v419_v32  ;;  %v2371_v60 = vsel %vm20574_vm4, %v20858_v13, 0.0 }
 0x21e   : > { %v20925_v40 = vpop.permute.xlu1 %1867  ;;  %v452_v32 = vand.u32 15, %v420_v17 }
 0x21f   : > { %v3183_v43 = vadd.f32 %v20806_v31, %v3144_v18  ;;  %1646 = vperm.xlu1 %17700, %v20908_v16  }
 0x220   : > { %v20939_v30 = vpop.permute.xlu0 %2443 }
 0x221   : > { %v3215_v41 = vmax.f32 %v3183_v43, 0.0  ;;  %2190 = vperm.xlu0 %17699, %v2079_v35   ;;  %v23770_v43 = vmov 0 }
 0x222   : > { %v2988_v57 = vpop.permute.xlu1 %2987 }
 0x223   : > { %3286 = vst.msk [vmem:[#allocation3 + $0x58] sm:$0xff] %vm23769_vm0, %v3215_v41  ;;  %v3113_v19 = vmul.f32 %v20794_v50, %v2988_v57  ;;  %2734 = vperm.xlu1 %17700, %v20787_v15   ;;  %vm20958_vm0 = vcmp.ne.s32.totalorder %v451_v34, 15  ;;  %v2924_v34 = vsel %vm20545_vm11, %v20831_v53, 0.0  ;;  %v20998_v53 = vld [vmem:[#allocation2 + $0xc8] sm:$0xff]  ;;  %vm23783_vm11 = vcmask 64512  }
 0x224   : > { %v20948_v36 = vpop.permute.xlu0 %774  ;;  %v23771_v43 = vsel %vm20958_vm0, 4294967295, %v23770_v43  ;;  %v1236_v13 = vsel %vm20958_vm0, %v20953_v29, 0.0 }
 0x225   : > { %v3145_v12 = vadd.f32 %v3113_v19, %v2852_v20  ;;  %1358 = vperm.xlu0 %17699, %v20941_v14   ;;  %23772 = vst [vmem:[#allocation45_spill] sm:$0xff] %v23771_v43  ;;  %v1127_v19 = vmul.f32 %v20687_v59, %v20533_v10 }
 0x226   : > { %v20946_v5 = vpop.permute.xlu1 %1035 }
 0x227   : > { %v3184_v18 = vadd.f32 %v20806_v31, %v3145_v12  ;;  %1902 = vperm.xlu1 %17700, %v20876_v51   ;;  %v866_v12 = vmul.f32 %v20694_v46, %v20535_v45 }
 0x228   : > { %v20965_v52 = vpop.permute.xlu0 %1611 }
 0x229   : > { %v3216_v15 = vmax.f32 %v3184_v18, 0.0  ;;  %2478 = vperm.xlu0 %17699, %v2371_v60   ;;  %v1420_v18 = vmul.f32 %v20707_v1, %v20615_v47  ;;  %v23775_v60 = vmov 0  ;;  %v1159_v17 = vadd.f32 %v1127_v19, %v866_v12 }
 0x22a   : > { %v20963_v35 = vpop.permute.xlu1 %2155  ;;  %v3449_v41 = vld [vmem:[#allocation3 + $0x58] sm:$0xff]  ;;  %v1128_v19 = vmul.f32 %v20687_v59, %v20580_v27 }
 0x22b   : > { %3287 = vst.msk [vmem:[#allocation3 + $0x60] sm:$0xff] %vm23773_vm8, %v3216_v15  ;;  %3022 = vperm.xlu1 %17700, %v20820_v33   ;;  %16852 = vmatprep.mubr.msk.f32.mxu0 %vm23774_vm6, %v3449_v41  ;;  %v20980_v33 = vld [vmem:[#allocation2 + $0xc7] sm:$0xff]  ;;  %vm20987_vm6 = vcmp.ne.s32.totalorder %v452_v32, 0  ;;  %v1713_v41 = vmul.f32 %v20722_v9, %v20674_v23  ;;  %v1974_v32 = vmul.f32 %v20736_v28, %v20770_v0 }
 0x22c   : > { %v2700_v20 = vpop.permute.xlu0 %2699  ;;  %v23776_v60 = vsel %vm20987_vm6, 4294967295, %v23775_v60  ;;  %v683_v47 = vsel %vm20987_vm6, %v20980_v33, 0.0  ;;  %v1421_v0 = vmul.f32 %v20707_v1, %v20636_v37  ;;  %v1528_v27 = vsel %vm20865_vm9, %v20980_v33, 0.0  ;;  %v21032_v37 = vld [vmem:[#allocation2 + $0xcf] sm:$0xff] }
 0x22d   : > { %1363 = vperm.xlu0 %17699, %v1236_v13   ;;  %23777 = vst [vmem:[#allocation53_spill] sm:$0xff] %v23776_v60  ;;  %v1452_v13 = vadd.f32 %v1420_v18, %v1159_v17  ;;  %v867_v18 = vmul.f32 %v20694_v46, %v20560_v56  ;;  %v1714_v17 = vmul.f32 %v20722_v9, %v20715_v49 }
 0x22e   : > { %v20973_v57 = vpop.permute.xlu1 %779  ;;  %v2821_v46 = vmul.f32 %v20779_v24, %v2700_v20 }
 0x22f   : > { %1907 = vperm.xlu1 %17700, %v20916_v42   ;;  %v1160_v58 = vadd.f32 %v1128_v19, %v867_v18  ;;  %v21038_v19 = vld [vmem:[#allocation2 + $0xd0] sm:$0xff] }
 0x230   : > { %v20993_v45 = vpop.permute.xlu0 %1040 }
 0x231   : > { %2483 = vperm.xlu0 %17699, %v20908_v16   ;;  %v1745_v16 = vadd.f32 %v1713_v41, %v1452_v13  ;;  %v1453_v1 = vadd.f32 %v1421_v0, %v1160_v58 }
 0x232   : > { %v20991_v10 = vpop.permute.xlu1 %1616  ;;  %v3450_v15 = vld [vmem:[#allocation3 + $0x60] sm:$0xff] }
 0x233   : > { %3027 = vperm.xlu1 %17700, %v2924_v34   ;;  %16853 = vmatmul.mubr.msk.f32.gmra.mrb[10].mxu0 %vm23773_vm8, %v3450_v15  ;;  %v593_v34 = vld [vmem:[%s19856_s24 + $0xf0] sm:$0xff]  ;;  %vm23778_vm8 = vcmask 7168   ;;  %v2006_v59 = vadd.f32 %v1974_v32, %v1745_v16  ;;  %v2560_v15 = vmul.f32 %v20764_v26, %v20914_v25  ;;  %v1975_v25 = vmul.f32 %v20736_v28, %v20801_v61  ;;  %v594_v16 = vld [vmem:[%s19856_s24 + $0xf8] sm:$0xff]  ;;  %s15008_s24 = scalar_lea.sflag [#allocation6], %s388_s26 }
 0x234   : > { %v21008_v23 = vpop.permute.xlu0 %2160  ;;  %625 = vst.msk [vmem:[#allocation2 + $0x108] sm:$0xff] %vm23778_vm8, %v593_v34  ;;  %v1746_v32 = vadd.f32 %v1714_v17, %v1453_v1  ;;  %626 = vst.msk [vmem:[#allocation2 + $0x110] sm:$0xff] %vm23778_vm8, %v594_v16  ;;  %v2561_v61 = vmul.f32 %v20764_v26, %v20939_v30  ;;  %v421_v30 = vadd.s32 200, %v19851_v3  ;;  %vm23779_vm8 = vcmask 64512  }
 0x235   : > { %814 = vperm.xlu0 %17699, %v683_v47   ;;  %v2299_v56 = vadd.f32 %v2267_v2, %v2006_v59  ;;  %v2268_v2 = vmul.f32 %v20748_v22, %v20886_v8 }
 0x236   : > { %v2705_v12 = vpop.permute.xlu1 %2704  ;;  %v2007_v28 = vadd.f32 %v1975_v25, %v1746_v32  ;;  %v453_v1 = vand.u32 15, %v421_v30  ;;  %v21118_v30 = vld [vmem:[%s23427_s1 + $0x2] ss:$0 sm:$0xff] }
 0x237   : > { %1075 = vperm.xlu1 %17700, %v20998_v53   ;;  %v2592_v13 = vadd.f32 %v2560_v15, %v2299_v56  ;;  %v2822_v8 = vmul.f32 %v20779_v24, %v2705_v12  ;;  %v21066_v12 = vld [vmem:[#allocation2 + $0xc9] sm:$0xff] }
 0x238   : > { %v21028_v47 = vpop.permute.xlu0 %1328  ;;  %v2300_v22 = vadd.f32 %v2268_v2, %v2007_v28  ;;  %v21082_v2 = vld [vmem:[#allocation2 + $0xd1] sm:$0xff] }
 0x239   : > { %1651 = vperm.xlu0 %17699, %v1528_v27   ;;  %v2853_v20 = vadd.f32 %v2821_v46, %v2592_v13 }
 0x23a   : > { %v21026_v41 = vpop.permute.xlu1 %1872  ;;  %v2593_v15 = vadd.f32 %v2561_v61, %v2300_v22 }
 0x23b   : > { %2195 = vperm.xlu1 %17700, %v20941_v14  }
 0x23c   : > { %v21036_v9 = vpop.permute.xlu0 %2448  ;;  %v2854_v56 = vadd.f32 %v2822_v8, %v2593_v15  ;;  %v21100_v8 = vld [vmem:[%s23427_s1 + $0x1] ss:$0 sm:$0xff] }
 0x23d   : > { %2739 = vperm.xlu0 %17699, %v20876_v51   ;;  %v2081_v51 = vsel %vm20836_vm15, %v20953_v29, 0.0 }
 0x23e   : > { %v2993_v49 = vpop.permute.xlu1 %2992 }
 0x23f   : > { %v3114_v34 = vmul.f32 %v20794_v50, %v2993_v49  ;;  %819 = vperm.xlu1 %17700, %v21032_v37   ;;  %v23780_v49 = vmov 0 }
 0x240   : > { %v21051_v27 = vpop.permute.xlu0 %1333 }
 0x241   : > { %v3146_v18 = vadd.f32 %v3114_v34, %v2853_v20  ;;  %1080 = vperm.xlu0 %17699, %v21038_v19   ;;  %v422_v20 = vadd.s32 208, %v19851_v3 }
 0x242   : > { %v21049_v0 = vpop.permute.xlu1 %1877 }
 0x243   : > { %v3185_v59 = vadd.f32 %v20806_v31, %v3146_v18  ;;  %1656 = vperm.xlu1 %17700, %v21032_v37   ;;  %v454_v61 = vand.u32 15, %v422_v20  ;;  %v21141_v20 = vld [vmem:[#allocation2 + $0xd8] sm:$0xff] }
 0x244   : > { %v21061_v17 = vpop.permute.xlu0 %2453 }
 0x245   : > { %v3217_v26 = vmax.f32 %v3185_v59, 0.0  ;;  %2200 = vperm.xlu0 %17699, %v2081_v51   ;;  %v1129_v59 = vmul.f32 %v21100_v8, %v20655_v39  ;;  %v23786_v51 = vld [vmem:[#allocation35_spill] sm:$0xff] }
 0x246   : > { %v2998_v58 = vpop.permute.xlu1 %2997  ;;  %v23787_v39 = vld [vmem:[#allocation43_spill] sm:$0xff] }
 0x247   : > { %3288 = vst.msk [vmem:[#allocation3 + $0x68] sm:$0xff] %vm23779_vm8, %v3217_v26  ;;  %v3115_v24 = vmul.f32 %v20794_v50, %v2998_v58  ;;  %2744 = vperm.xlu1 %17700, %v20916_v42   ;;  %v2373_v50 = vsel %vm20711_vm3, %v20980_v33, 0.0  ;;  %vm21078_vm8 = vcmp.ne.s32.totalorder %v453_v1, 15  ;;  %vm23784_vm3 = vmmov %vm23783_vm11  ;;  %v2926_v26 = vsel %vm20667_vm13, %v20953_v29, 0.0 }
 0x248   : > { %v21070_v13 = vpop.permute.xlu0 %784  ;;  %v23781_v49 = vsel %vm21078_vm8, 4294967295, %v23780_v49  ;;  %v1238_v33 = vsel %vm21078_vm8, %v21082_v2, 0.0  ;;  %v1422_v58 = vmul.f32 %v21118_v30, %v23787_v39  ;;  %v21160_v39 = vld [vmem:[%s23427_s1 + $0x5] ss:$0 sm:$0xff]  ;;  %vm23799_vm13 = vcmask 64512  }
 0x249   : > { %v3147_v46 = vadd.f32 %v3115_v24, %v2854_v56  ;;  %1368 = vperm.xlu0 %17699, %v21066_v12   ;;  %23782 = vst [vmem:[#allocation54_spill] sm:$0xff] %v23781_v49  ;;  %v23788_v56 = vmov 0  ;;  %v21126_v24 = vld [vmem:[#allocation2 + $0xd7] sm:$0xff] }
 0x24a   : > { %v21068_v25 = vpop.permute.xlu1 %1045 }
 0x24b   : > { %v3186_v32 = vadd.f32 %v20806_v31, %v3147_v46  ;;  %1912 = vperm.xlu1 %17700, %v20998_v53  }
 0x24c   : > { %v21087_v16 = vpop.permute.xlu0 %1621 }
 0x24d   : > { %v3218_v42 = vmax.f32 %v3186_v32, 0.0  ;;  %2488 = vperm.xlu0 %17699, %v2373_v50   ;;  %v21135_v50 = vld [vmem:[%s23427_s1 + $0x3] ss:$0 sm:$0xff] }
 0x24e   : > { %v21085_v34 = vpop.permute.xlu1 %2165  ;;  %v3451_v28 = vld [vmem:[#allocation3 + $0x68] sm:$0xff] }
 0x24f   : > { %3289 = vst.msk [vmem:[#allocation3 + $0x70] sm:$0xff] %vm23783_vm11, %v3218_v42  ;;  %3032 = vperm.xlu1 %17700, %v20941_v14   ;;  %16855 = vmatprep.mubr.msk.f32.mxu0 %vm23784_vm3, %v3451_v28  ;;  %v21107_v14 = vld [vmem:[%s23427_s1] ss:$0 sm:$0xff]  ;;  %vm21122_vm11 = vcmp.ne.s32.totalorder %v454_v61, 0  ;;  %v1715_v42 = vmul.f32 %v21135_v50, %v20843_v63  ;;  %v21149_v61 = vld [vmem:[%s23427_s1 + $0x4] ss:$0 sm:$0xff] }
 0x250   : > { %v2710_v22 = vpop.permute.xlu0 %2709  ;;  %v868_v15 = vmul.f32 %v21107_v14, %v23786_v51  ;;  %v23789_v56 = vsel %vm21122_vm11, 4294967295, %v23788_v56  ;;  %v685_v28 = vsel %vm21122_vm11, %v21126_v24, 0.0  ;;  %v1976_v63 = vmul.f32 %v21149_v61, %v20904_v6 }
 0x251   : > { %1373 = vperm.xlu0 %17699, %v1238_v33   ;;  %23790 = vst [vmem:[#allocation35_spill] sm:$0xff] %v23789_v56  ;;  %v1978_v4 = vmul.f32 %v21149_v61, %v21026_v41 }
 0x252   : > { %v21095_v18 = vpop.permute.xlu1 %789  ;;  %v1161_v29 = vadd.f32 %v1129_v59, %v868_v15  ;;  %v23792_v59 = vld [vmem:[#allocation37_spill] sm:$0xff] }
 0x253   : > { %23785 = vst [vmem:[#allocation55_spill] sm:$0xff] %v21095_v18  ;;  %1917 = vperm.xlu1 %17700, %v21038_v19  }
 0x254   : > { %v21130_v1 = vpop.permute.xlu0 %1050  ;;  %v1454_v33 = vadd.f32 %v1422_v58, %v1161_v29  ;;  %v2269_v58 = vmul.f32 %v21160_v39, %v20963_v35  ;;  %v1423_v29 = vmul.f32 %v21118_v30, %v20803_v62 }
 0x255   : > { %23791 = vst [vmem:[#allocation43_spill] sm:$0xff] %v21130_v1  ;;  %2493 = vperm.xlu0 %17699, %v21032_v37   ;;  %v1130_v37 = vmul.f32 %v21100_v8, %v23792_v59  ;;  %v21175_v59 = vld [vmem:[%s23427_s1 + $0x6] ss:$0 sm:$0xff] }
 0x256   : > { %v21128_v46 = vpop.permute.xlu1 %1626  ;;  %v3452_v32 = vld [vmem:[#allocation3 + $0x70] sm:$0xff]  ;;  %v2562_v35 = vmul.f32 %v21175_v59, %v21036_v9 }
 0x257   : > { %3037 = vperm.xlu1 %17700, %v2926_v26   ;;  %16856 = vmatmul.mubr.msk.f32.gmra.mrb[12].mxu0 %vm23784_vm3, %v3452_v32  ;;  %v1747_v26 = vadd.f32 %v1715_v42, %v1454_v33  ;;  %v23793_v32 = vld [vmem:[#allocation49_spill] sm:$0xff]  ;;  %v1530_v42 = vsel %vm20987_vm6, %v21126_v24, 0.0 }
 0x258   : > { %v21155_v15 = vpop.permute.xlu0 %2170  ;;  %v869_v6 = vmul.f32 %v21107_v14, %v23793_v32  ;;  %v1716_v32 = vmul.f32 %v21135_v50, %v20869_v21  ;;  %v1977_v21 = vmul.f32 %v21149_v61, %v20925_v40 }
 0x259   : > { %824 = vperm.xlu0 %17699, %v685_v28   ;;  %v2008_v33 = vadd.f32 %v1976_v63, %v1747_v26  ;;  %v21188_v63 = vld [vmem:[%s23427_s1 + $0x7] ss:$0 sm:$0xff] }
 0x25a   : > { %v2715_v51 = vpop.permute.xlu1 %2714  ;;  %v1162_v28 = vadd.f32 %v1130_v37, %v869_v6  ;;  %v2823_v26 = vmul.f32 %v21188_v63, %v2710_v22  ;;  %v21192_v37 = vld [vmem:[#allocation2 + $0xdf] sm:$0xff]  ;;  %v21203_v22 = vld [vmem:[%s23427_s1 + $0x8] ss:$0 sm:$0xff] }
 0x25b   : > { %1085 = vperm.xlu1 %17700, %v21141_v20   ;;  %v2301_v38 = vadd.f32 %v2269_v58, %v2008_v33  ;;  %v2270_v33 = vmul.f32 %v21160_v39, %v21008_v23  ;;  %v23819_v56 = vld [vmem:[#allocation55_spill] sm:$0xff] }
 0x25c   : > { %v21183_v62 = vpop.permute.xlu0 %1338  ;;  %v1455_v9 = vadd.f32 %v1423_v29, %v1162_v28  ;;  %v875_v60 = vmul.f32 %v21107_v14, %v23819_v56 }
 0x25d   : > { %1661 = vperm.xlu0 %17699, %v1530_v42   ;;  %v2594_v6 = vadd.f32 %v2562_v35, %v2301_v38  ;;  %v21208_v38 = vld [vmem:[#allocation2 + $0xe0] sm:$0xff]  ;;  %v2563_v42 = vmul.f32 %v21175_v59, %v21061_v17 }
 0x25e   : > { %v21181_v54 = vpop.permute.xlu1 %1882  ;;  %v1748_v7 = vadd.f32 %v1716_v32, %v1455_v9 }
 0x25f   : > { %2205 = vperm.xlu1 %17700, %v21066_v12   ;;  %v2855_v1 = vadd.f32 %v2823_v26, %v2594_v6  ;;  %v2824_v26 = vmul.f32 %v21188_v63, %v2715_v51  ;;  %v21229_v51 = vld [vmem:[#allocation2 + $0xd9] sm:$0xff] }
 0x260   : > { %v21196_v58 = vpop.permute.xlu0 %2458  ;;  %v2009_v40 = vadd.f32 %v1977_v21, %v1748_v7  ;;  %v2083_v7 = vsel %vm20958_vm0, %v21082_v2, 0.0 }
 0x261   : > { %2749 = vperm.xlu0 %17699, %v20998_v53  }
 0x262   : > { %v3003_v18 = vpop.permute.xlu1 %3002  ;;  %v2302_v32 = vadd.f32 %v2270_v33, %v2009_v40 }
 0x263   : > { %v3116_v29 = vmul.f32 %v21203_v22, %v3003_v18  ;;  %829 = vperm.xlu1 %17700, %v21192_v37  }
 0x264   : > { %v21214_v28 = vpop.permute.xlu0 %1343  ;;  %v2595_v53 = vadd.f32 %v2563_v42, %v2302_v32 }
 0x265   : > { %v3148_v35 = vadd.f32 %v3116_v29, %v2855_v1  ;;  %1090 = vperm.xlu0 %17699, %v21208_v38   ;;  %v423_v1 = vadd.s32 216, %v19851_v3 }
 0x266   : > { %v21212_v23 = vpop.permute.xlu1 %1887  ;;  %v2856_v6 = vadd.f32 %v2824_v26, %v2595_v53  ;;  %v424_v53 = vadd.s32 224, %v19851_v3 }
 0x267   : > { %v3187_v18 = vadd.f32 %v20806_v31, %v3148_v35  ;;  %1666 = vperm.xlu1 %17700, %v21192_v37   ;;  %v455_v29 = vand.u32 15, %v423_v1  ;;  %v21235_v35 = vld [vmem:[#allocation4] ss:$0 sm:$0xff] }
 0x268   : > { %v21224_v21 = vpop.permute.xlu0 %2463 }
 0x269   : > { %v3219_v17 = vmax.f32 %v3187_v18, 0.0  ;;  %2210 = vperm.xlu0 %17699, %v2083_v7   ;;  %v23796_v18 = vmov 0  ;;  %v21247_v7 = vld [vmem:[#allocation2 + $0xe1] sm:$0xff] }
 0x26a   : > { %v3008_v9 = vpop.permute.xlu1 %3007 }
 0x26b   : > { %3290 = vst.msk [vmem:[#allocation3 + $0x78] sm:$0xff] %vm23784_vm3, %v3219_v17  ;;  %v3117_v31 = vmul.f32 %v21203_v22, %v3008_v9  ;;  %2754 = vperm.xlu1 %17700, %v21038_v19   ;;  %v2375_v19 = vsel %vm20865_vm9, %v21126_v24, 0.0  ;;  %vm21243_vm3 = vcmp.ne.s32.totalorder %v455_v29, 15  ;;  %vm23800_vm9 = vmmov %vm23799_vm13  ;;  %v1131_v29 = vmul.f32 %v21100_v8, %v20824_v44 }
 0x26c   : > { %v21233_v42 = vpop.permute.xlu0 %794  ;;  %v23797_v18 = vsel %vm21243_vm3, 4294967295, %v23796_v18  ;;  %v1240_v24 = vsel %vm21243_vm3, %v21247_v7, 0.0 }
 0x26d   : > { %v3149_v33 = vadd.f32 %v3117_v31, %v2856_v6  ;;  %23795 = vst [vmem:[#allocation49_spill] sm:$0xff] %v21233_v42  ;;  %1378 = vperm.xlu0 %17699, %v21229_v51   ;;  %23798 = vst [vmem:[#allocation56_spill] sm:$0xff] %v23797_v18  ;;  %v456_v6 = vand.u32 15, %v424_v53  ;;  %v21276_v53 = vld [vmem:[#allocation2 + $0xe7] sm:$0xff] }
 0x26e   : > { %v21231_v40 = vpop.permute.xlu1 %1055  ;;  %v1532_v41 = vsel %vm21122_vm11, %v21276_v53, 0.0 }
 0x26f   : > { %23794 = vst [vmem:[#allocation37_spill] sm:$0xff] %v21231_v40  ;;  %v3188_v32 = vadd.f32 %v21235_v35, %v3149_v33  ;;  %1922 = vperm.xlu1 %17700, %v21141_v20  }
 0x270   : > { %v21252_v1 = vpop.permute.xlu0 %1631 }
 0x271   : > { %v3220_v26 = vmax.f32 %v3188_v32, 0.0  ;;  %2498 = vperm.xlu0 %17699, %v2375_v19   ;;  %v23802_v32 = vld [vmem:[#allocation42_spill] sm:$0xff]  ;;  %v1424_v19 = vmul.f32 %v21118_v30, %v20906_v11  ;;  %v21286_v11 = vld [vmem:[#allocation2 + $0xe8] sm:$0xff] }
 0x272   : > { %v21250_v17 = vpop.permute.xlu1 %2175  ;;  %v3453_v9 = vld [vmem:[#allocation3 + $0x78] sm:$0xff]  ;;  %v870_v55 = vmul.f32 %v21107_v14, %v23802_v32 }
 0x273   : > { %3291 = vst.msk [vmem:[#allocation3 + $0x80] sm:$0xff] %vm23799_vm13, %v3220_v26  ;;  %3042 = vperm.xlu1 %17700, %v21066_v12   ;;  %16858 = vmatprep.mubr.msk.f32.mxu0 %vm23800_vm9, %v3453_v9  ;;  %v2928_v12 = vsel %vm20836_vm15, %v21082_v2, 0.0  ;;  %vm21272_vm13 = vcmp.ne.s32.totalorder %v456_v6, 0  ;;  %v23803_v26 = vmov 0  ;;  %vm23813_vm15 = vcmask 64512  }
 0x274   : > { %v2720_v33 = vpop.permute.xlu0 %2719  ;;  %v23804_v26 = vsel %vm21272_vm13, 4294967295, %v23803_v26  ;;  %v687_v2 = vsel %vm21272_vm13, %v21276_v53, 0.0  ;;  %vm23814_vm4 = vmmov %vm23813_vm15 }
 0x275   : > { %1383 = vperm.xlu0 %17699, %v1240_v24   ;;  %23805 = vst [vmem:[#allocation42_spill] sm:$0xff] %v23804_v26  ;;  %v1717_v24 = vmul.f32 %v21135_v50, %v20965_v52  ;;  %v2825_v40 = vmul.f32 %v21188_v63, %v2720_v33 }
 0x276   : > { %v21260_v31 = vpop.permute.xlu1 %799 }
 0x277   : > { %23801 = vst [vmem:[#allocation57_spill] sm:$0xff] %v21260_v31  ;;  %1927 = vperm.xlu1 %17700, %v21208_v38   ;;  %v1163_v31 = vadd.f32 %v1131_v29, %v870_v55 }
 0x278   : > { %v21280_v9 = vpop.permute.xlu0 %1060 }
 0x279   : > { %23807 = vst [vmem:[#allocation59_spill] sm:$0xff] %v21280_v9  ;;  %2503 = vperm.xlu0 %17699, %v21192_v37   ;;  %v1456_v6 = vadd.f32 %v1424_v19, %v1163_v31  ;;  %v23808_v9 = vld [vmem:[#allocation52_spill] sm:$0xff]  ;;  %v2271_v37 = vmul.f32 %v21160_v39, %v21085_v34  ;;  %v1425_v31 = vmul.f32 %v21118_v30, %v20927_v48 }
 0x27a   : > { %v21278_v44 = vpop.permute.xlu1 %1636  ;;  %v3454_v32 = vld [vmem:[#allocation3 + $0x80] sm:$0xff]  ;;  %v1132_v55 = vmul.f32 %v21100_v8, %v23808_v9  ;;  %v2564_v9 = vmul.f32 %v21175_v59, %v21196_v58  ;;  %v1718_v34 = vmul.f32 %v21135_v50, %v20991_v10 }
 0x27b   : > { %23806 = vst [vmem:[#allocation58_spill] sm:$0xff] %v21278_v44  ;;  %3047 = vperm.xlu1 %17700, %v2928_v12   ;;  %16859 = vmatmul.mubr.msk.f32.gmra.mrb[14].mxu0 %vm23800_vm9, %v3454_v32  ;;  %v1749_v12 = vadd.f32 %v1717_v24, %v1456_v6  ;;  %v23809_v32 = vld [vmem:[#allocation50_spill] sm:$0xff] }
 0x27c   : > { %v21295_v52 = vpop.permute.xlu0 %2180  ;;  %v871_v42 = vmul.f32 %v21107_v14, %v23809_v32  ;;  %v21317_v44 = vld [vmem:[#allocation2 + $0xef] sm:$0xff] }
 0x27d   : > { %834 = vperm.xlu0 %17699, %v687_v2   ;;  %v2010_v19 = vadd.f32 %v1978_v4, %v1749_v12  ;;  %v1979_v4 = vmul.f32 %v21149_v61, %v21049_v0  ;;  %v2272_v12 = vmul.f32 %v21160_v39, %v21155_v15  ;;  %v2565_v0 = vmul.f32 %v21175_v59, %v21224_v21 }
 0x27e   : > { %v2725_v29 = vpop.permute.xlu1 %2724  ;;  %v1164_v24 = vadd.f32 %v1132_v55, %v871_v42 }
 0x27f   : > { %1095 = vperm.xlu1 %17700, %v21286_v11   ;;  %v2303_v32 = vadd.f32 %v2271_v37, %v2010_v19  ;;  %v2826_v15 = vmul.f32 %v21188_v63, %v2725_v29 }
 0x280   : > { %v21313_v2 = vpop.permute.xlu0 %1348  ;;  %v1457_v48 = vadd.f32 %v1425_v31, %v1164_v24  ;;  %v21328_v31 = vld [vmem:[#allocation2 + $0xf0] sm:$0xff] }
 0x281   : > { %1671 = vperm.xlu0 %17699, %v1532_v41   ;;  %v2596_v58 = vadd.f32 %v2564_v9, %v2303_v32 }
 0x282   : > { %v21311_v6 = vpop.permute.xlu1 %1892  ;;  %v1750_v42 = vadd.f32 %v1718_v34, %v1457_v48  ;;  %v425_v48 = vadd.s32 232, %v19851_v3 }
 0x283   : > { %2215 = vperm.xlu1 %17700, %v21229_v51   ;;  %v2857_v37 = vadd.f32 %v2825_v40, %v2596_v58 }
 0x284   : > { %v21321_v10 = vpop.permute.xlu0 %2468  ;;  %v2011_v41 = vadd.f32 %v1979_v4, %v1750_v42 }
 0x285   : > { %2759 = vperm.xlu0 %17699, %v21141_v20   ;;  %v2085_v20 = vsel %vm21078_vm8, %v21247_v7, 0.0 }
 0x286   : > { %v3013_v55 = vpop.permute.xlu1 %3012  ;;  %v2304_v34 = vadd.f32 %v2272_v12, %v2011_v41 }
 0x287   : > { %v3118_v33 = vmul.f32 %v21203_v22, %v3013_v55  ;;  %839 = vperm.xlu1 %17700, %v21317_v44   ;;  %v21349_v55 = vld [vmem:[#allocation2 + $0xe9] sm:$0xff] }
 0x288   : > { %v21334_v24 = vpop.permute.xlu0 %1353  ;;  %v2597_v32 = vadd.f32 %v2565_v0, %v2304_v34  ;;  %v23810_v34 = vmov 0 }
 0x289   : > { %v3150_v19 = vadd.f32 %v3118_v33, %v2857_v37  ;;  %1100 = vperm.xlu0 %17699, %v21328_v31   ;;  %v457_v37 = vand.u32 15, %v425_v48 }
 0x28a   : > { %v21332_v9 = vpop.permute.xlu1 %1897  ;;  %v2858_v42 = vadd.f32 %v2826_v15, %v2597_v32  ;;  %v21365_v15 = vld [vmem:[#allocation2 + $0xf1] sm:$0xff] }
 0x28b   : > { %v3189_v40 = vadd.f32 %v21235_v35, %v3150_v19  ;;  %1676 = vperm.xlu1 %17700, %v21317_v44   ;;  %v2377_v19 = vsel %vm20987_vm6, %v21276_v53, 0.0 }
 0x28c   : > { %v21344_v58 = vpop.permute.xlu0 %2473 }
 0x28d   : > { %v3221_v21 = vmax.f32 %v3189_v40, 0.0  ;;  %2220 = vperm.xlu0 %17699, %v2085_v20  }
 0x28e   : > { %v3018_v4 = vpop.permute.xlu1 %3017 }
 0x28f   : > { %3292 = vst.msk [vmem:[#allocation3 + $0x88] sm:$0xff] %vm23800_vm9, %v3221_v21  ;;  %v3119_v29 = vmul.f32 %v21203_v22, %v3018_v4  ;;  %2764 = vperm.xlu1 %17700, %v21208_v38   ;;  %vm21361_vm9 = vcmp.ne.s32.totalorder %v457_v37, 15  ;;  %v1133_v4 = vmul.f32 %v21100_v8, %v20946_v5 }
 0x290   : > { %v21353_v41 = vpop.permute.xlu0 %804  ;;  %v23811_v34 = vsel %vm21361_vm9, 4294967295, %v23810_v34  ;;  %v1242_v53 = vsel %vm21361_vm9, %v21365_v15, 0.0 }
 0x291   : > { %v3151_v12 = vadd.f32 %v3119_v29, %v2858_v42  ;;  %1388 = vperm.xlu0 %17699, %v21349_v55   ;;  %23812 = vst [vmem:[#allocation52_spill] sm:$0xff] %v23811_v34  ;;  %v872_v42 = vmul.f32 %v21107_v14, %v20948_v36  ;;  %v1426_v29 = vmul.f32 %v21118_v30, %v21028_v47 }
 0x292   : > { %v21351_v33 = vpop.permute.xlu1 %1065  ;;  %v1719_v36 = vmul.f32 %v21135_v50, %v21087_v16 }
 0x293   : > { %v3190_v0 = vadd.f32 %v21235_v35, %v3151_v12  ;;  %1932 = vperm.xlu1 %17700, %v21286_v11   ;;  %v21389_v12 = vld [vmem:[#allocation2 + $0xf7] sm:$0xff] }
 0x294   : > { %v21369_v20 = vpop.permute.xlu0 %1641  ;;  %v1534_v47 = vsel %vm21272_vm13, %v21389_v12, 0.0 }
 0x295   : > { %v3222_v38 = vmax.f32 %v3190_v0, 0.0  ;;  %2508 = vperm.xlu0 %17699, %v2377_v19   ;;  %v1165_v19 = vadd.f32 %v1133_v4, %v872_v42  ;;  %v873_v42 = vmul.f32 %v21107_v14, %v20973_v57 }
 0x296   : > { %v21367_v40 = vpop.permute.xlu1 %2185  ;;  %v3455_v32 = vld [vmem:[#allocation3 + $0x88] sm:$0xff] }
 0x297   : > { %3293 = vst.msk [vmem:[#allocation3 + $0x90] sm:$0xff] %vm23813_vm15, %v3222_v38  ;;  %3052 = vperm.xlu1 %17700, %v21229_v51   ;;  %16861 = vmatprep.mubr.msk.f32.mxu0 %vm23814_vm4, %v3455_v32  ;;  %v2930_v51 = vsel %vm20958_vm0, %v21247_v7, 0.0  ;;  %v1458_v7 = vadd.f32 %v1426_v29, %v1165_v19  ;;  %v1980_v38 = vmul.f32 %v21149_v61, %v21181_v54  ;;  %v21415_v54 = vld [vmem:[#allocation2 + $0xff] sm:$0xff]  ;;  %vm23815_vm15 = vmmov %vm23814_vm4 }
 0x298   : > { %v2730_v48 = vpop.permute.xlu0 %2729  ;;  %v1134_v32 = vmul.f32 %v21100_v8, %v20993_v45  ;;  %v2566_v45 = vmul.f32 %v21175_v59, %v21321_v10  ;;  %v1720_v19 = vmul.f32 %v21135_v50, %v21128_v46  ;;  %v2087_v46 = vsel %vm21243_vm3, %v21365_v15, 0.0 }
 0x299   : > { %1393 = vperm.xlu0 %17699, %v1242_v53   ;;  %v1751_v16 = vadd.f32 %v1719_v36, %v1458_v7  ;;  %v2827_v57 = vmul.f32 %v21188_v63, %v2730_v48  ;;  %v1981_v7 = vmul.f32 %v21149_v61, %v21212_v23  ;;  %v21445_v23 = vld [vmem:[#allocation2 + $0xf8] sm:$0xff] }
 0x29a   : > { %v21377_v21 = vpop.permute.xlu1 %809 }
 0x29b   : > { %1937 = vperm.xlu1 %17700, %v21328_v31   ;;  %v2012_v29 = vadd.f32 %v1980_v38, %v1751_v16 }
 0x29c   : > { %v21393_v0 = vpop.permute.xlu0 %1070 }
 0x29d   : > { %2513 = vperm.xlu0 %17699, %v21317_v44   ;;  %v2273_v44 = vmul.f32 %v21160_v39, %v21250_v17 }
 0x29e   : > { %v21391_v37 = vpop.permute.xlu1 %1646  ;;  %v3456_v5 = vld [vmem:[#allocation3 + $0x90] sm:$0xff] }
 0x29f   : > { %3057 = vperm.xlu1 %17700, %v2930_v51   ;;  %16862 = vmatmul.mubr.msk.f32.gmra.mrb[16].mxu0 %vm23814_vm4, %v3456_v5  ;;  %v1427_v51 = vmul.f32 %v21118_v30, %v21051_v27  ;;  %v1166_v5 = vadd.f32 %v1134_v32, %v873_v42  ;;  %v3438_v27 = vld [vmem:[%s23429_s3] sm:$0xff] }
 0x2a0   : > { %v21406_v4 = vpop.permute.xlu0 %2190  ;;  %16885 = vmatprep.subr.mxu0 %v3438_v27 }
 0x2a1   : > { %1681 = vperm.xlu0 %17699, %v1534_v47   ;;  %v2305_v47 = vadd.f32 %v2273_v44, %v2012_v29  ;;  %v1459_v10 = vadd.f32 %v1427_v51, %v1166_v5  ;;  %16886 = vmatpush3.msra.mxu0 %v3438_v27  ;;  %v2379_v51 = vsel %vm21122_vm11, %v21389_v12, 0.0  ;;  %v21456_v27 = vld [vmem:[#allocation2 + $0x100] sm:$0xff] }
 0x2a2   : > { %v2735_v53 = vpop.permute.xlu1 %2734 }
 0x2a3   : > { %2225 = vperm.xlu1 %17700, %v21349_v55   ;;  %v2598_v38 = vadd.f32 %v2566_v45, %v2305_v47  ;;  %v1752_v48 = vadd.f32 %v1720_v19, %v1459_v10  ;;  %v2567_v45 = vmul.f32 %v21175_v59, %v21344_v58 }
 0x2a4   : > { %v21423_v36 = vpop.permute.xlu0 %1358 }
 0x2a5   : > { %2769 = vperm.xlu0 %17699, %v21286_v11   ;;  %v2274_v11 = vmul.f32 %v21160_v39, %v21295_v52  ;;  %v2859_v44 = vadd.f32 %v2827_v57, %v2598_v38  ;;  %v2013_v29 = vadd.f32 %v1981_v7, %v1752_v48  ;;  %v2828_v57 = vmul.f32 %v21188_v63, %v2735_v53 }
 0x2a6   : > { %v21421_v17 = vpop.permute.xlu1 %1902  ;;  %v2932_v53 = vsel %vm21078_vm8, %v21365_v15, 0.0 }
 0x2a7   : > { %1686 = vperm.xlu1 %17700, %v21415_v54   ;;  %v2306_v47 = vadd.f32 %v2274_v11, %v2013_v29 }
 0x2a8   : > { %v21436_v16 = vpop.permute.xlu0 %2478 }
 0x2a9   : > { %2230 = vperm.xlu0 %17699, %v2087_v46   ;;  %v2599_v10 = vadd.f32 %v2567_v45, %v2306_v47  ;;  %v21471_v45 = vld [vmem:[#allocation2 + $0x101] sm:$0xff]  ;;  %v2568_v56 = vmul.f32 %v21175_v59, %v21436_v16 }
 0x2aa   : > { %v3023_v32 = vpop.permute.xlu1 %3022  ;;  %v2089_v15 = vsel %vm21361_vm9, %v21471_v45, 0.0 }
 0x2ab   : > { %v3120_v42 = vmul.f32 %v21203_v22, %v3023_v32  ;;  %2774 = vperm.xlu1 %17700, %v21328_v31   ;;  %v2860_v58 = vadd.f32 %v2828_v57, %v2599_v10  ;;  %v1135_v57 = vmul.f32 %v21100_v8, %v21068_v25  ;;  %v21486_v10 = vld [vmem:[#allocation2 + $0x107] sm:$0xff]  ;;  %v1721_v25 = vmul.f32 %v21135_v50, %v21252_v1 }
 0x2ac   : > { %v21451_v52 = vpop.permute.xlu0 %1363  ;;  %v1982_v1 = vmul.f32 %v21149_v61, %v21311_v6  ;;  %v2275_v6 = vmul.f32 %v21160_v39, %v21367_v40 }
 0x2ad   : > { %v3152_v5 = vadd.f32 %v3120_v42, %v2859_v44  ;;  %1942 = vperm.xlu0 %17699, %v21445_v23  }
 0x2ae   : > { %v21449_v19 = vpop.permute.xlu1 %1907 }
 0x2af   : > { %v3191_v31 = vadd.f32 %v21235_v35, %v3152_v5  ;;  %2518 = vperm.xlu1 %17700, %v2379_v51   ;;  %v21469_v51 = vld [vmem:[#allocation2 + $0xf9] sm:$0xff] }
 0x2b0   : > { %v21458_v38 = vpop.permute.xlu0 %2483 }
 0x2b1   : > { %v3223_v46 = vmax.f32 %v3191_v31, 0.0  ;;  %3062 = vperm.xlu0 %17699, %v21349_v55   ;;  %v874_v31 = vmul.f32 %v21107_v14, %v21070_v13  ;;  %v1139_v13 = vmul.f32 %v21100_v8, %v21351_v33  ;;  %v1432_v33 = vmul.f32 %v21118_v30, %v21423_v36 }
 0x2b2   : > { %v3028_v7 = vpop.permute.xlu1 %3027 }
 0x2b3   : > { %3294 = vst.msk [vmem:[#allocation3 + $0x98] sm:$0xff] %vm23815_vm15, %v3223_v46  ;;  %v3121_v48 = vmul.f32 %v21203_v22, %v3028_v7  ;;  %1947 = vperm.xlu1 %17700, %v21456_v27   ;;  %vm23816_vm15 = vmmov %vm23814_vm4 }
 0x2b4   : > { %v815_v44 = vpop.permute.xlu0 %814 }
 0x2b5   : > { %v3153_v32 = vadd.f32 %v3121_v48, %v2860_v58  ;;  %2523 = vperm.xlu0 %17699, %v21415_v54   ;;  %v1428_v58 = vmul.f32 %v21118_v30, %v21183_v62  ;;  %v2381_v48 = vsel %vm21272_vm13, %v21486_v10, 0.0 }
 0x2b6   : > { %v1076_v11 = vpop.permute.xlu1 %1075 }
 0x2b7   : > { %v3192_v42 = vadd.f32 %v21235_v35, %v3153_v32  ;;  %3067 = vperm.xlu1 %17700, %v2932_v53   ;;  %v1167_v53 = vadd.f32 %v1135_v57, %v874_v31  ;;  %v878_v32 = vmul.f32 %v21107_v14, %v21353_v41  ;;  %v2934_v41 = vsel %vm21243_vm3, %v21471_v45, 0.0  ;;  %v21511_v57 = vld [vmem:[#allocation2 + $0x10f] sm:$0xff] }
 0x2b8   : > { %v1652_v55 = vpop.permute.xlu0 %1651  ;;  %v426_v31 = vadd.s32 240, %v19851_v3  ;;  %v1141_v36 = vmul.f32 %v21100_v8, %v1076_v11  ;;  %v21532_v11 = vld [vmem:[#allocation2 + $0x108] sm:$0xff] }
 0x2b9   : > { %v3224_v29 = vmax.f32 %v3192_v42, 0.0  ;;  %2235 = vperm.xlu0 %17699, %v21469_v51   ;;  %v1725_v18 = vmul.f32 %v21135_v50, %v1652_v55 }
 0x2ba   : > { %v21473_v5 = vpop.permute.xlu1 %2195  ;;  %v3457_v47 = vld [vmem:[#allocation3 + $0x98] sm:$0xff] }
 0x2bb   : > { %3295 = vst.msk [vmem:[#allocation3 + $0xa0] sm:$0xff] %vm23814_vm4, %v3224_v29  ;;  %2779 = vperm.xlu1 %17700, %v21445_v23   ;;  %16864 = vmatprep.mubr.msk.f32.mxu0 %vm23816_vm15, %v3457_v47  ;;  %v1460_v47 = vadd.f32 %v1428_v58, %v1167_v53  ;;  %v1171_v53 = vadd.f32 %v1139_v13, %v878_v32  ;;  %v21530_v13 = vld [vmem:[#allocation2 + $0x110] sm:$0xff] }
 0x2bc   : > { %v2740_v7 = vpop.permute.xlu0 %2739  ;;  %v23820_v32 = vld [vmem:[#allocation58_spill] sm:$0xff] }
 0x2bd   : > { %2240 = vperm.xlu0 %17699, %v2089_v15   ;;  %v1464_v40 = vadd.f32 %v1432_v33, %v1171_v53  ;;  %v2829_v53 = vmul.f32 %v21188_v63, %v2740_v7  ;;  %v1433_v7 = vmul.f32 %v21118_v30, %v21451_v52 }
 0x2be   : > { %v820_v46 = vpop.permute.xlu1 %819 }
 0x2bf   : > { %2784 = vperm.xlu1 %17700, %v21456_v27   ;;  %v881_v15 = vmul.f32 %v21107_v14, %v820_v46  ;;  %v23817_v46 = vld [vmem:[#allocation43_spill] sm:$0xff]  ;;  %v1757_v33 = vadd.f32 %v1725_v18, %v1464_v40  ;;  %v1983_v18 = vmul.f32 %v21149_v61, %v21332_v9  ;;  %v2276_v9 = vmul.f32 %v21160_v39, %v21406_v4 }
 0x2c0   : > { %v1081_v29 = vpop.permute.xlu0 %1080  ;;  %v1136_v58 = vmul.f32 %v21100_v8, %v23817_v46 }
 0x2c1   : > { %v1142_v49 = vmul.f32 %v21100_v8, %v1081_v29  ;;  %2528 = vperm.xlu0 %17699, %v2381_v48   ;;  %v1753_v48 = vadd.f32 %v1721_v25, %v1460_v47  ;;  %v1722_v47 = vmul.f32 %v21135_v50, %v23820_v32 }
 0x2c2   : > { %v1657_v42 = vpop.permute.xlu1 %1656  ;;  %v3458_v62 = vld [vmem:[#allocation3 + $0xa0] sm:$0xff]  ;;  %v1168_v55 = vadd.f32 %v1136_v58, %v875_v60 }
 0x2c3   : > { %3072 = vperm.xlu1 %17700, %v21469_v51   ;;  %16865 = vmatmul.mubr.msk.f32.gmra.mrb[18].mxu0 %vm23814_vm4, %v3458_v62  ;;  %v21516_v29 = vadd.f32 %v1142_v49, %v881_v15  ;;  %v880_v62 = vmul.f32 %v21107_v14, %v815_v44  ;;  %v1429_v49 = vmul.f32 %v21118_v30, %v21214_v28  ;;  %v21534_v44 = vld [vmem:[#allocation2 + $0x111] sm:$0xff]  ;;  %v458_v15 = vand.u32 15, %v426_v31  ;;  %v2903_v58 = vld [vmem:[#allocation2 + $0x109] sm:$0xff] }
 0x2c4   : > { %v21523_v26 = vpop.permute.xlu0 %2200  ;;  %v2014_v25 = vadd.f32 %v1982_v1, %v1753_v48  ;;  %v1140_v28 = vmul.f32 %v21100_v8, %v21393_v0  ;;  %v2936_v16 = vsel %vm21361_vm9, %v21534_v44, 0.0  ;;  %v879_v0 = vmul.f32 %v21107_v14, %v21377_v21  ;;  %vm23824_vm9 = vmmov %vm23814_vm4 }
 0x2c5   : > { %23818 = vst [vmem:[#allocation50_spill] sm:$0xff] %v21523_v26  ;;  %2533 = vperm.xlu0 %17699, %v21511_v57   ;;  %v1173_v1 = vadd.f32 %v1141_v36, %v880_v62  ;;  %v1461_v31 = vadd.f32 %v1429_v49, %v1168_v55  ;;  %vm21560_vm15 = vcmp.ne.s32.totalorder %v458_v15, 0  ;;  %v1726_v21 = vmul.f32 %v21135_v50, %v1657_v42 }
 0x2c6   : > { %v2745_v43 = vpop.permute.xlu1 %2744  ;;  %v1172_v40 = vadd.f32 %v1140_v28, %v879_v0 }
 0x2c7   : > { %3077 = vperm.xlu1 %17700, %v2934_v41   ;;  %v2307_v41 = vadd.f32 %v2275_v6, %v2014_v25  ;;  %v23821_v25 = vmov 0  ;;  %v1754_v49 = vadd.f32 %v1722_v47, %v1461_v31  ;;  %v689_v47 = vsel %vm21560_vm15, %v21389_v12, 0.0 }
 0x2c8   : > { %v1369_v48 = vpop.permute.xlu0 %1368  ;;  %v23822_v25 = vsel %vm21560_vm15, 4294967295, %v23821_v25  ;;  %v1465_v15 = vadd.f32 %v1433_v7, %v1172_v40  ;;  %v1536_v12 = vsel %vm21560_vm15, %v21486_v10, 0.0  ;;  %v427_v10 = vadd.s32 248, %v19851_v3 }
 0x2c9   : > { %v1434_v60 = vmul.f32 %v21118_v30, %v1369_v48  ;;  %2789 = vperm.xlu0 %17699, %v21532_v11   ;;  %v2600_v6 = vadd.f32 %v2568_v56, %v2307_v41  ;;  %23823 = vst [vmem:[#allocation43_spill] sm:$0xff] %v23822_v25  ;;  %v2015_v56 = vadd.f32 %v1983_v18, %v1754_v49  ;;  %v2351_v49 = vld [vmem:[#allocation2 + $0x117] sm:$0xff] }
 0x2ca   : > { %v1913_v46 = vpop.permute.xlu1 %1912  ;;  %v2569_v41 = vmul.f32 %v21175_v59, %v21458_v38  ;;  %v1758_v42 = vadd.f32 %v1726_v21, %v1465_v15  ;;  %v459_v15 = vand.u32 15, %v427_v10 }
 0x2cb   : > { %v1986_v26 = vmul.f32 %v21149_v61, %v1913_v46  ;;  %2794 = vperm.xlu1 %17700, %v21530_v13   ;;  %v21558_v62 = vadd.f32 %v1434_v60, %v1173_v1  ;;  %v2861_v52 = vadd.f32 %v2829_v53, %v2600_v6  ;;  %v2308_v28 = vadd.f32 %v2276_v9, %v2015_v56 }
 0x2cc   : > { %v21567_v32 = vpop.permute.xlu0 %2488  ;;  %v2830_v1 = vmul.f32 %v21188_v63, %v2745_v43  ;;  %vm21608_vm3 = vcmp.ne.s32.totalorder %v459_v15, 15  ;;  %v2906_v15 = vld [vmem:[#allocation2 + $0x121] sm:$0xff] }
 0x2cd   : > { %v21556_v36 = vadd.f32 %v1986_v26, %v1757_v33  ;;  %3082 = vperm.xlu0 %17699, %v2903_v58   ;;  %v2601_v38 = vadd.f32 %v2569_v41, %v2308_v28 }
 0x2ce   : > { %v3033_v55 = vpop.permute.xlu1 %3032 }
 0x2cf   : > { %v3122_v26 = vmul.f32 %v21203_v22, %v3033_v55  ;;  %3087 = vperm.xlu1 %17700, %v2936_v16   ;;  %v2862_v7 = vadd.f32 %v2830_v1, %v2601_v38  ;;  %v23828_v1 = vld [vmem:[#allocation37_spill] sm:$0xff] }
 0x2d0   : > { %v1374_v46 = vpop.permute.xlu0 %1373 }
 0x2d1   : > { %v3154_v4 = vadd.f32 %v3122_v26, %v2861_v52  ;;  %v1435_v60 = vmul.f32 %v21118_v30, %v1374_v46  ;;  %844 = vperm.xlu0 %17699, %v689_v47   ;;  %v2644_v52 = vld [vmem:[#allocation2 + $0x118] sm:$0xff]  ;;  %v2383_v26 = vsel %vm21560_vm15, %v2351_v49, 0.0  ;;  %v23829_v46 = vld [vmem:[#allocation49_spill] sm:$0xff] }
 0x2d2   : > { %v1918_v33 = vpop.permute.xlu1 %1917 }
 0x2d3   : > { %v3193_v48 = vadd.f32 %v21235_v35, %v3154_v4  ;;  %v1987_v53 = vmul.f32 %v21149_v61, %v1918_v33  ;;  %1105 = vperm.xlu1 %17700, %v21445_v23   ;;  %v1467_v43 = vadd.f32 %v1435_v60, %v21516_v29  ;;  %v1137_v33 = vmul.f32 %v21100_v8, %v23828_v1 }
 0x2d4   : > { %v21586_v0 = vpop.permute.xlu0 %2493 }
 0x2d5   : > { %v3225_v16 = vmax.f32 %v3193_v48, 0.0  ;;  %v21583_v31 = vadd.f32 %v1987_v53, %v1758_v42  ;;  %1398 = vperm.xlu0 %17699, %v21469_v51   ;;  %v23825_v42 = vmov 0  ;;  %v876_v48 = vmul.f32 %v21107_v14, %v23829_v46 }
 0x2d6   : > { %v3038_v18 = vpop.permute.xlu1 %3037  ;;  %v23826_v42 = vsel %vm21608_vm3, 4294967295, %v23825_v42  ;;  %v2938_v46 = vsel %vm21608_vm3, %v2906_v15, 0.0 }
 0x2d7   : > { %3296 = vst.msk [vmem:[#allocation3 + $0xa8] sm:$0xff] %vm23814_vm4, %v3225_v16  ;;  %v3123_v6 = vmul.f32 %v21203_v22, %v3038_v18  ;;  %1691 = vperm.xlu1 %17700, %v1536_v12   ;;  %23827 = vst [vmem:[#allocation55_spill] sm:$0xff] %v23826_v42  ;;  %v1430_v12 = vmul.f32 %v21118_v30, %v21313_v2  ;;  %v1169_v38 = vadd.f32 %v1137_v33, %v876_v48 }
 0x2d8   : > { %v825_v9 = vpop.permute.xlu0 %824  ;;  %v1723_v16 = vmul.f32 %v21135_v50, %v21369_v20  ;;  %v1984_v2 = vmul.f32 %v21149_v61, %v21421_v17  ;;  %v21644_v17 = vld [vmem:[%s23429_s3 + $0x10] sm:$0xff]  ;;  %v1985_v48 = vmul.f32 %v21149_v61, %v21449_v19 }
 0x2d9   : > { %v3155_v23 = vadd.f32 %v3123_v6, %v2862_v7  ;;  %v882_v55 = vmul.f32 %v21107_v14, %v825_v9  ;;  %1952 = vperm.xlu0 %17699, %v21532_v11   ;;  %v2905_v11 = vld [vmem:[#allocation2 + $0x119] sm:$0xff]  ;;  %16935 = vmatprep.subr.mxu0 %v21644_v17 }
 0x2da   : > { %v1086_v40 = vpop.permute.xlu1 %1085 }
 0x2db   : > { %v3194_v21 = vadd.f32 %v21235_v35, %v3155_v23  ;;  %v1143_v29 = vmul.f32 %v21100_v8, %v1086_v40  ;;  %2245 = vperm.xlu1 %17700, %v2903_v58   ;;  %v23831_v40 = vld [vmem:[#allocation59_spill] sm:$0xff] }
 0x2dc   : > { %v1662_v41 = vpop.permute.xlu0 %1661  ;;  %v1138_v9 = vmul.f32 %v21100_v8, %v23831_v40 }
 0x2dd   : > { %v3226_v51 = vmax.f32 %v3194_v21, 0.0  ;;  %v21598_v56 = vadd.f32 %v1143_v29, %v882_v55  ;;  %v1727_v28 = vmul.f32 %v21135_v50, %v1662_v41  ;;  %2538 = vperm.xlu0 %17699, %v2383_v26   ;;  %v1431_v26 = vmul.f32 %v21118_v30, %v21334_v24 }
 0x2de   : > { %v21600_v47 = vpop.permute.xlu1 %2205  ;;  %v3459_v4 = vld [vmem:[#allocation3 + $0xa8] sm:$0xff] }
 0x2df   : > { %3297 = vst.msk [vmem:[#allocation3 + $0xb0] sm:$0xff] %vm23814_vm4, %v3226_v51  ;;  %2799 = vperm.xlu1 %17700, %v2644_v52   ;;  %16867 = vmatprep.mubr.msk.f32.mxu0 %vm23824_vm9, %v3459_v4  ;;  %v21606_v58 = vadd.f32 %v1727_v28, %v21558_v62  ;;  %v1244_v62 = vsel %vm21608_vm3, %v21471_v45, 0.0  ;;  %vm23830_vm9 = vmmov %vm23814_vm4  ;;  %v1462_v45 = vadd.f32 %v1430_v12, %v1169_v38  ;;  %v2352_v51 = vld [vmem:[#allocation2 + $0x11f] sm:$0xff] }
 0x2e0   : > { %v2750_v60 = vpop.permute.xlu0 %2749  ;;  %v2277_v52 = vmul.f32 %v21160_v39, %v21473_v5  ;;  %v2091_v5 = vsel %vm21608_vm3, %v21534_v44, 0.0  ;;  %v1724_v4 = vmul.f32 %v21135_v50, %v21391_v37  ;;  %vm23835_vm3 = vmmov %vm23814_vm4 }
 0x2e1   : > { %3092 = vperm.xlu0 %17699, %v2905_v11   ;;  %v1755_v55 = vadd.f32 %v1723_v16, %v1462_v45  ;;  %v2831_v1 = vmul.f32 %v21188_v63, %v2750_v60  ;;  %v23833_v60 = vld [vmem:[#allocation50_spill] sm:$0xff]  ;;  %vm23846_vm8 = vmmov %vm23835_vm3 }
 0x2e2   : > { %v830_v53 = vpop.permute.xlu1 %829  ;;  %v2278_v38 = vmul.f32 %v21160_v39, %v23833_v60 }
 0x2e3   : > { %849 = vperm.xlu1 %17700, %v21415_v54   ;;  %v883_v23 = vmul.f32 %v21107_v14, %v830_v53 }
 0x2e4   : > { %v1091_v7 = vpop.permute.xlu0 %1090 }
 0x2e5   : > { %v1144_v54 = vmul.f32 %v21100_v8, %v1091_v7  ;;  %1110 = vperm.xlu0 %17699, %v21456_v27   ;;  %v23832_v27 = vld [vmem:[#allocation57_spill] sm:$0xff] }
 0x2e6   : > { %v1667_v18 = vpop.permute.xlu1 %1666  ;;  %v3460_v6 = vld [vmem:[#allocation3 + $0xb0] sm:$0xff] }
 0x2e7   : > { %v1728_v49 = vmul.f32 %v21135_v50, %v1667_v18  ;;  %1403 = vperm.xlu1 %17700, %v1244_v62   ;;  %16868 = vmatmul.mubr.msk.f32.gmra.mrb[20].mxu0 %vm23830_vm9, %v3460_v6  ;;  %v1176_v20 = vadd.f32 %v1144_v54, %v883_v23  ;;  %v2571_v6 = vmul.f32 %v21175_v59, %v21586_v0  ;;  %vm23834_vm9 = vmmov %vm23814_vm4 }
 0x2e8   : > { %v21635_v29 = vpop.permute.xlu0 %2210 }
 0x2e9   : > { %v21631_v10 = vadd.f32 %v1728_v49, %v1467_v43  ;;  %1696 = vperm.xlu0 %17699, %v21511_v57   ;;  %v877_v43 = vmul.f32 %v21107_v14, %v23832_v27  ;;  %v2570_v57 = vmul.f32 %v21175_v59, %v21567_v32  ;;  %v2645_v32 = vld [vmem:[#allocation2 + $0x120] sm:$0xff] }
 0x2ea   : > { %v2755_v21 = vpop.permute.xlu1 %2754 }
 0x2eb   : > { %1957 = vperm.xlu1 %17700, %v21530_v13   ;;  %v2016_v13 = vadd.f32 %v1984_v2, %v1755_v55  ;;  %v1170_v41 = vadd.f32 %v1138_v9, %v877_v43  ;;  %v2832_v49 = vmul.f32 %v21188_v63, %v2755_v21 }
 0x2ec   : > { %v1379_v11 = vpop.permute.xlu0 %1378 }
 0x2ed   : > { %v2309_v24 = vadd.f32 %v2277_v52, %v2016_v13  ;;  %v1436_v33 = vmul.f32 %v21118_v30, %v1379_v11  ;;  %2250 = vperm.xlu0 %17699, %v2091_v5   ;;  %v1463_v44 = vadd.f32 %v1431_v26, %v1170_v41 }
 0x2ee   : > { %v21658_v28 = vpop.permute.xlu1 %1922 }
 0x2ef   : > { %2543 = vperm.xlu1 %17700, %v2352_v51   ;;  %v2602_v53 = vadd.f32 %v2570_v57, %v2309_v24  ;;  %v21667_v50 = vadd.f32 %v1436_v33, %v21598_v56  ;;  %v1756_v37 = vadd.f32 %v1724_v4, %v1463_v44  ;;  %v2279_v44 = vmul.f32 %v21160_v39, %v21600_v47 }
 0x2f0   : > { %v2499_v12 = vpop.permute.xlu0 %2498 }
 0x2f1   : > { %v2863_v16 = vadd.f32 %v2831_v1, %v2602_v53  ;;  %2804 = vperm.xlu0 %17699, %v2645_v32   ;;  %v2017_v7 = vadd.f32 %v1985_v48, %v1756_v37  ;;  %v2311_v53 = vadd.f32 %v2279_v44, %v21556_v36 }
 0x2f2   : > { %v3043_v62 = vpop.permute.xlu1 %3042 }
 0x2f3   : > { %v3124_v18 = vmul.f32 %v21203_v22, %v3043_v62  ;;  %3097 = vperm.xlu1 %17700, %v2938_v46   ;;  %v2310_v23 = vadd.f32 %v2278_v38, %v2017_v7  ;;  %v2572_v46 = vmul.f32 %v21175_v59, %v2499_v12 }
 0x2f4   : > { %v1384_v56 = vpop.permute.xlu0 %1383 }
 0x2f5   : > { %v3156_v61 = vadd.f32 %v3124_v18, %v2863_v16  ;;  %v1437_v45 = vmul.f32 %v21118_v30, %v1384_v56  ;;  %v2603_v2 = vadd.f32 %v2571_v6, %v2310_v23  ;;  %v2604_v62 = vadd.f32 %v2572_v46, %v2311_v53 }
 0x2f6   : > { %v21674_v19 = vpop.permute.xlu1 %1927  ;;  %v2280_v16 = vmul.f32 %v21160_v39, %v21635_v29 }
 0x2f7   : > { %v3195_v54 = vadd.f32 %v21235_v35, %v3156_v61  ;;  %v21679_v9 = vadd.f32 %v1437_v45, %v1176_v20  ;;  %v2864_v27 = vadd.f32 %v2832_v49, %v2603_v2 }
 0x2f8   : > { %v2504_v52 = vpop.permute.xlu0 %2503  ;;  %v2312_v36 = vadd.f32 %v2280_v16, %v21583_v31 }
 0x2f9   : > { %v3227_v40 = vmax.f32 %v3195_v54, 0.0  ;;  %v2573_v47 = vmul.f32 %v21175_v59, %v2504_v52 }
 0x2fa   : > { %v3048_v55 = vpop.permute.xlu1 %3047 }
 0x2fb   : > { %3298 = vst.msk [vmem:[#allocation3 + $0xb8] sm:$0xff] %vm23814_vm4, %v3227_v40  ;;  %v3125_v0 = vmul.f32 %v21203_v22, %v3048_v55  ;;  %v2605_v49 = vadd.f32 %v2573_v47, %v2312_v36  ;;  %v21778_v47 = vld [vmem:[%s23427_s1 + $0x8] ss:$0 sm:$0xff] }
 0x2fc   : > { %v835_v51 = vpop.permute.xlu0 %834 }
 0x2fd   : > { %v3157_v43 = vadd.f32 %v3125_v0, %v2864_v27  ;;  %v884_v30 = vmul.f32 %v21107_v14, %v835_v51 }
 0x2fe   : > { %v1096_v26 = vpop.permute.xlu1 %1095 }
 0x2ff   : > { %v3196_v21 = vadd.f32 %v21235_v35, %v3157_v43  ;;  %v1145_v5 = vmul.f32 %v21100_v8, %v1096_v26 }
 0x300   : > { %v21688_v15 = vpop.permute.xlu0 %1671 }
 0x301   : > { %v3228_v13 = vmax.f32 %v3196_v21, 0.0  ;;  %v21686_v57 = vadd.f32 %v1145_v5, %v884_v30  ;;  %v21747_v21 = vld [vmem:[%s23427_s1 + $0x5] ss:$0 sm:$0xff] }
 0x302   : > { %v2216_v20 = vpop.permute.xlu1 %2215  ;;  %v21690_v41 = vld [vmem:[#allocation3 + $0xb8] sm:$0xff] }
 0x303   : > { %3299 = vst.msk [vmem:[#allocation3 + $0xc0] sm:$0xff] %vm23834_vm9, %v3228_v13  ;;  %16870 = vmatprep.mubr.msk.f32.mxu0 %vm23814_vm4, %v21690_v41  ;;  %vm23836_vm9 = vmmov %vm23835_vm3  ;;  %v2281_v5 = vmul.f32 %v21747_v21, %v2216_v20 }
 0x304   : > { %v2760_v11 = vpop.permute.xlu0 %2759  ;;  %vm23837_vm4 = vmmov %vm23835_vm3 }
 0x305   : > { %v2833_v37 = vmul.f32 %v21188_v63, %v2760_v11  ;;  %v21756_v11 = vld [vmem:[%s23427_s1 + $0x6] ss:$0 sm:$0xff] }
 0x306   : > { %v21695_v4 = vpop.permute.xlu1 %839 }
 0x307   : > { %v2865_v18 = vadd.f32 %v2833_v37, %v2604_v62 }
 0x308   : > { %v21699_v8 = vpop.permute.xlu0 %1100 }
 0x30a   : > { %v21697_v24 = vpop.permute.xlu1 %1676  ;;  %v21701_v14 = vld [vmem:[#allocation3 + $0xc0] sm:$0xff] }
 0x30b   : > { %16871 = vmatmul.mubr.msk.f32.gmra.mrb[22].mxu0 %vm23835_vm3, %v21701_v14 }
 0x30c   : > { %v2221_v33 = vpop.permute.xlu0 %2220 }
 0x30d   : > { %v2282_v20 = vmul.f32 %v21747_v21, %v2221_v33 }
 0x30e   : > { %v2765_v1 = vpop.permute.xlu1 %2764 }
 0x30f   : > { %v2834_v56 = vmul.f32 %v21188_v63, %v2765_v1 }
 0x310   : > { %v21710_v48 = vpop.permute.xlu0 %1388 }
 0x311   : > { %v2866_v29 = vadd.f32 %v2834_v56, %v2605_v49  ;;  %v21784_v49 = vld [vmem:[%s23427_s1 + $0x3] ss:$0 sm:$0xff] }
 0x312   : > { %v21708_v32 = vpop.permute.xlu1 %1932 }
 0x314   : > { %v2509_v38 = vpop.permute.xlu0 %2508 }
 0x316   : > { %v3053_v60 = vpop.permute.xlu1 %3052 }
 0x317   : > { %v3126_v7 = vmul.f32 %v21203_v22, %v3053_v60 }
 0x318   : > { %v21720_v61 = vpop.permute.xlu0 %1393 }
 0x319   : > { %v3158_v12 = vadd.f32 %v3126_v7, %v2865_v18 }
 0x31a   : > { %v21718_v6 = vpop.permute.xlu1 %1937 }
 0x31b   : > { %v3197_v23 = vadd.f32 %v21235_v35, %v3158_v12 }
 0x31c   : > { %v2514_v39 = vpop.permute.xlu0 %2513 }
 0x31d   : > { %v3229_v54 = vmax.f32 %v3197_v23, 0.0  ;;  %v2575_v60 = vmul.f32 %v21756_v11, %v2514_v39 }
 0x31e   : > { %v3058_v45 = vpop.permute.xlu1 %3057 }
 0x31f   : > { %3300 = vst.msk [vmem:[#allocation3 + $0xc8] sm:$0xff] %vm23835_vm3, %v3229_v54  ;;  %v3127_v59 = vmul.f32 %v21203_v22, %v3058_v45  ;;  %v21740_v22 = vld [vmem:[%s23427_s1 + $0x4] ss:$0 sm:$0xff]  ;;  %v1729_v54 = vmul.f32 %v21784_v49, %v21688_v15  ;;  %v21797_v15 = vld [vmem:[#allocation4] ss:$0 sm:$0xff] }
 0x320   : > { %v21727_v55 = vpop.permute.xlu0 %1681  ;;  %v1988_v43 = vmul.f32 %v21740_v22, %v21658_v28  ;;  %v1989_v13 = vmul.f32 %v21740_v22, %v21674_v19  ;;  %v2574_v28 = vmul.f32 %v21756_v11, %v2509_v38 }
 0x321   : > { %v3159_v2 = vadd.f32 %v3127_v59, %v2866_v29  ;;  %v1990_v59 = vmul.f32 %v21740_v22, %v21708_v32  ;;  %v1991_v32 = vmul.f32 %v21740_v22, %v21718_v6 }
 0x322   : > { %v2226_v40 = vpop.permute.xlu1 %2225  ;;  %v2020_v30 = vadd.f32 %v1988_v43, %v21606_v58  ;;  %v21767_v58 = vld [vmem:[%s23427_s1 + $0x7] ss:$0 sm:$0xff]  ;;  %v2021_v37 = vadd.f32 %v1989_v13, %v21631_v10  ;;  %v1761_v43 = vadd.f32 %v1729_v54, %v21667_v50  ;;  %v21806_v50 = vld [vmem:[%s23427_s1 + $0x1] ss:$0 sm:$0xff] }
 0x323   : > { %v3198_v52 = vadd.f32 %v21235_v35, %v3159_v2 }
 0x324   : > { %v2770_v63 = vpop.permute.xlu0 %2769  ;;  %v2313_v53 = vadd.f32 %v2281_v5, %v2020_v30  ;;  %v2314_v18 = vadd.f32 %v2282_v20, %v2021_v37  ;;  %v2283_v5 = vmul.f32 %v21747_v21, %v2226_v40  ;;  %v2022_v30 = vadd.f32 %v1990_v59, %v1761_v43 }
 0x325   : > { %v3230_v31 = vmax.f32 %v3198_v52, 0.0  ;;  %v2835_v19 = vmul.f32 %v21767_v58, %v2770_v63 }
 0x326   : > { %v21730_v27 = vpop.permute.xlu1 %1686  ;;  %v21732_v0 = vld [vmem:[#allocation3 + $0xc8] sm:$0xff]  ;;  %v2606_v62 = vadd.f32 %v2574_v28, %v2313_v53  ;;  %v2607_v36 = vadd.f32 %v2575_v60, %v2314_v18 }
 0x327   : > { %3301 = vst.msk [vmem:[#allocation3 + $0xd0] sm:$0xff] %vm23836_vm9, %v3230_v31  ;;  %16873 = vmatprep.mubr.msk.f32.mxu0 %vm23837_vm4, %v21732_v0  ;;  %vm23838_vm9 = vmmov %vm23835_vm3 }
 0x328   : > { %v2231_v51 = vpop.permute.xlu0 %2230  ;;  %v2867_v7 = vadd.f32 %v2835_v19, %v2606_v62  ;;  %v2315_v19 = vadd.f32 %v2283_v5, %v2022_v30  ;;  %vm23839_vm4 = vmmov %vm23835_vm3 }
 0x329   : > { %v2284_v37 = vmul.f32 %v21747_v21, %v2231_v51 }
 0x32a   : > { %v2775_v26 = vpop.permute.xlu1 %2774 }
 0x32b   : > { %v2836_v33 = vmul.f32 %v21767_v58, %v2775_v26  ;;  %v1730_v26 = vmul.f32 %v21784_v49, %v21697_v24  ;;  %v1146_v24 = vmul.f32 %v21806_v50, %v21699_v8  ;;  %v21824_v8 = vld [vmem:[%s23427_s1 + $0x2] ss:$0 sm:$0xff] }
 0x32c   : > { %v21759_v44 = vpop.permute.xlu0 %1942  ;;  %v1439_v51 = vmul.f32 %v21824_v8, %v21720_v61 }
 0x32d   : > { %v2868_v45 = vadd.f32 %v2836_v33, %v2607_v36  ;;  %v1762_v20 = vadd.f32 %v1730_v26, %v21679_v9  ;;  %v1438_v9 = vmul.f32 %v21824_v8, %v21710_v48  ;;  %v1731_v33 = vmul.f32 %v21784_v49, %v21727_v55 }
 0x32e   : > { %v2519_v1 = vpop.permute.xlu1 %2518  ;;  %v21761_v46 = vld [vmem:[#allocation3 + $0xd0] sm:$0xff]  ;;  %v1992_v55 = vmul.f32 %v21740_v22, %v21759_v44 }
 0x32f   : > { %16874 = vmatmul.mubr.msk.f32.gmra.mrb[24].mxu0 %vm23835_vm3, %v21761_v46  ;;  %v2576_v13 = vmul.f32 %v21756_v11, %v2519_v1  ;;  %v21817_v1 = vld [vmem:[%s23427_s1] ss:$0 sm:$0xff]  ;;  %v2023_v60 = vadd.f32 %v1991_v32, %v1762_v20 }
 0x330   : > { %v3063_v16 = vpop.permute.xlu0 %3062  ;;  %v885_v62 = vmul.f32 %v21817_v1, %v21695_v4  ;;  %v1732_v4 = vmul.f32 %v21784_v49, %v21730_v27 }
 0x331   : > { %v3128_v12 = vmul.f32 %v21778_v47, %v3063_v16  ;;  %v2608_v16 = vadd.f32 %v2576_v13, %v2315_v19 }
 0x332   : > { %v1948_v38 = vpop.permute.xlu1 %1947 }
 0x333   : > { %v3160_v56 = vadd.f32 %v3128_v12, %v2867_v7  ;;  %v1178_v7 = vadd.f32 %v1146_v24, %v885_v62  ;;  %v1993_v27 = vmul.f32 %v21740_v22, %v1948_v38 }
 0x334   : > { %v2524_v10 = vpop.permute.xlu0 %2523 }
 0x335   : > { %v3199_v39 = vadd.f32 %v21235_v35, %v3160_v56  ;;  %v2577_v18 = vmul.f32 %v21756_v11, %v2524_v10  ;;  %v1470_v10 = vadd.f32 %v1438_v9, %v21686_v57 }
 0x336   : > { %v3068_v23 = vpop.permute.xlu1 %3067 }
 0x337   : > { %v3129_v29 = vmul.f32 %v21778_v47, %v3068_v23  ;;  %v3231_v2 = vmax.f32 %v3199_v39, 0.0  ;;  %v2316_v23 = vadd.f32 %v2284_v37, %v2023_v60  ;;  %v1763_v59 = vadd.f32 %v1731_v33, %v1470_v10 }
 0x338   : > { %v2236_v63 = vpop.permute.xlu0 %2235 }
 0x339   : > { %v3161_v52 = vadd.f32 %v3129_v29, %v2868_v45  ;;  %3302 = vst.msk [vmem:[#allocation3 + $0xd8] sm:$0xff] %vm23838_vm9, %v3231_v2  ;;  %v1471_v45 = vadd.f32 %v1439_v51, %v1178_v7  ;;  %v2609_v39 = vadd.f32 %v2577_v18, %v2316_v23  ;;  %vm23840_vm9 = vmmov %vm23835_vm3  ;;  %v2024_v44 = vadd.f32 %v1992_v55, %v1763_v59 }
 0x33a   : > { %v2780_v31 = vpop.permute.xlu1 %2779 }
 0x33b   : > { %v3200_v35 = vadd.f32 %v21797_v15, %v3161_v52  ;;  %v2837_v6 = vmul.f32 %v21767_v58, %v2780_v31  ;;  %v1764_v2 = vadd.f32 %v1732_v4, %v1471_v45  ;;  %v2285_v52 = vmul.f32 %v21747_v21, %v2236_v63 }
 0x33c   : > { %v2241_v53 = vpop.permute.xlu0 %2240 }
 0x33d   : > { %v3232_v28 = vmax.f32 %v3200_v35, 0.0  ;;  %v2869_v48 = vadd.f32 %v2837_v6, %v2608_v16  ;;  %v2286_v35 = vmul.f32 %v21747_v21, %v2241_v53  ;;  %v2025_v38 = vadd.f32 %v1993_v27, %v1764_v2 }
 0x33e   : > { %v2785_v40 = vpop.permute.xlu1 %2784  ;;  %v2317_v24 = vadd.f32 %v2285_v52, %v2024_v44 }
 0x33f   : > { %3303 = vst.msk [vmem:[#allocation3 + $0xe0] sm:$0xff] %vm23839_vm4, %v3232_v28  ;;  %v2838_v54 = vmul.f32 %v21767_v58, %v2785_v40  ;;  %v2318_v19 = vadd.f32 %v2286_v35, %v2025_v38  ;;  %vm23841_vm4 = vmmov %vm23835_vm3  ;;  %v3310_v38 = vld [vmem:[#allocation3 + $0x7] sm:$0xff] }
 0x340   : > { %v2529_v36 = vpop.permute.xlu0 %2528  ;;  %v21835_v56 = vld [vmem:[#allocation3 + $0xd8] sm:$0xff] }
 0x341   : > { %16876 = vmatprep.mubr.msk.f32.mxu0 %vm23835_vm3, %v21835_v56  ;;  %v2870_v5 = vadd.f32 %v2838_v54, %v2609_v39  ;;  %v2578_v13 = vmul.f32 %v21756_v11, %v2529_v36 }
 0x342   : > { %v3073_v12 = vpop.permute.xlu1 %3072 }
 0x343   : > { %v3130_v61 = vmul.f32 %v21778_v47, %v3073_v12  ;;  %v2610_v62 = vadd.f32 %v2578_v13, %v2317_v24 }
 0x344   : > { %v2534_v43 = vpop.permute.xlu0 %2533 }
 0x345   : > { %v3162_v29 = vadd.f32 %v3130_v61, %v2869_v48  ;;  %v2579_v28 = vmul.f32 %v21756_v11, %v2534_v43 }
 0x346   : > { %v3078_v31 = vpop.permute.xlu1 %3077  ;;  %v21846_v26 = vld [vmem:[#allocation3 + $0xe0] sm:$0xff] }
 0x347   : > { %v3201_v57 = vadd.f32 %v21797_v15, %v3162_v29  ;;  %v3131_v30 = vmul.f32 %v21778_v47, %v3078_v31  ;;  %16877 = vmatmul.mubr.msk.f32.gmra.mrb[26].mxu0 %vm23840_vm9, %v21846_v26  ;;  %v2611_v51 = vadd.f32 %v2579_v28, %v2318_v19  ;;  %vm23843_vm9 = vmmov %vm23835_vm3  ;;  %v3406_v19 = vsel %vm19871_vm1, %v3310_v38, 0.0  ;;  %v21935_v38 = vld [vmem:[#allocation3 + $0x47] sm:$0xff] }
 0x348   : > { %v2790_v20 = vpop.permute.xlu0 %2789 }
 0x349   : > { %v3233_v32 = vmax.f32 %v3201_v57, 0.0  ;;  %v3163_v63 = vadd.f32 %v3131_v30, %v2870_v5  ;;  %v2839_v6 = vmul.f32 %v21767_v58, %v2790_v20 }
 0x34a   : > { %v2795_v40 = vpop.permute.xlu1 %2794 }
 0x34b   : > { %3304 = vst.msk [vmem:[#allocation3 + $0xe8] sm:$0xff] %vm23841_vm4, %v3233_v32  ;;  %v3202_v53 = vadd.f32 %v21797_v15, %v3163_v63  ;;  %v2840_v37 = vmul.f32 %v21767_v58, %v2795_v40  ;;  %v2871_v7 = vadd.f32 %v2839_v6, %v2610_v62  ;;  %vm23845_vm4 = vmmov %vm23835_vm3 }
 0x34c   : > { %v3083_v16 = vpop.permute.xlu0 %3082 }
 0x34d   : > { %v3234_v9 = vmax.f32 %v3202_v53, 0.0  ;;  %v2872_v18 = vadd.f32 %v2840_v37, %v2611_v51  ;;  %v3132_v4 = vmul.f32 %v21778_v47, %v3083_v16  ;;  %v21893_v51 = vld [vmem:[#allocation3 + $0x17] sm:$0xff] }
 0x34e   : > { %v3088_v60 = vpop.permute.xlu1 %3087 }
 0x34f   : > { %3305 = vst.msk [vmem:[#allocation3 + $0xf0] sm:$0xff] %vm23835_vm3, %v3234_v9  ;;  %v3133_v33 = vmul.f32 %v21778_v47, %v3088_v60  ;;  %v3164_v36 = vadd.f32 %v3132_v4, %v2871_v7  ;;  %v3311_v9 = vld [vmem:[#allocation3 + $0xf] sm:$0xff] }
 0x350   : > { %v845_v48 = vpop.permute.xlu0 %844  ;;  %v23853_v4 = vld [vmem:[#allocation23_spill] sm:$0xff] }
 0x351   : > { %v3165_v12 = vadd.f32 %v3133_v33, %v2872_v18  ;;  %v3203_v10 = vadd.f32 %v21797_v15, %v3164_v36  ;;  %v886_v55 = vmul.f32 %v21817_v1, %v845_v48  ;;  %v21899_v33 = vld [vmem:[%s23429_s3 + $0x18] sm:$0xff] }
 0x352   : > { %v1106_v23 = vpop.permute.xlu1 %1105  ;;  %v21862_v54 = vld [vmem:[#allocation3 + $0xe8] sm:$0xff] }
 0x353   : > { %23842 = vst [vmem:[#allocation58_spill] sm:$0xff] %v21862_v54  ;;  %v3204_v61 = vadd.f32 %v21797_v15, %v3165_v12  ;;  %v1147_v45 = vmul.f32 %v21806_v50, %v1106_v23  ;;  %16879 = vmatprep.mubr.msk.f32.mxu0 %vm23843_vm9, %v21862_v54  ;;  %v3235_v39 = vmax.f32 %v3203_v10, 0.0  ;;  %vm23851_vm9 = vmmov %vm23835_vm3  ;;  %v3408_v12 = vsel %vm19887_vm2, %v21893_v51, 0.0  ;;  %v21907_v23 = vld [vmem:[#allocation3 + $0x27] sm:$0xff] }
 0x354   : > { %v1399_v59 = vpop.permute.xlu0 %1398  ;;  %v22098_v54 = vld [vmem:[#allocation3 + $0x41] sm:$0xff] }
 0x355   : > { %v3236_v27 = vmax.f32 %v3204_v61, 0.0  ;;  %3306 = vst.msk [vmem:[#allocation3 + $0xf8] sm:$0xff] %vm23835_vm3, %v3235_v39  ;;  %v1179_v52 = vadd.f32 %v1147_v45, %v886_v55  ;;  %v1440_v31 = vmul.f32 %v21824_v8, %v1399_v59  ;;  %v3410_v39 = vsel %vm19911_vm5, %v21907_v23, 0.0 }
 0x356   : > { %v1692_v29 = vpop.permute.xlu1 %1691  ;;  %v21870_v2 = vld [vmem:[#allocation3 + $0xf0] sm:$0xff] }
 0x357   : > { %23844 = vst [vmem:[#allocation37_spill] sm:$0xff] %v21870_v2  ;;  %3307 = vst.msk [vmem:[#allocation3 + $0x100] sm:$0xff] %vm23845_vm4, %v3236_v27  ;;  %16880 = vmatmul.mubr.msk.f32.gmra.mrb[28].mxu0 %vm23846_vm8, %v21870_v2  ;;  %v1733_v43 = vmul.f32 %v21784_v49, %v1692_v29  ;;  %v1472_v5 = vadd.f32 %v1440_v31, %v1179_v52  ;;  %v21913_v27 = vld [vmem:[#allocation3 + $0x1f] sm:$0xff] }
 0x358   : > { %v1953_v57 = vpop.permute.xlu0 %1952  ;;  %vm23850_vm8 = vmmov %vm23835_vm3 }
 0x359   : > { %v1765_v30 = vadd.f32 %v1733_v43, %v1472_v5  ;;  %v1994_v44 = vmul.f32 %v21740_v22, %v1953_v57  ;;  %vm23852_vm4 = vmmov %vm23835_vm3  ;;  %v23859_v57 = vld [vmem:[#allocation28_spill] sm:$0xff] }
 0x35a   : > { %v2246_v35 = vpop.permute.xlu1 %2245  ;;  %23912 = vst [vmem:[#allocation28_spill] sm:$0xff] %v22098_v54 }
 0x35b   : > { %v2287_v32 = vmul.f32 %v21747_v21, %v2246_v35  ;;  %v2026_v13 = vadd.f32 %v1994_v44, %v1765_v30  ;;  %v21926_v35 = vld [vmem:[#allocation3 + $0x2f] sm:$0xff] }
 0x35c   : > { %v2539_v28 = vpop.permute.xlu0 %2538  ;;  %v21880_v24 = vld [vmem:[#allocation3 + $0xf8] sm:$0xff] }
 0x35d   : > { %23847 = vst [vmem:[#allocation49_spill] sm:$0xff] %v21880_v24  ;;  %v2319_v53 = vadd.f32 %v2287_v32, %v2026_v13  ;;  %v2580_v37 = vmul.f32 %v21756_v11, %v2539_v28  ;;  %16882 = vmatprep.mubr.msk.f32.mxu0 %vm23850_vm8, %v21880_v24  ;;  %vm23854_vm8 = vmmov %vm23835_vm3  ;;  %v21938_v28 = vld [vmem:[#allocation3 + $0x3f] sm:$0xff] }
 0x35e   : > { %v2800_v63 = vpop.permute.xlu1 %2799  ;;  %v21882_v40 = vld [vmem:[#allocation3 + $0x100] sm:$0xff] }
 0x35f   : > { %23848 = vst [vmem:[#allocation59_spill] sm:$0xff] %v21882_v40  ;;  %16883 = vmatmul.mubr.msk.f32.gmra.mrb[30].mxu0 %vm23851_vm9, %v21882_v40  ;;  %v2841_v6 = vmul.f32 %v21767_v58, %v2800_v63  ;;  %v2612_v62 = vadd.f32 %v2580_v37, %v2319_v53  ;;  %vm23855_vm9 = vmmov %vm23835_vm3  ;;  %v3414_v53 = vsel %vm20068_vm10, %v21935_v38, 0.0  ;;  %v22071_v40 = vld [vmem:[%s23429_s3 + $0x20] sm:$0xff]  ;;  %v22076_v24 = vld [vmem:[#allocation3 + $0x21] sm:$0xff] }
 0x360   : > { %16887 = vmatprep.mubr.msk.f32.mxu0 %vm23852_vm4, %v3406_v19  ;;  %v3093_v16 = vpop.permute.xlu0 %3092  ;;  %vm23857_vm4 = vmmov %vm23835_vm3  ;;  %v23862_v19 = vld [vmem:[#allocation30_spill] sm:$0xff]  ;;  %23901 = vst [vmem:[#allocation50_spill] sm:$0xff] %v22076_v24 }
 0x361   : > { %v2873_v18 = vadd.f32 %v2841_v6, %v2612_v62  ;;  %v3134_v7 = vmul.f32 %v21778_v47, %v3093_v16  ;;  %v21947_v6 = vld [vmem:[#allocation3 + $0x57] sm:$0xff]  ;;  %v21950_v16 = vld [vmem:[#allocation3 + $0x4f] sm:$0xff] }
 0x362   : > { %v850_v60 = vpop.permute.xlu1 %849 }
 0x363   : > { %16888 = vmatmul.mubr.msk.f32.vlgmr.msra.gmra.mrb[0].mxu0 %vm23835_vm3, %v3311_v9  ;;  %v3166_v36 = vadd.f32 %v3134_v7, %v2873_v18  ;;  %v887_v10 = vmul.f32 %v21817_v1, %v850_v60  ;;  %v21922_v1 = vld [vmem:[#allocation3 + $0x37] sm:$0xff]  ;;  %v3416_v7 = vsel %vm20116_vm12, %v21947_v6, 0.0  ;;  %vm23872_vm12 = vmmov %vm23835_vm3 }
 0x364   : > { %16936 = vmatpush3.msra.mxu0 %v21644_v17  ;;  %16890 = vmatprep.mubr.msk.f32.mxu0 %vm23854_vm8, %v3408_v12  ;;  %v1111_v61 = vpop.permute.xlu0 %1110  ;;  %v23856_v17 = vld [vmem:[#allocation26_spill] sm:$0xff]  ;;  %vm23858_vm8 = vmmov %vm23835_vm3  ;;  %v23864_v18 = vld [vmem:[#allocation32_spill] sm:$0xff] }
 0x365   : > { %16985 = vmatprep.subr.mxu0 %v21899_v33  ;;  %v3205_v45 = vadd.f32 %v21797_v15, %v3166_v36  ;;  %v1148_v55 = vmul.f32 %v21806_v50, %v1111_v61  ;;  %v21959_v36 = vld [vmem:[#allocation3 + $0x67] sm:$0xff]  ;;  %v21961_v61 = vld [vmem:[#allocation3 + $0x5f] sm:$0xff] }
 0x366   : > { %v1404_v48 = vpop.permute.xlu1 %1403 }
 0x367   : > { %16891 = vmatmul.mubr.msk.f32.gmra.mrb[2].mxu0 %vm23855_vm9, %v21913_v27  ;;  %v3237_v29 = vmax.f32 %v3205_v45, 0.0  ;;  %v1441_v59 = vmul.f32 %v21824_v8, %v1404_v48  ;;  %v1180_v52 = vadd.f32 %v1148_v55, %v887_v10  ;;  %v3412_v8 = vsel %vm19941_vm7, %v21922_v1, 0.0  ;;  %vm23860_vm9 = vmmov %vm23835_vm3 }
 0x368   : > { %16893 = vmatprep.mubr.msk.f32.mxu0 %vm23857_vm4, %v3410_v39  ;;  %v1697_v43 = vpop.permute.xlu0 %1696  ;;  %vm23861_vm4 = vmmov %vm23835_vm3  ;;  %v3418_v10 = vsel %vm20197_vm14, %v21959_v36, 0.0  ;;  %v21972_v39 = vld [vmem:[#allocation3 + $0x6f] sm:$0xff] }
 0x369   : > { %3308 = vst.msk [vmem:[#allocation3 + $0x108] sm:$0xff] %vm23835_vm3, %v3237_v29  ;;  %v1473_v50 = vadd.f32 %v1441_v59, %v1180_v52  ;;  %v1734_v5 = vmul.f32 %v21784_v49, %v1697_v43  ;;  %v23869_v29 = vld [vmem:[#allocation40_spill] sm:$0xff]  ;;  %v21981_v52 = vld [vmem:[#allocation3 + $0x87] sm:$0xff] }
 0x36a   : > { %v1958_v31 = vpop.permute.xlu1 %1957 }
 0x36b   : > { %16894 = vmatmul.mubr.msk.f32.gmra.mrb[4].mxu0 %vm23858_vm8, %v21926_v35  ;;  %v1995_v30 = vmul.f32 %v21740_v22, %v1958_v31  ;;  %v1766_v44 = vadd.f32 %v1734_v5, %v1473_v50  ;;  %vm23863_vm8 = vmmov %vm23835_vm3  ;;  %v23873_v31 = vld [vmem:[#allocation46_spill] sm:$0xff]  ;;  %v21991_v50 = vld [vmem:[#allocation3 + $0x97] sm:$0xff] }
 0x36c   : > { %16896 = vmatprep.mubr.msk.f32.mxu0 %vm23860_vm9, %v3412_v8  ;;  %v2251_v13 = vpop.permute.xlu0 %2250  ;;  %vm23865_vm9 = vmmov %vm23835_vm3  ;;  %vm23874_vm14 = vnez %v23873_v31  ;;  %v21993_v5 = vld [vmem:[#allocation3 + $0x8f] sm:$0xff] }
 0x36d   : > { %v2027_v63 = vadd.f32 %v1995_v30, %v1766_v44  ;;  %v2288_v49 = vmul.f32 %v21747_v21, %v2251_v13  ;;  %v3422_v43 = vsel %vm23874_vm14, %v21981_v52, 0.0  ;;  %v23877_v8 = vld [vmem:[#allocation48_spill] sm:$0xff]  ;;  %v22001_v44 = vld [vmem:[#allocation3 + $0xa7] sm:$0xff]  ;;  %vm23882_vm14 = vmmov %vm23835_vm3 }
 0x36e   : > { %v2544_v32 = vpop.permute.xlu1 %2543  ;;  %v23880_v13 = vld [vmem:[#allocation36_spill] sm:$0xff] }
 0x36f   : > { %16897 = vmatmul.mubr.msk.f32.gmra.mrb[6].mxu0 %vm23861_vm4, %v21938_v28  ;;  %v2581_v22 = vmul.f32 %v21756_v11, %v2544_v32  ;;  %v2320_v37 = vadd.f32 %v2288_v49, %v2027_v63  ;;  %vm23866_vm4 = vmmov %vm23835_vm3  ;;  %v22003_v32 = vld [vmem:[#allocation3 + $0x9f] sm:$0xff]  ;;  %v22011_v49 = vld [vmem:[#allocation3 + $0xb7] sm:$0xff] }
 0x370   : > { %16899 = vmatprep.mubr.msk.f32.mxu0 %vm23835_vm3, %v3414_v53  ;;  %v2805_v9 = vpop.permute.xlu0 %2804  ;;  %v22013_v53 = vld [vmem:[#allocation3 + $0xaf] sm:$0xff] }
 0x371   : > { %v2613_v60 = vadd.f32 %v2581_v22, %v2320_v37  ;;  %v2842_v21 = vmul.f32 %v21767_v58, %v2805_v9  ;;  %v23867_v58 = vld [vmem:[#allocation34_spill] sm:$0xff]  ;;  %v23884_v22 = vld [vmem:[#allocation51_spill] sm:$0xff] }
 0x372   : > { %v3098_v62 = vpop.permute.xlu1 %3097  ;;  %v22023_v9 = vld [vmem:[#allocation3 + $0xbf] sm:$0xff] }
 0x373   : > { %16900 = vmatmul.mubr.msk.f32.gmra.mrb[8].mxu0 %vm23863_vm8, %v21950_v16  ;;  %v3135_v11 = vmul.f32 %v21778_v47, %v3098_v62  ;;  %v2874_v12 = vadd.f32 %v2842_v21, %v2613_v60  ;;  %v21970_v47 = vld [vmem:[#allocation3 + $0x77] sm:$0xff]  ;;  %vm23868_vm8 = vmmov %vm23835_vm3  ;;  %v22021_v62 = vld [vmem:[#allocation3 + $0xc7] sm:$0xff] }
 0x374   : > { %16902 = vmatprep.mubr.msk.f32.mxu0 %vm23865_vm9, %v3416_v7  ;;  %vm23870_vm9 = vnez %v23869_v29  ;;  %v23887_v60 = vld [vmem:[#allocation53_spill] sm:$0xff]  ;;  %v3430_v21 = vsel %vm20987_vm6, %v22021_v62, 0.0 }
 0x375   : > { %v3167_v48 = vadd.f32 %v3135_v11, %v2874_v12  ;;  %v3420_v59 = vsel %vm23870_vm9, %v21970_v47, 0.0  ;;  %vm23879_vm9 = vmmov %vm23835_vm3  ;;  %v22031_v7 = vld [vmem:[#allocation3 + $0xd7] sm:$0xff]  ;;  %v22033_v11 = vld [vmem:[#allocation3 + $0xcf] sm:$0xff] }
 0x376   : > { %v23890_v12 = vld [vmem:[#allocation35_spill] sm:$0xff] }
 0x377   : > { %16903 = vmatmul.mubr.msk.f32.gmra.mrb[10].mxu0 %vm23866_vm4, %v21961_v61  ;;  %v3206_v45 = vadd.f32 %v21797_v15, %v3167_v48  ;;  %vm23871_vm4 = vmmov %vm23835_vm3  ;;  %v21983_v15 = vld [vmem:[#allocation3 + $0x7f] sm:$0xff]  ;;  %v3432_v48 = vsel %vm21122_vm11, %v22031_v7, 0.0 }
 0x378   : > { %16905 = vmatprep.mubr.msk.f32.mxu0 %vm23835_vm3, %v3418_v10  ;;  %v22041_v10 = vld [vmem:[#allocation3 + $0xe7] sm:$0xff] }
 0x379   : > { %v3238_v55 = vmax.f32 %v3206_v45, 0.0  ;;  %v22043_v45 = vld [vmem:[#allocation3 + $0xdf] sm:$0xff] }
 0x37b   : > { %16906 = vmatmul.mubr.msk.f32.gmra.mrb[12].mxu0 %vm23868_vm8, %v21972_v39  ;;  %3309 = vst.msk [vmem:[#allocation3 + $0x110] sm:$0xff] %vm23871_vm4, %v3238_v55  ;;  %vm23875_vm8 = vmmov %vm23835_vm3  ;;  %v23892_v55 = vld [vmem:[#allocation42_spill] sm:$0xff] }
 0x37c   : > { %16908 = vmatprep.mubr.msk.f32.mxu0 %vm23872_vm12, %v3420_v59  ;;  %vm23876_vm4 = vmmov %vm23835_vm3  ;;  %vm23878_vm12 = vnez %v23877_v8  ;;  %v3434_v59 = vsel %vm21272_vm13, %v22041_v10, 0.0 }
 0x37d   : > { %v3424_v30 = vsel %vm23878_vm12, %v21991_v50, 0.0  ;;  %vm23886_vm12 = vmmov %vm23835_vm3 }
 0x37f   : > { %16909 = vmatmul.mubr.msk.f32.gmra.mrb[14].mxu0 %vm23835_vm3, %v21983_v15 }
 0x380   : > { %16911 = vmatprep.mubr.msk.f32.mxu0 %vm23875_vm8, %v3422_v43  ;;  %vm23881_vm8 = vnez %v23880_v13  ;;  %v22051_v43 = vld [vmem:[#allocation3 + $0xf7] sm:$0xff] }
 0x381   : > { %v3426_v63 = vsel %vm23881_vm8, %v22001_v44, 0.0 }
 0x383   : > { %16912 = vmatmul.mubr.msk.f32.gmra.mrb[16].mxu0 %vm23876_vm4, %v21993_v5  ;;  %vm23883_vm4 = vmmov %vm23835_vm3 }
 0x384   : > { %16914 = vmatprep.mubr.msk.f32.mxu0 %vm23879_vm9, %v3424_v30  ;;  %vm23885_vm9 = vnez %v23884_v22  ;;  %v22053_v30 = vld [vmem:[#allocation3 + $0xef] sm:$0xff] }
 0x385   : > { %v3428_v37 = vsel %vm23885_vm9, %v22011_v49, 0.0 }
 0x387   : > { %16915 = vmatmul.mubr.msk.f32.gmra.mrb[18].mxu0 %vm23835_vm3, %v22003_v32 }
 0x388   : > { %16917 = vmatprep.mubr.msk.f32.mxu0 %vm23882_vm14, %v3426_v63  ;;  %vm23888_vm14 = vmmov %vm23835_vm3  ;;  %v3436_v63 = vsel %vm21560_vm15, %v22051_v43, 0.0 }
 0x38b   : > { %16918 = vmatmul.mubr.msk.f32.gmra.mrb[20].mxu0 %vm23883_vm4, %v22013_v53  ;;  %vm23889_vm4 = vmmov %vm23835_vm3 }
 0x38c   : > { %16920 = vmatprep.mubr.msk.f32.mxu0 %vm23886_vm12, %v3428_v37  ;;  %vm23891_vm12 = vmmov %vm23835_vm3  ;;  %v4114_v37 = vld [vmem:[#allocation3 + $0x9] sm:$0xff] }
 0x38f   : > { %16921 = vmatmul.mubr.msk.f32.gmra.mrb[22].mxu0 %vm23835_vm3, %v22023_v9 }
 0x390   : > { %16923 = vmatprep.mubr.msk.f32.mxu0 %vm23888_vm14, %v3430_v21  ;;  %vm23893_vm14 = vmmov %vm23835_vm3  ;;  %v22061_v21 = vld [vmem:[#allocation3 + $0xff] sm:$0xff] }
 0x393   : > { %16924 = vmatmul.mubr.msk.f32.gmra.mrb[24].mxu0 %vm23889_vm4, %v22033_v11  ;;  %vm23894_vm4 = vmmov %vm23835_vm3 }
 0x394   : > { %16926 = vmatprep.mubr.msk.f32.mxu0 %vm23891_vm12, %v3432_v48  ;;  %vm23895_vm12 = vmmov %vm23835_vm3  ;;  %v4115_v48 = vld [vmem:[#allocation3 + $0x11] sm:$0xff] }
 0x397   : > { %16927 = vmatmul.mubr.msk.f32.gmra.mrb[26].mxu0 %vm23835_vm3, %v22043_v45 }
 0x398   : > { %16929 = vmatprep.mubr.msk.f32.mxu0 %vm23893_vm14, %v3434_v59  ;;  %vm23896_vm14 = vmmov %vm23835_vm3  ;;  %v23897_v59 = vld [vmem:[#allocation24_spill] sm:$0xff] }
 0x399   : > { %vm23898_vm13 = vnez %v23897_v59  ;;  %v22086_v59 = vld [vmem:[#allocation3 + $0x29] sm:$0xff] }
 0x39a   : > { %v4211_v3 = vsel %vm23898_vm13, %v4115_v48, 0.0  ;;  %23906 = vst [vmem:[#allocation22_spill] sm:$0xff] %v22086_v59 }
 0x39b   : > { %16930 = vmatmul.mubr.msk.f32.gmra.mrb[28].mxu0 %vm23894_vm4, %v22053_v30  ;;  %vm23899_vm4 = vmmov %vm23835_vm3 }
 0x39c   : > { %16932 = vmatprep.mubr.msk.f32.mxu0 %vm23895_vm12, %v3436_v63  ;;  %v22074_v63 = vld [vmem:[#allocation3 + $0x19] sm:$0xff]  ;;  %vm23902_vm12 = vmmov %vm23835_vm3 }
 0x39d   : > { %23900 = vst [vmem:[#allocation57_spill] sm:$0xff] %v22074_v63 }
 0x39f   : > { %16933 = vmatmul.mubr.msk.f32.gmra.mrb[30].mxu0 %vm23835_vm3, %v22061_v21 }
 0x3a0   : > { %16937 = vmatprep.mubr.msk.f32.mxu0 %vm23896_vm14, %v4114_v37  ;;  %v23903_v37 = vld [vmem:[#allocation25_spill] sm:$0xff]  ;;  %vm23905_vm14 = vmmov %vm23899_vm4 }
 0x3a1   : > { %vm23904_vm3 = vnez %v23903_v37 }
 0x3a2   : > { %v4213_v48 = vsel %vm23904_vm3, %v22076_v24, 0.0  ;;  %vm23913_vm3 = vmmov %vm23899_vm4  ;;  %v22108_v24 = vld [vmem:[#allocation3 + $0x51] sm:$0xff] }
 0x3a3   : > { %16938 = vmatmul.mubr.msk.f32.vlgmr.msra.gmra.mrb[0].mxu0 %vm23899_vm4, %v4211_v3  ;;  %v22088_v3 = vld [vmem:[#allocation3 + $0x31] sm:$0xff]  ;;  %vm23916_vm15 = vmmov %vm23913_vm3  ;;  %23918 = vst [vmem:[#allocation32_spill] sm:$0xff] %v22108_v24 }
 0x3a4   : > { %16986 = vmatpush3.msra.mxu0 %v21899_v33  ;;  %16940 = vmatprep.mubr.msk.f32.mxu0 %vm23902_vm12, %v22074_v63  ;;  %23907 = vst [vmem:[#allocation23_spill] sm:$0xff] %v22088_v3  ;;  %v23908_v33 = vld [vmem:[#allocation27_spill] sm:$0xff]  ;;  %vm23910_vm12 = vmmov %vm23899_vm4  ;;  %v22096_v63 = vld [vmem:[#allocation3 + $0x39] sm:$0xff] }
 0x3a5   : > { %17035 = vmatprep.subr.mxu0 %v22071_v40  ;;  %vm23909_vm13 = vnez %v23908_v33  ;;  %23911 = vst [vmem:[#allocation26_spill] sm:$0xff] %v22096_v63 }
 0x3a6   : > { %v4215_v2 = vsel %vm23909_vm13, %v22088_v3, 0.0  ;;  %vm23922_vm13 = vmmov %vm23913_vm3  ;;  %v22118_v3 = vld [vmem:[#allocation3 + $0x61] sm:$0xff] }
 0x3a7   : > { %16941 = vmatmul.mubr.msk.f32.gmra.mrb[2].mxu0 %vm23905_vm14, %v4213_v48  ;;  %v23914_v48 = vld [vmem:[#allocation29_spill] sm:$0xff]  ;;  %23924 = vst [vmem:[#allocation40_spill] sm:$0xff] %v22118_v3 }
 0x3a8   : > { %16943 = vmatprep.mubr.msk.f32.mxu0 %vm23899_vm4, %v22086_v59  ;;  %vm23915_vm14 = vnez %v23914_v48  ;;  %v22106_v59 = vld [vmem:[#allocation3 + $0x49] sm:$0xff]  ;;  %vm23919_vm4 = vmmov %vm23913_vm3 }
 0x3a9   : > { %v4217_v37 = vsel %vm23915_vm14, %v22098_v54, 0.0  ;;  %23917 = vst [vmem:[#allocation30_spill] sm:$0xff] %v22106_v59  ;;  %vm23927_vm14 = vmmov %vm23913_vm3  ;;  %v22128_v54 = vld [vmem:[#allocation3 + $0x71] sm:$0xff] }
 0x3aa   : > { %23929 = vst [vmem:[#allocation48_spill] sm:$0xff] %v22128_v54 }
 0x3ab   : > { %16944 = vmatmul.mubr.msk.f32.gmra.mrb[4].mxu0 %vm23910_vm12, %v4215_v2  ;;  %v23920_v2 = vld [vmem:[#allocation31_spill] sm:$0xff] }
 0x3ac   : > { %16946 = vmatprep.mubr.msk.f32.mxu0 %vm23913_vm3, %v22096_v63  ;;  %vm23921_vm12 = vnez %v23920_v2  ;;  %v22116_v63 = vld [vmem:[#allocation3 + $0x59] sm:$0xff] }
 0x3ad   : > { %v4219_v33 = vsel %vm23921_vm12, %v22108_v24, 0.0  ;;  %23923 = vst [vmem:[#allocation34_spill] sm:$0xff] %v22116_v63  ;;  %vm23933_vm12 = vmmov %vm23913_vm3  ;;  %v22138_v24 = vld [vmem:[#allocation3 + $0x81] sm:$0xff] }
 0x3ae   : > { %23935 = vst [vmem:[#allocation51_spill] sm:$0xff] %v22138_v24 }
 0x3af   : > { %16947 = vmatmul.mubr.msk.f32.gmra.mrb[6].mxu0 %vm23916_vm15, %v4217_v37  ;;  %v23925_v37 = vld [vmem:[#allocation33_spill] sm:$0xff] }
 0x3b0   : > { %16949 = vmatprep.mubr.msk.f32.mxu0 %vm23919_vm4, %v22106_v59  ;;  %vm23926_vm15 = vnez %v23925_v37  ;;  %v22126_v59 = vld [vmem:[#allocation3 + $0x69] sm:$0xff]  ;;  %vm23930_vm4 = vmmov %vm23913_vm3 }
 0x3b1   : > { %v4221_v48 = vsel %vm23926_vm15, %v22118_v3, 0.0  ;;  %23928 = vst [vmem:[#allocation46_spill] sm:$0xff] %v22126_v59  ;;  %vm23938_vm15 = vmmov %vm23913_vm3  ;;  %v22148_v3 = vld [vmem:[#allocation3 + $0x91] sm:$0xff] }
 0x3b2   : > { %23940 = vst [vmem:[#allocation35_spill] sm:$0xff] %v22148_v3 }
 0x3b3   : > { %16950 = vmatmul.mubr.msk.f32.gmra.mrb[8].mxu0 %vm23922_vm13, %v4219_v33  ;;  %v23931_v33 = vld [vmem:[#allocation38_spill] sm:$0xff] }
 0x3b4   : > { %16952 = vmatprep.mubr.msk.f32.mxu0 %vm23913_vm3, %v22116_v63  ;;  %vm23932_vm13 = vnez %v23931_v33  ;;  %v22136_v63 = vld [vmem:[#allocation3 + $0x79] sm:$0xff] }
 0x3b5   : > { %v4223_v2 = vsel %vm23932_vm13, %v22128_v54, 0.0  ;;  %23934 = vst [vmem:[#allocation36_spill] sm:$0xff] %v22136_v63  ;;  %vm23944_vm13 = vmmov %vm23913_vm3  ;;  %v22158_v54 = vld [vmem:[#allocation3 + $0xa1] sm:$0xff] }
 0x3b6   : > { %23946 = vst [vmem:[#allocation61_spill] sm:$0xff] %v22158_v54 }
 0x3b7   : > { %16953 = vmatmul.mubr.msk.f32.gmra.mrb[10].mxu0 %vm23927_vm14, %v4221_v48  ;;  %v23936_v48 = vld [vmem:[#allocation44_spill] sm:$0xff] }
 0x3b8   : > { %16955 = vmatprep.mubr.msk.f32.mxu0 %vm23930_vm4, %v22126_v59  ;;  %vm23937_vm14 = vnez %v23936_v48  ;;  %v22146_v59 = vld [vmem:[#allocation3 + $0x89] sm:$0xff]  ;;  %vm23941_vm4 = vmmov %vm23913_vm3 }
 0x3b9   : > { %v4225_v37 = vsel %vm23937_vm14, %v22138_v24, 0.0  ;;  %23939 = vst [vmem:[#allocation53_spill] sm:$0xff] %v22146_v59  ;;  %vm23949_vm14 = vmmov %vm23913_vm3  ;;  %v22168_v24 = vld [vmem:[#allocation3 + $0xb1] sm:$0xff] }
 0x3ba   : > { %23951 = vst [vmem:[#allocation63_spill] sm:$0xff] %v22168_v24 }
 0x3bb   : > { %16956 = vmatmul.mubr.msk.f32.gmra.mrb[12].mxu0 %vm23933_vm12, %v4223_v2  ;;  %v23942_v2 = vld [vmem:[#allocation47_spill] sm:$0xff] }
 0x3bc   : > { %16958 = vmatprep.mubr.msk.f32.mxu0 %vm23913_vm3, %v22136_v63  ;;  %vm23943_vm12 = vnez %v23942_v2  ;;  %v22156_v63 = vld [vmem:[#allocation3 + $0x99] sm:$0xff] }
 0x3bd   : > { %v4227_v33 = vsel %vm23943_vm12, %v22148_v3, 0.0  ;;  %23945 = vst [vmem:[#allocation60_spill] sm:$0xff] %v22156_v63  ;;  %vm23955_vm12 = vmmov %vm23913_vm3  ;;  %v22178_v3 = vld [vmem:[#allocation3 + $0xc1] sm:$0xff] }
 0x3be   : > { %23957 = vst [vmem:[#allocation65_spill] sm:$0xff] %v22178_v3 }
 0x3bf   : > { %16959 = vmatmul.mubr.msk.f32.gmra.mrb[14].mxu0 %vm23938_vm15, %v4225_v37  ;;  %v23947_v37 = vld [vmem:[#allocation41_spill] sm:$0xff] }
 0x3c0   : > { %16961 = vmatprep.mubr.msk.f32.mxu0 %vm23941_vm4, %v22146_v59  ;;  %vm23948_vm15 = vnez %v23947_v37  ;;  %v22166_v59 = vld [vmem:[#allocation3 + $0xa9] sm:$0xff]  ;;  %vm23952_vm4 = vmmov %vm23913_vm3  ;;  %v4233_v37 = vsel %vm20958_vm0, %v22178_v3, 0.0  ;;  %v22208_v3 = vld [vmem:[#allocation3 + $0xf1] sm:$0xff] }
 0x3c1   : > { %v4229_v48 = vsel %vm23948_vm15, %v22158_v54, 0.0  ;;  %23950 = vst [vmem:[#allocation62_spill] sm:$0xff] %v22166_v59  ;;  %v22188_v54 = vld [vmem:[#allocation3 + $0xd1] sm:$0xff]  ;;  %vm23968_vm0 = vmmov %vm23913_vm3 }
 0x3c3   : > { %16962 = vmatmul.mubr.msk.f32.gmra.mrb[16].mxu0 %vm23944_vm13, %v4227_v33  ;;  %v23953_v33 = vld [vmem:[#allocation39_spill] sm:$0xff] }
 0x3c4   : > { %16964 = vmatprep.mubr.msk.f32.mxu0 %vm23913_vm3, %v22156_v63  ;;  %vm23954_vm13 = vnez %v23953_v33  ;;  %v22176_v63 = vld [vmem:[#allocation3 + $0xb9] sm:$0xff] }
 0x3c5   : > { %v4231_v2 = vsel %vm23954_vm13, %v22168_v24, 0.0  ;;  %23956 = vst [vmem:[#allocation64_spill] sm:$0xff] %v22176_v63  ;;  %vm23964_vm13 = vmmov %vm23913_vm3  ;;  %v22198_v24 = vld [vmem:[#allocation3 + $0xe1] sm:$0xff] }
 0x3c7   : > { %16965 = vmatmul.mubr.msk.f32.gmra.mrb[18].mxu0 %vm23949_vm14, %v4229_v48  ;;  %vm23959_vm14 = vmmov %vm23913_vm3 }
 0x3c8   : > { %16967 = vmatprep.mubr.msk.f32.mxu0 %vm23952_vm4, %v22166_v59  ;;  %v22186_v59 = vld [vmem:[#allocation3 + $0xc9] sm:$0xff]  ;;  %vm23961_vm4 = vmmov %vm23913_vm3 }
 0x3c9   : > { %23960 = vst [vmem:[#allocation66_spill] sm:$0xff] %v22186_v59 }
 0x3cb   : > { %16968 = vmatmul.mubr.msk.f32.gmra.mrb[20].mxu0 %vm23955_vm12, %v4231_v2  ;;  %v23962_v2 = vld [vmem:[#allocation54_spill] sm:$0xff] }
 0x3cc   : > { %16970 = vmatprep.mubr.msk.f32.mxu0 %vm23913_vm3, %v22176_v63  ;;  %vm23963_vm12 = vnez %v23962_v2  ;;  %v22196_v63 = vld [vmem:[#allocation3 + $0xd9] sm:$0xff] }
 0x3cd   : > { %v4235_v33 = vsel %vm23963_vm12, %v22188_v54, 0.0  ;;  %23965 = vst [vmem:[#allocation67_spill] sm:$0xff] %v22196_v63  ;;  %vm23971_vm12 = vmmov %vm23968_vm0  ;;  %v22216_v2 = vld [vmem:[#allocation3 + $0xf9] sm:$0xff] }
 0x3cf   : > { %16971 = vmatmul.mubr.msk.f32.gmra.mrb[22].mxu0 %vm23959_vm14, %v4233_v37  ;;  %v23966_v37 = vld [vmem:[#allocation56_spill] sm:$0xff] }
 0x3d0   : > { %16973 = vmatprep.mubr.msk.f32.mxu0 %vm23961_vm4, %v22186_v59  ;;  %vm23967_vm14 = vnez %v23966_v37  ;;  %v22206_v59 = vld [vmem:[#allocation3 + $0xe9] sm:$0xff]  ;;  %vm23969_vm4 = vmmov %vm23968_vm0 }
 0x3d1   : > { %v4237_v48 = vsel %vm23967_vm14, %v22198_v24, 0.0 }
 0x3d3   : > { %16974 = vmatmul.mubr.msk.f32.gmra.mrb[24].mxu0 %vm23964_vm13, %v4235_v33  ;;  %vm23970_vm13 = vnez %v23811_v34  ;;  %v4628_v34 = vsel %vm19871_vm1, %v21893_v51, 0.0  ;;  %v4634_v51 = vsel %vm19941_vm7, %v21935_v38, 0.0 }
 0x3d4   : > { %16976 = vmatprep.mubr.msk.f32.mxu0 %vm23913_vm3, %v22196_v63  ;;  %v4239_v33 = vsel %vm23970_vm13, %v22208_v3, 0.0  ;;  %v22218_v63 = vld [vmem:[#allocation3 + $0x101] sm:$0xff]  ;;  %vm23972_vm3 = vmmov %vm23968_vm0 }
 0x3d5   : > { %vm23974_vm14 = vmmov %vm23972_vm3 }
 0x3d7   : > { %16977 = vmatmul.mubr.msk.f32.gmra.mrb[26].mxu0 %vm23968_vm0, %v4237_v48  ;;  %vm23973_vm0 = vnez %v23826_v42  ;;  %v4630_v42 = vsel %vm19887_vm2, %v21907_v23, 0.0  ;;  %vm23980_vm2 = vmmov %vm23972_vm3 }
 0x3d8   : > { %16979 = vmatprep.mubr.msk.f32.mxu0 %vm23969_vm4, %v22206_v59  ;;  %v4241_v48 = vsel %vm23973_vm0, %v22218_v63, 0.0  ;;  %vm23975_vm4 = vmmov %vm23972_vm3 }
 0x3d9   : > { %vm23987_vm7 = vmmov %vm23980_vm2 }
 0x3db   : > { %16980 = vmatmul.mubr.msk.f32.gmra.mrb[28].mxu0 %vm23971_vm12, %v4239_v33  ;;  %v5464_v33 = vld [vmem:[%s23429_s3 + $0x28] sm:$0xff]  ;;  %vm23976_vm12 = vmmov %vm23972_vm3 }
 0x3dc   : > { %16982 = vmatprep.mubr.msk.f32.mxu0 %vm23972_vm3, %v22216_v2 }
 0x3df   : > { %16983 = vmatmul.mubr.msk.f32.gmra.mrb[30].mxu0 %vm23974_vm14, %v4241_v48  ;;  %vm23977_vm14 = vmmov %vm23972_vm3 }
 0x3e0   : > { %16987 = vmatprep.mubr.msk.f32.mxu0 %vm23975_vm4, %v4628_v34  ;;  %v4632_v34 = vsel %vm19911_vm5, %v21922_v1, 0.0  ;;  %vm23978_vm4 = vmmov %vm23972_vm3 }
 0x3e1   : > { %vm23985_vm5 = vmmov %vm23980_vm2 }
 0x3e3   : > { %16988 = vmatmul.mubr.msk.f32.vlgmr.msra.gmra.mrb[0].mxu0 %vm23976_vm12, %v21913_v27  ;;  %vm23979_vm12 = vmmov %vm23972_vm3 }
 0x3e4   : > { %17036 = vmatpush3.msra.mxu0 %v22071_v40  ;;  %16990 = vmatprep.mubr.msk.f32.mxu0 %vm23977_vm14, %v4630_v42  ;;  %vm23981_vm14 = vmmov %vm23980_vm2  ;;  %v4636_v42 = vsel %vm20068_vm10, %v21947_v6, 0.0 }
 0x3e5   : > { %17085 = vmatprep.subr.mxu0 %v5464_v33  ;;  %vm23990_vm10 = vmmov %vm23980_vm2 }
 0x3e7   : > { %16991 = vmatmul.mubr.msk.f32.gmra.mrb[2].mxu0 %vm23972_vm3, %v21926_v35  ;;  %vm23982_vm3 = vmmov %vm23980_vm2 }
 0x3e8   : > { %16993 = vmatprep.mubr.msk.f32.mxu0 %vm23978_vm4, %v4632_v34  ;;  %vm23983_vm4 = vmmov %vm23980_vm2 }
 0x3eb   : > { %16994 = vmatmul.mubr.msk.f32.gmra.mrb[4].mxu0 %vm23979_vm12, %v21938_v28  ;;  %vm23984_vm12 = vnez %v23864_v18 }
 0x3ec   : > { %16996 = vmatprep.mubr.msk.f32.mxu0 %vm23980_vm2, %v4634_v51  ;;  %v4638_v40 = vsel %vm23984_vm12, %v21959_v36, 0.0 }
 0x3ef   : > { %16997 = vmatmul.mubr.msk.f32.gmra.mrb[6].mxu0 %vm23981_vm14, %v21950_v16  ;;  %vm23986_vm14 = vnez %v23867_v58 }
 0x3f0   : > { %16999 = vmatprep.mubr.msk.f32.mxu0 %vm23982_vm3, %v4636_v42  ;;  %v4640_v27 = vsel %vm23986_vm14, %v21970_v47, 0.0  ;;  %vm23988_vm3 = vmmov %vm23980_vm2  ;;  %v4648_v42 = vsel %vm23881_vm8, %v22011_v49, 0.0 }
 0x3f1   : > { %vm23993_vm12 = vmmov %vm23988_vm3 }
 0x3f3   : > { %17000 = vmatmul.mubr.msk.f32.gmra.mrb[8].mxu0 %vm23983_vm4, %v21961_v61  ;;  %vm23989_vm4 = vnez %v23869_v29 }
 0x3f4   : > { %17002 = vmatprep.mubr.msk.f32.mxu0 %vm23985_vm5, %v4638_v40  ;;  %v4642_v48 = vsel %vm23989_vm4, %v21981_v52, 0.0  ;;  %vm23991_vm5 = vmmov %vm23980_vm2  ;;  %v4650_v40 = vsel %vm23885_vm9, %v22021_v62, 0.0 }
 0x3f5   : > { %vm23996_vm14 = vmmov %vm23991_vm5 }
 0x3f6   : > { %vm24005_vm9 = vmmov %vm23991_vm5 }
 0x3f7   : > { %17003 = vmatmul.mubr.msk.f32.gmra.mrb[10].mxu0 %vm23980_vm2, %v21972_v39  ;;  %vm23992_vm2 = vnez %v23873_v31 }
 0x3f8   : > { %17005 = vmatprep.mubr.msk.f32.mxu0 %vm23987_vm7, %v4640_v27  ;;  %v4644_v34 = vsel %vm23992_vm2, %v21991_v50, 0.0  ;;  %vm23994_vm7 = vmmov %vm23988_vm3  ;;  %v4652_v27 = vsel %vm20987_vm6, %v22031_v7, 0.0 }
 0x3fb   : > { %17006 = vmatmul.mubr.msk.f32.gmra.mrb[12].mxu0 %vm23988_vm3, %v21983_v15  ;;  %vm23995_vm3 = vnez %v23877_v8 }
 0x3fc   : > { %17008 = vmatprep.mubr.msk.f32.mxu0 %vm23990_vm10, %v4642_v48  ;;  %v4646_v51 = vsel %vm23995_vm3, %v22001_v44, 0.0  ;;  %vm23997_vm10 = vmmov %vm23991_vm5  ;;  %v4654_v48 = vsel %vm21122_vm11, %v22041_v10, 0.0 }
 0x3ff   : > { %17009 = vmatmul.mubr.msk.f32.gmra.mrb[14].mxu0 %vm23991_vm5, %v21993_v5 }
 0x400   : > { %17011 = vmatprep.mubr.msk.f32.mxu0 %vm23993_vm12, %v4644_v34  ;;  %vm23998_vm12 = vmmov %vm23991_vm5 }
 0x403   : > { %17012 = vmatmul.mubr.msk.f32.gmra.mrb[16].mxu0 %vm23994_vm7, %v22003_v32  ;;  %vm23999_vm7 = vmmov %vm23991_vm5 }
 0x404   : > { %17014 = vmatprep.mubr.msk.f32.mxu0 %vm23996_vm14, %v4646_v51  ;;  %vm24000_vm14 = vmmov %vm23991_vm5  ;;  %v22318_v51 = vld [vmem:[#allocation3 + $0x107] sm:$0xff] }
 0x407   : > { %17015 = vmatmul.mubr.msk.f32.gmra.mrb[18].mxu0 %vm23997_vm10, %v22013_v53  ;;  %vm24001_vm10 = vmmov %vm23991_vm5 }
 0x408   : > { %17017 = vmatprep.mubr.msk.f32.mxu0 %vm23991_vm5, %v4648_v42 }
 0x40b   : > { %17018 = vmatmul.mubr.msk.f32.gmra.mrb[20].mxu0 %vm23998_vm12, %v22023_v9  ;;  %vm24002_vm12 = vmmov %vm23991_vm5 }
 0x40c   : > { %17020 = vmatprep.mubr.msk.f32.mxu0 %vm23999_vm7, %v4650_v40  ;;  %vm24003_vm7 = vmmov %vm23991_vm5  ;;  %v22326_v40 = vld [vmem:[#allocation3 + $0x10f] sm:$0xff] }
 0x40d   : > { %vm24008_vm11 = vmmov %vm24003_vm7 }
 0x40f   : > { %17021 = vmatmul.mubr.msk.f32.gmra.mrb[22].mxu0 %vm24000_vm14, %v22033_v11  ;;  %vm24004_vm14 = vnez %v23892_v55  ;;  %v22335_v55 = vld [vmem:[#allocation3 + $0x28] sm:$0xff] }
 0x410   : > { %17023 = vmatprep.mubr.msk.f32.mxu0 %vm24001_vm10, %v4652_v27  ;;  %v4656_v34 = vsel %vm24004_vm14, %v22051_v43, 0.0  ;;  %vm24006_vm10 = vmmov %vm23991_vm5  ;;  %v5014_v27 = vld [vmem:[#allocation3 + $0x18] sm:$0xff] }
 0x413   : > { %17024 = vmatmul.mubr.msk.f32.gmra.mrb[24].mxu0 %vm23991_vm5, %v22043_v45  ;;  %vm24007_vm5 = vnez %v23822_v25  ;;  %v22347_v25 = vld [vmem:[#allocation3 + $0x40] sm:$0xff] }
 0x414   : > { %17026 = vmatprep.mubr.msk.f32.mxu0 %vm24002_vm12, %v4654_v48  ;;  %v4658_v42 = vsel %vm24007_vm5, %v22318_v51, 0.0  ;;  %vm24009_vm12 = vmmov %vm24003_vm7  ;;  %v5015_v48 = vld [vmem:[#allocation3 + $0x20] sm:$0xff]  ;;  %24016 = vst [vmem:[#allocation70_spill] sm:$0xff] %v22347_v25 }
 0x415   : > { %vm24044_vm5 = vmmov %vm24003_vm7 }
 0x416   : > { %vm24046_vm14 = vmmov %vm24044_vm5 }
 0x417   : > { %17027 = vmatmul.mubr.msk.f32.gmra.mrb[26].mxu0 %vm24003_vm7, %v22053_v30 }
 0x418   : > { %17029 = vmatprep.mubr.msk.f32.mxu0 %vm24005_vm9, %v4656_v34  ;;  %v5882_v34 = vld [vmem:[%s23429_s3 + $0x30] sm:$0xff]  ;;  %vm24010_vm9 = vmmov %vm24003_vm7 }
 0x41b   : > { %17030 = vmatmul.mubr.msk.f32.gmra.mrb[28].mxu0 %vm24006_vm10, %v22061_v21  ;;  %vm24013_vm10 = vmmov %vm24003_vm7 }
 0x41c   : > { %17032 = vmatprep.mubr.msk.f32.mxu0 %vm24008_vm11, %v4658_v42  ;;  %vm24011_vm11 = vmmov %vm24003_vm7  ;;  %v22339_v42 = vld [vmem:[#allocation3 + $0x30] sm:$0xff] }
 0x41d   : > { %24012 = vst [vmem:[#allocation68_spill] sm:$0xff] %v22339_v42 }
 0x41f   : > { %17033 = vmatmul.mubr.msk.f32.gmra.mrb[30].mxu0 %vm24009_vm12, %v22326_v40  ;;  %vm24015_vm12 = vmmov %vm24003_vm7 }
 0x420   : > { %17037 = vmatprep.mubr.msk.f32.mxu0 %vm24003_vm7, %v5014_v27  ;;  %v22343_v27 = vld [vmem:[#allocation3 + $0x38] sm:$0xff] }
 0x421   : > { %24014 = vst [vmem:[#allocation69_spill] sm:$0xff] %v22343_v27 }
 0x423   : > { %17038 = vmatmul.mubr.msk.f32.vlgmr.msra.gmra.mrb[0].mxu0 %vm24010_vm9, %v5015_v48  ;;  %vm24018_vm9 = vmmov %vm24003_vm7  ;;  %v22355_v48 = vld [vmem:[#allocation3 + $0x50] sm:$0xff] }
 0x424   : > { %17086 = vmatpush3.msra.mxu0 %v5464_v33  ;;  %17040 = vmatprep.mubr.msk.f32.mxu0 %vm24011_vm11, %v22335_v55  ;;  %v22351_v33 = vld [vmem:[#allocation3 + $0x48] sm:$0xff]  ;;  %24019 = vst [vmem:[#allocation72_spill] sm:$0xff] %v22355_v48  ;;  %vm24020_vm11 = vmmov %vm24003_vm7  ;;  %v24183_v29 = vld [vmem:[#allocation68_spill] sm:$0xff] }
 0x425   : > { %17135 = vmatprep.subr.mxu0 %v5882_v34  ;;  %24017 = vst [vmem:[#allocation71_spill] sm:$0xff] %v22351_v33 }
 0x427   : > { %17041 = vmatmul.mubr.msk.f32.gmra.mrb[2].mxu0 %vm24013_vm10, %v22339_v42  ;;  %v22359_v42 = vld [vmem:[#allocation3 + $0x58] sm:$0xff]  ;;  %vm24022_vm10 = vmmov %vm24003_vm7 }
 0x428   : > { %17043 = vmatprep.mubr.msk.f32.mxu0 %vm24015_vm12, %v22343_v27  ;;  %24021 = vst [vmem:[#allocation73_spill] sm:$0xff] %v22359_v42  ;;  %v22363_v27 = vld [vmem:[#allocation3 + $0x60] sm:$0xff]  ;;  %vm24024_vm12 = vmmov %vm24003_vm7 }
 0x429   : > { %24023 = vst [vmem:[#allocation74_spill] sm:$0xff] %v22363_v27 }
 0x42b   : > { %17044 = vmatmul.mubr.msk.f32.gmra.mrb[4].mxu0 %vm24003_vm7, %v22347_v25  ;;  %v22367_v25 = vld [vmem:[#allocation3 + $0x68] sm:$0xff] }
 0x42c   : > { %17046 = vmatprep.mubr.msk.f32.mxu0 %vm24018_vm9, %v22351_v33  ;;  %24025 = vst [vmem:[#allocation75_spill] sm:$0xff] %v22367_v25  ;;  %v22371_v33 = vld [vmem:[#allocation3 + $0x70] sm:$0xff]  ;;  %vm24027_vm9 = vmmov %vm24003_vm7 }
 0x42d   : > { %24026 = vst [vmem:[#allocation76_spill] sm:$0xff] %v22371_v33  ;;  %v24188_v31 = vld [vmem:[#allocation71_spill] sm:$0xff] }
 0x42f   : > { %17047 = vmatmul.mubr.msk.f32.gmra.mrb[6].mxu0 %vm24020_vm11, %v22355_v48  ;;  %v22375_v48 = vld [vmem:[#allocation3 + $0x78] sm:$0xff]  ;;  %vm24029_vm11 = vmmov %vm24003_vm7 }
 0x430   : > { %17049 = vmatprep.mubr.msk.f32.mxu0 %vm24022_vm10, %v22359_v42  ;;  %24028 = vst [vmem:[#allocation77_spill] sm:$0xff] %v22375_v48  ;;  %v22379_v42 = vld [vmem:[#allocation3 + $0x80] sm:$0xff]  ;;  %vm24031_vm10 = vmmov %vm24003_vm7 }
 0x431   : > { %24030 = vst [vmem:[#allocation78_spill] sm:$0xff] %v22379_v42  ;;  %v24194_v8 = vld [vmem:[#allocation74_spill] sm:$0xff] }
 0x433   : > { %17050 = vmatmul.mubr.msk.f32.gmra.mrb[8].mxu0 %vm24024_vm12, %v22363_v27  ;;  %v22383_v27 = vld [vmem:[#allocation3 + $0x88] sm:$0xff]  ;;  %vm24033_vm12 = vmmov %vm24003_vm7 }
 0x434   : > { %17052 = vmatprep.mubr.msk.f32.mxu0 %vm24003_vm7, %v22367_v25  ;;  %24032 = vst [vmem:[#allocation79_spill] sm:$0xff] %v22383_v27  ;;  %v22387_v25 = vld [vmem:[#allocation3 + $0x90] sm:$0xff] }
 0x435   : > { %24034 = vst [vmem:[#allocation80_spill] sm:$0xff] %v22387_v25 }
 0x437   : > { %17053 = vmatmul.mubr.msk.f32.gmra.mrb[10].mxu0 %vm24027_vm9, %v22371_v33  ;;  %v22391_v33 = vld [vmem:[#allocation3 + $0x98] sm:$0xff]  ;;  %vm24036_vm9 = vmmov %vm24003_vm7 }
 0x438   : > { %17055 = vmatprep.mubr.msk.f32.mxu0 %vm24029_vm11, %v22375_v48  ;;  %24035 = vst [vmem:[#allocation81_spill] sm:$0xff] %v22391_v33  ;;  %v22395_v48 = vld [vmem:[#allocation3 + $0xa0] sm:$0xff]  ;;  %vm24038_vm11 = vmmov %vm24003_vm7 }
 0x439   : > { %24037 = vst [vmem:[#allocation82_spill] sm:$0xff] %v22395_v48  ;;  %v24200_v13 = vld [vmem:[#allocation77_spill] sm:$0xff] }
 0x43b   : > { %17056 = vmatmul.mubr.msk.f32.gmra.mrb[12].mxu0 %vm24031_vm10, %v22379_v42  ;;  %v22399_v42 = vld [vmem:[#allocation3 + $0xa8] sm:$0xff]  ;;  %vm24040_vm10 = vmmov %vm24003_vm7 }
 0x43c   : > { %17058 = vmatprep.mubr.msk.f32.mxu0 %vm24033_vm12, %v22383_v27  ;;  %24039 = vst [vmem:[#allocation83_spill] sm:$0xff] %v22399_v42  ;;  %v22403_v27 = vld [vmem:[#allocation3 + $0xb0] sm:$0xff]  ;;  %vm24042_vm12 = vmmov %vm24003_vm7 }
 0x43d   : > { %24041 = vst [vmem:[#allocation84_spill] sm:$0xff] %v22403_v27 }
 0x43f   : > { %17059 = vmatmul.mubr.msk.f32.gmra.mrb[14].mxu0 %vm24003_vm7, %v22387_v25 }
 0x440   : > { %17061 = vmatprep.mubr.msk.f32.mxu0 %vm24036_vm9, %v22391_v33  ;;  %vm24043_vm9 = vmmov %vm24003_vm7 }
 0x443   : > { %17062 = vmatmul.mubr.msk.f32.gmra.mrb[16].mxu0 %vm24038_vm11, %v22395_v48  ;;  %vm24045_vm11 = vmmov %vm24044_vm5 }
 0x444   : > { %17064 = vmatprep.mubr.msk.f32.mxu0 %vm24040_vm10, %v22399_v42  ;;  %vm24047_vm10 = vmmov %vm24044_vm5  ;;  %v24048_v42 = vld [vmem:[#allocation58_spill] sm:$0xff] }
 0x447   : > { %17065 = vmatmul.mubr.msk.f32.gmra.mrb[18].mxu0 %vm24042_vm12, %v22403_v27  ;;  %vm24049_vm12 = vmmov %vm24044_vm5  ;;  %v24050_v27 = vld [vmem:[#allocation37_spill] sm:$0xff] }
 0x448   : > { %17067 = vmatprep.mubr.msk.f32.mxu0 %vm24003_vm7, %v21690_v41  ;;  %vm24051_vm7 = vmmov %vm24044_vm5  ;;  %v24052_v41 = vld [vmem:[#allocation49_spill] sm:$0xff] }
 0x44b   : > { %17068 = vmatmul.mubr.msk.f32.gmra.mrb[20].mxu0 %vm24043_vm9, %v21701_v14  ;;  %vm24053_vm9 = vmmov %vm24044_vm5  ;;  %v24054_v14 = vld [vmem:[#allocation59_spill] sm:$0xff] }
 0x44c   : > { %17070 = vmatprep.mubr.msk.f32.mxu0 %vm24044_vm5, %v21732_v0  ;;  %v22427_v0 = vld [vmem:[#allocation3 + $0x108] sm:$0xff] }
 0x44d   : > { %24055 = vst [vmem:[#allocation58_spill] sm:$0xff] %v22427_v0 }
 0x44f   : > { %17071 = vmatmul.mubr.msk.f32.gmra.mrb[22].mxu0 %vm24045_vm11, %v21761_v46  ;;  %vm24056_vm11 = vmmov %vm24044_vm5  ;;  %v22431_v46 = vld [vmem:[#allocation3 + $0x110] sm:$0xff] }
 0x450   : > { %17073 = vmatprep.mubr.msk.f32.mxu0 %vm24046_vm14, %v21835_v56  ;;  %24057 = vst [vmem:[#allocation37_spill] sm:$0xff] %v22431_v46  ;;  %vm24058_vm14 = vmmov %vm24044_vm5  ;;  %v24059_v56 = vld [vmem:[#allocation57_spill] sm:$0xff] }
 0x453   : > { %17074 = vmatmul.mubr.msk.f32.gmra.mrb[24].mxu0 %vm24047_vm10, %v21846_v26  ;;  %vm24060_vm10 = vmmov %vm24044_vm5  ;;  %v24061_v26 = vld [vmem:[#allocation50_spill] sm:$0xff] }
 0x454   : > { %17076 = vmatprep.mubr.msk.f32.mxu0 %vm24049_vm12, %v24048_v42  ;;  %v24062_v42 = vld [vmem:[#allocation24_spill] sm:$0xff] }
 0x455   : > { %vm24063_vm12 = vnez %v24062_v42  ;;  %v24074_v42 = vld [vmem:[#allocation27_spill] sm:$0xff] }
 0x457   : > { %17077 = vmatmul.mubr.msk.f32.gmra.mrb[26].mxu0 %vm24051_vm7, %v24050_v27  ;;  %v5433_v27 = vsel %vm24063_vm12, %v24061_v26, 0.0  ;;  %vm24064_vm7 = vmmov %vm24044_vm5  ;;  %v24073_v26 = vld [vmem:[#allocation28_spill] sm:$0xff] }
 0x458   : > { %17079 = vmatprep.mubr.msk.f32.mxu0 %vm24053_vm9, %v24052_v41  ;;  %v6268_v41 = vld [vmem:[%s23429_s3 + $0x38] sm:$0xff]  ;;  %vm24066_vm9 = vmmov %vm24044_vm5 }
 0x459   : > { %vm24076_vm12 = vmmov %vm24064_vm7 }
 0x45a   : > { %vm24081_vm6 = vmmov %vm24064_vm7 }
 0x45b   : > { %17080 = vmatmul.mubr.msk.f32.gmra.mrb[28].mxu0 %vm24044_vm5, %v24054_v14  ;;  %v24065_v14 = vld [vmem:[#allocation22_spill] sm:$0xff] }
 0x45c   : > { %17082 = vmatprep.mubr.msk.f32.mxu0 %vm24056_vm11, %v22427_v0  ;;  %v24067_v0 = vld [vmem:[#allocation23_spill] sm:$0xff]  ;;  %vm24070_vm11 = vmmov %vm24064_vm7 }
 0x45f   : > { %17083 = vmatmul.mubr.msk.f32.gmra.mrb[30].mxu0 %vm24058_vm14, %v22431_v46  ;;  %v24068_v46 = vld [vmem:[#allocation25_spill] sm:$0xff]  ;;  %vm24072_vm14 = vmmov %vm24064_vm7 }
 0x460   : > { %17087 = vmatprep.mubr.msk.f32.mxu0 %vm24060_vm10, %v24059_v56  ;;  %vm24069_vm5 = vnez %v24068_v46  ;;  %v24071_v56 = vld [vmem:[#allocation26_spill] sm:$0xff]  ;;  %vm24075_vm10 = vnez %v24074_v42 }
 0x461   : > { %v5435_v48 = vsel %vm24069_vm5, %v24067_v0, 0.0  ;;  %v5437_v33 = vsel %vm24075_vm10, %v24073_v26, 0.0  ;;  %v24082_v46 = vld [vmem:[#allocation34_spill] sm:$0xff]  ;;  %vm24087_vm5 = vmmov %vm24081_vm6 }
 0x462   : > { %v24088_v42 = vld [vmem:[#allocation46_spill] sm:$0xff]  ;;  %vm24093_vm10 = vmmov %vm24087_vm5 }
 0x463   : > { %17088 = vmatmul.mubr.msk.f32.vlgmr.msra.gmra.mrb[0].mxu0 %vm24064_vm7, %v5433_v27  ;;  %v24078_v27 = vld [vmem:[#allocation32_spill] sm:$0xff] }
 0x464   : > { %17136 = vmatpush3.msra.mxu0 %v5882_v34  ;;  %17090 = vmatprep.mubr.msk.f32.mxu0 %vm24066_vm9, %v24065_v14  ;;  %v24077_v34 = vld [vmem:[#allocation30_spill] sm:$0xff]  ;;  %v24079_v14 = vld [vmem:[#allocation29_spill] sm:$0xff] }
 0x465   : > { %17185 = vmatprep.subr.mxu0 %v6268_v41  ;;  %vm24080_vm9 = vnez %v24079_v14  ;;  %v24094_v14 = vld [vmem:[#allocation36_spill] sm:$0xff] }
 0x466   : > { %v5439_v25 = vsel %vm24080_vm9, %v24078_v27, 0.0  ;;  %vm24099_vm9 = vmmov %vm24087_vm5 }
 0x467   : > { %17091 = vmatmul.mubr.msk.f32.gmra.mrb[2].mxu0 %vm24070_vm11, %v5435_v48  ;;  %vm24083_vm11 = vmmov %vm24081_vm6  ;;  %v24084_v48 = vld [vmem:[#allocation40_spill] sm:$0xff] }
 0x468   : > { %17093 = vmatprep.mubr.msk.f32.mxu0 %vm24072_vm14, %v24071_v56  ;;  %v24085_v56 = vld [vmem:[#allocation31_spill] sm:$0xff] }
 0x469   : > { %vm24086_vm14 = vnez %v24085_v56  ;;  %v24100_v56 = vld [vmem:[#allocation53_spill] sm:$0xff] }
 0x46a   : > { %v5441_v0 = vsel %vm24086_vm14, %v24084_v48, 0.0  ;;  %vm24104_vm14 = vmmov %vm24087_vm5 }
 0x46b   : > { %17094 = vmatmul.mubr.msk.f32.gmra.mrb[4].mxu0 %vm24076_vm12, %v5437_v33  ;;  %vm24089_vm12 = vmmov %vm24087_vm5  ;;  %v24090_v33 = vld [vmem:[#allocation48_spill] sm:$0xff] }
 0x46c   : > { %17096 = vmatprep.mubr.msk.f32.mxu0 %vm24064_vm7, %v24077_v34  ;;  %v24091_v34 = vld [vmem:[#allocation33_spill] sm:$0xff] }
 0x46d   : > { %vm24092_vm7 = vnez %v24091_v34  ;;  %v24105_v34 = vld [vmem:[#allocation60_spill] sm:$0xff] }
 0x46e   : > { %v5443_v26 = vsel %vm24092_vm7, %v24090_v33, 0.0  ;;  %vm24110_vm7 = vmmov %vm24087_vm5 }
 0x46f   : > { %17097 = vmatmul.mubr.msk.f32.gmra.mrb[6].mxu0 %vm24081_vm6, %v5439_v25  ;;  %vm24095_vm6 = vmmov %vm24087_vm5  ;;  %v24096_v25 = vld [vmem:[#allocation51_spill] sm:$0xff] }
 0x470   : > { %17099 = vmatprep.mubr.msk.f32.mxu0 %vm24083_vm11, %v24082_v46  ;;  %v24097_v46 = vld [vmem:[#allocation38_spill] sm:$0xff] }
 0x471   : > { %vm24098_vm11 = vnez %v24097_v46  ;;  %v24111_v46 = vld [vmem:[#allocation62_spill] sm:$0xff] }
 0x472   : > { %v5445_v27 = vsel %vm24098_vm11, %v24096_v25, 0.0 }
 0x473   : > { %17100 = vmatmul.mubr.msk.f32.gmra.mrb[8].mxu0 %vm24087_vm5, %v5441_v0  ;;  %v24101_v0 = vld [vmem:[#allocation35_spill] sm:$0xff] }
 0x474   : > { %17102 = vmatprep.mubr.msk.f32.mxu0 %vm24089_vm12, %v24088_v42  ;;  %v24102_v42 = vld [vmem:[#allocation44_spill] sm:$0xff] }
 0x475   : > { %vm24103_vm12 = vnez %v24102_v42  ;;  %v24115_v42 = vld [vmem:[#allocation64_spill] sm:$0xff] }
 0x476   : > { %v5447_v48 = vsel %vm24103_vm12, %v24101_v0, 0.0  ;;  %vm24120_vm12 = vmmov %vm24087_vm5 }
 0x477   : > { %17103 = vmatmul.mubr.msk.f32.gmra.mrb[10].mxu0 %vm24093_vm10, %v5443_v26  ;;  %vm24106_vm10 = vmmov %vm24087_vm5  ;;  %v24107_v26 = vld [vmem:[#allocation61_spill] sm:$0xff] }
 0x478   : > { %17105 = vmatprep.mubr.msk.f32.mxu0 %vm24095_vm6, %v24094_v14  ;;  %v24108_v14 = vld [vmem:[#allocation47_spill] sm:$0xff] }
 0x479   : > { %vm24109_vm6 = vnez %v24108_v14  ;;  %v24121_v14 = vld [vmem:[#allocation66_spill] sm:$0xff] }
 0x47a   : > { %v5449_v33 = vsel %vm24109_vm6, %v24107_v26, 0.0  ;;  %vm24125_vm6 = vmmov %vm24087_vm5 }
 0x47b   : > { %17106 = vmatmul.mubr.msk.f32.gmra.mrb[12].mxu0 %vm24099_vm9, %v5445_v27  ;;  %vm24112_vm9 = vmmov %vm24087_vm5  ;;  %v24113_v27 = vld [vmem:[#allocation63_spill] sm:$0xff] }
 0x47c   : > { %17108 = vmatprep.mubr.msk.f32.mxu0 %vm24087_vm5, %v24100_v56  ;;  %v5451_v25 = vsel %vm23948_vm15, %v24113_v27, 0.0  ;;  %v24126_v56 = vld [vmem:[#allocation67_spill] sm:$0xff]  ;;  %vm24129_vm15 = vmmov %vm24087_vm5 }
 0x47f   : > { %17109 = vmatmul.mubr.msk.f32.gmra.mrb[14].mxu0 %vm24104_vm14, %v5447_v48  ;;  %vm24116_vm14 = vmmov %vm24087_vm5  ;;  %v24117_v48 = vld [vmem:[#allocation65_spill] sm:$0xff] }
 0x480   : > { %17111 = vmatprep.mubr.msk.f32.mxu0 %vm24106_vm10, %v24105_v34  ;;  %v24118_v34 = vld [vmem:[#allocation39_spill] sm:$0xff] }
 0x481   : > { %vm24119_vm10 = vnez %v24118_v34 }
 0x482   : > { %v5453_v0 = vsel %vm24119_vm10, %v24117_v48, 0.0  ;;  %vm24132_vm10 = vmmov %vm24087_vm5 }
 0x483   : > { %17112 = vmatmul.mubr.msk.f32.gmra.mrb[16].mxu0 %vm24110_vm7, %v5449_v33  ;;  %vm24122_vm7 = vmmov %vm24087_vm5  ;;  %v24123_v33 = vld [vmem:[#allocation45_spill] sm:$0xff] }
 0x484   : > { %17114 = vmatprep.mubr.msk.f32.mxu0 %vm24112_vm9, %v24111_v46  ;;  %vm24124_vm9 = vnez %v24123_v33  ;;  %v5461_v33 = vsel %vm23970_vm13, %v22218_v63, 0.0 }
 0x485   : > { %v5455_v46 = vsel %vm24124_vm9, %v22188_v54, 0.0 }
 0x487   : > { %17115 = vmatmul.mubr.msk.f32.gmra.mrb[18].mxu0 %vm24087_vm5, %v5451_v25  ;;  %v24127_v25 = vld [vmem:[#allocation54_spill] sm:$0xff] }
 0x488   : > { %17117 = vmatprep.mubr.msk.f32.mxu0 %vm24116_vm14, %v24115_v42  ;;  %vm24128_vm14 = vnez %v24127_v25  ;;  %v22528_v25 = vld [vmem:[#allocation3 + $0x109] sm:$0xff] }
 0x489   : > { %v5457_v42 = vsel %vm24128_vm14, %v22198_v24, 0.0 }
 0x48b   : > { %17118 = vmatmul.mubr.msk.f32.gmra.mrb[20].mxu0 %vm24120_vm12, %v5453_v0  ;;  %vm24130_vm12 = vmmov %vm24087_vm5 }
 0x48c   : > { %17120 = vmatprep.mubr.msk.f32.mxu0 %vm24122_vm7, %v24121_v14  ;;  %vm24131_vm7 = vnez %v23966_v37 }
 0x48d   : > { %v5459_v0 = vsel %vm24131_vm7, %v22208_v3, 0.0 }
 0x48f   : > { %17121 = vmatmul.mubr.msk.f32.gmra.mrb[22].mxu0 %vm24125_vm6, %v5455_v46  ;;  %vm24133_vm6 = vmmov %vm24087_vm5  ;;  %v5850_v46 = vsel %vm19871_vm1, %v21907_v23, 0.0  ;;  %vm24143_vm1 = vnez %v23856_v17 }
 0x490   : > { %17123 = vmatprep.mubr.msk.f32.mxu0 %vm24087_vm5, %v24126_v56  ;;  %v5854_v20 = vsel %vm24143_vm1, %v21935_v38, 0.0  ;;  %v5868_v38 = vsel %vm23995_vm3, %v22011_v49, 0.0  ;;  %v24202_v49 = vld [vmem:[#allocation78_spill] sm:$0xff] }
 0x493   : > { %17124 = vmatmul.mubr.msk.f32.gmra.mrb[24].mxu0 %vm24129_vm15, %v5457_v42  ;;  %v22530_v42 = vld [vmem:[#allocation3 + $0x111] sm:$0xff]  ;;  %vm24135_vm15 = vmmov %vm24087_vm5 }
 0x494   : > { %17126 = vmatprep.mubr.msk.f32.mxu0 %vm24130_vm12, %v22206_v59  ;;  %vm24138_vm12 = vmmov %vm24087_vm5 }
 0x497   : > { %17127 = vmatmul.mubr.msk.f32.gmra.mrb[26].mxu0 %vm24132_vm10, %v5459_v0  ;;  %v5463_v0 = vsel %vm23973_vm0, %v22530_v42, 0.0  ;;  %vm24137_vm10 = vmmov %vm24087_vm5 }
 0x498   : > { %17129 = vmatprep.mubr.msk.f32.mxu0 %vm24133_vm6, %v22216_v2  ;;  %vm24139_vm6 = vmmov %vm24087_vm5 }
 0x499   : > { %vm24145_vm0 = vmmov %vm24139_vm6 }
 0x49a   : > { %vm24150_vm13 = vmmov %vm24145_vm0 }
 0x49b   : > { %17130 = vmatmul.mubr.msk.f32.gmra.mrb[28].mxu0 %vm24087_vm5, %v5461_v33  ;;  %v6686_v33 = vld [vmem:[%s23429_s3 + $0x40] sm:$0xff]  ;;  %vm24140_vm5 = vnez %v23853_v4  ;;  %vm24151_vm1 = vmmov %vm24145_vm0 }
 0x49c   : > { %17132 = vmatprep.mubr.msk.f32.mxu0 %vm24135_vm15, %v22528_v25  ;;  %v5852_v37 = vsel %vm24140_vm5, %v21922_v1, 0.0  ;;  %vm24141_vm15 = vmmov %vm24139_vm6 }
 0x49d   : > { %vm24147_vm5 = vmmov %vm24145_vm0 }
 0x49f   : > { %17133 = vmatmul.mubr.msk.f32.gmra.mrb[30].mxu0 %vm24137_vm10, %v5463_v0  ;;  %vm24142_vm10 = vmmov %vm24139_vm6  ;;  %v6267_v0 = vld [vmem:[#allocation3 + $0x120] sm:$0xff] }
 0x4a0   : > { %17137 = vmatprep.mubr.msk.f32.mxu0 %vm24138_vm12, %v5850_v46  ;;  %vm24144_vm12 = vmmov %vm24139_vm6  ;;  %v24226_v46 = vld [vmem:[#allocation37_spill] sm:$0xff] }
 0x4a3   : > { %17138 = vmatmul.mubr.msk.f32.vlgmr.msra.gmra.mrb[0].mxu0 %vm24139_vm6, %v21926_v35  ;;  %vm24146_vm6 = vnez %v23859_v57  ;;  %v5864_v35 = vsel %vm23989_vm4, %v21991_v50, 0.0  ;;  %v5866_v57 = vsel %vm23992_vm2, %v22001_v44, 0.0  ;;  %v24190_v50 = vld [vmem:[#allocation72_spill] sm:$0xff]  ;;  %v24196_v44 = vld [vmem:[#allocation75_spill] sm:$0xff] }
 0x4a4   : > { %17186 = vmatpush3.msra.mxu0 %v6268_v41  ;;  %17140 = vmatprep.mubr.msk.f32.mxu0 %vm24141_vm15, %v5852_v37  ;;  %v5856_v4 = vsel %vm24146_vm6, %v21947_v6, 0.0  ;;  %vm24148_vm15 = vmmov %vm24145_vm0  ;;  %v6262_v37 = vld [vmem:[#allocation3 + $0xf8] sm:$0xff] }
 0x4a5   : > { %17235 = vmatprep.subr.mxu0 %v6686_v33  ;;  %vm24154_vm6 = vmmov %vm24151_vm1  ;;  %v6266_v41 = vld [vmem:[#allocation3 + $0x118] sm:$0xff] }
 0x4a7   : > { %17141 = vmatmul.mubr.msk.f32.gmra.mrb[2].mxu0 %vm24142_vm10, %v21938_v28  ;;  %vm24149_vm10 = vnez %v23862_v19  ;;  %v5870_v28 = vsel %vm23881_vm8, %v22021_v62, 0.0  ;;  %v24208_v62 = vld [vmem:[#allocation81_spill] sm:$0xff] }
 0x4a8   : > { %17143 = vmatprep.mubr.msk.f32.mxu0 %vm24144_vm12, %v5854_v20  ;;  %v5858_v23 = vsel %vm24149_vm10, %v21959_v36, 0.0  ;;  %vm24153_vm12 = vmmov %vm24151_vm1  ;;  %v24232_v20 = vld [vmem:[#allocation23_spill] sm:$0xff] }
 0x4a9   : > { %vm24158_vm10 = vmmov %vm24151_vm1 }
 0x4ab   : > { %17144 = vmatmul.mubr.msk.f32.gmra.mrb[4].mxu0 %vm24145_vm0, %v21950_v16  ;;  %vm24152_vm0 = vnez %v23864_v18  ;;  %v24174_v18 = vld [vmem:[#allocation42_spill] sm:$0xff] }
 0x4ac   : > { %17146 = vmatprep.mubr.msk.f32.mxu0 %vm24147_vm5, %v5856_v4  ;;  %v5860_v17 = vsel %vm24152_vm0, %v21970_v47, 0.0  ;;  %vm24155_vm5 = vnez %v23867_v58  ;;  %vm24159_vm0 = vmmov %vm24151_vm1  ;;  %v24178_v58 = vld [vmem:[#allocation43_spill] sm:$0xff]  ;;  %v24233_v4 = vld [vmem:[#allocation24_spill] sm:$0xff] }
 0x4ad   : > { %v5862_v1 = vsel %vm24155_vm5, %v21981_v52, 0.0  ;;  %vm24162_vm4 = vmmov %vm24159_vm0  ;;  %v24184_v52 = vld [vmem:[#allocation69_spill] sm:$0xff] }
 0x4ae   : > { %vm24163_vm5 = vmmov %vm24159_vm0 }
 0x4af   : > { %17147 = vmatmul.mubr.msk.f32.gmra.mrb[6].mxu0 %vm24148_vm15, %v21961_v61  ;;  %vm24156_vm15 = vmmov %vm24151_vm1  ;;  %v5848_v61 = vld [vmem:[#allocation3 + $0x117] sm:$0xff] }
 0x4b0   : > { %17149 = vmatprep.mubr.msk.f32.mxu0 %vm24150_vm13, %v5858_v23  ;;  %vm24157_vm13 = vmmov %vm24151_vm1 }
 0x4b1   : > { %vm24164_vm2 = vmmov %vm24159_vm0 }
 0x4b2   : > { %vm24167_vm3 = vmmov %vm24159_vm0 }
 0x4b3   : > { %17150 = vmatmul.mubr.msk.f32.gmra.mrb[8].mxu0 %vm24151_vm1, %v21972_v39  ;;  %vm24170_vm8 = vmmov %vm24159_vm0  ;;  %v5849_v39 = vld [vmem:[#allocation3 + $0x11f] sm:$0xff] }
 0x4b4   : > { %17152 = vmatprep.mubr.msk.f32.mxu0 %vm24153_vm12, %v5860_v17  ;;  %vm24160_vm12 = vmmov %vm24159_vm0  ;;  %v24236_v17 = vld [vmem:[#allocation26_spill] sm:$0xff] }
 0x4b7   : > { %17153 = vmatmul.mubr.msk.f32.gmra.mrb[10].mxu0 %vm24154_vm6, %v21983_v15  ;;  %vm24161_vm6 = vmmov %vm24159_vm0  ;;  %v24186_v15 = vld [vmem:[#allocation70_spill] sm:$0xff] }
 0x4b8   : > { %17155 = vmatprep.mubr.msk.f32.mxu0 %vm24156_vm15, %v5862_v1  ;;  %vm24165_vm15 = vnez %v23884_v22  ;;  %v24206_v22 = vld [vmem:[#allocation80_spill] sm:$0xff] }
 0x4b9   : > { %v5872_v19 = vsel %vm24165_vm15, %v22031_v7, 0.0  ;;  %vm24179_vm15 = vnez %v24178_v58  ;;  %v24213_v7 = vld [vmem:[#allocation84_spill] sm:$0xff]  ;;  %v24254_v58 = vld [vmem:[#allocation46_spill] sm:$0xff] }
 0x4ba   : > { %v5880_v47 = vsel %vm24179_vm15, %v5848_v61, 0.0  ;;  %v24238_v1 = vld [vmem:[#allocation28_spill] sm:$0xff] }
 0x4bb   : > { %17156 = vmatmul.mubr.msk.f32.gmra.mrb[12].mxu0 %vm24157_vm13, %v21993_v5  ;;  %vm24166_vm13 = vmmov %vm24159_vm0  ;;  %v24192_v5 = vld [vmem:[#allocation73_spill] sm:$0xff] }
 0x4bc   : > { %17158 = vmatprep.mubr.msk.f32.mxu0 %vm24158_vm10, %v5864_v35  ;;  %vm24168_vm10 = vnez %v23887_v60  ;;  %v24211_v60 = vld [vmem:[#allocation83_spill] sm:$0xff]  ;;  %v24239_v35 = vld [vmem:[#allocation25_spill] sm:$0xff] }
 0x4bd   : > { %v5874_v6 = vsel %vm24168_vm10, %v22041_v10, 0.0  ;;  %v6256_v10 = vld [vmem:[#allocation3 + $0xc8] sm:$0xff] }
 0x4bf   : > { %17159 = vmatmul.mubr.msk.f32.gmra.mrb[14].mxu0 %vm24151_vm1, %v22003_v32  ;;  %vm24169_vm1 = vmmov %vm24159_vm0  ;;  %v24198_v32 = vld [vmem:[#allocation76_spill] sm:$0xff] }
 0x4c0   : > { %17161 = vmatprep.mubr.msk.f32.mxu0 %vm24159_vm0, %v5866_v57  ;;  %vm24171_vm0 = vnez %v23890_v12  ;;  %vm24182_vm10 = vmmov %vm24169_vm1  ;;  %v6255_v12 = vld [vmem:[#allocation3 + $0xc0] sm:$0xff] }
 0x4c1   : > { %v5876_v16 = vsel %vm24171_vm0, %v22051_v43, 0.0  ;;  %vm24187_vm0 = vmmov %vm24169_vm1  ;;  %v6259_v43 = vld [vmem:[#allocation3 + $0xe0] sm:$0xff] }
 0x4c2   : > { %vm24199_vm15 = vmmov %vm24187_vm0 }
 0x4c3   : > { %17162 = vmatmul.mubr.msk.f32.gmra.mrb[16].mxu0 %vm24160_vm12, %v22013_v53  ;;  %vm24172_vm12 = vmmov %vm24169_vm1  ;;  %v24204_v53 = vld [vmem:[#allocation79_spill] sm:$0xff] }
 0x4c4   : > { %17164 = vmatprep.mubr.msk.f32.mxu0 %vm24161_vm6, %v5868_v38  ;;  %vm24173_vm6 = vmmov %vm24169_vm1  ;;  %v24242_v38 = vld [vmem:[#allocation30_spill] sm:$0xff] }
 0x4c7   : > { %17165 = vmatmul.mubr.msk.f32.gmra.mrb[18].mxu0 %vm24162_vm4, %v22023_v9  ;;  %vm24175_vm4 = vnez %v24174_v18  ;;  %v24210_v9 = vld [vmem:[#allocation82_spill] sm:$0xff]  ;;  %v24250_v18 = vld [vmem:[#allocation40_spill] sm:$0xff] }
 0x4c8   : > { %17167 = vmatprep.mubr.msk.f32.mxu0 %vm24163_vm5, %v5870_v28  ;;  %v5878_v36 = vsel %vm24175_vm4, %v22318_v51, 0.0  ;;  %vm24176_vm5 = vmmov %vm24169_vm1  ;;  %v6263_v51 = vld [vmem:[#allocation3 + $0x100] sm:$0xff]  ;;  %v24244_v28 = vld [vmem:[#allocation32_spill] sm:$0xff] }
 0x4c9   : > { %vm24193_vm4 = vmmov %vm24187_vm0 }
 0x4cb   : > { %17168 = vmatmul.mubr.msk.f32.gmra.mrb[20].mxu0 %vm24164_vm2, %v22033_v11  ;;  %vm24177_vm2 = vmmov %vm24169_vm1  ;;  %v6254_v11 = vld [vmem:[#allocation3 + $0xb8] sm:$0xff] }
 0x4cc   : > { %17170 = vmatprep.mubr.msk.f32.mxu0 %vm24166_vm13, %v5872_v19  ;;  %vm24180_vm13 = vmmov %vm24169_vm1  ;;  %v24245_v19 = vld [vmem:[#allocation27_spill] sm:$0xff] }
 0x4cf   : > { %17171 = vmatmul.mubr.msk.f32.gmra.mrb[22].mxu0 %vm24167_vm3, %v22043_v45  ;;  %vm24181_vm3 = vmmov %vm24169_vm1  ;;  %v6257_v45 = vld [vmem:[#allocation3 + $0xd0] sm:$0xff] }
 0x4d0   : > { %17173 = vmatprep.mubr.msk.f32.mxu0 %vm24169_vm1, %v5874_v6 }
 0x4d3   : > { %17174 = vmatmul.mubr.msk.f32.gmra.mrb[24].mxu0 %vm24170_vm8, %v22053_v30  ;;  %vm24185_vm8 = vmmov %vm24169_vm1  ;;  %v6260_v30 = vld [vmem:[#allocation3 + $0xe8] sm:$0xff] }
 0x4d4   : > { %17176 = vmatprep.mubr.msk.f32.mxu0 %vm24172_vm12, %v5876_v16  ;;  %vm24189_vm12 = vmmov %vm24187_vm0  ;;  %v24248_v16 = vld [vmem:[#allocation34_spill] sm:$0xff] }
 0x4d7   : > { %17177 = vmatmul.mubr.msk.f32.gmra.mrb[26].mxu0 %vm24173_vm6, %v22061_v21  ;;  %vm24191_vm6 = vmmov %vm24187_vm0  ;;  %v6261_v21 = vld [vmem:[#allocation3 + $0xf0] sm:$0xff] }
 0x4d8   : > { %17179 = vmatprep.mubr.msk.f32.mxu0 %vm24176_vm5, %v5878_v36  ;;  %vm24195_vm5 = vmmov %vm24187_vm0  ;;  %v24251_v36 = vld [vmem:[#allocation29_spill] sm:$0xff] }
 0x4db   : > { %17180 = vmatmul.mubr.msk.f32.gmra.mrb[28].mxu0 %vm24177_vm2, %v22326_v40  ;;  %vm24197_vm2 = vmmov %vm24187_vm0  ;;  %v24224_v40 = vld [vmem:[#allocation58_spill] sm:$0xff] }
 0x4dc   : > { %17182 = vmatprep.mubr.msk.f32.mxu0 %vm24180_vm13, %v5880_v47  ;;  %vm24201_vm13 = vmmov %vm24187_vm0  ;;  %v24256_v47 = vld [vmem:[#allocation48_spill] sm:$0xff] }
 0x4df   : > { %17183 = vmatmul.mubr.msk.f32.gmra.mrb[30].mxu0 %vm24181_vm3, %v5849_v39  ;;  %vm24203_vm3 = vmmov %vm24187_vm0  ;;  %v24257_v39 = vld [vmem:[#allocation31_spill] sm:$0xff] }
 0x4e0   : > { %17187 = vmatprep.mubr.msk.f32.mxu0 %vm24182_vm10, %v22335_v55  ;;  %vm24205_vm10 = vmmov %vm24187_vm0  ;;  %v6258_v55 = vld [vmem:[#allocation3 + $0xd8] sm:$0xff] }
 0x4e3   : > { %17188 = vmatmul.mubr.msk.f32.vlgmr.msra.gmra.mrb[0].mxu0 %vm24169_vm1, %v24183_v29  ;;  %vm24207_vm1 = vmmov %vm24187_vm0 }
 0x4e4   : > { %17236 = vmatpush3.msra.mxu0 %v6686_v33  ;;  %17190 = vmatprep.mubr.msk.f32.mxu0 %vm24185_vm8, %v24184_v52  ;;  %vm24209_vm8 = vmmov %vm24187_vm0  ;;  %v24230_v33 = vld [vmem:[#allocation22_spill] sm:$0xff]  ;;  %v24260_v52 = vld [vmem:[#allocation36_spill] sm:$0xff] }
 0x4e7   : > { %17191 = vmatmul.mubr.msk.f32.gmra.mrb[2].mxu0 %vm24187_vm0, %v24186_v15  ;;  %v24262_v15 = vld [vmem:[#allocation51_spill] sm:$0xff] }
 0x4e8   : > { %17193 = vmatprep.mubr.msk.f32.mxu0 %vm24189_vm12, %v24188_v31  ;;  %vm24212_vm12 = vmmov %vm24187_vm0  ;;  %v24263_v31 = vld [vmem:[#allocation33_spill] sm:$0xff] }
 0x4eb   : > { %17194 = vmatmul.mubr.msk.f32.gmra.mrb[4].mxu0 %vm24191_vm6, %v24190_v50  ;;  %vm24214_vm6 = vmmov %vm24187_vm0 }
 0x4ec   : > { %17196 = vmatprep.mubr.msk.f32.mxu0 %vm24193_vm4, %v24192_v5  ;;  %vm24215_vm4 = vmmov %vm24187_vm0  ;;  %v24265_v5 = vld [vmem:[#allocation53_spill] sm:$0xff] }
 0x4ef   : > { %17197 = vmatmul.mubr.msk.f32.gmra.mrb[6].mxu0 %vm24195_vm5, %v24194_v8  ;;  %vm24216_vm5 = vmmov %vm24187_vm0  ;;  %v24267_v8 = vld [vmem:[#allocation35_spill] sm:$0xff] }
 0x4f0   : > { %17199 = vmatprep.mubr.msk.f32.mxu0 %vm24197_vm2, %v24196_v44  ;;  %vm24217_vm2 = vmmov %vm24187_vm0  ;;  %v17801_v44 = vld [vmem:[#allocation9 + $0x92c] ss:$16 sps:$4 sm:$0xff]  }
 0x4f3   : > { %17200 = vmatmul.mubr.msk.f32.gmra.mrb[8].mxu0 %vm24199_vm15, %v24198_v32  ;;  %vm24218_vm15 = vmmov %vm24187_vm0  ;;  %v6667_v32 = vsel %vm24098_vm11, %v24267_v8, 0.0  ;;  %v17797_v8 = vld [vmem:[#allocation9 + $0x324] ss:$16 sps:$4 sm:$0xff]  }
 0x4f4   : > { %17202 = vmatprep.mubr.msk.f32.mxu0 %vm24201_vm13, %v24200_v13  ;;  %vm24219_vm13 = vmmov %vm24187_vm0  ;;  %v24270_v13 = vld [vmem:[#allocation60_spill] sm:$0xff] }
 0x4f7   : > { %17203 = vmatmul.mubr.msk.f32.gmra.mrb[10].mxu0 %vm24203_vm3, %v24202_v49  ;;  %vm24220_vm3 = vmmov %vm24187_vm0  ;;  %v24272_v49 = vld [vmem:[#allocation44_spill] sm:$0xff] }
 0x4f8   : > { %17205 = vmatprep.mubr.msk.f32.mxu0 %vm24205_vm10, %v24204_v53  ;;  %vm24221_vm10 = vmmov %vm24187_vm0 }
 0x4fb   : > { %17206 = vmatmul.mubr.msk.f32.gmra.mrb[12].mxu0 %vm24207_vm1, %v24206_v22  ;;  %vm24222_vm1 = vmmov %vm24187_vm0  ;;  %v24275_v22 = vld [vmem:[#allocation62_spill] sm:$0xff] }
 0x4fc   : > { %17208 = vmatprep.mubr.msk.f32.mxu0 %vm24209_vm8, %v24208_v62  ;;  %vm24223_vm8 = vmmov %vm24187_vm0  ;;  %v24277_v62 = vld [vmem:[#allocation47_spill] sm:$0xff] }
 0x4ff   : > { %17209 = vmatmul.mubr.msk.f32.gmra.mrb[14].mxu0 %vm24187_vm0, %v24210_v9 }
 0x500   : > { %17211 = vmatprep.mubr.msk.f32.mxu0 %vm24212_vm12, %v24211_v60  ;;  %vm24225_vm12 = vmmov %vm24187_vm0  ;;  %v24280_v60 = vld [vmem:[#allocation64_spill] sm:$0xff] }
 0x503   : > { %17212 = vmatmul.mubr.msk.f32.gmra.mrb[16].mxu0 %vm24214_vm6, %v24213_v7  ;;  %vm24227_vm6 = vmmov %vm24187_vm0  ;;  %v24282_v7 = vld [vmem:[#allocation41_spill] sm:$0xff] }
 0x504   : > { %17214 = vmatprep.mubr.msk.f32.mxu0 %vm24215_vm4, %v6254_v11  ;;  %vm24228_vm4 = vmmov %vm24187_vm0 }
 0x507   : > { %17215 = vmatmul.mubr.msk.f32.gmra.mrb[18].mxu0 %vm24216_vm5, %v6255_v12  ;;  %vm24229_vm5 = vmmov %vm24187_vm0  ;;  %v6677_v12 = vsel %vm24124_vm9, %v22198_v24, 0.0  ;;  %v6652_v24 = vld [vmem:[#allocation3 + $0x119] sm:$0xff] }
 0x508   : > { %17217 = vmatprep.mubr.msk.f32.mxu0 %vm24217_vm2, %v6256_v10  ;;  %vm24231_vm2 = vmmov %vm24187_vm0 }
 0x50b   : > { %17218 = vmatmul.mubr.msk.f32.gmra.mrb[20].mxu0 %vm24218_vm15, %v6257_v45  ;;  %vm24234_vm15 = vnez %v24233_v4  ;;  %v17745_v45 = vld [vmem:[#allocation9 + $0x808] ss:$16 sps:$4 sm:$0xff]   ;;  %v17767_v4 = vld [vmem:[#allocation9 + $0x284] ss:$16 sps:$4 sm:$0xff]  }
 0x50c   : > { %17220 = vmatprep.mubr.msk.f32.mxu0 %vm24219_vm13, %v6258_v55  ;;  %v6655_v23 = vsel %vm24234_vm15, %v24232_v20, 0.0  ;;  %vm24235_vm13 = vmmov %vm24187_vm0  ;;  %vm24258_vm15 = vnez %v24257_v39  ;;  %v17747_v55 = vld [vmem:[#allocation9 + $0x80c] ss:$16 sps:$4 sm:$0xff]   ;;  %v17766_v20 = vld [vmem:[#allocation9 + $0x260] ss:$16 sps:$4 sm:$0xff]  }
 0x50d   : > { %v6663_v29 = vsel %vm24258_vm15, %v24256_v47, 0.0  ;;  %9500 = vmatprep.subr.bf16.mxu0 %v17747_v55  ;;  %v17790_v47 = vld [vmem:[#allocation9 + $0x2e0] ss:$16 sps:$4 sm:$0xff]   ;;  %v17823_v55 = vld [vmem:[#allocation9 + $0x9a8] ss:$16 sps:$4 sm:$0xff]  }
 0x50f   : > { %17221 = vmatmul.mubr.msk.f32.gmra.mrb[22].mxu0 %vm24220_vm3, %v6259_v43  ;;  %vm24237_vm3 = vmmov %vm24187_vm0  ;;  %v17748_v43 = vld [vmem:[#allocation9 + $0x200] ss:$16 sps:$4 sm:$0xff]  }
 0x510   : > { %17223 = vmatprep.mubr.msk.f32.mxu0 %vm24221_vm10, %v6260_v30  ;;  %vm24240_vm10 = vnez %v24239_v35  ;;  %v17753_v30 = vld [vmem:[#allocation9 + $0x82c] ss:$16 sps:$4 sm:$0xff]   ;;  %v17773_v35 = vld [vmem:[#allocation9 + $0x2a4] ss:$16 sps:$4 sm:$0xff]  }
 0x511   : > { %v6657_v57 = vsel %vm24240_vm10, %v24238_v1, 0.0  ;;  %vm24264_vm10 = vnez %v24263_v31  ;;  %v17772_v1 = vld [vmem:[#allocation9 + $0x280] ss:$16 sps:$4 sm:$0xff]   ;;  %v17793_v31 = vld [vmem:[#allocation9 + $0x908] ss:$16 sps:$4 sm:$0xff]  }
 0x512   : > { %v6665_v50 = vsel %vm24264_vm10, %v24262_v15, 0.0 }
 0x513   : > { %17224 = vmatmul.mubr.msk.f32.gmra.mrb[24].mxu0 %vm24222_vm1, %v6261_v21  ;;  %vm24241_vm1 = vmmov %vm24187_vm0  ;;  %v17754_v21 = vld [vmem:[#allocation9 + $0x220] ss:$16 sps:$4 sm:$0xff]  }
 0x514   : > { %17226 = vmatprep.mubr.msk.f32.mxu0 %vm24223_vm8, %v6262_v37  ;;  %vm24243_vm8 = vmmov %vm24187_vm0  ;;  %v17755_v37 = vld [vmem:[#allocation9 + $0x244] ss:$16 sps:$4 sm:$0xff]  }
 0x517   : > { %17227 = vmatmul.mubr.msk.f32.gmra.mrb[26].mxu0 %vm24187_vm0, %v6263_v51  ;;  %vm24246_vm0 = vnez %v24245_v19  ;;  %v17759_v51 = vld [vmem:[#allocation9 + $0x84c] ss:$16 sps:$4 sm:$0xff]   ;;  %v17779_v19 = vld [vmem:[#allocation9 + $0x2c4] ss:$16 sps:$4 sm:$0xff]  }
 0x518   : > { %17229 = vmatprep.mubr.msk.f32.mxu0 %vm24225_vm12, %v24224_v40  ;;  %v6659_v6 = vsel %vm24246_vm0, %v24244_v28, 0.0  ;;  %vm24247_vm12 = vmmov %vm24241_vm1  ;;  %v17757_v40 = vld [vmem:[#allocation9 + $0x848] ss:$16 sps:$4 sm:$0xff]   ;;  %v17778_v28 = vld [vmem:[#allocation9 + $0x2a0] ss:$16 sps:$4 sm:$0xff]  }
 0x519   : > { %vm24269_vm0 = vmmov %vm24241_vm1 }
 0x51a   : > { %vm24279_vm15 = vmmov %vm24269_vm0 }
 0x51b   : > { %17230 = vmatmul.mubr.msk.f32.gmra.mrb[28].mxu0 %vm24227_vm6, %v24226_v46  ;;  %vm24249_vm6 = vmmov %vm24241_vm1  ;;  %v17761_v46 = vld [vmem:[#allocation9 + $0x264] ss:$16 sps:$4 sm:$0xff]  }
 0x51c   : > { %17232 = vmatprep.mubr.msk.f32.mxu0 %vm24228_vm4, %v6266_v41  ;;  %vm24252_vm4 = vnez %v24251_v36  ;;  %vm24281_vm11 = vmmov %vm24269_vm0  ;;  %v17760_v41 = vld [vmem:[#allocation9 + $0x240] ss:$16 sps:$4 sm:$0xff]   ;;  %v17785_v36 = vld [vmem:[#allocation9 + $0x2e4] ss:$16 sps:$4 sm:$0xff]  }
 0x51d   : > { %v6661_v61 = vsel %vm24252_vm4, %v24250_v18, 0.0  ;;  %vm24274_vm4 = vmmov %vm24269_vm0  ;;  %v17784_v18 = vld [vmem:[#allocation9 + $0x2c0] ss:$16 sps:$4 sm:$0xff]  }
 0x51e   : > { %vm24285_vm10 = vmmov %vm24269_vm0 }
 0x51f   : > { %17233 = vmatmul.mubr.msk.f32.gmra.mrb[30].mxu0 %vm24229_vm5, %v6267_v0  ;;  %vm24253_vm5 = vmmov %vm24241_vm1  ;;  %v17765_v0 = vld [vmem:[#allocation9 + $0x86c] ss:$16 sps:$4 sm:$0xff]  }
 0x520   : > { %17237 = vmatprep.mubr.msk.f32.mxu0 %vm24231_vm2, %v24230_v33  ;;  %vm24255_vm2 = vmmov %vm24241_vm1  ;;  %v17763_v33 = vld [vmem:[#allocation9 + $0x868] ss:$16 sps:$4 sm:$0xff]  }
 0x521   : > { %vm24296_vm9 = vmmov %vm24269_vm0 }
 0x523   : > { %17238 = vmatmul.mubr.msk.f32.vlgmr.msra.gmra.mrb[0].mxu0 %vm24235_vm13, %v6655_v23  ;;  %vm24259_vm13 = vmmov %vm24241_vm1  ;;  %v17771_v23 = vld [vmem:[#allocation9 + $0x88c] ss:$16 sps:$4 sm:$0xff]  }
 0x524   : > { %17240 = vmatprep.mubr.msk.f32.mxu0 %vm24237_vm3, %v24236_v17  ;;  %vm24261_vm3 = vmmov %vm24241_vm1  ;;  %9501 = vmatpush1.bf16.msra.mxu0 %v17745_v45  ;;  %v17769_v17 = vld [vmem:[#allocation9 + $0x888] ss:$16 sps:$4 sm:$0xff]  }
 0x525   : > { %9502 = vmatprep.subr.bf16.mxu0 %v17753_v30 }
 0x527   : > { %17241 = vmatmul.mubr.msk.f32.gmra.mrb[2].mxu0 %vm24241_vm1, %v6657_v57  ;;  %v17777_v57 = vld [vmem:[#allocation9 + $0x8ac] ss:$16 sps:$4 sm:$0xff]  }
 0x528   : > { %17243 = vmatprep.mubr.msk.f32.mxu0 %vm24243_vm8, %v24242_v38  ;;  %vm24266_vm8 = vmmov %vm24241_vm1  ;;  %v17775_v38 = vld [vmem:[#allocation9 + $0x8a8] ss:$16 sps:$4 sm:$0xff]  }
 0x52b   : > { %17244 = vmatmul.mubr.msk.f32.gmra.mrb[4].mxu0 %vm24247_vm12, %v6659_v6  ;;  %vm24271_vm12 = vmmov %vm24269_vm0  ;;  %v17783_v6 = vld [vmem:[#allocation9 + $0x8cc] ss:$16 sps:$4 sm:$0xff]  }
 0x52c   : > { %17246 = vmatprep.mubr.msk.f32.mxu0 %vm24249_vm6, %v24248_v16  ;;  %vm24273_vm6 = vnez %v24272_v49  ;;  %v17781_v16 = vld [vmem:[#allocation9 + $0x8c8] ss:$16 sps:$4 sm:$0xff]   ;;  %v17802_v49 = vld [vmem:[#allocation9 + $0x320] ss:$16 sps:$4 sm:$0xff]  }
 0x52d   : > { %v6669_v53 = vsel %vm24273_vm6, %v24107_v26, 0.0  ;;  %vm24290_vm6 = vmmov %vm24269_vm0 }
 0x52f   : > { %17247 = vmatmul.mubr.msk.f32.gmra.mrb[6].mxu0 %vm24253_vm5, %v6661_v61  ;;  %vm24276_vm5 = vmmov %vm24269_vm0  ;;  %v17789_v61 = vld [vmem:[#allocation9 + $0x8ec] ss:$16 sps:$4 sm:$0xff]  }
 0x530   : > { %17249 = vmatprep.mubr.msk.f32.mxu0 %vm24255_vm2, %v24254_v58  ;;  %vm24278_vm2 = vnez %v24277_v62  ;;  %v17787_v58 = vld [vmem:[#allocation9 + $0x8e8] ss:$16 sps:$4 sm:$0xff]   ;;  %v17807_v62 = vld [vmem:[#allocation9 + $0x94c] ss:$16 sps:$4 sm:$0xff]  }
 0x531   : > { %v6671_v9 = vsel %vm24278_vm2, %v24113_v27, 0.0  ;;  %vm24295_vm2 = vmmov %vm24269_vm0  ;;  %v17813_v27 = vld [vmem:[#allocation9 + $0x96c] ss:$16 sps:$4 sm:$0xff]  }
 0x533   : > { %17250 = vmatmul.mubr.msk.f32.gmra.mrb[8].mxu0 %vm24259_vm13, %v6663_v29  ;;  %vm24283_vm13 = vnez %v24282_v7  ;;  %v17791_v29 = vld [vmem:[#allocation9 + $0x304] ss:$16 sps:$4 sm:$0xff]   ;;  %v17808_v7 = vld [vmem:[#allocation9 + $0x340] ss:$16 sps:$4 sm:$0xff]  }
 0x534   : > { %17252 = vmatprep.mubr.msk.f32.mxu0 %vm24261_vm3, %v24260_v52  ;;  %v6673_v11 = vsel %vm24283_vm13, %v24117_v48, 0.0  ;;  %vm24284_vm3 = vmmov %vm24269_vm0  ;;  %v6679_v48 = vsel %vm24128_vm14, %v22208_v3, 0.0  ;;  %v17795_v52 = vld [vmem:[#allocation9 + $0x90c] ss:$16 sps:$4 sm:$0xff]  }
 0x535   : > { %vm24299_vm14 = vmmov %vm24269_vm0 }
 0x537   : > { %17253 = vmatmul.mubr.msk.f32.gmra.mrb[10].mxu0 %vm24241_vm1, %v6665_v50  ;;  %vm24286_vm1 = vnez %v24118_v34  ;;  %v24297_v34 = vld [vmem:[#allocation52_spill] sm:$0xff] }
 0x538   : > { %17255 = vmatprep.mubr.msk.f32.mxu0 %vm24266_vm8, %v24265_v5  ;;  %v6675_v26 = vsel %vm24286_vm1, %v22188_v54, 0.0  ;;  %vm24287_vm8 = vmmov %vm24269_vm0  ;;  %v17796_v50 = vld [vmem:[#allocation9 + $0x300] ss:$16 sps:$4 sm:$0xff]  }
 0x53b   : > { %17256 = vmatmul.mubr.msk.f32.gmra.mrb[12].mxu0 %vm24269_vm0, %v6667_v32 }
 0x53c   : > { %17258 = vmatprep.mubr.msk.f32.mxu0 %vm24271_vm12, %v24270_v13  ;;  %vm24289_vm12 = vmmov %vm24269_vm0  ;;  %v17799_v13 = vld [vmem:[#allocation9 + $0x928] ss:$16 sps:$4 sm:$0xff]  }
 0x53f   : > { %17259 = vmatmul.mubr.msk.f32.gmra.mrb[14].mxu0 %vm24274_vm4, %v6669_v53  ;;  %vm24292_vm4 = vmmov %vm24269_vm0 }
 0x540   : > { %17261 = vmatprep.mubr.msk.f32.mxu0 %vm24276_vm5, %v24275_v22  ;;  %vm24293_vm5 = vmmov %vm24269_vm0  ;;  %v17803_v22 = vld [vmem:[#allocation9 + $0x344] ss:$16 sps:$4 sm:$0xff]  }
 0x543   : > { %17262 = vmatmul.mubr.msk.f32.gmra.mrb[16].mxu0 %vm24279_vm15, %v6671_v9  ;;  %vm24298_vm15 = vnez %v24297_v34  ;;  %v17817_v34 = vld [vmem:[#allocation9 + $0x988] ss:$16 sps:$4 sm:$0xff]  }
 0x544   : > { %17264 = vmatprep.mubr.msk.f32.mxu0 %vm24281_vm11, %v24280_v60  ;;  %v6683_v3 = vsel %vm24298_vm15, %v22530_v42, 0.0  ;;  %vm24300_vm11 = vmmov %vm24269_vm0  ;;  %v17751_v42 = vld [vmem:[#allocation9 + $0x828] ss:$16 sps:$4 sm:$0xff]  }
 0x545   : > { %9503 = vmatpush1.bf16.msra.mxu0 %v17751_v42  ;;  %v17805_v60 = vld [vmem:[#allocation9 + $0x948] ss:$16 sps:$4 sm:$0xff]   ;;  %v22809_v42 = vld [vmem:[#allocation7] ss:$0 sm:$0xff] }
 0x546   : > { %9504 = vmatprep.subr.bf16.mxu0 %v17759_v51 }
 0x547   : > { %17265 = vmatmul.mubr.msk.f32.gmra.mrb[18].mxu0 %vm24284_vm3, %v6673_v11  ;;  %vm24303_vm3 = vmmov %vm24269_vm0 }
 0x548   : > { %17267 = vmatprep.mubr.msk.f32.mxu0 %vm24285_vm10, %v24121_v14  ;;  %v17811_v14 = vld [vmem:[#allocation9 + $0x968] ss:$16 sps:$4 sm:$0xff]  }
 0x549   : > { %9505 = vmatpush1.bf16.msra.mxu0 %v17757_v40 }
 0x54a   : > { %9506 = vmatprep.subr.bf16.mxu0 %v17765_v0 }
 0x54b   : > { %17268 = vmatmul.mubr.msk.f32.gmra.mrb[20].mxu0 %vm24287_vm8, %v6675_v26  ;;  %v17809_v26 = vld [vmem:[#allocation9 + $0x364] ss:$16 sps:$4 sm:$0xff]  }
 0x54c   : > { %17270 = vmatprep.mubr.msk.f32.mxu0 %vm24269_vm0, %v24126_v56  ;;  %v6681_v56 = vsel %vm24131_vm7, %v22218_v63, 0.0  ;;  %v17743_v63 = vld [vmem:[#allocation9 + $0x204] ss:$16 sps:$4 sm:$0xff]   ;;  %vm15005_vm7 = vcmask 8192  }
 0x54d   : > { %7634 = vmatprep.subr.bf16.mxu1 %v17743_v63  ;;  %9507 = vmatpush1.bf16.msra.mxu0 %v17763_v33  ;;  %v17825_v63 = vld [vmem:[#allocation9 + $0x9ac] ss:$16 sps:$4 sm:$0xff]  }
 0x54e   : > { %7635 = vmatpush1.bf16.msra.mxu1 %v17748_v43  ;;  %9508 = vmatprep.subr.bf16.mxu0 %v17771_v23  ;;  %v17826_v43 = vld [vmem:[#allocation9 + $0x3a0] ss:$16 sps:$4 sm:$0xff]  }
 0x54f   : > { %17271 = vmatmul.mubr.msk.f32.gmra.mrb[22].mxu0 %vm24289_vm12, %v6677_v12 }
 0x550   : > { %17273 = vmatprep.mubr.msk.f32.mxu0 %vm24290_vm6, %v22206_v59  ;;  %v6653_v59 = vld [vmem:[#allocation3 + $0x121] sm:$0xff] }
 0x551   : > { %9509 = vmatpush1.bf16.msra.mxu0 %v17769_v17 }
 0x552   : > { %9510 = vmatprep.subr.bf16.mxu0 %v17777_v57 }
 0x553   : > { %17274 = vmatmul.mubr.msk.f32.gmra.mrb[24].mxu0 %vm24292_vm4, %v6679_v48  ;;  %v17814_v48 = vld [vmem:[#allocation9 + $0x360] ss:$16 sps:$4 sm:$0xff]  }
 0x554   : > { %17276 = vmatprep.mubr.msk.f32.mxu0 %vm24293_vm5, %v22216_v2  ;;  %v24301_v2 = vld [vmem:[#allocation55_spill] sm:$0xff] }
 0x555   : > { %vm24302_vm13 = vnez %v24301_v2  ;;  %9511 = vmatpush1.bf16.msra.mxu0 %v17775_v38 }
 0x556   : > { %v6685_v10 = vsel %vm24302_vm13, %v6653_v59, 0.0  ;;  %9512 = vmatprep.subr.bf16.mxu0 %v17783_v6 }
 0x557   : > { %17277 = vmatmul.mubr.msk.f32.gmra.mrb[26].mxu0 %vm24295_vm2, %v6681_v56  ;;  %v17815_v56 = vld [vmem:[#allocation9 + $0x384] ss:$16 sps:$4 sm:$0xff]  }
 0x558   : > { %17279 = vmatprep.mubr.msk.f32.mxu0 %vm24296_vm9, %v22528_v25  ;;  %v17749_v25 = vld [vmem:[#allocation9 + $0x224] ss:$16 sps:$4 sm:$0xff]  }
 0x559   : > { %7636 = vmatprep.subr.bf16.mxu1 %v17749_v25  ;;  %9513 = vmatpush1.bf16.msra.mxu0 %v17781_v16 }
 0x55a   : > { %7637 = vmatpush1.bf16.msra.mxu1 %v17754_v21  ;;  %9514 = vmatprep.subr.bf16.mxu0 %v17789_v61 }
 0x55b   : > { %17280 = vmatmul.mubr.msk.f32.gmra.mrb[28].mxu0 %vm24299_vm14, %v6683_v3  ;;  %7638 = vmatprep.subr.bf16.mxu1 %v17755_v37  ;;  %v17820_v3 = vld [vmem:[#allocation9 + $0x380] ss:$16 sps:$4 sm:$0xff]  }
 0x55c   : > { %17282 = vmatprep.mubr.msk.f32.mxu0 %vm24300_vm11, %v6652_v24  ;;  %v17819_v24 = vld [vmem:[#allocation9 + $0x98c] ss:$16 sps:$4 sm:$0xff]  }
 0x55d   : > { %9515 = vmatpush1.bf16.msra.mxu0 %v17787_v58 }
 0x55e   : > { %7639 = vmatpush1.bf16.msra.mxu1 %v17760_v41  ;;  %9516 = vmatprep.subr.bf16.mxu0 %v17795_v52 }
 0x55f   : > { %17283 = vmatmul.mubr.msk.f32.gmra.mrb[30].mxu0 %vm24303_vm3, %v6685_v10  ;;  %7640 = vmatprep.subr.bf16.mxu1 %v17761_v46  ;;  %v17821_v10 = vld [vmem:[#allocation9 + $0x3a4] ss:$16 sps:$4 sm:$0xff]  }
 0x561   : > { %9517 = vmatpush1.bf16.msra.mxu0 %v17793_v31 }
 0x562   : > { %7641 = vmatpush1.bf16.msra.mxu1 %v17766_v20  ;;  %9518 = vmatprep.subr.bf16.mxu0 %v17801_v44 }
 0x563   : > { %7642 = vmatprep.subr.bf16.mxu1 %v17767_v4 }
 0x565   : > { %9519 = vmatpush1.bf16.msra.mxu0 %v17799_v13  ;;  %v17832_v13 = vld [vmem:[#allocation9 + $0x3c0] ss:$16 sps:$4 sm:$0xff]  }
 0x566   : > { %7643 = vmatpush1.bf16.msra.mxu1 %v17772_v1  ;;  %9520 = vmatprep.subr.bf16.mxu0 %v17807_v62 }
 0x567   : > { %7644 = vmatprep.subr.bf16.mxu1 %v17773_v35 }
 0x569   : > { %9521 = vmatpush1.bf16.msra.mxu0 %v17805_v60 }
 0x56a   : > { %7645 = vmatpush1.bf16.msra.mxu1 %v17778_v28  ;;  %9522 = vmatprep.subr.bf16.mxu0 %v17813_v27 }
 0x56b   : > { %7646 = vmatprep.subr.bf16.mxu1 %v17779_v19 }
 0x56d   : > { %9523 = vmatpush1.bf16.msra.mxu0 %v17811_v14 }
 0x56e   : > { %7647 = vmatpush1.bf16.msra.mxu1 %v17784_v18  ;;  %9524 = vmatprep.subr.bf16.mxu0 %v17819_v24 }
 0x56f   : > { %7648 = vmatprep.subr.bf16.mxu1 %v17785_v36 }
 0x571   : > { %9525 = vmatpush1.bf16.msra.mxu0 %v17817_v34 }
 0x572   : > { %7649 = vmatpush1.bf16.msra.mxu1 %v17790_v47  ;;  %9526 = vmatprep.subr.bf16.mxu0 %v17825_v63 }
 0x573   : > { %7650 = vmatprep.subr.bf16.mxu1 %v17791_v29 }
 0x575   : > { %9527 = vmatpush1.bf16.msra.mxu0 %v17823_v55 }
 0x576   : > { %7651 = vmatpush1.bf16.msra.mxu1 %v17796_v50  ;;  %v17827_v50 = vld [vmem:[#allocation9 + $0x3c4] ss:$16 sps:$4 sm:$0xff]  }
 0x577   : > { %7652 = vmatprep.subr.bf16.mxu1 %v17797_v8 }
 0x57a   : > { %7653 = vmatpush1.bf16.msra.mxu1 %v17802_v49 }
 0x57b   : > { %7654 = vmatprep.subr.bf16.mxu1 %v17803_v22 }
 0x57e   : > { %7655 = vmatpush1.bf16.msra.mxu1 %v17808_v7 }
 0x57f   : > { %7656 = vmatprep.subr.bf16.mxu1 %v17809_v26 }
 0x582   : > { %7657 = vmatpush1.bf16.msra.mxu1 %v17814_v48 }
 0x583   : > { %7658 = vmatprep.subr.bf16.mxu1 %v17815_v56 }
 0x586   : > { %7659 = vmatpush1.bf16.msra.mxu1 %v17820_v3  ;;  %v17835_v3 = vld [vmem:[#allocation9 + $0x9e8] ss:$16 sps:$4 sm:$0xff]  }
 0x587   : > { %7660 = vmatprep.subr.bf16.mxu1 %v17821_v10 }
 0x58a   : > { %7661 = vmatpush1.bf16.msra.mxu1 %v17826_v43 }
 0x58b   : > { %7662 = vmatprep.subr.bf16.mxu1 %v17827_v50 }
 0x58e   : > { %7663 = vmatpush1.bf16.msra.mxu1 %v17832_v13 }
 0x5f6   : > { %v22781_v39 = vpop.f32.mrb[0].mxu0 }
 0x5f7   : > { %v22783_v15 = vpop.f32.mrb[1].mxu0  ;;  %v7048_v51 = vadd.f32 %v22781_v39, %v22809_v42 }
 0x5f8   : > { %v7047_v40 = vadd.f32 %v22809_v42, %v22783_v15 }
 0x5f9   : > { %v7080_v20 = vmax.f32 %v7048_v51, 0.0  ;;  %v17837_v51 = vld [vmem:[#allocation9 + $0x9ec] ss:$16 sps:$4 sm:$0xff]  }
 0x5fa   : > { %v22785_v5 = vpop.f32.mrb[2].mxu0  ;;  %v7079_v17 = vmax.f32 %v7047_v40, 0.0 }
 0x5fb   : > { %v22787_v32 = vpop.f32.mrb[3].mxu0  ;;  %v7050_v4 = vadd.f32 %v22785_v5, %v22809_v42  ;;  %v17829_v5 = vld [vmem:[#allocation9 + $0x9c8] ss:$16 sps:$4 sm:$0xff]  }
 0x5fc   : > { %v7049_v1 = vadd.f32 %v22809_v42, %v22787_v32  ;;  %v17831_v32 = vld [vmem:[#allocation9 + $0x9cc] ss:$16 sps:$4 sm:$0xff]  }
 0x5fd   : > { %v7082_v18 = vmax.f32 %v7050_v4, 0.0  ;;  %9528 = vmatprep.subr.bf16.mxu0 %v17831_v32 }
 0x5fe   : > { %v22789_v53 = vpop.f32.mrb[4].mxu0  ;;  %v7081_v58 = vmax.f32 %v7049_v1, 0.0  ;;  %9529 = vmatpush1.bf16.msra.mxu0 %v17829_v5 }
 0x5ff   : > { %v22791_v9 = vpop.f32.mrb[5].mxu0  ;;  %v7052_v36 = vadd.f32 %v22789_v53, %v22809_v42  ;;  %9530 = vmatprep.subr.bf16.mxu0 %v17837_v51 }
 0x600   : > { %v7051_v47 = vadd.f32 %v22809_v42, %v22791_v9 }
 0x601   : > { %v7084_v49 = vmax.f32 %v7052_v36, 0.0 }
 0x602   : > { %v22793_v11 = vpop.f32.mrb[6].mxu0  ;;  %v7083_v62 = vmax.f32 %v7051_v47, 0.0  ;;  %9531 = vmatpush1.bf16.msra.mxu0 %v17835_v3  ;;  %v17839_v3 = vld [vmem:[#allocation9 + $0x208] ss:$16 sps:$4 sm:$0xff]  }
 0x603   : > { %v22795_v12 = vpop.f32.mrb[7].mxu0  ;;  %v7054_v53 = vadd.f32 %v22793_v11, %v22809_v42 }
 0x604   : > { %v7053_v9 = vadd.f32 %v22809_v42, %v22795_v12  ;;  %v17833_v12 = vld [vmem:[#allocation9 + $0x3e4] ss:$16 sps:$4 sm:$0xff]  }
 0x605   : > { %v7086_v56 = vmax.f32 %v7054_v53, 0.0  ;;  %7664 = vmatprep.subr.bf16.mxu1 %v17833_v12 }
 0x606   : > { %v22797_v54 = vpop.f32.mrb[8].mxu0  ;;  %v7085_v10 = vmax.f32 %v7053_v9, 0.0 }
 0x607   : > { %v22799_v59 = vpop.f32.mrb[9].mxu0  ;;  %v7056_v24 = vadd.f32 %v22797_v54, %v22809_v42 }
 0x608   : > { %v7055_v63 = vadd.f32 %v22809_v42, %v22799_v59  ;;  %v17841_v59 = vld [vmem:[#allocation9 + $0x20c] ss:$16 sps:$4 sm:$0xff]  }
 0x60a   : > { %v22801_v2 = vpop.f32.mrb[10].mxu0 }
 0x60b   : > { %v22803_v45 = vpop.f32.mrb[11].mxu0  ;;  %v7058_v4 = vadd.f32 %v22801_v2, %v22809_v42 }
 0x60c   : > { %v7057_v1 = vadd.f32 %v22809_v42, %v22803_v45 }
 0x60e   : > { %v22805_v25 = vpop.f32.mrb[12].mxu0 }
 0x60f   : > { %v22807_v30 = vpop.f32.mrb[13].mxu0  ;;  %v7060_v36 = vadd.f32 %v22805_v25, %v22809_v42 }
 0x610   : > { %v7059_v45 = vadd.f32 %v22809_v42, %v22807_v30 }
 0x611   : > { %v7092_v5 = vmax.f32 %v7060_v36, 0.0  ;;  %v17877_v36 = vld [vmem:[#allocation9 + $0x2cc] ss:$16 sps:$4 sm:$0xff]  }
 0x612   : > { %v22811_v21 = vpop.f32.mrb[14].mxu0 }
 0x613   : > { %v22813_v37 = vpop.f32.mrb[15].mxu0  ;;  %v7062_v25 = vadd.f32 %v22811_v21, %v22809_v42 }
 0x614   : > { %v7061_v32 = vadd.f32 %v22809_v42, %v22813_v37 }
 0x616   : > { %v17263_v41 = vpop.f32.mrb[16].mxu0 }
 0x617   : > { %v7064_v46 = vadd.f32 %v17263_v41, %v22809_v42  ;;  %v6929_v0 = vpop.f32.mrb[17].mxu0 }
 0x618   : > { %v7063_v33 = vadd.f32 %v22809_v42, %v6929_v0  ;;  %v17838_v0 = vld [vmem:[#allocation9 + $0x3e0] ss:$16 sps:$4 sm:$0xff]  }
 0x619   : > { %v7096_v23 = vmax.f32 %v7064_v46, 0.0  ;;  %7665 = vmatpush1.bf16.msra.mxu1 %v17838_v0  ;;  %v17845_v0 = vld [vmem:[#allocation9 + $0x228] ss:$16 sps:$4 sm:$0xff]  }
 0x61a   : > { %v7095_v35 = vmax.f32 %v7063_v33, 0.0  ;;  %v17266_v57 = vpop.f32.mrb[18].mxu0  ;;  %7675 = vmatprep.subr.bf16.mxu1 %v17841_v59  ;;  %v17859_v59 = vld [vmem:[#allocation9 + $0x26c] ss:$16 sps:$4 sm:$0xff]  }
 0x61b   : > { %v17703_v38 = vpack.i.bf16 %v7080_v20, %v7096_v23  ;;  %v7066_v28 = vadd.f32 %v17266_v57, %v22809_v42  ;;  %v6939_v19 = vpop.f32.mrb[19].mxu0  ;;  %v7088_v20 = vmax.f32 %v7056_v24, 0.0 }
 0x61c   : > { %v17701_v6 = vpack.i.bf16 %v7079_v17, %v7095_v35  ;;  %v7065_v16 = vadd.f32 %v22809_v42, %v6939_v19  ;;  %v7087_v17 = vmax.f32 %v7055_v63, 0.0 }
 0x61d   : > { %v7098_v61 = vmax.f32 %v7066_v28, 0.0 }
 0x61e   : > { %v7097_v39 = vmax.f32 %v7065_v16, 0.0  ;;  %17702 = vxpose.xlu0.b32.start [1/16] (narrow) %v17701_v6, 16  ;;  %v17269_v29 = vpop.f32.mrb[20].mxu0  ;;  %v17844_v6 = vld [vmem:[#allocation9 + $0xa0c] ss:$16 sps:$4 sm:$0xff]  }
 0x61f   : > { %v17707_v52 = vpack.i.bf16 %v7082_v18, %v7098_v61  ;;  %v7068_v15 = vadd.f32 %v17269_v29, %v22809_v42  ;;  %v6949_v31 = vpop.f32.mrb[21].mxu0  ;;  %v7090_v18 = vmax.f32 %v7058_v4, 0.0  ;;  %9975 = vmatprep.subr.bf16.mxu0 %v17844_v6  ;;  %v17851_v4 = vld [vmem:[#allocation9 + $0x248] ss:$16 sps:$4 sm:$0xff]   ;;  %v17871_v6 = vld [vmem:[#allocation9 + $0x2ac] ss:$16 sps:$4 sm:$0xff]  }
 0x620   : > { %v17705_v8 = vpack.i.bf16 %v7081_v58, %v7097_v39  ;;  %v7067_v44 = vadd.f32 %v22809_v42, %v6949_v31  ;;  %v7089_v58 = vmax.f32 %v7057_v1, 0.0  ;;  %v17857_v1 = vld [vmem:[#allocation9 + $0x268] ss:$16 sps:$4 sm:$0xff]  }
 0x621   : > { %v7100_v22 = vmax.f32 %v7068_v15, 0.0 }
 0x622   : > { %v7099_v60 = vmax.f32 %v7067_v44, 0.0  ;;  %17704 = vxpose.xlu0.b32.cont [2/16] (narrow) %v17703_v38, 16  ;;  %v17272_v7 = vpop.f32.mrb[22].mxu0  ;;  %v7091_v44 = vmax.f32 %v7059_v45, 0.0  ;;  %v17878_v45 = vld [vmem:[#allocation9 + $0xac8] ss:$16 sps:$4 sm:$0xff]  }
 0x623   : > { %v22837_v26 = vpack.i.bf16 %v7084_v49, %v7100_v22  ;;  %v7070_v27 = vadd.f32 %v17272_v7, %v22809_v42  ;;  %v6959_v14 = vpop.f32.mrb[23].mxu0 }
 0x624   : > { %v17709_v48 = vpack.i.bf16 %v7083_v62, %v7099_v60  ;;  %v7069_v11 = vadd.f32 %v22809_v42, %v6959_v14  ;;  %v7094_v60 = vmax.f32 %v7062_v25, 0.0  ;;  %v17895_v25 = vld [vmem:[#allocation9 + $0x32c] ss:$16 sps:$4 sm:$0xff]  }
 0x625   : > { %v7102_v34 = vmax.f32 %v7070_v27, 0.0  ;;  %v7093_v27 = vmax.f32 %v7061_v32, 0.0  ;;  %v17896_v32 = vld [vmem:[#allocation9 + $0xb28] ss:$16 sps:$4 sm:$0xff]  }
 0x626   : > { %v7101_v55 = vmax.f32 %v7069_v11, 0.0  ;;  %17706 = vxpose.xlu0.b32.cont [3/16] (narrow) %v17705_v8, 16  ;;  %v17275_v43 = vpop.f32.mrb[24].mxu0 }
 0x627   : > { %v17715_v40 = vpack.i.bf16 %v7086_v56, %v7102_v34  ;;  %v7072_v41 = vadd.f32 %v17275_v43, %v22809_v42  ;;  %v6969_v46 = vpop.f32.mrb[25].mxu0 }
 0x628   : > { %v17713_v33 = vpack.i.bf16 %v7085_v10, %v7101_v55  ;;  %v7071_v54 = vadd.f32 %v22809_v42, %v6969_v46  ;;  %v17842_v55 = vld [vmem:[#allocation9 + $0xa08] ss:$16 sps:$4 sm:$0xff]   ;;  %v17850_v46 = vld [vmem:[#allocation9 + $0xa2c] ss:$16 sps:$4 sm:$0xff]  }
 0x629   : > { %v7104_v23 = vmax.f32 %v7072_v41, 0.0  ;;  %v17847_v41 = vld [vmem:[#allocation9 + $0x22c] ss:$16 sps:$4 sm:$0xff]  }
 0x62a   : > { %v7103_v35 = vmax.f32 %v7071_v54, 0.0  ;;  %17708 = vxpose.xlu0.b32.cont [4/16] (narrow) %v17707_v52, 16  ;;  %v17278_v57 = vpop.f32.mrb[26].mxu0  ;;  %v17853_v54 = vld [vmem:[#allocation9 + $0x24c] ss:$16 sps:$4 sm:$0xff]  }
 0x62b   : > { %v17719_v38 = vpack.i.bf16 %v7088_v20, %v7104_v23  ;;  %v7074_v28 = vadd.f32 %v17278_v57, %v22809_v42  ;;  %v6979_v19 = vpop.f32.mrb[27].mxu0  ;;  %v17856_v20 = vld [vmem:[#allocation9 + $0xa4c] ss:$16 sps:$4 sm:$0xff]   ;;  %v17854_v23 = vld [vmem:[#allocation9 + $0xa48] ss:$16 sps:$4 sm:$0xff]  }
 0x62c   : > { %v17717_v16 = vpack.i.bf16 %v7087_v17, %v7103_v35  ;;  %v7073_v2 = vadd.f32 %v22809_v42, %v6979_v19  ;;  %v17862_v17 = vld [vmem:[#allocation9 + $0xa6c] ss:$16 sps:$4 sm:$0xff]   ;;  %v17860_v35 = vld [vmem:[#allocation9 + $0xa68] ss:$16 sps:$4 sm:$0xff]  }
 0x62d   : > { %v7106_v61 = vmax.f32 %v7074_v28, 0.0  ;;  %v17865_v57 = vld [vmem:[#allocation9 + $0x28c] ss:$16 sps:$4 sm:$0xff]   ;;  %v17863_v28 = vld [vmem:[#allocation9 + $0x288] ss:$16 sps:$4 sm:$0xff]  }
 0x62e   : > { %v7105_v47 = vmax.f32 %v7073_v2, 0.0  ;;  %17710 = vxpose.xlu0.b32.cont [5/16] (narrow) %v17709_v48, 16  ;;  %v17281_v39 = vpop.f32.mrb[28].mxu0  ;;  %v17866_v19 = vld [vmem:[#allocation9 + $0xa88] ss:$16 sps:$4 sm:$0xff]  }
 0x62f   : > { %v17723_v29 = vpack.i.bf16 %v7090_v18, %v7106_v61  ;;  %v7076_v52 = vadd.f32 %v17281_v39, %v22809_v42  ;;  %v6989_v15 = vpop.f32.mrb[29].mxu0  ;;  %v17869_v2 = vld [vmem:[#allocation9 + $0x2a8] ss:$16 sps:$4 sm:$0xff]   ;;  %v17880_v61 = vld [vmem:[#allocation9 + $0xacc] ss:$16 sps:$4 sm:$0xff]  }
 0x630   : > { %v17721_v31 = vpack.i.bf16 %v7089_v58, %v7105_v47  ;;  %v7075_v50 = vadd.f32 %v22809_v42, %v6989_v15  ;;  %v17872_v18 = vld [vmem:[#allocation9 + $0xaa8] ss:$16 sps:$4 sm:$0xff]   ;;  %v17883_v47 = vld [vmem:[#allocation9 + $0x2ec] ss:$16 sps:$4 sm:$0xff]  }
 0x631   : > { %v7108_v8 = vmax.f32 %v7076_v52, 0.0  ;;  %v17875_v58 = vld [vmem:[#allocation9 + $0x2c8] ss:$16 sps:$4 sm:$0xff]   ;;  %v17886_v39 = vld [vmem:[#allocation9 + $0xaec] ss:$16 sps:$4 sm:$0xff]  }
 0x632   : > { %v7107_v30 = vmax.f32 %v7075_v50, 0.0  ;;  %17712 = vxpose.xlu0.b32.cont [6/16] (narrow) %v22837_v26, 16  ;;  %v17284_v13 = vpop.f32.mrb[30].mxu0  ;;  %v17884_v52 = vld [vmem:[#allocation9 + $0xae8] ss:$16 sps:$4 sm:$0xff]  }
 0x633   : > { %v17727_v49 = vpack.i.bf16 %v7092_v5, %v7108_v8  ;;  %v7078_v53 = vadd.f32 %v17284_v13, %v22809_v42  ;;  %v6999_v22 = vpop.f32.mrb[31].mxu0  ;;  %v17889_v15 = vld [vmem:[#allocation9 + $0x30c] ss:$16 sps:$4 sm:$0xff]   ;;  %v17887_v50 = vld [vmem:[#allocation9 + $0x308] ss:$16 sps:$4 sm:$0xff]  }
 0x634   : > { %v17725_v62 = vpack.i.bf16 %v7091_v44, %v7107_v30  ;;  %v7077_v9 = vadd.f32 %v22809_v42, %v6999_v22  ;;  %v17890_v5 = vld [vmem:[#allocation9 + $0xb08] ss:$16 sps:$4 sm:$0xff]   ;;  %v17898_v8 = vld [vmem:[#allocation9 + $0xb2c] ss:$16 sps:$4 sm:$0xff]  }
 0x635   : > { %v7110_v7 = vmax.f32 %v7078_v53, 0.0  ;;  %v17893_v44 = vld [vmem:[#allocation9 + $0x328] ss:$16 sps:$4 sm:$0xff]   ;;  %v17901_v30 = vld [vmem:[#allocation9 + $0x34c] ss:$16 sps:$4 sm:$0xff]  }
 0x636   : > { %v7109_v21 = vmax.f32 %v7077_v9, 0.0  ;;  %17714 = vxpose.xlu0.b32.cont [7/16] (narrow) %v17713_v33, 16  ;;  %v17848_v33 = vld [vmem:[#allocation9 + $0xa28] ss:$16 sps:$4 sm:$0xff]   ;;  %v17904_v13 = vld [vmem:[#allocation9 + $0xb4c] ss:$16 sps:$4 sm:$0xff]  }
 0x637   : > { %v17731_v14 = vpack.i.bf16 %v7094_v60, %v7110_v7  ;;  %v17902_v53 = vld [vmem:[#allocation9 + $0xb48] ss:$16 sps:$4 sm:$0xff]   ;;  %v17907_v22 = vld [vmem:[#allocation9 + $0x36c] ss:$16 sps:$4 sm:$0xff]  }
 0x638   : > { %v17729_v48 = vpack.i.bf16 %v7093_v27, %v7109_v21  ;;  %v17905_v9 = vld [vmem:[#allocation9 + $0x368] ss:$16 sps:$4 sm:$0xff]   ;;  %v17913_v7 = vld [vmem:[#allocation9 + $0x38c] ss:$16 sps:$4 sm:$0xff]  }
 0x639   : > { %v17908_v60 = vld [vmem:[#allocation9 + $0xb68] ss:$16 sps:$4 sm:$0xff]   ;;  %v17916_v27 = vld [vmem:[#allocation9 + $0xb8c] ss:$16 sps:$4 sm:$0xff]  }
 0x63a   : > { %17716 = vxpose.xlu0.b32.cont [8/16] (narrow) %v17715_v40, 16  ;;  %v17911_v21 = vld [vmem:[#allocation9 + $0x388] ss:$16 sps:$4 sm:$0xff]  }
 0x63e   : > { %17718 = vxpose.xlu0.b32.cont [9/16] (narrow) %v17717_v16, 16  ;;  %v17874_v16 = vld [vmem:[#allocation9 + $0xaac] ss:$16 sps:$4 sm:$0xff]  }
 0x642   : > { %17720 = vxpose.xlu0.b32.cont [10/16] (narrow) %v17719_v38, 16  ;;  %v17868_v38 = vld [vmem:[#allocation9 + $0xa8c] ss:$16 sps:$4 sm:$0xff]  }
 0x646   : > { %17722 = vxpose.xlu0.b32.cont [11/16] (narrow) %v17721_v31, 16  ;;  %v17892_v31 = vld [vmem:[#allocation9 + $0xb0c] ss:$16 sps:$4 sm:$0xff]  }
 0x64a   : > { %17724 = vxpose.xlu0.b32.cont [12/16] (narrow) %v17723_v29, 16  ;;  %v17881_v29 = vld [vmem:[#allocation9 + $0x2e8] ss:$16 sps:$4 sm:$0xff]  }
 0x64e   : > { %17726 = vxpose.xlu0.b32.cont [13/16] (narrow) %v17725_v62, 16  ;;  %v17910_v62 = vld [vmem:[#allocation9 + $0xb6c] ss:$16 sps:$4 sm:$0xff]  }
 0x652   : > { %17728 = vxpose.xlu0.b32.cont [14/16] (narrow) %v17727_v49, 16  ;;  %v17899_v49 = vld [vmem:[#allocation9 + $0x348] ss:$16 sps:$4 sm:$0xff]  }
 0x656   : > { %17730 = vxpose.xlu0.b32.cont [15/16] (narrow) %v17729_v48, 16  ;;  %v17919_v48 = vld [vmem:[#allocation9 + $0x3ac] ss:$16 sps:$4 sm:$0xff]  }
 0x65a   : > { %17732 = vxpose.xlu0.b32.end [16/16] (narrow) %v17731_v14, 16  ;;  %v17914_v14 = vld [vmem:[#allocation9 + $0xb88] ss:$16 sps:$4 sm:$0xff]  }
 0x69e   : > { %v17733_v37 = vpop.trf.xlu0 }
 0x69f   : > { %v17737_v26 = vunpack.i.h.bf16 %v17733_v37  ;;  %v17734_v11 = vunpack.i.l.bf16 %v17733_v37  ;;  %v17922_v37 = vld [vmem:[#allocation9 + $0xbac] ss:$16 sps:$4 sm:$0xff]  }
 0x6a2   : > { %v17738_v42 = vpop.trf.xlu0 }
 0x6a3   : > { %v17742_v56 = vunpack.i.h.bf16 %v17738_v42  ;;  %v17739_v24 = vunpack.i.l.bf16 %v17738_v42  ;;  %v17925_v42 = vld [vmem:[#allocation9 + $0x3cc] ss:$16 sps:$4 sm:$0xff]  }
 0x6a5   : > { %v22866_v34 = vpack.c.bf16 %v17742_v56, %v17737_v26  ;;  %v22868_v12 = vpack.c.bf16 %v17739_v24, %v17734_v11  ;;  %v17917_v26 = vld [vmem:[#allocation9 + $0x3a8] ss:$16 sps:$4 sm:$0xff]   ;;  %v17928_v56 = vld [vmem:[#allocation9 + $0xbcc] ss:$16 sps:$4 sm:$0xff]  }
 0x6a6   : > { %v17920_v11 = vld [vmem:[#allocation9 + $0xba8] ss:$16 sps:$4 sm:$0xff]  }
 0x6a7   : > { %v22871_v10 = vshrl.u32 %v22868_v12, 16  ;;  %v9136_v63 = vrot.slane %v22868_v12, 2  ;;  %v22875_v43 = vshrl.u32 %v22866_v34, 16  ;;  %v9135_v51 = vrot.slane %v22866_v34, 2  ;;  %v17923_v24 = vld [vmem:[#allocation9 + $0x3c8] ss:$16 sps:$4 sm:$0xff]  }
 0x6a9   : > { %7666 = vmatprep.mubr.bf16.mxu1 %v22871_v10  ;;  %9532 = vmatprep.mubr.bf16.mxu0 %v9136_v63  ;;  %v9611_v40 = vrot.slane %v22871_v10, 2 }
 0x6aa   : > { %7667 = vmatmul.mubr.bf16.vlgmr.msra.gmra.mrb[0].mxu1 %v22875_v43  ;;  %9533 = vmatmul.mubr.bf16.vlgmr.msra.gmra.mrb[32].mxu0 %v9135_v51 }
 0x6ab   : > { %7676 = vmatpush1.bf16.msra.mxu1 %v17839_v3  ;;  %9976 = vmatpush1.bf16.msra.mxu0 %v17842_v55  ;;  %v17926_v3 = vld [vmem:[#allocation9 + $0xbc8] ss:$16 sps:$4 sm:$0xff]   ;;  %v17931_v55 = vld [vmem:[#allocation9 + $0x3ec] ss:$16 sps:$4 sm:$0xff]  }
 0x6ac   : > { %7707 = vmatprep.mubr.bf16.mxu1 %v22871_v10  ;;  %10007 = vmatprep.mubr.bf16.mxu0 %v9611_v40 }
 0x6ad   : > { %7677 = vmatprep.subr.bf16.mxu1 %v17847_v41  ;;  %9977 = vmatprep.subr.bf16.mxu0 %v17850_v46  ;;  %v17934_v41 = vld [vmem:[#allocation9 + $0xbec] ss:$16 sps:$4 sm:$0xff]   ;;  %v17929_v46 = vld [vmem:[#allocation9 + $0x3e8] ss:$16 sps:$4 sm:$0xff]  }
 0x6af   : > { %7678 = vmatpush1.bf16.msra.mxu1 %v17845_v0  ;;  %9978 = vmatpush1.bf16.msra.mxu0 %v17848_v33  ;;  %v17932_v0 = vld [vmem:[#allocation9 + $0xbe8] ss:$16 sps:$4 sm:$0xff]   ;;  %v17937_v33 = vld [vmem:[#allocation9 + $0x4] ss:$16 sps:$4 sm:$0xff]  }
 0x6b0   : > { %7679 = vmatprep.subr.bf16.mxu1 %v17853_v54  ;;  %9979 = vmatprep.subr.bf16.mxu0 %v17856_v20  ;;  %v17940_v54 = vld [vmem:[#allocation9 + $0xc0c] ss:$16 sps:$4 sm:$0xff]   ;;  %v17935_v20 = vld [vmem:[#allocation9] ss:$16 sps:$4 sm:$0xff]  }
 0x6b3   : > { %7680 = vmatpush1.bf16.msra.mxu1 %v17851_v4  ;;  %9980 = vmatpush1.bf16.msra.mxu0 %v17854_v23  ;;  %v9610_v4 = vrot.slane %v22875_v43, 2  ;;  %v17938_v23 = vld [vmem:[#allocation9 + $0xc08] ss:$16 sps:$4 sm:$0xff]  }
 0x6b4   : > { %7681 = vmatprep.subr.bf16.mxu1 %v17859_v59  ;;  %9981 = vmatprep.subr.bf16.mxu0 %v17862_v17  ;;  %v17943_v59 = vld [vmem:[#allocation9 + $0x24] ss:$16 sps:$4 sm:$0xff]   ;;  %v17946_v17 = vld [vmem:[#allocation9 + $0xc2c] ss:$16 sps:$4 sm:$0xff]  }
 0x6b7   : > { %7682 = vmatpush1.bf16.msra.mxu1 %v17857_v1  ;;  %9982 = vmatpush1.bf16.msra.mxu0 %v17860_v35  ;;  %v10086_v1 = vrot.slane %v22868_v12, 3  ;;  %v17941_v35 = vld [vmem:[#allocation9 + $0x20] ss:$16 sps:$4 sm:$0xff]  }
 0x6b8   : > { %7683 = vmatprep.subr.bf16.mxu1 %v17865_v57  ;;  %9983 = vmatprep.subr.bf16.mxu0 %v17868_v38  ;;  %v17944_v57 = vld [vmem:[#allocation9 + $0xc28] ss:$16 sps:$4 sm:$0xff]   ;;  %v17949_v38 = vld [vmem:[#allocation9 + $0x44] ss:$16 sps:$4 sm:$0xff]  }
 0x6bb   : > { %7684 = vmatpush1.bf16.msra.mxu1 %v17863_v28  ;;  %9984 = vmatpush1.bf16.msra.mxu0 %v17866_v19  ;;  %v17952_v28 = vld [vmem:[#allocation9 + $0xc4c] ss:$16 sps:$4 sm:$0xff]   ;;  %v17947_v19 = vld [vmem:[#allocation9 + $0x40] ss:$16 sps:$4 sm:$0xff]  }
 0x6bc   : > { %7685 = vmatprep.subr.bf16.mxu1 %v17871_v6  ;;  %9985 = vmatprep.subr.bf16.mxu0 %v17874_v16  ;;  %v17950_v6 = vld [vmem:[#allocation9 + $0xc48] ss:$16 sps:$4 sm:$0xff]   ;;  %v17955_v16 = vld [vmem:[#allocation9 + $0x64] ss:$16 sps:$4 sm:$0xff]  }
 0x6bf   : > { %7686 = vmatpush1.bf16.msra.mxu1 %v17869_v2  ;;  %9986 = vmatpush1.bf16.msra.mxu0 %v17872_v18  ;;  %v17958_v2 = vld [vmem:[#allocation9 + $0xc6c] ss:$16 sps:$4 sm:$0xff]   ;;  %v17953_v18 = vld [vmem:[#allocation9 + $0x60] ss:$16 sps:$4 sm:$0xff]  }
 0x6c0   : > { %7687 = vmatprep.subr.bf16.mxu1 %v17877_v36  ;;  %9987 = vmatprep.subr.bf16.mxu0 %v17880_v61  ;;  %v17956_v36 = vld [vmem:[#allocation9 + $0xc68] ss:$16 sps:$4 sm:$0xff]   ;;  %v17961_v61 = vld [vmem:[#allocation9 + $0x84] ss:$16 sps:$4 sm:$0xff]  }
 0x6c3   : > { %7688 = vmatpush1.bf16.msra.mxu1 %v17875_v58  ;;  %9988 = vmatpush1.bf16.msra.mxu0 %v17878_v45  ;;  %v17964_v58 = vld [vmem:[#allocation9 + $0xc8c] ss:$16 sps:$4 sm:$0xff]   ;;  %v17959_v45 = vld [vmem:[#allocation9 + $0x80] ss:$16 sps:$4 sm:$0xff]  }
 0x6c4   : > { %7689 = vmatprep.subr.bf16.mxu1 %v17883_v47  ;;  %9989 = vmatprep.subr.bf16.mxu0 %v17886_v39  ;;  %v17962_v47 = vld [vmem:[#allocation9 + $0xc88] ss:$16 sps:$4 sm:$0xff]   ;;  %v17967_v39 = vld [vmem:[#allocation9 + $0xa4] ss:$16 sps:$4 sm:$0xff]  }
 0x6c7   : > { %7690 = vmatpush1.bf16.msra.mxu1 %v17881_v29  ;;  %9990 = vmatpush1.bf16.msra.mxu0 %v17884_v52  ;;  %v17970_v29 = vld [vmem:[#allocation9 + $0xcac] ss:$16 sps:$4 sm:$0xff]   ;;  %v17965_v52 = vld [vmem:[#allocation9 + $0xa0] ss:$16 sps:$4 sm:$0xff]  }
 0x6c8   : > { %7691 = vmatprep.subr.bf16.mxu1 %v17889_v15  ;;  %9991 = vmatprep.subr.bf16.mxu0 %v17892_v31  ;;  %v17968_v15 = vld [vmem:[#allocation9 + $0xca8] ss:$16 sps:$4 sm:$0xff]   ;;  %v17973_v31 = vld [vmem:[#allocation9 + $0xc4] ss:$16 sps:$4 sm:$0xff]  }
 0x6cb   : > { %7692 = vmatpush1.bf16.msra.mxu1 %v17887_v50  ;;  %9992 = vmatpush1.bf16.msra.mxu0 %v17890_v5  ;;  %v17976_v50 = vld [vmem:[#allocation9 + $0xccc] ss:$16 sps:$4 sm:$0xff]   ;;  %v17971_v5 = vld [vmem:[#allocation9 + $0xc0] ss:$16 sps:$4 sm:$0xff]  }
 0x6cc   : > { %7693 = vmatprep.subr.bf16.mxu1 %v17895_v25  ;;  %9993 = vmatprep.subr.bf16.mxu0 %v17898_v8  ;;  %v17974_v25 = vld [vmem:[#allocation9 + $0xcc8] ss:$16 sps:$4 sm:$0xff]   ;;  %v17979_v8 = vld [vmem:[#allocation9 + $0xe4] ss:$16 sps:$4 sm:$0xff]  }
 0x6cf   : > { %7694 = vmatpush1.bf16.msra.mxu1 %v17893_v44  ;;  %9994 = vmatpush1.bf16.msra.mxu0 %v17896_v32  ;;  %v17982_v44 = vld [vmem:[#allocation9 + $0xcec] ss:$16 sps:$4 sm:$0xff]   ;;  %v17977_v32 = vld [vmem:[#allocation9 + $0xe0] ss:$16 sps:$4 sm:$0xff]  }
 0x6d0   : > { %7695 = vmatprep.subr.bf16.mxu1 %v17901_v30  ;;  %9995 = vmatprep.subr.bf16.mxu0 %v17904_v13  ;;  %v17980_v30 = vld [vmem:[#allocation9 + $0xce8] ss:$16 sps:$4 sm:$0xff]   ;;  %v17985_v13 = vld [vmem:[#allocation9 + $0x104] ss:$16 sps:$4 sm:$0xff]  }
 0x6d3   : > { %7696 = vmatpush1.bf16.msra.mxu1 %v17899_v49  ;;  %9996 = vmatpush1.bf16.msra.mxu0 %v17902_v53  ;;  %v17988_v49 = vld [vmem:[#allocation9 + $0xd0c] ss:$16 sps:$4 sm:$0xff]   ;;  %v17983_v53 = vld [vmem:[#allocation9 + $0x100] ss:$16 sps:$4 sm:$0xff]  }
 0x6d4   : > { %7697 = vmatprep.subr.bf16.mxu1 %v17907_v22  ;;  %9997 = vmatprep.subr.bf16.mxu0 %v17910_v62  ;;  %v17986_v22 = vld [vmem:[#allocation9 + $0xd08] ss:$16 sps:$4 sm:$0xff]   ;;  %v17991_v62 = vld [vmem:[#allocation9 + $0x124] ss:$16 sps:$4 sm:$0xff]  }
 0x6d7   : > { %7698 = vmatpush1.bf16.msra.mxu1 %v17905_v9  ;;  %9998 = vmatpush1.bf16.msra.mxu0 %v17908_v60  ;;  %v17994_v9 = vld [vmem:[#allocation9 + $0xd2c] ss:$16 sps:$4 sm:$0xff]   ;;  %v17989_v60 = vld [vmem:[#allocation9 + $0x120] ss:$16 sps:$4 sm:$0xff]  }
 0x6d8   : > { %7699 = vmatprep.subr.bf16.mxu1 %v17913_v7  ;;  %9999 = vmatprep.subr.bf16.mxu0 %v17916_v27  ;;  %v17992_v7 = vld [vmem:[#allocation9 + $0xd28] ss:$16 sps:$4 sm:$0xff]   ;;  %v17997_v27 = vld [vmem:[#allocation9 + $0x144] ss:$16 sps:$4 sm:$0xff]  }
 0x6db   : > { %7700 = vmatpush1.bf16.msra.mxu1 %v17911_v21  ;;  %10000 = vmatpush1.bf16.msra.mxu0 %v17914_v14  ;;  %v18000_v21 = vld [vmem:[#allocation9 + $0xd4c] ss:$16 sps:$4 sm:$0xff]   ;;  %v17995_v14 = vld [vmem:[#allocation9 + $0x140] ss:$16 sps:$4 sm:$0xff]  }
 0x6dc   : > { %7701 = vmatprep.subr.bf16.mxu1 %v17919_v48  ;;  %10001 = vmatprep.subr.bf16.mxu0 %v17922_v37  ;;  %v17998_v48 = vld [vmem:[#allocation9 + $0xd48] ss:$16 sps:$4 sm:$0xff]   ;;  %v18003_v37 = vld [vmem:[#allocation9 + $0x164] ss:$16 sps:$4 sm:$0xff]  }
 0x6df   : > { %7702 = vmatpush1.bf16.msra.mxu1 %v17917_v26  ;;  %10002 = vmatpush1.bf16.msra.mxu0 %v17920_v11  ;;  %v18006_v26 = vld [vmem:[#allocation9 + $0xd6c] ss:$16 sps:$4 sm:$0xff]   ;;  %v18001_v11 = vld [vmem:[#allocation9 + $0x160] ss:$16 sps:$4 sm:$0xff]  }
 0x6e0   : > { %7703 = vmatprep.subr.bf16.mxu1 %v17925_v42  ;;  %10003 = vmatprep.subr.bf16.mxu0 %v17928_v56  ;;  %v18004_v42 = vld [vmem:[#allocation9 + $0xd68] ss:$16 sps:$4 sm:$0xff]   ;;  %v18009_v56 = vld [vmem:[#allocation9 + $0x184] ss:$16 sps:$4 sm:$0xff]  }
 0x6e3   : > { %7704 = vmatpush1.bf16.msra.mxu1 %v17923_v24  ;;  %10004 = vmatpush1.bf16.msra.mxu0 %v17926_v3  ;;  %v18012_v24 = vld [vmem:[#allocation9 + $0xd8c] ss:$16 sps:$4 sm:$0xff]   ;;  %v18007_v3 = vld [vmem:[#allocation9 + $0x180] ss:$16 sps:$4 sm:$0xff]  }
 0x6e4   : > { %7705 = vmatprep.subr.bf16.mxu1 %v17931_v55  ;;  %10005 = vmatprep.subr.bf16.mxu0 %v17934_v41  ;;  %v18010_v55 = vld [vmem:[#allocation9 + $0xd88] ss:$16 sps:$4 sm:$0xff]   ;;  %v18015_v41 = vld [vmem:[#allocation9 + $0x1a4] ss:$16 sps:$4 sm:$0xff]  }
 0x6e7   : > { %7706 = vmatpush1.bf16.msra.mxu1 %v17929_v46  ;;  %10006 = vmatpush1.bf16.msra.mxu0 %v17932_v0  ;;  %v18018_v46 = vld [vmem:[#allocation9 + $0xdac] ss:$16 sps:$4 sm:$0xff]   ;;  %v18013_v0 = vld [vmem:[#allocation9 + $0x1a0] ss:$16 sps:$4 sm:$0xff]  }
 0x6e8   : > { %8036 = vmatprep.subr.bf16.mxu1 %v17937_v33  ;;  %10450 = vmatprep.subr.bf16.mxu0 %v17940_v54  ;;  %v18016_v33 = vld [vmem:[#allocation9 + $0xda8] ss:$16 sps:$4 sm:$0xff]   ;;  %v18021_v54 = vld [vmem:[#allocation9 + $0x1c4] ss:$16 sps:$4 sm:$0xff]  }
 0x6ea   : > { %7708 = vmatmul.mubr.bf16.vlgmr.msra.gmra.mrb[4].mxu1 %v22875_v43  ;;  %10008 = vmatmul.mubr.bf16.vlgmr.msra.gmra.mrb[36].mxu0 %v9610_v4 }
 0x6eb   : > { %8037 = vmatpush1.bf16.msra.mxu1 %v17935_v20  ;;  %8068 = vmatprep.mubr.bf16.mxu1 %v22868_v12  ;;  %v18024_v20 = vld [vmem:[#allocation9 + $0xdcc] ss:$16 sps:$4 sm:$0xff]  }
 0x6ec   : > { %10451 = vmatpush1.bf16.msra.mxu0 %v17938_v23  ;;  %10482 = vmatprep.mubr.bf16.mxu0 %v10086_v1  ;;  %v18019_v23 = vld [vmem:[#allocation9 + $0x1c0] ss:$16 sps:$4 sm:$0xff]  }
 0x6ed   : > { %8038 = vmatprep.subr.bf16.mxu1 %v17943_v59  ;;  %10452 = vmatprep.subr.bf16.mxu0 %v17946_v17  ;;  %v18022_v59 = vld [vmem:[#allocation9 + $0xdc8] ss:$16 sps:$4 sm:$0xff]   ;;  %v18027_v17 = vld [vmem:[#allocation9 + $0x1e4] ss:$16 sps:$4 sm:$0xff]  }
 0x6ef   : > { %8039 = vmatpush1.bf16.msra.mxu1 %v17941_v35  ;;  %v18030_v35 = vld [vmem:[#allocation9 + $0xdec] ss:$16 sps:$4 sm:$0xff]  }
 0x6f0   : > { %10453 = vmatpush1.bf16.msra.mxu0 %v17944_v57  ;;  %8040 = vmatprep.subr.bf16.mxu1 %v17949_v38  ;;  %v18025_v57 = vld [vmem:[#allocation9 + $0x1e0] ss:$16 sps:$4 sm:$0xff]   ;;  %v18028_v38 = vld [vmem:[#allocation9 + $0xde8] ss:$16 sps:$4 sm:$0xff]  }
 0x6f1   : > { %10454 = vmatprep.subr.bf16.mxu0 %v17952_v28  ;;  %v18033_v28 = vld [vmem:[#allocation9 + $0xc] ss:$16 sps:$4 sm:$0xff]  }
 0x6f3   : > { %8041 = vmatpush1.bf16.msra.mxu1 %v17947_v19  ;;  %v18036_v19 = vld [vmem:[#allocation9 + $0xe0c] ss:$16 sps:$4 sm:$0xff]  }
 0x6f4   : > { %10455 = vmatpush1.bf16.msra.mxu0 %v17950_v6  ;;  %8042 = vmatprep.subr.bf16.mxu1 %v17955_v16  ;;  %v18031_v6 = vld [vmem:[#allocation9 + $0x8] ss:$16 sps:$4 sm:$0xff]  }
 0x6f5   : > { %10456 = vmatprep.subr.bf16.mxu0 %v17958_v2  ;;  %v18034_v16 = vld [vmem:[#allocation9 + $0xe08] ss:$16 sps:$4 sm:$0xff]   ;;  %v10085_v2 = vrot.slane %v22866_v34, 3 }
 0x6f7   : > { %8043 = vmatpush1.bf16.msra.mxu1 %v17953_v18  ;;  %v18039_v18 = vld [vmem:[#allocation9 + $0x2c] ss:$16 sps:$4 sm:$0xff]  }
 0x6f8   : > { %10457 = vmatpush1.bf16.msra.mxu0 %v17956_v36  ;;  %8044 = vmatprep.subr.bf16.mxu1 %v17961_v61  ;;  %v18042_v36 = vld [vmem:[#allocation9 + $0xe2c] ss:$16 sps:$4 sm:$0xff]   ;;  %v10561_v61 = vrot.slane %v22871_v10, 3 }
 0x6f9   : > { %10458 = vmatprep.subr.bf16.mxu0 %v17964_v58  ;;  %v18037_v58 = vld [vmem:[#allocation9 + $0x28] ss:$16 sps:$4 sm:$0xff]  }
 0x6fb   : > { %8045 = vmatpush1.bf16.msra.mxu1 %v17959_v45  ;;  %v18040_v45 = vld [vmem:[#allocation9 + $0xe28] ss:$16 sps:$4 sm:$0xff]  }
 0x6fc   : > { %10459 = vmatpush1.bf16.msra.mxu0 %v17962_v47  ;;  %8046 = vmatprep.subr.bf16.mxu1 %v17967_v39  ;;  %v18045_v47 = vld [vmem:[#allocation9 + $0x4c] ss:$16 sps:$4 sm:$0xff]  }
 0x6fd   : > { %10460 = vmatprep.subr.bf16.mxu0 %v17970_v29  ;;  %v18048_v39 = vld [vmem:[#allocation9 + $0xe4c] ss:$16 sps:$4 sm:$0xff]   ;;  %v18043_v29 = vld [vmem:[#allocation9 + $0x48] ss:$16 sps:$4 sm:$0xff]  }
 0x6ff   : > { %8047 = vmatpush1.bf16.msra.mxu1 %v17965_v52  ;;  %v18046_v52 = vld [vmem:[#allocation9 + $0xe48] ss:$16 sps:$4 sm:$0xff]  }
 0x700   : > { %10461 = vmatpush1.bf16.msra.mxu0 %v17968_v15  ;;  %8048 = vmatprep.subr.bf16.mxu1 %v17973_v31  ;;  %v18051_v15 = vld [vmem:[#allocation9 + $0x6c] ss:$16 sps:$4 sm:$0xff]  }
 0x701   : > { %10462 = vmatprep.subr.bf16.mxu0 %v17976_v50  ;;  %v18054_v31 = vld [vmem:[#allocation9 + $0xe6c] ss:$16 sps:$4 sm:$0xff]   ;;  %v18049_v50 = vld [vmem:[#allocation9 + $0x68] ss:$16 sps:$4 sm:$0xff]  }
 0x703   : > { %8049 = vmatpush1.bf16.msra.mxu1 %v17971_v5  ;;  %v18052_v5 = vld [vmem:[#allocation9 + $0xe68] ss:$16 sps:$4 sm:$0xff]  }
 0x704   : > { %10463 = vmatpush1.bf16.msra.mxu0 %v17974_v25  ;;  %8050 = vmatprep.subr.bf16.mxu1 %v17979_v8  ;;  %v18057_v25 = vld [vmem:[#allocation9 + $0x8c] ss:$16 sps:$4 sm:$0xff]  }
 0x705   : > { %10464 = vmatprep.subr.bf16.mxu0 %v17982_v44  ;;  %v18060_v8 = vld [vmem:[#allocation9 + $0xe8c] ss:$16 sps:$4 sm:$0xff]   ;;  %v18055_v44 = vld [vmem:[#allocation9 + $0x88] ss:$16 sps:$4 sm:$0xff]  }
 0x707   : > { %8051 = vmatpush1.bf16.msra.mxu1 %v17977_v32  ;;  %v18058_v32 = vld [vmem:[#allocation9 + $0xe88] ss:$16 sps:$4 sm:$0xff]  }
 0x708   : > { %10465 = vmatpush1.bf16.msra.mxu0 %v17980_v30  ;;  %8052 = vmatprep.subr.bf16.mxu1 %v17985_v13  ;;  %v18063_v30 = vld [vmem:[#allocation9 + $0xac] ss:$16 sps:$4 sm:$0xff]  }
 0x709   : > { %10466 = vmatprep.subr.bf16.mxu0 %v17988_v49  ;;  %v18066_v13 = vld [vmem:[#allocation9 + $0xeac] ss:$16 sps:$4 sm:$0xff]   ;;  %v18061_v49 = vld [vmem:[#allocation9 + $0xa8] ss:$16 sps:$4 sm:$0xff]  }
 0x70b   : > { %8053 = vmatpush1.bf16.msra.mxu1 %v17983_v53  ;;  %v18064_v53 = vld [vmem:[#allocation9 + $0xea8] ss:$16 sps:$4 sm:$0xff]  }
 0x70c   : > { %10467 = vmatpush1.bf16.msra.mxu0 %v17986_v22  ;;  %8054 = vmatprep.subr.bf16.mxu1 %v17991_v62  ;;  %v18069_v22 = vld [vmem:[#allocation9 + $0xcc] ss:$16 sps:$4 sm:$0xff]  }
 0x70d   : > { %10468 = vmatprep.subr.bf16.mxu0 %v17994_v9  ;;  %v18072_v62 = vld [vmem:[#allocation9 + $0xecc] ss:$16 sps:$4 sm:$0xff]   ;;  %v18067_v9 = vld [vmem:[#allocation9 + $0xc8] ss:$16 sps:$4 sm:$0xff]  }
 0x70f   : > { %8055 = vmatpush1.bf16.msra.mxu1 %v17989_v60  ;;  %v18070_v60 = vld [vmem:[#allocation9 + $0xec8] ss:$16 sps:$4 sm:$0xff]  }
 0x710   : > { %10469 = vmatpush1.bf16.msra.mxu0 %v17992_v7  ;;  %8056 = vmatprep.subr.bf16.mxu1 %v17997_v27  ;;  %v18075_v7 = vld [vmem:[#allocation9 + $0xec] ss:$16 sps:$4 sm:$0xff]  }
 0x711   : > { %10470 = vmatprep.subr.bf16.mxu0 %v18000_v21  ;;  %v18078_v27 = vld [vmem:[#allocation9 + $0xeec] ss:$16 sps:$4 sm:$0xff]   ;;  %v18073_v21 = vld [vmem:[#allocation9 + $0xe8] ss:$16 sps:$4 sm:$0xff]  }
 0x713   : > { %8057 = vmatpush1.bf16.msra.mxu1 %v17995_v14  ;;  %v18076_v14 = vld [vmem:[#allocation9 + $0xee8] ss:$16 sps:$4 sm:$0xff]  }
 0x714   : > { %10471 = vmatpush1.bf16.msra.mxu0 %v17998_v48  ;;  %8058 = vmatprep.subr.bf16.mxu1 %v18003_v37  ;;  %v18081_v48 = vld [vmem:[#allocation9 + $0x10c] ss:$16 sps:$4 sm:$0xff]  }
 0x715   : > { %10472 = vmatprep.subr.bf16.mxu0 %v18006_v26  ;;  %v18084_v37 = vld [vmem:[#allocation9 + $0xf0c] ss:$16 sps:$4 sm:$0xff]   ;;  %v18079_v26 = vld [vmem:[#allocation9 + $0x108] ss:$16 sps:$4 sm:$0xff]  }
 0x717   : > { %8059 = vmatpush1.bf16.msra.mxu1 %v18001_v11  ;;  %v18082_v11 = vld [vmem:[#allocation9 + $0xf08] ss:$16 sps:$4 sm:$0xff]  }
 0x718   : > { %10473 = vmatpush1.bf16.msra.mxu0 %v18004_v42  ;;  %8060 = vmatprep.subr.bf16.mxu1 %v18009_v56  ;;  %v18087_v42 = vld [vmem:[#allocation9 + $0x12c] ss:$16 sps:$4 sm:$0xff]  }
 0x719   : > { %10474 = vmatprep.subr.bf16.mxu0 %v18012_v24  ;;  %v18090_v56 = vld [vmem:[#allocation9 + $0xf2c] ss:$16 sps:$4 sm:$0xff]   ;;  %v18085_v24 = vld [vmem:[#allocation9 + $0x128] ss:$16 sps:$4 sm:$0xff]  }
 0x71b   : > { %8061 = vmatpush1.bf16.msra.mxu1 %v18007_v3  ;;  %v18088_v3 = vld [vmem:[#allocation9 + $0xf28] ss:$16 sps:$4 sm:$0xff]  }
 0x71c   : > { %10475 = vmatpush1.bf16.msra.mxu0 %v18010_v55  ;;  %8062 = vmatprep.subr.bf16.mxu1 %v18015_v41  ;;  %v18093_v55 = vld [vmem:[#allocation9 + $0x14c] ss:$16 sps:$4 sm:$0xff]  }
 0x71d   : > { %10476 = vmatprep.subr.bf16.mxu0 %v18018_v46  ;;  %v18096_v41 = vld [vmem:[#allocation9 + $0xf4c] ss:$16 sps:$4 sm:$0xff]   ;;  %v18091_v46 = vld [vmem:[#allocation9 + $0x148] ss:$16 sps:$4 sm:$0xff]  }
 0x71f   : > { %8063 = vmatpush1.bf16.msra.mxu1 %v18013_v0  ;;  %v18094_v0 = vld [vmem:[#allocation9 + $0xf48] ss:$16 sps:$4 sm:$0xff]  }
 0x720   : > { %10477 = vmatpush1.bf16.msra.mxu0 %v18016_v33  ;;  %8064 = vmatprep.subr.bf16.mxu1 %v18021_v54  ;;  %v18099_v33 = vld [vmem:[#allocation9 + $0x16c] ss:$16 sps:$4 sm:$0xff]  }
 0x721   : > { %10478 = vmatprep.subr.bf16.mxu0 %v18024_v20  ;;  %v18102_v54 = vld [vmem:[#allocation9 + $0xf6c] ss:$16 sps:$4 sm:$0xff]   ;;  %v18097_v20 = vld [vmem:[#allocation9 + $0x168] ss:$16 sps:$4 sm:$0xff]  }
 0x723   : > { %8065 = vmatpush1.bf16.msra.mxu1 %v18019_v23  ;;  %v18100_v23 = vld [vmem:[#allocation9 + $0xf68] ss:$16 sps:$4 sm:$0xff]  }
 0x724   : > { %10479 = vmatpush1.bf16.msra.mxu0 %v18022_v59  ;;  %8066 = vmatprep.subr.bf16.mxu1 %v18027_v17  ;;  %v18105_v59 = vld [vmem:[#allocation9 + $0x18c] ss:$16 sps:$4 sm:$0xff]  }
 0x725   : > { %10480 = vmatprep.subr.bf16.mxu0 %v18030_v35  ;;  %v18108_v17 = vld [vmem:[#allocation9 + $0xf8c] ss:$16 sps:$4 sm:$0xff]   ;;  %v18103_v35 = vld [vmem:[#allocation9 + $0x188] ss:$16 sps:$4 sm:$0xff]  }
 0x727   : > { %8067 = vmatpush1.bf16.msra.mxu1 %v18025_v57  ;;  %v18106_v57 = vld [vmem:[#allocation9 + $0xf88] ss:$16 sps:$4 sm:$0xff]  }
 0x728   : > { %10481 = vmatpush1.bf16.msra.mxu0 %v18028_v38  ;;  %8077 = vmatprep.subr.bf16.mxu1 %v18033_v28  ;;  %v18111_v38 = vld [vmem:[#allocation9 + $0x1ac] ss:$16 sps:$4 sm:$0xff]  }
 0x729   : > { %10925 = vmatprep.subr.bf16.mxu0 %v18036_v19  ;;  %v18114_v28 = vld [vmem:[#allocation9 + $0xfac] ss:$16 sps:$4 sm:$0xff]   ;;  %v18109_v19 = vld [vmem:[#allocation9 + $0x1a8] ss:$16 sps:$4 sm:$0xff]  }
 0x72a   : > { %8069 = vmatmul.mubr.bf16.vlgmr.msra.gmra.mrb[8].mxu1 %v22866_v34 }
 0x72b   : > { %10483 = vmatmul.mubr.bf16.vlgmr.msra.gmra.mrb[40].mxu0 %v10085_v2  ;;  %8078 = vmatpush1.bf16.msra.mxu1 %v18031_v6  ;;  %v18112_v6 = vld [vmem:[#allocation9 + $0xfa8] ss:$16 sps:$4 sm:$0xff]  }
 0x72c   : > { %8109 = vmatprep.mubr.bf16.mxu1 %v22868_v12  ;;  %10926 = vmatpush1.bf16.msra.mxu0 %v18034_v16  ;;  %v18117_v16 = vld [vmem:[#allocation9 + $0x1cc] ss:$16 sps:$4 sm:$0xff]  }
 0x72d   : > { %10957 = vmatprep.mubr.bf16.mxu0 %v10561_v61  ;;  %8079 = vmatprep.subr.bf16.mxu1 %v18039_v18  ;;  %v18120_v18 = vld [vmem:[#allocation9 + $0xfcc] ss:$16 sps:$4 sm:$0xff]  }
 0x72e   : > { %10927 = vmatprep.subr.bf16.mxu0 %v18042_v36  ;;  %v18115_v36 = vld [vmem:[#allocation9 + $0x1c8] ss:$16 sps:$4 sm:$0xff]  }
 0x72f   : > { %8080 = vmatpush1.bf16.msra.mxu1 %v18037_v58  ;;  %v18118_v58 = vld [vmem:[#allocation9 + $0xfc8] ss:$16 sps:$4 sm:$0xff]  }
 0x730   : > { %10928 = vmatpush1.bf16.msra.mxu0 %v18040_v45  ;;  %8081 = vmatprep.subr.bf16.mxu1 %v18045_v47  ;;  %v18123_v45 = vld [vmem:[#allocation9 + $0x1ec] ss:$16 sps:$4 sm:$0xff]  }
 0x731   : > { %10929 = vmatprep.subr.bf16.mxu0 %v18048_v39  ;;  %v18126_v47 = vld [vmem:[#allocation9 + $0xfec] ss:$16 sps:$4 sm:$0xff]   ;;  %v18121_v39 = vld [vmem:[#allocation9 + $0x1e8] ss:$16 sps:$4 sm:$0xff]  }
 0x733   : > { %8082 = vmatpush1.bf16.msra.mxu1 %v18043_v29  ;;  %v18124_v29 = vld [vmem:[#allocation9 + $0xfe8] ss:$16 sps:$4 sm:$0xff]  }
 0x734   : > { %10930 = vmatpush1.bf16.msra.mxu0 %v18046_v52  ;;  %8083 = vmatprep.subr.bf16.mxu1 %v18051_v15  ;;  %v18129_v52 = vld [vmem:[#allocation9 + $0x404] ss:$16 sps:$4 sm:$0xff]   ;;  %v18132_v15 = vld [vmem:[#allocation9 + $0x100c] ss:$16 sps:$4 sm:$0xff]  }
 0x735   : > { %10931 = vmatprep.subr.bf16.mxu0 %v18054_v31  ;;  %v18127_v31 = vld [vmem:[#allocation9 + $0x400] ss:$16 sps:$4 sm:$0xff]  }
 0x737   : > { %8084 = vmatpush1.bf16.msra.mxu1 %v18049_v50  ;;  %v18130_v50 = vld [vmem:[#allocation9 + $0x1008] ss:$16 sps:$4 sm:$0xff]  }
 0x738   : > { %10932 = vmatpush1.bf16.msra.mxu0 %v18052_v5  ;;  %8085 = vmatprep.subr.bf16.mxu1 %v18057_v25  ;;  %v10560_v5 = vrot.slane %v22875_v43, 3  ;;  %v18135_v25 = vld [vmem:[#allocation9 + $0x424] ss:$16 sps:$4 sm:$0xff]  }
 0x739   : > { %10933 = vmatprep.subr.bf16.mxu0 %v18060_v8  ;;  %v8186_v8 = vrot.slane %v22868_v12, 1 }
 0x73b   : > { %8086 = vmatpush1.bf16.msra.mxu1 %v18055_v44  ;;  %v18138_v44 = vld [vmem:[#allocation9 + $0x102c] ss:$16 sps:$4 sm:$0xff]  }
 0x73c   : > { %10934 = vmatpush1.bf16.msra.mxu0 %v18058_v32  ;;  %8087 = vmatprep.subr.bf16.mxu1 %v18063_v30  ;;  %v11036_v32 = vrot.slane %v22868_v12, 4  ;;  %v18133_v30 = vld [vmem:[#allocation9 + $0x420] ss:$16 sps:$4 sm:$0xff]  }
 0x73d   : > { %10935 = vmatprep.subr.bf16.mxu0 %v18066_v13  ;;  %v18136_v13 = vld [vmem:[#allocation9 + $0x1028] ss:$16 sps:$4 sm:$0xff]  }
 0x73f   : > { %8088 = vmatpush1.bf16.msra.mxu1 %v18061_v49  ;;  %v18141_v49 = vld [vmem:[#allocation9 + $0x444] ss:$16 sps:$4 sm:$0xff]  }
 0x740   : > { %10936 = vmatpush1.bf16.msra.mxu0 %v18064_v53  ;;  %8089 = vmatprep.subr.bf16.mxu1 %v18069_v22  ;;  %v18144_v53 = vld [vmem:[#allocation9 + $0x104c] ss:$16 sps:$4 sm:$0xff]   ;;  %v18139_v22 = vld [vmem:[#allocation9 + $0x440] ss:$16 sps:$4 sm:$0xff]  }
 0x741   : > { %10937 = vmatprep.subr.bf16.mxu0 %v18072_v62  ;;  %v18142_v62 = vld [vmem:[#allocation9 + $0x1048] ss:$16 sps:$4 sm:$0xff]  }
 0x743   : > { %8090 = vmatpush1.bf16.msra.mxu1 %v18067_v9  ;;  %v18147_v9 = vld [vmem:[#allocation9 + $0x464] ss:$16 sps:$4 sm:$0xff]  }
 0x744   : > { %10938 = vmatpush1.bf16.msra.mxu0 %v18070_v60  ;;  %8091 = vmatprep.subr.bf16.mxu1 %v18075_v7  ;;  %v18150_v60 = vld [vmem:[#allocation9 + $0x106c] ss:$16 sps:$4 sm:$0xff]   ;;  %v18145_v7 = vld [vmem:[#allocation9 + $0x460] ss:$16 sps:$4 sm:$0xff]  }
 0x745   : > { %10939 = vmatprep.subr.bf16.mxu0 %v18078_v27  ;;  %v18148_v27 = vld [vmem:[#allocation9 + $0x1068] ss:$16 sps:$4 sm:$0xff]  }
 0x747   : > { %8092 = vmatpush1.bf16.msra.mxu1 %v18073_v21  ;;  %v18153_v21 = vld [vmem:[#allocation9 + $0x484] ss:$16 sps:$4 sm:$0xff]  }
 0x748   : > { %10940 = vmatpush1.bf16.msra.mxu0 %v18076_v14  ;;  %8093 = vmatprep.subr.bf16.mxu1 %v18081_v48  ;;  %v18156_v14 = vld [vmem:[#allocation9 + $0x108c] ss:$16 sps:$4 sm:$0xff]   ;;  %v18151_v48 = vld [vmem:[#allocation9 + $0x480] ss:$16 sps:$4 sm:$0xff]  }
 0x749   : > { %10941 = vmatprep.subr.bf16.mxu0 %v18084_v37  ;;  %v18154_v37 = vld [vmem:[#allocation9 + $0x1088] ss:$16 sps:$4 sm:$0xff]  }
 0x74b   : > { %8094 = vmatpush1.bf16.msra.mxu1 %v18079_v26  ;;  %v18159_v26 = vld [vmem:[#allocation9 + $0x4a4] ss:$16 sps:$4 sm:$0xff]  }
 0x74c   : > { %10942 = vmatpush1.bf16.msra.mxu0 %v18082_v11  ;;  %8095 = vmatprep.subr.bf16.mxu1 %v18087_v42  ;;  %v18162_v11 = vld [vmem:[#allocation9 + $0x10ac] ss:$16 sps:$4 sm:$0xff]   ;;  %v18157_v42 = vld [vmem:[#allocation9 + $0x4a0] ss:$16 sps:$4 sm:$0xff]  }
 0x74d   : > { %10943 = vmatprep.subr.bf16.mxu0 %v18090_v56  ;;  %v18160_v56 = vld [vmem:[#allocation9 + $0x10a8] ss:$16 sps:$4 sm:$0xff]  }
 0x74f   : > { %8096 = vmatpush1.bf16.msra.mxu1 %v18085_v24  ;;  %v18165_v24 = vld [vmem:[#allocation9 + $0x4c4] ss:$16 sps:$4 sm:$0xff]  }
 0x750   : > { %10944 = vmatpush1.bf16.msra.mxu0 %v18088_v3  ;;  %8097 = vmatprep.subr.bf16.mxu1 %v18093_v55 }
 0x751   : > { %10945 = vmatprep.subr.bf16.mxu0 %v18096_v41  ;;  %v18168_v41 = vld [vmem:[#allocation9 + $0x10cc] ss:$16 sps:$4 sm:$0xff]  }
 0x753   : > { %8098 = vmatpush1.bf16.msra.mxu1 %v18091_v46 }
 0x754   : > { %10946 = vmatpush1.bf16.msra.mxu0 %v18094_v0  ;;  %8099 = vmatprep.subr.bf16.mxu1 %v18099_v33 }
 0x755   : > { %10947 = vmatprep.subr.bf16.mxu0 %v18102_v54 }
 0x757   : > { %8100 = vmatpush1.bf16.msra.mxu1 %v18097_v20  ;;  %v18163_v20 = vld [vmem:[#allocation9 + $0x4c0] ss:$16 sps:$4 sm:$0xff]  }
 0x758   : > { %10948 = vmatpush1.bf16.msra.mxu0 %v18100_v23  ;;  %8101 = vmatprep.subr.bf16.mxu1 %v18105_v59 }
 0x759   : > { %10949 = vmatprep.subr.bf16.mxu0 %v18108_v17  ;;  %v18166_v17 = vld [vmem:[#allocation9 + $0x10c8] ss:$16 sps:$4 sm:$0xff]  }
 0x75b   : > { %8102 = vmatpush1.bf16.msra.mxu1 %v18103_v35  ;;  %v18171_v35 = vld [vmem:[#allocation9 + $0x4e4] ss:$16 sps:$4 sm:$0xff]  }
 0x75c   : > { %10950 = vmatpush1.bf16.msra.mxu0 %v18106_v57  ;;  %8103 = vmatprep.subr.bf16.mxu1 %v18111_v38  ;;  %v18174_v57 = vld [vmem:[#allocation9 + $0x10ec] ss:$16 sps:$4 sm:$0xff]   ;;  %v18169_v38 = vld [vmem:[#allocation9 + $0x4e0] ss:$16 sps:$4 sm:$0xff]  }
 0x75d   : > { %10951 = vmatprep.subr.bf16.mxu0 %v18114_v28  ;;  %v18172_v28 = vld [vmem:[#allocation9 + $0x10e8] ss:$16 sps:$4 sm:$0xff]  }
 0x75f   : > { %8104 = vmatpush1.bf16.msra.mxu1 %v18109_v19  ;;  %v18177_v19 = vld [vmem:[#allocation9 + $0x504] ss:$16 sps:$4 sm:$0xff]  }
 0x760   : > { %10952 = vmatpush1.bf16.msra.mxu0 %v18112_v6  ;;  %8105 = vmatprep.subr.bf16.mxu1 %v18117_v16  ;;  %v18180_v6 = vld [vmem:[#allocation9 + $0x110c] ss:$16 sps:$4 sm:$0xff]   ;;  %v18175_v16 = vld [vmem:[#allocation9 + $0x500] ss:$16 sps:$4 sm:$0xff]  }
 0x761   : > { %10953 = vmatprep.subr.bf16.mxu0 %v18120_v18  ;;  %v18178_v18 = vld [vmem:[#allocation9 + $0x1108] ss:$16 sps:$4 sm:$0xff]  }
 0x763   : > { %8106 = vmatpush1.bf16.msra.mxu1 %v18115_v36  ;;  %v18183_v36 = vld [vmem:[#allocation9 + $0x524] ss:$16 sps:$4 sm:$0xff]  }
 0x764   : > { %10954 = vmatpush1.bf16.msra.mxu0 %v18118_v58  ;;  %8107 = vmatprep.subr.bf16.mxu1 %v18123_v45  ;;  %v18186_v58 = vld [vmem:[#allocation9 + $0x112c] ss:$16 sps:$4 sm:$0xff]   ;;  %v18181_v45 = vld [vmem:[#allocation9 + $0x520] ss:$16 sps:$4 sm:$0xff]  }
 0x765   : > { %10955 = vmatprep.subr.bf16.mxu0 %v18126_v47  ;;  %v18184_v47 = vld [vmem:[#allocation9 + $0x1128] ss:$16 sps:$4 sm:$0xff]  }
 0x767   : > { %8108 = vmatpush1.bf16.msra.mxu1 %v18121_v39  ;;  %v18189_v39 = vld [vmem:[#allocation9 + $0x544] ss:$16 sps:$4 sm:$0xff]  }
 0x768   : > { %10956 = vmatpush1.bf16.msra.mxu0 %v18124_v29  ;;  %8509 = vmatprep.subr.bf16.mxu1 %v18129_v52  ;;  %v18192_v29 = vld [vmem:[#allocation9 + $0x114c] ss:$16 sps:$4 sm:$0xff]   ;;  %v18187_v52 = vld [vmem:[#allocation9 + $0x540] ss:$16 sps:$4 sm:$0xff]  }
 0x769   : > { %11400 = vmatprep.subr.bf16.mxu0 %v18132_v15  ;;  %v18190_v15 = vld [vmem:[#allocation9 + $0x1148] ss:$16 sps:$4 sm:$0xff]  }
 0x76a   : > { %8110 = vmatmul.mubr.bf16.vlgmr.msra.gmra.mrb[12].mxu1 %v22866_v34 }
 0x76b   : > { %10958 = vmatmul.mubr.bf16.vlgmr.msra.gmra.mrb[44].mxu0 %v10560_v5  ;;  %8510 = vmatpush1.bf16.msra.mxu1 %v18127_v31  ;;  %v18195_v31 = vld [vmem:[#allocation9 + $0x564] ss:$16 sps:$4 sm:$0xff]  }
 0x76c   : > { %8541 = vmatprep.mubr.bf16.mxu1 %v8186_v8  ;;  %11401 = vmatpush1.bf16.msra.mxu0 %v18130_v50  ;;  %v18198_v50 = vld [vmem:[#allocation9 + $0x116c] ss:$16 sps:$4 sm:$0xff]  }
 0x76d   : > { %11432 = vmatprep.mubr.bf16.mxu0 %v11036_v32  ;;  %8511 = vmatprep.subr.bf16.mxu1 %v18135_v25  ;;  %v18193_v25 = vld [vmem:[#allocation9 + $0x560] ss:$16 sps:$4 sm:$0xff]  }
 0x76e   : > { %11402 = vmatprep.subr.bf16.mxu0 %v18138_v44  ;;  %v18196_v44 = vld [vmem:[#allocation9 + $0x1168] ss:$16 sps:$4 sm:$0xff]  }
 0x76f   : > { %8512 = vmatpush1.bf16.msra.mxu1 %v18133_v30  ;;  %v18201_v30 = vld [vmem:[#allocation9 + $0x584] ss:$16 sps:$4 sm:$0xff]  }
 0x770   : > { %11403 = vmatpush1.bf16.msra.mxu0 %v18136_v13  ;;  %8513 = vmatprep.subr.bf16.mxu1 %v18141_v49  ;;  %v18204_v13 = vld [vmem:[#allocation9 + $0x118c] ss:$16 sps:$4 sm:$0xff]   ;;  %v18199_v49 = vld [vmem:[#allocation9 + $0x580] ss:$16 sps:$4 sm:$0xff]  }
 0x771   : > { %11404 = vmatprep.subr.bf16.mxu0 %v18144_v53  ;;  %v18202_v53 = vld [vmem:[#allocation9 + $0x1188] ss:$16 sps:$4 sm:$0xff]  }
 0x773   : > { %8514 = vmatpush1.bf16.msra.mxu1 %v18139_v22  ;;  %v18207_v22 = vld [vmem:[#allocation9 + $0x5a4] ss:$16 sps:$4 sm:$0xff]  }
 0x774   : > { %11405 = vmatpush1.bf16.msra.mxu0 %v18142_v62  ;;  %8515 = vmatprep.subr.bf16.mxu1 %v18147_v9  ;;  %v18210_v62 = vld [vmem:[#allocation9 + $0x11ac] ss:$16 sps:$4 sm:$0xff]   ;;  %v18205_v9 = vld [vmem:[#allocation9 + $0x5a0] ss:$16 sps:$4 sm:$0xff]  }
 0x775   : > { %11406 = vmatprep.subr.bf16.mxu0 %v18150_v60  ;;  %v18208_v60 = vld [vmem:[#allocation9 + $0x11a8] ss:$16 sps:$4 sm:$0xff]  }
 0x777   : > { %8516 = vmatpush1.bf16.msra.mxu1 %v18145_v7  ;;  %v18213_v7 = vld [vmem:[#allocation9 + $0x5c4] ss:$16 sps:$4 sm:$0xff]  }
 0x778   : > { %11407 = vmatpush1.bf16.msra.mxu0 %v18148_v27  ;;  %8517 = vmatprep.subr.bf16.mxu1 %v18153_v21  ;;  %v18216_v27 = vld [vmem:[#allocation9 + $0x11cc] ss:$16 sps:$4 sm:$0xff]   ;;  %v18211_v21 = vld [vmem:[#allocation9 + $0x5c0] ss:$16 sps:$4 sm:$0xff]  }
 0x779   : > { %11408 = vmatprep.subr.bf16.mxu0 %v18156_v14  ;;  %v18214_v14 = vld [vmem:[#allocation9 + $0x11c8] ss:$16 sps:$4 sm:$0xff]  }
 0x77b   : > { %8518 = vmatpush1.bf16.msra.mxu1 %v18151_v48  ;;  %v18219_v48 = vld [vmem:[#allocation9 + $0x5e4] ss:$16 sps:$4 sm:$0xff]  }
 0x77c   : > { %11409 = vmatpush1.bf16.msra.mxu0 %v18154_v37  ;;  %8519 = vmatprep.subr.bf16.mxu1 %v18159_v26  ;;  %v18222_v37 = vld [vmem:[#allocation9 + $0x11ec] ss:$16 sps:$4 sm:$0xff]   ;;  %v18217_v26 = vld [vmem:[#allocation9 + $0x5e0] ss:$16 sps:$4 sm:$0xff]  }
 0x77d   : > { %v22914_v3 = vpop.f32.mrb[0].mxu1  ;;  %v22916_v55 = vpop.f32.mrb[32].mxu0  ;;  %11410 = vmatprep.subr.bf16.mxu0 %v18162_v11  ;;  %v18220_v11 = vld [vmem:[#allocation9 + $0x11e8] ss:$16 sps:$4 sm:$0xff]  }
 0x77e   : > { %v22918_v46 = vpop.f32.mrb[1].mxu1  ;;  %v22920_v0 = vpop.f32.mrb[33].mxu0 }
 0x77f   : > { %8520 = vmatpush1.bf16.msra.mxu1 %v18157_v42  ;;  %v7672_v33 = vpop.f32.mrb[2].mxu1  ;;  %v9538_v54 = vpop.f32.mrb[34].mxu0  ;;  %v18225_v42 = vld [vmem:[#allocation9 + $0x40c] ss:$16 sps:$4 sm:$0xff]  }
 0x780   : > { %11411 = vmatpush1.bf16.msra.mxu0 %v18160_v56  ;;  %v7673_v23 = vpop.f32.mrb[3].mxu1  ;;  %v9539_v59 = vpop.f32.mrb[35].mxu0  ;;  %8521 = vmatprep.subr.bf16.mxu1 %v18165_v24  ;;  %v18228_v56 = vld [vmem:[#allocation9 + $0x120c] ss:$16 sps:$4 sm:$0xff]   ;;  %v18223_v24 = vld [vmem:[#allocation9 + $0x408] ss:$16 sps:$4 sm:$0xff]  }
 0x781   : > { %11412 = vmatprep.subr.bf16.mxu0 %v18168_v41  ;;  %v8185_v41 = vrot.slane %v22866_v34, 1  ;;  %v18226_v33 = vld [vmem:[#allocation9 + $0x1208] ss:$16 sps:$4 sm:$0xff]   ;;  %v11035_v54 = vrot.slane %v22866_v34, 4  ;;  %v18234_v23 = vld [vmem:[#allocation9 + $0x122c] ss:$16 sps:$4 sm:$0xff]  }
 0x782   : > { %v11511_v59 = vrot.slane %v22871_v10, 4 }
 0x783   : > { %8522 = vmatpush1.bf16.msra.mxu1 %v18163_v20  ;;  %v18231_v20 = vld [vmem:[#allocation9 + $0x42c] ss:$16 sps:$4 sm:$0xff]  }
 0x784   : > { %11413 = vmatpush1.bf16.msra.mxu0 %v18166_v17  ;;  %8523 = vmatprep.subr.bf16.mxu1 %v18171_v35  ;;  %v18229_v17 = vld [vmem:[#allocation9 + $0x428] ss:$16 sps:$4 sm:$0xff]  }
 0x785   : > { %11414 = vmatprep.subr.bf16.mxu0 %v18174_v57  ;;  %v18232_v35 = vld [vmem:[#allocation9 + $0x1228] ss:$16 sps:$4 sm:$0xff]   ;;  %v18237_v57 = vld [vmem:[#allocation9 + $0x44c] ss:$16 sps:$4 sm:$0xff]  }
 0x787   : > { %8524 = vmatpush1.bf16.msra.mxu1 %v18169_v38  ;;  %v18240_v38 = vld [vmem:[#allocation9 + $0x124c] ss:$16 sps:$4 sm:$0xff]  }
 0x788   : > { %11415 = vmatpush1.bf16.msra.mxu0 %v18172_v28  ;;  %8525 = vmatprep.subr.bf16.mxu1 %v18177_v19  ;;  %v18235_v28 = vld [vmem:[#allocation9 + $0x448] ss:$16 sps:$4 sm:$0xff]  }
 0x789   : > { %11416 = vmatprep.subr.bf16.mxu0 %v18180_v6  ;;  %v18238_v19 = vld [vmem:[#allocation9 + $0x1248] ss:$16 sps:$4 sm:$0xff]   ;;  %v18243_v6 = vld [vmem:[#allocation9 + $0x46c] ss:$16 sps:$4 sm:$0xff]  }
 0x78b   : > { %8526 = vmatpush1.bf16.msra.mxu1 %v18175_v16  ;;  %v18246_v16 = vld [vmem:[#allocation9 + $0x126c] ss:$16 sps:$4 sm:$0xff]  }
 0x78c   : > { %11417 = vmatpush1.bf16.msra.mxu0 %v18178_v18  ;;  %8527 = vmatprep.subr.bf16.mxu1 %v18183_v36  ;;  %v18241_v18 = vld [vmem:[#allocation9 + $0x468] ss:$16 sps:$4 sm:$0xff]   ;;  %v18249_v36 = vld [vmem:[#allocation9 + $0x48c] ss:$16 sps:$4 sm:$0xff]  }
 0x78d   : > { %11418 = vmatprep.subr.bf16.mxu0 %v18186_v58  ;;  %v18252_v58 = vld [vmem:[#allocation9 + $0x128c] ss:$16 sps:$4 sm:$0xff]  }
 0x78f   : > { %8528 = vmatpush1.bf16.msra.mxu1 %v18181_v45  ;;  %v18247_v45 = vld [vmem:[#allocation9 + $0x488] ss:$16 sps:$4 sm:$0xff]  }
 0x790   : > { %11419 = vmatpush1.bf16.msra.mxu0 %v18184_v47  ;;  %8529 = vmatprep.subr.bf16.mxu1 %v18189_v39  ;;  %v18250_v47 = vld [vmem:[#allocation9 + $0x1288] ss:$16 sps:$4 sm:$0xff]   ;;  %v18255_v39 = vld [vmem:[#allocation9 + $0x4ac] ss:$16 sps:$4 sm:$0xff]  }
 0x791   : > { %11420 = vmatprep.subr.bf16.mxu0 %v18192_v29  ;;  %v18258_v29 = vld [vmem:[#allocation9 + $0x12ac] ss:$16 sps:$4 sm:$0xff]  }
 0x793   : > { %8530 = vmatpush1.bf16.msra.mxu1 %v18187_v52  ;;  %v18253_v52 = vld [vmem:[#allocation9 + $0x4a8] ss:$16 sps:$4 sm:$0xff]  }
 0x794   : > { %11421 = vmatpush1.bf16.msra.mxu0 %v18190_v15  ;;  %8531 = vmatprep.subr.bf16.mxu1 %v18195_v31  ;;  %v18256_v15 = vld [vmem:[#allocation9 + $0x12a8] ss:$16 sps:$4 sm:$0xff]   ;;  %v18261_v31 = vld [vmem:[#allocation9 + $0x4cc] ss:$16 sps:$4 sm:$0xff]  }
 0x795   : > { %11422 = vmatprep.subr.bf16.mxu0 %v18198_v50 }
 0x797   : > { %8532 = vmatpush1.bf16.msra.mxu1 %v18193_v25 }
 0x798   : > { %11423 = vmatpush1.bf16.msra.mxu0 %v18196_v44  ;;  %8533 = vmatprep.subr.bf16.mxu1 %v18201_v30  ;;  %v18264_v44 = vld [vmem:[#allocation9 + $0x12cc] ss:$16 sps:$4 sm:$0xff]  }
 0x799   : > { %11424 = vmatprep.subr.bf16.mxu0 %v18204_v13 }
 0x79b   : > { %8534 = vmatpush1.bf16.msra.mxu1 %v18199_v49 }
 0x79c   : > { %11425 = vmatpush1.bf16.msra.mxu0 %v18202_v53  ;;  %8535 = vmatprep.subr.bf16.mxu1 %v18207_v22  ;;  %v18259_v22 = vld [vmem:[#allocation9 + $0x4c8] ss:$16 sps:$4 sm:$0xff]  }
 0x79d   : > { %11426 = vmatprep.subr.bf16.mxu0 %v18210_v62 }
 0x79f   : > { %8536 = vmatpush1.bf16.msra.mxu1 %v18205_v9 }
 0x7a0   : > { %11427 = vmatpush1.bf16.msra.mxu0 %v18208_v60  ;;  %8537 = vmatprep.subr.bf16.mxu1 %v18213_v7  ;;  %v18262_v60 = vld [vmem:[#allocation9 + $0x12c8] ss:$16 sps:$4 sm:$0xff]   ;;  %v18267_v7 = vld [vmem:[#allocation9 + $0x4ec] ss:$16 sps:$4 sm:$0xff]  }
 0x7a1   : > { %11428 = vmatprep.subr.bf16.mxu0 %v18216_v27  ;;  %v18270_v27 = vld [vmem:[#allocation9 + $0x12ec] ss:$16 sps:$4 sm:$0xff]  }
 0x7a3   : > { %8538 = vmatpush1.bf16.msra.mxu1 %v18211_v21  ;;  %v18265_v21 = vld [vmem:[#allocation9 + $0x4e8] ss:$16 sps:$4 sm:$0xff]  }
 0x7a4   : > { %11429 = vmatpush1.bf16.msra.mxu0 %v18214_v14  ;;  %8539 = vmatprep.subr.bf16.mxu1 %v18219_v48  ;;  %v18268_v14 = vld [vmem:[#allocation9 + $0x12e8] ss:$16 sps:$4 sm:$0xff]   ;;  %v18273_v48 = vld [vmem:[#allocation9 + $0x50c] ss:$16 sps:$4 sm:$0xff]  }
 0x7a5   : > { %11430 = vmatprep.subr.bf16.mxu0 %v18222_v37  ;;  %v18276_v37 = vld [vmem:[#allocation9 + $0x130c] ss:$16 sps:$4 sm:$0xff]  }
 0x7a7   : > { %8540 = vmatpush1.bf16.msra.mxu1 %v18217_v26  ;;  %v18271_v26 = vld [vmem:[#allocation9 + $0x508] ss:$16 sps:$4 sm:$0xff]  }
 0x7a8   : > { %11431 = vmatpush1.bf16.msra.mxu0 %v18220_v11  ;;  %8550 = vmatprep.subr.bf16.mxu1 %v18225_v42  ;;  %v18274_v11 = vld [vmem:[#allocation9 + $0x1308] ss:$16 sps:$4 sm:$0xff]   ;;  %v18279_v42 = vld [vmem:[#allocation9 + $0x52c] ss:$16 sps:$4 sm:$0xff]  }
 0x7a9   : > { %11875 = vmatprep.subr.bf16.mxu0 %v18228_v56  ;;  %v18282_v56 = vld [vmem:[#allocation9 + $0x132c] ss:$16 sps:$4 sm:$0xff]  }
 0x7aa   : > { %8542 = vmatmul.mubr.bf16.vlgmr.msra.gmra.mrb[16].mxu1 %v8185_v41 }
 0x7ab   : > { %11433 = vmatmul.mubr.bf16.vlgmr.msra.gmra.mrb[48].mxu0 %v11035_v54  ;;  %8551 = vmatpush1.bf16.msra.mxu1 %v18223_v24  ;;  %v18277_v24 = vld [vmem:[#allocation9 + $0x528] ss:$16 sps:$4 sm:$0xff]  }
 0x7ac   : > { %8582 = vmatprep.mubr.bf16.mxu1 %v8186_v8  ;;  %11876 = vmatpush1.bf16.msra.mxu0 %v18226_v33  ;;  %v18244_v8 = vld [vmem:[#allocation9 + $0x1268] ss:$16 sps:$4 sm:$0xff]  }
 0x7ad   : > { %11907 = vmatprep.mubr.bf16.mxu0 %v11511_v59  ;;  %8552 = vmatprep.subr.bf16.mxu1 %v18231_v20  ;;  %v18280_v33 = vld [vmem:[#allocation9 + $0x1328] ss:$16 sps:$4 sm:$0xff]   ;;  %v18285_v20 = vld [vmem:[#allocation9 + $0x54c] ss:$16 sps:$4 sm:$0xff]  }
 0x7ae   : > { %11877 = vmatprep.subr.bf16.mxu0 %v18234_v23  ;;  %v18288_v23 = vld [vmem:[#allocation9 + $0x134c] ss:$16 sps:$4 sm:$0xff]  }
 0x7af   : > { %8553 = vmatpush1.bf16.msra.mxu1 %v18229_v17  ;;  %v18283_v17 = vld [vmem:[#allocation9 + $0x548] ss:$16 sps:$4 sm:$0xff]  }
 0x7b0   : > { %11878 = vmatpush1.bf16.msra.mxu0 %v18232_v35  ;;  %8554 = vmatprep.subr.bf16.mxu1 %v18237_v57  ;;  %v18286_v35 = vld [vmem:[#allocation9 + $0x1348] ss:$16 sps:$4 sm:$0xff]   ;;  %v18291_v57 = vld [vmem:[#allocation9 + $0x56c] ss:$16 sps:$4 sm:$0xff]  }
 0x7b1   : > { %11879 = vmatprep.subr.bf16.mxu0 %v18240_v38  ;;  %v18294_v38 = vld [vmem:[#allocation9 + $0x136c] ss:$16 sps:$4 sm:$0xff]  }
 0x7b3   : > { %8555 = vmatpush1.bf16.msra.mxu1 %v18235_v28  ;;  %v18289_v28 = vld [vmem:[#allocation9 + $0x568] ss:$16 sps:$4 sm:$0xff]  }
 0x7b4   : > { %11880 = vmatpush1.bf16.msra.mxu0 %v18238_v19  ;;  %8556 = vmatprep.subr.bf16.mxu1 %v18243_v6  ;;  %v18292_v19 = vld [vmem:[#allocation9 + $0x1368] ss:$16 sps:$4 sm:$0xff]   ;;  %v18297_v6 = vld [vmem:[#allocation9 + $0x58c] ss:$16 sps:$4 sm:$0xff]  }
 0x7b5   : > { %11881 = vmatprep.subr.bf16.mxu0 %v18246_v16  ;;  %v18300_v16 = vld [vmem:[#allocation9 + $0x138c] ss:$16 sps:$4 sm:$0xff]  }
 0x7b7   : > { %8557 = vmatpush1.bf16.msra.mxu1 %v18241_v18  ;;  %v18295_v18 = vld [vmem:[#allocation9 + $0x588] ss:$16 sps:$4 sm:$0xff]  }
 0x7b8   : > { %11882 = vmatpush1.bf16.msra.mxu0 %v18244_v8  ;;  %8558 = vmatprep.subr.bf16.mxu1 %v18249_v36  ;;  %v18298_v8 = vld [vmem:[#allocation9 + $0x1388] ss:$16 sps:$4 sm:$0xff]   ;;  %v18303_v36 = vld [vmem:[#allocation9 + $0x5ac] ss:$16 sps:$4 sm:$0xff]  }
 0x7b9   : > { %11883 = vmatprep.subr.bf16.mxu0 %v18252_v58  ;;  %v18306_v58 = vld [vmem:[#allocation9 + $0x13ac] ss:$16 sps:$4 sm:$0xff]  }
 0x7bb   : > { %8559 = vmatpush1.bf16.msra.mxu1 %v18247_v45  ;;  %v18301_v45 = vld [vmem:[#allocation9 + $0x5a8] ss:$16 sps:$4 sm:$0xff]  }
 0x7bc   : > { %11884 = vmatpush1.bf16.msra.mxu0 %v18250_v47  ;;  %8560 = vmatprep.subr.bf16.mxu1 %v18255_v39  ;;  %v18304_v47 = vld [vmem:[#allocation9 + $0x13a8] ss:$16 sps:$4 sm:$0xff]   ;;  %v18309_v39 = vld [vmem:[#allocation9 + $0x5cc] ss:$16 sps:$4 sm:$0xff]  }
 0x7bd   : > { %v22933_v50 = vpop.f32.mrb[4].mxu1  ;;  %v22935_v25 = vpop.f32.mrb[36].mxu0  ;;  %11885 = vmatprep.subr.bf16.mxu0 %v18258_v29  ;;  %v18312_v29 = vld [vmem:[#allocation9 + $0x13cc] ss:$16 sps:$4 sm:$0xff]  }
 0x7be   : > { %v22937_v30 = vpop.f32.mrb[5].mxu1  ;;  %v22939_v13 = vpop.f32.mrb[37].mxu0 }
 0x7bf   : > { %v7713_v49 = vpop.f32.mrb[6].mxu1  ;;  %8561 = vmatpush1.bf16.msra.mxu1 %v18253_v52  ;;  %v10013_v53 = vpop.f32.mrb[38].mxu0  ;;  %v18307_v52 = vld [vmem:[#allocation9 + $0x5c8] ss:$16 sps:$4 sm:$0xff]  }
 0x7c0   : > { %11886 = vmatpush1.bf16.msra.mxu0 %v18256_v15  ;;  %v7714_v62 = vpop.f32.mrb[7].mxu1  ;;  %v10014_v9 = vpop.f32.mrb[39].mxu0  ;;  %8562 = vmatprep.subr.bf16.mxu1 %v18261_v31  ;;  %v18310_v15 = vld [vmem:[#allocation9 + $0x13c8] ss:$16 sps:$4 sm:$0xff]   ;;  %v18315_v31 = vld [vmem:[#allocation9 + $0x5ec] ss:$16 sps:$4 sm:$0xff]  }
 0x7c1   : > { %11887 = vmatprep.subr.bf16.mxu0 %v18264_v44  ;;  %v18318_v44 = vld [vmem:[#allocation9 + $0x13ec] ss:$16 sps:$4 sm:$0xff]   ;;  %v18313_v49 = vld [vmem:[#allocation9 + $0x5e8] ss:$16 sps:$4 sm:$0xff]   ;;  %v18319_v9 = vld [vmem:[#allocation9 + $0x600] ss:$16 sps:$4 sm:$0xff]  }
 0x7c2   : > { %v18316_v53 = vld [vmem:[#allocation9 + $0x13e8] ss:$16 sps:$4 sm:$0xff]   ;;  %v18324_v62 = vld [vmem:[#allocation9 + $0x140c] ss:$16 sps:$4 sm:$0xff]  }
 0x7c3   : > { %8563 = vmatpush1.bf16.msra.mxu1 %v18259_v22  ;;  %v18321_v22 = vld [vmem:[#allocation9 + $0x604] ss:$16 sps:$4 sm:$0xff]  }
 0x7c4   : > { %11888 = vmatpush1.bf16.msra.mxu0 %v18262_v60  ;;  %8564 = vmatprep.subr.bf16.mxu1 %v18267_v7  ;;  %v18322_v60 = vld [vmem:[#allocation9 + $0x1408] ss:$16 sps:$4 sm:$0xff]   ;;  %v11510_v7 = vrot.slane %v22875_v43, 4 }
 0x7c5   : > { %11889 = vmatprep.subr.bf16.mxu0 %v18270_v27  ;;  %v18327_v27 = vld [vmem:[#allocation9 + $0x624] ss:$16 sps:$4 sm:$0xff]  }
 0x7c7   : > { %8565 = vmatpush1.bf16.msra.mxu1 %v18265_v21  ;;  %v8661_v21 = vrot.slane %v22871_v10, 1 }
 0x7c8   : > { %11890 = vmatpush1.bf16.msra.mxu0 %v18268_v14  ;;  %8566 = vmatprep.subr.bf16.mxu1 %v18273_v48  ;;  %v18330_v14 = vld [vmem:[#allocation9 + $0x142c] ss:$16 sps:$4 sm:$0xff]   ;;  %v11986_v48 = vrot.slane %v22868_v12, 5 }
 0x7c9   : > { %11891 = vmatprep.subr.bf16.mxu0 %v18276_v37  ;;  %v18325_v37 = vld [vmem:[#allocation9 + $0x620] ss:$16 sps:$4 sm:$0xff]  }
 0x7cb   : > { %8567 = vmatpush1.bf16.msra.mxu1 %v18271_v26  ;;  %v18328_v26 = vld [vmem:[#allocation9 + $0x1428] ss:$16 sps:$4 sm:$0xff]  }
 0x7cc   : > { %11892 = vmatpush1.bf16.msra.mxu0 %v18274_v11  ;;  %8568 = vmatprep.subr.bf16.mxu1 %v18279_v42  ;;  %v18333_v11 = vld [vmem:[#allocation9 + $0x644] ss:$16 sps:$4 sm:$0xff]   ;;  %v18331_v42 = vld [vmem:[#allocation9 + $0x640] ss:$16 sps:$4 sm:$0xff]  }
 0x7cd   : > { %11893 = vmatprep.subr.bf16.mxu0 %v18282_v56  ;;  %v18334_v56 = vld [vmem:[#allocation9 + $0x1448] ss:$16 sps:$4 sm:$0xff]  }
 0x7cf   : > { %8569 = vmatpush1.bf16.msra.mxu1 %v18277_v24  ;;  %v18339_v24 = vld [vmem:[#allocation9 + $0x664] ss:$16 sps:$4 sm:$0xff]  }
 0x7d0   : > { %11894 = vmatpush1.bf16.msra.mxu0 %v18280_v33  ;;  %8570 = vmatprep.subr.bf16.mxu1 %v18285_v20  ;;  %v18342_v33 = vld [vmem:[#allocation9 + $0x146c] ss:$16 sps:$4 sm:$0xff]   ;;  %v18337_v20 = vld [vmem:[#allocation9 + $0x660] ss:$16 sps:$4 sm:$0xff]  }
 0x7d1   : > { %11895 = vmatprep.subr.bf16.mxu0 %v18288_v23  ;;  %v18340_v23 = vld [vmem:[#allocation9 + $0x1468] ss:$16 sps:$4 sm:$0xff]  }
 0x7d3   : > { %8571 = vmatpush1.bf16.msra.mxu1 %v18283_v17  ;;  %v18345_v17 = vld [vmem:[#allocation9 + $0x684] ss:$16 sps:$4 sm:$0xff]  }
 0x7d4   : > { %11896 = vmatpush1.bf16.msra.mxu0 %v18286_v35  ;;  %8572 = vmatprep.subr.bf16.mxu1 %v18291_v57  ;;  %v18348_v35 = vld [vmem:[#allocation9 + $0x148c] ss:$16 sps:$4 sm:$0xff]   ;;  %v18343_v57 = vld [vmem:[#allocation9 + $0x680] ss:$16 sps:$4 sm:$0xff]  }
 0x7d5   : > { %11897 = vmatprep.subr.bf16.mxu0 %v18294_v38  ;;  %v18346_v38 = vld [vmem:[#allocation9 + $0x1488] ss:$16 sps:$4 sm:$0xff]  }
 0x7d7   : > { %8573 = vmatpush1.bf16.msra.mxu1 %v18289_v28  ;;  %v18351_v28 = vld [vmem:[#allocation9 + $0x6a4] ss:$16 sps:$4 sm:$0xff]  }
 0x7d8   : > { %11898 = vmatpush1.bf16.msra.mxu0 %v18292_v19  ;;  %8574 = vmatprep.subr.bf16.mxu1 %v18297_v6  ;;  %v18354_v19 = vld [vmem:[#allocation9 + $0x14ac] ss:$16 sps:$4 sm:$0xff]   ;;  %v18349_v6 = vld [vmem:[#allocation9 + $0x6a0] ss:$16 sps:$4 sm:$0xff]  }
 0x7d9   : > { %11899 = vmatprep.subr.bf16.mxu0 %v18300_v16  ;;  %v18352_v16 = vld [vmem:[#allocation9 + $0x14a8] ss:$16 sps:$4 sm:$0xff]  }
 0x7db   : > { %8575 = vmatpush1.bf16.msra.mxu1 %v18295_v18  ;;  %v18357_v18 = vld [vmem:[#allocation9 + $0x6c4] ss:$16 sps:$4 sm:$0xff]  }
 0x7dc   : > { %11900 = vmatpush1.bf16.msra.mxu0 %v18298_v8  ;;  %8576 = vmatprep.subr.bf16.mxu1 %v18303_v36  ;;  %v18360_v36 = vld [vmem:[#allocation9 + $0x14cc] ss:$16 sps:$4 sm:$0xff]  }
 0x7dd   : > { %11901 = vmatprep.subr.bf16.mxu0 %v18306_v58 }
 0x7df   : > { %8577 = vmatpush1.bf16.msra.mxu1 %v18301_v45 }
 0x7e0   : > { %11902 = vmatpush1.bf16.msra.mxu0 %v18304_v47  ;;  %8578 = vmatprep.subr.bf16.mxu1 %v18309_v39 }
 0x7e1   : > { %11903 = vmatprep.subr.bf16.mxu0 %v18312_v29 }
 0x7e3   : > { %8579 = vmatpush1.bf16.msra.mxu1 %v18307_v52 }
 0x7e4   : > { %11904 = vmatpush1.bf16.msra.mxu0 %v18310_v15  ;;  %8580 = vmatprep.subr.bf16.mxu1 %v18315_v31  ;;  %v18355_v15 = vld [vmem:[#allocation9 + $0x6c0] ss:$16 sps:$4 sm:$0xff]  }
 0x7e5   : > { %11905 = vmatprep.subr.bf16.mxu0 %v18318_v44 }
 0x7e7   : > { %8581 = vmatpush1.bf16.msra.mxu1 %v18313_v49  ;;  %v18358_v49 = vld [vmem:[#allocation9 + $0x14c8] ss:$16 sps:$4 sm:$0xff]  }
 0x7e8   : > { %11906 = vmatpush1.bf16.msra.mxu0 %v18316_v53  ;;  %8984 = vmatprep.subr.bf16.mxu1 %v18321_v22  ;;  %v18363_v53 = vld [vmem:[#allocation9 + $0x6e4] ss:$16 sps:$4 sm:$0xff]  }
 0x7e9   : > { %12350 = vmatprep.subr.bf16.mxu0 %v18324_v62  ;;  %v18361_v62 = vld [vmem:[#allocation9 + $0x6e0] ss:$16 sps:$4 sm:$0xff]  }
 0x7ea   : > { %8583 = vmatmul.mubr.bf16.vlgmr.msra.gmra.mrb[20].mxu1 %v8185_v41  ;;  %v18336_v41 = vld [vmem:[#allocation9 + $0x144c] ss:$16 sps:$4 sm:$0xff]  }
 0x7eb   : > { %11908 = vmatmul.mubr.bf16.vlgmr.msra.gmra.mrb[52].mxu0 %v11510_v7  ;;  %8985 = vmatpush1.bf16.msra.mxu1 %v18319_v9  ;;  %v18369_v9 = vld [vmem:[#allocation9 + $0x704] ss:$16 sps:$4 sm:$0xff]  }
 0x7ec   : > { %9016 = vmatprep.mubr.bf16.mxu1 %v8661_v21  ;;  %12351 = vmatpush1.bf16.msra.mxu0 %v18322_v60  ;;  %v18372_v60 = vld [vmem:[#allocation9 + $0x150c] ss:$16 sps:$4 sm:$0xff]  }
 0x7ed   : > { %12382 = vmatprep.mubr.bf16.mxu0 %v11986_v48  ;;  %8986 = vmatprep.subr.bf16.mxu1 %v18327_v27  ;;  %v18367_v27 = vld [vmem:[#allocation9 + $0x700] ss:$16 sps:$4 sm:$0xff]  }
 0x7ee   : > { %12352 = vmatprep.subr.bf16.mxu0 %v18330_v14  ;;  %v18370_v14 = vld [vmem:[#allocation9 + $0x1508] ss:$16 sps:$4 sm:$0xff]  }
 0x7ef   : > { %8987 = vmatpush1.bf16.msra.mxu1 %v18325_v37  ;;  %v18375_v37 = vld [vmem:[#allocation9 + $0x724] ss:$16 sps:$4 sm:$0xff]  }
 0x7f0   : > { %12353 = vmatpush1.bf16.msra.mxu0 %v18328_v26  ;;  %8988 = vmatprep.subr.bf16.mxu1 %v18333_v11  ;;  %v18378_v26 = vld [vmem:[#allocation9 + $0x152c] ss:$16 sps:$4 sm:$0xff]   ;;  %v18373_v11 = vld [vmem:[#allocation9 + $0x720] ss:$16 sps:$4 sm:$0xff]  }
 0x7f1   : > { %12354 = vmatprep.subr.bf16.mxu0 %v18336_v41  ;;  %v18376_v41 = vld [vmem:[#allocation9 + $0x1528] ss:$16 sps:$4 sm:$0xff]  }
 0x7f3   : > { %8989 = vmatpush1.bf16.msra.mxu1 %v18331_v42  ;;  %v18381_v42 = vld [vmem:[#allocation9 + $0x744] ss:$16 sps:$4 sm:$0xff]  }
 0x7f4   : > { %12355 = vmatpush1.bf16.msra.mxu0 %v18334_v56  ;;  %8990 = vmatprep.subr.bf16.mxu1 %v18339_v24  ;;  %v18384_v56 = vld [vmem:[#allocation9 + $0x154c] ss:$16 sps:$4 sm:$0xff]   ;;  %v18379_v24 = vld [vmem:[#allocation9 + $0x740] ss:$16 sps:$4 sm:$0xff]  }
 0x7f5   : > { %12356 = vmatprep.subr.bf16.mxu0 %v18342_v33  ;;  %v18382_v33 = vld [vmem:[#allocation9 + $0x1548] ss:$16 sps:$4 sm:$0xff]  }
 0x7f7   : > { %8991 = vmatpush1.bf16.msra.mxu1 %v18337_v20  ;;  %v18387_v20 = vld [vmem:[#allocation9 + $0x764] ss:$16 sps:$4 sm:$0xff]  }
 0x7f8   : > { %12357 = vmatpush1.bf16.msra.mxu0 %v18340_v23  ;;  %8992 = vmatprep.subr.bf16.mxu1 %v18345_v17  ;;  %v18390_v23 = vld [vmem:[#allocation9 + $0x156c] ss:$16 sps:$4 sm:$0xff]   ;;  %v18385_v17 = vld [vmem:[#allocation9 + $0x760] ss:$16 sps:$4 sm:$0xff]  }
 0x7f9   : > { %12358 = vmatprep.subr.bf16.mxu0 %v18348_v35  ;;  %v18388_v35 = vld [vmem:[#allocation9 + $0x1568] ss:$16 sps:$4 sm:$0xff]  }
 0x7fb   : > { %8993 = vmatpush1.bf16.msra.mxu1 %v18343_v57  ;;  %v18393_v57 = vld [vmem:[#allocation9 + $0x784] ss:$16 sps:$4 sm:$0xff]  }
 0x7fc   : > { %12359 = vmatpush1.bf16.msra.mxu0 %v18346_v38  ;;  %8994 = vmatprep.subr.bf16.mxu1 %v18351_v28  ;;  %v18396_v38 = vld [vmem:[#allocation9 + $0x158c] ss:$16 sps:$4 sm:$0xff]   ;;  %v18391_v28 = vld [vmem:[#allocation9 + $0x780] ss:$16 sps:$4 sm:$0xff]  }
 0x7fd   : > { %v8070_v8 = vpop.f32.mrb[8].mxu1  ;;  %12360 = vmatprep.subr.bf16.mxu0 %v18354_v19  ;;  %v18394_v19 = vld [vmem:[#allocation9 + $0x1588] ss:$16 sps:$4 sm:$0xff]  }
 0x7fe   : > { %v22953_v58 = vadd.f32 %v8070_v8, %v22914_v3  ;;  %v22955_v45 = vpop.f32.mrb[40].mxu0  ;;  %v8072_v47 = vpop.f32.mrb[9].mxu1  ;;  %v18366_v3 = vld [vmem:[#allocation9 + $0x14ec] ss:$16 sps:$4 sm:$0xff]   ;;  %v18400_v8 = vld [vmem:[#allocation9 + $0x15a8] ss:$16 sps:$4 sm:$0xff]  }
 0x7ff   : > { %v22958_v39 = vadd.f32 %v8072_v47, %v22918_v46  ;;  %v22960_v29 = vpop.f32.mrb[41].mxu0  ;;  %v8074_v52 = vpop.f32.mrb[10].mxu1  ;;  %8995 = vmatpush1.bf16.msra.mxu1 %v18349_v6  ;;  %v18364_v46 = vld [vmem:[#allocation9 + $0x14e8] ss:$16 sps:$4 sm:$0xff]   ;;  %v18399_v6 = vld [vmem:[#allocation9 + $0x7a4] ss:$16 sps:$4 sm:$0xff]  }
 0x800   : > { %v10488_v31 = vpop.f32.mrb[42].mxu0  ;;  %12361 = vmatpush1.bf16.msra.mxu0 %v18352_v16  ;;  %v8075_v44 = vpop.f32.mrb[11].mxu1  ;;  %8996 = vmatprep.subr.bf16.mxu1 %v18357_v18  ;;  %v18402_v16 = vld [vmem:[#allocation9 + $0x15ac] ss:$16 sps:$4 sm:$0xff]   ;;  %v18397_v18 = vld [vmem:[#allocation9 + $0x7a0] ss:$16 sps:$4 sm:$0xff]  }
 0x801   : > { %v10489_v22 = vpop.f32.mrb[43].mxu0  ;;  %12362 = vmatprep.subr.bf16.mxu0 %v18360_v36  ;;  %v18405_v36 = vld [vmem:[#allocation9 + $0x7c4] ss:$16 sps:$4 sm:$0xff]   ;;  %v18408_v47 = vld [vmem:[#allocation9 + $0x15cc] ss:$16 sps:$4 sm:$0xff]  }
 0x802   : > { %v18403_v52 = vld [vmem:[#allocation9 + $0x7c0] ss:$16 sps:$4 sm:$0xff]   ;;  %v18411_v31 = vld [vmem:[#allocation9 + $0x7e4] ss:$16 sps:$4 sm:$0xff]   ;;  %v18414_v44 = vld [vmem:[#allocation9 + $0x15ec] ss:$16 sps:$4 sm:$0xff]  }
 0x803   : > { %8997 = vmatpush1.bf16.msra.mxu1 %v18355_v15  ;;  %v18406_v15 = vld [vmem:[#allocation9 + $0x15c8] ss:$16 sps:$4 sm:$0xff]   ;;  %v18417_v22 = vld [vmem:[#allocation9 + $0x60c] ss:$16 sps:$4 sm:$0xff]  }
 0x804   : > { %12363 = vmatpush1.bf16.msra.mxu0 %v18358_v49  ;;  %8998 = vmatprep.subr.bf16.mxu1 %v18363_v53  ;;  %v18409_v49 = vld [vmem:[#allocation9 + $0x7e0] ss:$16 sps:$4 sm:$0xff]   ;;  %v18412_v53 = vld [vmem:[#allocation9 + $0x15e8] ss:$16 sps:$4 sm:$0xff]  }
 0x805   : > { %12364 = vmatprep.subr.bf16.mxu0 %v18366_v3  ;;  %v18420_v3 = vld [vmem:[#allocation9 + $0x160c] ss:$16 sps:$4 sm:$0xff]  }
 0x807   : > { %8999 = vmatpush1.bf16.msra.mxu1 %v18361_v62  ;;  %v18415_v62 = vld [vmem:[#allocation9 + $0x608] ss:$16 sps:$4 sm:$0xff]  }
 0x808   : > { %12365 = vmatpush1.bf16.msra.mxu0 %v18364_v46  ;;  %9000 = vmatprep.subr.bf16.mxu1 %v18369_v9  ;;  %v8660_v46 = vrot.slane %v22875_v43, 1  ;;  %v18418_v9 = vld [vmem:[#allocation9 + $0x1608] ss:$16 sps:$4 sm:$0xff]  }
 0x809   : > { %12366 = vmatprep.subr.bf16.mxu0 %v18372_v60  ;;  %v11985_v60 = vrot.slane %v22866_v34, 5 }
 0x80b   : > { %9001 = vmatpush1.bf16.msra.mxu1 %v18367_v27  ;;  %v18423_v27 = vld [vmem:[#allocation9 + $0x62c] ss:$16 sps:$4 sm:$0xff]  }
 0x80c   : > { %12367 = vmatpush1.bf16.msra.mxu0 %v18370_v14  ;;  %9002 = vmatprep.subr.bf16.mxu1 %v18375_v37  ;;  %v18426_v14 = vld [vmem:[#allocation9 + $0x162c] ss:$16 sps:$4 sm:$0xff]   ;;  %v12461_v37 = vrot.slane %v22871_v10, 5 }
 0x80d   : > { %12368 = vmatprep.subr.bf16.mxu0 %v18378_v26  ;;  %v18421_v26 = vld [vmem:[#allocation9 + $0x628] ss:$16 sps:$4 sm:$0xff]  }
 0x80f   : > { %9003 = vmatpush1.bf16.msra.mxu1 %v18373_v11  ;;  %v18424_v11 = vld [vmem:[#allocation9 + $0x1628] ss:$16 sps:$4 sm:$0xff]  }
 0x810   : > { %12369 = vmatpush1.bf16.msra.mxu0 %v18376_v41  ;;  %9004 = vmatprep.subr.bf16.mxu1 %v18381_v42  ;;  %v18429_v41 = vld [vmem:[#allocation9 + $0x64c] ss:$16 sps:$4 sm:$0xff]  }
 0x811   : > { %12370 = vmatprep.subr.bf16.mxu0 %v18384_v56  ;;  %v18432_v42 = vld [vmem:[#allocation9 + $0x164c] ss:$16 sps:$4 sm:$0xff]   ;;  %v18427_v56 = vld [vmem:[#allocation9 + $0x648] ss:$16 sps:$4 sm:$0xff]  }
 0x813   : > { %9005 = vmatpush1.bf16.msra.mxu1 %v18379_v24  ;;  %v18430_v24 = vld [vmem:[#allocation9 + $0x1648] ss:$16 sps:$4 sm:$0xff]  }
 0x814   : > { %12371 = vmatpush1.bf16.msra.mxu0 %v18382_v33  ;;  %9006 = vmatprep.subr.bf16.mxu1 %v18387_v20  ;;  %v18435_v33 = vld [vmem:[#allocation9 + $0x66c] ss:$16 sps:$4 sm:$0xff]  }
 0x815   : > { %12372 = vmatprep.subr.bf16.mxu0 %v18390_v23  ;;  %v18438_v20 = vld [vmem:[#allocation9 + $0x166c] ss:$16 sps:$4 sm:$0xff]   ;;  %v18433_v23 = vld [vmem:[#allocation9 + $0x668] ss:$16 sps:$4 sm:$0xff]  }
 0x817   : > { %9007 = vmatpush1.bf16.msra.mxu1 %v18385_v17  ;;  %v18441_v17 = vld [vmem:[#allocation9 + $0x68c] ss:$16 sps:$4 sm:$0xff]  }
 0x818   : > { %12373 = vmatpush1.bf16.msra.mxu0 %v18388_v35  ;;  %9008 = vmatprep.subr.bf16.mxu1 %v18393_v57  ;;  %v18444_v35 = vld [vmem:[#allocation9 + $0x168c] ss:$16 sps:$4 sm:$0xff]   ;;  %v18439_v57 = vld [vmem:[#allocation9 + $0x688] ss:$16 sps:$4 sm:$0xff]  }
 0x819   : > { %12374 = vmatprep.subr.bf16.mxu0 %v18396_v38  ;;  %v18442_v38 = vld [vmem:[#allocation9 + $0x1688] ss:$16 sps:$4 sm:$0xff]  }
 0x81b   : > { %9009 = vmatpush1.bf16.msra.mxu1 %v18391_v28  ;;  %v18447_v28 = vld [vmem:[#allocation9 + $0x6ac] ss:$16 sps:$4 sm:$0xff]  }
 0x81c   : > { %12375 = vmatpush1.bf16.msra.mxu0 %v18394_v19  ;;  %9010 = vmatprep.subr.bf16.mxu1 %v18399_v6  ;;  %v18450_v19 = vld [vmem:[#allocation9 + $0x16ac] ss:$16 sps:$4 sm:$0xff]   ;;  %v18445_v6 = vld [vmem:[#allocation9 + $0x6a8] ss:$16 sps:$4 sm:$0xff]  }
 0x81d   : > { %12376 = vmatprep.subr.bf16.mxu0 %v18402_v16  ;;  %v18448_v16 = vld [vmem:[#allocation9 + $0x16a8] ss:$16 sps:$4 sm:$0xff]  }
 0x81f   : > { %9011 = vmatpush1.bf16.msra.mxu1 %v18397_v18  ;;  %v18453_v18 = vld [vmem:[#allocation9 + $0x6cc] ss:$16 sps:$4 sm:$0xff]  }
 0x820   : > { %12377 = vmatpush1.bf16.msra.mxu0 %v18400_v8  ;;  %9012 = vmatprep.subr.bf16.mxu1 %v18405_v36  ;;  %v18456_v36 = vld [vmem:[#allocation9 + $0x16cc] ss:$16 sps:$4 sm:$0xff]  }
 0x821   : > { %12378 = vmatprep.subr.bf16.mxu0 %v18408_v47 }
 0x823   : > { %9013 = vmatpush1.bf16.msra.mxu1 %v18403_v52 }
 0x824   : > { %12379 = vmatpush1.bf16.msra.mxu0 %v18406_v15  ;;  %9014 = vmatprep.subr.bf16.mxu1 %v18411_v31 }
 0x825   : > { %12380 = vmatprep.subr.bf16.mxu0 %v18414_v44 }
 0x827   : > { %9015 = vmatpush1.bf16.msra.mxu1 %v18409_v49 }
 0x828   : > { %12381 = vmatpush1.bf16.msra.mxu0 %v18412_v53  ;;  %9025 = vmatprep.subr.bf16.mxu1 %v18417_v22  ;;  %v18451_v53 = vld [vmem:[#allocation9 + $0x6c8] ss:$16 sps:$4 sm:$0xff]  }
 0x829   : > { %12825 = vmatprep.subr.bf16.mxu0 %v18420_v3 }
 0x82a   : > { %9017 = vmatmul.mubr.bf16.vlgmr.msra.gmra.mrb[24].mxu1 %v8660_v46 }
 0x82b   : > { %12383 = vmatmul.mubr.bf16.vlgmr.msra.gmra.mrb[56].mxu0 %v11985_v60  ;;  %9026 = vmatpush1.bf16.msra.mxu1 %v18415_v62  ;;  %v18454_v62 = vld [vmem:[#allocation9 + $0x16c8] ss:$16 sps:$4 sm:$0xff]  }
 0x82c   : > { %9057 = vmatprep.mubr.bf16.mxu1 %v8661_v21  ;;  %12826 = vmatpush1.bf16.msra.mxu0 %v18418_v9  ;;  %v18436_v21 = vld [vmem:[#allocation9 + $0x1668] ss:$16 sps:$4 sm:$0xff]   ;;  %v18459_v9 = vld [vmem:[#allocation9 + $0x6ec] ss:$16 sps:$4 sm:$0xff]  }
 0x82d   : > { %12857 = vmatprep.mubr.bf16.mxu0 %v12461_v37  ;;  %9027 = vmatprep.subr.bf16.mxu1 %v18423_v27 }
 0x82e   : > { %12827 = vmatprep.subr.bf16.mxu0 %v18426_v14  ;;  %v18457_v14 = vld [vmem:[#allocation9 + $0x6e8] ss:$16 sps:$4 sm:$0xff]  }
 0x82f   : > { %9028 = vmatpush1.bf16.msra.mxu1 %v18421_v26  ;;  %v18465_v26 = vld [vmem:[#allocation9 + $0x70c] ss:$16 sps:$4 sm:$0xff]  }
 0x830   : > { %12828 = vmatpush1.bf16.msra.mxu0 %v18424_v11  ;;  %9029 = vmatprep.subr.bf16.mxu1 %v18429_v41  ;;  %v18468_v11 = vld [vmem:[#allocation9 + $0x170c] ss:$16 sps:$4 sm:$0xff]   ;;  %v18463_v41 = vld [vmem:[#allocation9 + $0x708] ss:$16 sps:$4 sm:$0xff]  }
 0x831   : > { %12829 = vmatprep.subr.bf16.mxu0 %v18432_v42  ;;  %v18466_v42 = vld [vmem:[#allocation9 + $0x1708] ss:$16 sps:$4 sm:$0xff]  }
 0x833   : > { %9030 = vmatpush1.bf16.msra.mxu1 %v18427_v56  ;;  %v18471_v56 = vld [vmem:[#allocation9 + $0x72c] ss:$16 sps:$4 sm:$0xff]  }
 0x834   : > { %12830 = vmatpush1.bf16.msra.mxu0 %v18430_v24  ;;  %9031 = vmatprep.subr.bf16.mxu1 %v18435_v33  ;;  %v18474_v24 = vld [vmem:[#allocation9 + $0x172c] ss:$16 sps:$4 sm:$0xff]   ;;  %v18469_v33 = vld [vmem:[#allocation9 + $0x728] ss:$16 sps:$4 sm:$0xff]  }
 0x835   : > { %12831 = vmatprep.subr.bf16.mxu0 %v18438_v20  ;;  %v18472_v20 = vld [vmem:[#allocation9 + $0x1728] ss:$16 sps:$4 sm:$0xff]  }
 0x837   : > { %9032 = vmatpush1.bf16.msra.mxu1 %v18433_v23  ;;  %v18477_v23 = vld [vmem:[#allocation9 + $0x74c] ss:$16 sps:$4 sm:$0xff]  }
 0x838   : > { %12832 = vmatpush1.bf16.msra.mxu0 %v18436_v21  ;;  %9033 = vmatprep.subr.bf16.mxu1 %v18441_v17  ;;  %v18480_v21 = vld [vmem:[#allocation9 + $0x174c] ss:$16 sps:$4 sm:$0xff]   ;;  %v18475_v17 = vld [vmem:[#allocation9 + $0x748] ss:$16 sps:$4 sm:$0xff]  }
 0x839   : > { %12833 = vmatprep.subr.bf16.mxu0 %v18444_v35  ;;  %v18478_v35 = vld [vmem:[#allocation9 + $0x1748] ss:$16 sps:$4 sm:$0xff]  }
 0x83b   : > { %9034 = vmatpush1.bf16.msra.mxu1 %v18439_v57  ;;  %v18483_v57 = vld [vmem:[#allocation9 + $0x76c] ss:$16 sps:$4 sm:$0xff]  }
 0x83c   : > { %12834 = vmatpush1.bf16.msra.mxu0 %v18442_v38  ;;  %9035 = vmatprep.subr.bf16.mxu1 %v18447_v28  ;;  %v18486_v38 = vld [vmem:[#allocation9 + $0x176c] ss:$16 sps:$4 sm:$0xff]   ;;  %v18481_v28 = vld [vmem:[#allocation9 + $0x768] ss:$16 sps:$4 sm:$0xff]  }
 0x83d   : > { %v8111_v8 = vpop.f32.mrb[12].mxu1  ;;  %12835 = vmatprep.subr.bf16.mxu0 %v18450_v19  ;;  %v18484_v19 = vld [vmem:[#allocation9 + $0x1768] ss:$16 sps:$4 sm:$0xff]  }
 0x83e   : > { %v22974_v47 = vadd.f32 %v8111_v8, %v22933_v50  ;;  %v22976_v52 = vpop.f32.mrb[44].mxu0  ;;  %v8113_v15 = vpop.f32.mrb[13].mxu1  ;;  %v18462_v50 = vld [vmem:[#allocation9 + $0x16ec] ss:$16 sps:$4 sm:$0xff]   ;;  %v18490_v8 = vld [vmem:[#allocation9 + $0x1788] ss:$16 sps:$4 sm:$0xff]  }
 0x83f   : > { %v22979_v31 = vadd.f32 %v8113_v15, %v22937_v30  ;;  %v22981_v44 = vpop.f32.mrb[45].mxu0  ;;  %v8115_v49 = vpop.f32.mrb[14].mxu1  ;;  %9036 = vmatpush1.bf16.msra.mxu1 %v18445_v6  ;;  %v18460_v30 = vld [vmem:[#allocation9 + $0x16e8] ss:$16 sps:$4 sm:$0xff]   ;;  %v18489_v6 = vld [vmem:[#allocation9 + $0x78c] ss:$16 sps:$4 sm:$0xff]  }
 0x840   : > { %v10963_v22 = vpop.f32.mrb[46].mxu0  ;;  %12836 = vmatpush1.bf16.msra.mxu0 %v18448_v16  ;;  %v8116_v3 = vpop.f32.mrb[15].mxu1  ;;  %9037 = vmatprep.subr.bf16.mxu1 %v18453_v18  ;;  %v18492_v16 = vld [vmem:[#allocation9 + $0x178c] ss:$16 sps:$4 sm:$0xff]   ;;  %v18487_v18 = vld [vmem:[#allocation9 + $0x788] ss:$16 sps:$4 sm:$0xff]  }
 0x841   : > { %v10964_v27 = vpop.f32.mrb[47].mxu0  ;;  %12837 = vmatprep.subr.bf16.mxu0 %v18456_v36  ;;  %v18495_v36 = vld [vmem:[#allocation9 + $0x7ac] ss:$16 sps:$4 sm:$0xff]   ;;  %v18493_v49 = vld [vmem:[#allocation9 + $0x7a8] ss:$16 sps:$4 sm:$0xff]  }
 0x842   : > { %v18498_v15 = vld [vmem:[#allocation9 + $0x17ac] ss:$16 sps:$4 sm:$0xff]  }
 0x843   : > { %9038 = vmatpush1.bf16.msra.mxu1 %v18451_v53  ;;  %v18496_v53 = vld [vmem:[#allocation9 + $0x17a8] ss:$16 sps:$4 sm:$0xff]   ;;  %v18501_v22 = vld [vmem:[#allocation9 + $0x7cc] ss:$16 sps:$4 sm:$0xff]  }
 0x844   : > { %12838 = vmatpush1.bf16.msra.mxu0 %v18454_v62  ;;  %9039 = vmatprep.subr.bf16.mxu1 %v18459_v9  ;;  %v18504_v3 = vld [vmem:[#allocation9 + $0x17cc] ss:$16 sps:$4 sm:$0xff]   ;;  %v18499_v62 = vld [vmem:[#allocation9 + $0x7c8] ss:$16 sps:$4 sm:$0xff]  }
 0x845   : > { %12839 = vmatprep.subr.bf16.mxu0 %v18462_v50  ;;  %v18502_v9 = vld [vmem:[#allocation9 + $0x17c8] ss:$16 sps:$4 sm:$0xff]   ;;  %v18507_v27 = vld [vmem:[#allocation9 + $0x7ec] ss:$16 sps:$4 sm:$0xff]  }
 0x846   : > { %v18510_v50 = vld [vmem:[#allocation9 + $0x17ec] ss:$16 sps:$4 sm:$0xff]  }
 0x847   : > { %9040 = vmatpush1.bf16.msra.mxu1 %v18457_v14  ;;  %v18505_v14 = vld [vmem:[#allocation9 + $0x7e8] ss:$16 sps:$4 sm:$0xff]  }
 0x848   : > { %12840 = vmatpush1.bf16.msra.mxu0 %v18460_v30  ;;  %9041 = vmatprep.subr.bf16.mxu1 %v18465_v26  ;;  %v18508_v30 = vld [vmem:[#allocation9 + $0x17e8] ss:$16 sps:$4 sm:$0xff]   ;;  %v18513_v26 = vld [vmem:[#allocation9 + $0x804] ss:$16 sps:$4 sm:$0xff]  }
 0x849   : > { %12841 = vmatprep.subr.bf16.mxu0 %v18468_v11  ;;  %v18516_v11 = vld [vmem:[#allocation9 + $0x180c] ss:$16 sps:$4 sm:$0xff]  }
 0x84b   : > { %9042 = vmatpush1.bf16.msra.mxu1 %v18463_v41  ;;  %v18511_v41 = vld [vmem:[#allocation9 + $0x800] ss:$16 sps:$4 sm:$0xff]  }
 0x84c   : > { %12842 = vmatpush1.bf16.msra.mxu0 %v18466_v42  ;;  %9043 = vmatprep.subr.bf16.mxu1 %v18471_v56  ;;  %v18514_v42 = vld [vmem:[#allocation9 + $0x1808] ss:$16 sps:$4 sm:$0xff]   ;;  %v12460_v56 = vrot.slane %v22875_v43, 5 }
 0x84d   : > { %12843 = vmatprep.subr.bf16.mxu0 %v18474_v24  ;;  %v18519_v24 = vld [vmem:[#allocation9 + $0x824] ss:$16 sps:$4 sm:$0xff]  }
 0x84f   : > { %9044 = vmatpush1.bf16.msra.mxu1 %v18469_v33  ;;  %v18522_v33 = vld [vmem:[#allocation9 + $0x182c] ss:$16 sps:$4 sm:$0xff]  }
 0x850   : > { %12844 = vmatpush1.bf16.msra.mxu0 %v18472_v20  ;;  %9045 = vmatprep.subr.bf16.mxu1 %v18477_v23  ;;  %v12936_v20 = vrot.slane %v22868_v12, 6  ;;  %v18517_v23 = vld [vmem:[#allocation9 + $0x820] ss:$16 sps:$4 sm:$0xff]  }
 0x851   : > { %12845 = vmatprep.subr.bf16.mxu0 %v18480_v21  ;;  %v18520_v21 = vld [vmem:[#allocation9 + $0x1828] ss:$16 sps:$4 sm:$0xff]  }
 0x853   : > { %9046 = vmatpush1.bf16.msra.mxu1 %v18475_v17  ;;  %v18525_v17 = vld [vmem:[#allocation9 + $0x844] ss:$16 sps:$4 sm:$0xff]  }
 0x854   : > { %12846 = vmatpush1.bf16.msra.mxu0 %v18478_v35  ;;  %9047 = vmatprep.subr.bf16.mxu1 %v18483_v57  ;;  %v18528_v35 = vld [vmem:[#allocation9 + $0x184c] ss:$16 sps:$4 sm:$0xff]   ;;  %v18526_v57 = vld [vmem:[#allocation9 + $0x1848] ss:$16 sps:$4 sm:$0xff]  }
 0x855   : > { %12847 = vmatprep.subr.bf16.mxu0 %v18486_v38  ;;  %v18531_v38 = vld [vmem:[#allocation9 + $0x864] ss:$16 sps:$4 sm:$0xff]  }
 0x857   : > { %9048 = vmatpush1.bf16.msra.mxu1 %v18481_v28  ;;  %v18534_v28 = vld [vmem:[#allocation9 + $0x186c] ss:$16 sps:$4 sm:$0xff]  }
 0x858   : > { %12848 = vmatpush1.bf16.msra.mxu0 %v18484_v19  ;;  %9049 = vmatprep.subr.bf16.mxu1 %v18489_v6  ;;  %v18529_v19 = vld [vmem:[#allocation9 + $0x860] ss:$16 sps:$4 sm:$0xff]   ;;  %v18537_v6 = vld [vmem:[#allocation9 + $0x884] ss:$16 sps:$4 sm:$0xff]  }
 0x859   : > { %12849 = vmatprep.subr.bf16.mxu0 %v18492_v16  ;;  %v18540_v16 = vld [vmem:[#allocation9 + $0x188c] ss:$16 sps:$4 sm:$0xff]  }
 0x85b   : > { %9050 = vmatpush1.bf16.msra.mxu1 %v18487_v18  ;;  %v18535_v18 = vld [vmem:[#allocation9 + $0x880] ss:$16 sps:$4 sm:$0xff]  }
 0x85c   : > { %12850 = vmatpush1.bf16.msra.mxu0 %v18490_v8  ;;  %9051 = vmatprep.subr.bf16.mxu1 %v18495_v36  ;;  %v18538_v8 = vld [vmem:[#allocation9 + $0x1888] ss:$16 sps:$4 sm:$0xff]   ;;  %v18543_v36 = vld [vmem:[#allocation9 + $0x8a4] ss:$16 sps:$4 sm:$0xff]  }
 0x85d   : > { %12851 = vmatprep.subr.bf16.mxu0 %v18498_v15  ;;  %v18546_v15 = vld [vmem:[#allocation9 + $0x18ac] ss:$16 sps:$4 sm:$0xff]  }
 0x85f   : > { %9052 = vmatpush1.bf16.msra.mxu1 %v18493_v49  ;;  %v18541_v49 = vld [vmem:[#allocation9 + $0x8a0] ss:$16 sps:$4 sm:$0xff]  }
 0x860   : > { %12852 = vmatpush1.bf16.msra.mxu0 %v18496_v53  ;;  %9053 = vmatprep.subr.bf16.mxu1 %v18501_v22  ;;  %v18544_v53 = vld [vmem:[#allocation9 + $0x18a8] ss:$16 sps:$4 sm:$0xff]   ;;  %v18549_v22 = vld [vmem:[#allocation9 + $0x8c4] ss:$16 sps:$4 sm:$0xff]  }
 0x861   : > { %12853 = vmatprep.subr.bf16.mxu0 %v18504_v3 }
 0x863   : > { %9054 = vmatpush1.bf16.msra.mxu1 %v18499_v62  ;;  %v18552_v62 = vld [vmem:[#allocation9 + $0x18cc] ss:$16 sps:$4 sm:$0xff]  }
 0x864   : > { %12854 = vmatpush1.bf16.msra.mxu0 %v18502_v9  ;;  %9055 = vmatprep.subr.bf16.mxu1 %v18507_v27 }
 0x865   : > { %12855 = vmatprep.subr.bf16.mxu0 %v18510_v50 }
 0x867   : > { %9056 = vmatpush1.bf16.msra.mxu1 %v18505_v14 }
 0x868   : > { %12856 = vmatpush1.bf16.msra.mxu0 %v18508_v30  ;;  %9459 = vmatprep.subr.bf16.mxu1 %v18513_v26 }
 0x869   : > { %13300 = vmatprep.subr.bf16.mxu0 %v18516_v11  ;;  %v18547_v11 = vld [vmem:[#allocation9 + $0x8c0] ss:$16 sps:$4 sm:$0xff]  }
 0x86a   : > { %9058 = vmatmul.mubr.bf16.vlgmr.msra.gmra.mrb[28].mxu1 %v8660_v46  ;;  %v18523_v46 = vld [vmem:[#allocation9 + $0x840] ss:$16 sps:$4 sm:$0xff]  }
 0x86b   : > { %12858 = vmatmul.mubr.bf16.vlgmr.msra.gmra.mrb[60].mxu0 %v12460_v56  ;;  %9460 = vmatpush1.bf16.msra.mxu1 %v18511_v41 }
 0x86c   : > { %9491 = vmatprep.mubr.bf16.mxu1 %v9136_v63  ;;  %13301 = vmatpush1.bf16.msra.mxu0 %v18514_v42  ;;  %v18532_v63 = vld [vmem:[#allocation9 + $0x1868] ss:$16 sps:$4 sm:$0xff]  }
 0x86d   : > { %13332 = vmatprep.mubr.bf16.mxu0 %v12936_v20  ;;  %9461 = vmatprep.subr.bf16.mxu1 %v18519_v24  ;;  %v18550_v24 = vld [vmem:[#allocation9 + $0x18c8] ss:$16 sps:$4 sm:$0xff]  }
 0x86e   : > { %13302 = vmatprep.subr.bf16.mxu0 %v18522_v33  ;;  %v18555_v33 = vld [vmem:[#allocation9 + $0x8e4] ss:$16 sps:$4 sm:$0xff]  }
 0x86f   : > { %9462 = vmatpush1.bf16.msra.mxu1 %v18517_v23 }
 0x870   : > { %13303 = vmatpush1.bf16.msra.mxu0 %v18520_v21  ;;  %9463 = vmatprep.subr.bf16.mxu1 %v18525_v17  ;;  %v18553_v21 = vld [vmem:[#allocation9 + $0x8e0] ss:$16 sps:$4 sm:$0xff]   ;;  %v18561_v17 = vld [vmem:[#allocation9 + $0x904] ss:$16 sps:$4 sm:$0xff]  }
 0x871   : > { %13304 = vmatprep.subr.bf16.mxu0 %v18528_v35  ;;  %v18564_v35 = vld [vmem:[#allocation9 + $0x190c] ss:$16 sps:$4 sm:$0xff]  }
 0x873   : > { %9464 = vmatpush1.bf16.msra.mxu1 %v18523_v46  ;;  %v18559_v46 = vld [vmem:[#allocation9 + $0x900] ss:$16 sps:$4 sm:$0xff]  }
 0x874   : > { %13305 = vmatpush1.bf16.msra.mxu0 %v18526_v57  ;;  %9465 = vmatprep.subr.bf16.mxu1 %v18531_v38  ;;  %v18562_v57 = vld [vmem:[#allocation9 + $0x1908] ss:$16 sps:$4 sm:$0xff]   ;;  %v18567_v38 = vld [vmem:[#allocation9 + $0x924] ss:$16 sps:$4 sm:$0xff]  }
 0x875   : > { %13306 = vmatprep.subr.bf16.mxu0 %v18534_v28  ;;  %v18570_v28 = vld [vmem:[#allocation9 + $0x192c] ss:$16 sps:$4 sm:$0xff]  }
 0x877   : > { %9466 = vmatpush1.bf16.msra.mxu1 %v18529_v19  ;;  %v18565_v19 = vld [vmem:[#allocation9 + $0x920] ss:$16 sps:$4 sm:$0xff]  }
 0x878   : > { %13307 = vmatpush1.bf16.msra.mxu0 %v18532_v63  ;;  %9467 = vmatprep.subr.bf16.mxu1 %v18537_v6  ;;  %v18568_v63 = vld [vmem:[#allocation9 + $0x1928] ss:$16 sps:$4 sm:$0xff]   ;;  %v18573_v6 = vld [vmem:[#allocation9 + $0x944] ss:$16 sps:$4 sm:$0xff]  }
 0x879   : > { %13308 = vmatprep.subr.bf16.mxu0 %v18540_v16  ;;  %v18576_v16 = vld [vmem:[#allocation9 + $0x194c] ss:$16 sps:$4 sm:$0xff]  }
 0x87b   : > { %9468 = vmatpush1.bf16.msra.mxu1 %v18535_v18  ;;  %v18571_v18 = vld [vmem:[#allocation9 + $0x940] ss:$16 sps:$4 sm:$0xff]  }
 0x87c   : > { %13309 = vmatpush1.bf16.msra.mxu0 %v18538_v8  ;;  %9469 = vmatprep.subr.bf16.mxu1 %v18543_v36  ;;  %v18574_v8 = vld [vmem:[#allocation9 + $0x1948] ss:$16 sps:$4 sm:$0xff]   ;;  %v18579_v36 = vld [vmem:[#allocation9 + $0x964] ss:$16 sps:$4 sm:$0xff]  }
 0x87d   : > { %v8543_v3 = vpop.f32.mrb[16].mxu1  ;;  %13310 = vmatprep.subr.bf16.mxu0 %v18546_v15  ;;  %v18582_v15 = vld [vmem:[#allocation9 + $0x196c] ss:$16 sps:$4 sm:$0xff]  }
 0x87e   : > { %v22994_v9 = vadd.f32 %v8543_v3, %v22953_v58  ;;  %v22996_v27 = vpop.f32.mrb[48].mxu0  ;;  %v8545_v50 = vpop.f32.mrb[17].mxu1  ;;  %v18558_v58 = vld [vmem:[#allocation9 + $0x18ec] ss:$16 sps:$4 sm:$0xff]  }
 0x87f   : > { %v22999_v14 = vadd.f32 %v8545_v50, %v22958_v39  ;;  %v23001_v30 = vpop.f32.mrb[49].mxu0  ;;  %v8547_v26 = vpop.f32.mrb[18].mxu1  ;;  %9470 = vmatpush1.bf16.msra.mxu1 %v18541_v49  ;;  %v18556_v39 = vld [vmem:[#allocation9 + $0x18e8] ss:$16 sps:$4 sm:$0xff]   ;;  %v18577_v49 = vld [vmem:[#allocation9 + $0x960] ss:$16 sps:$4 sm:$0xff]  }
 0x880   : > { %v11438_v41 = vpop.f32.mrb[50].mxu0  ;;  %13311 = vmatpush1.bf16.msra.mxu0 %v18544_v53  ;;  %v8548_v42 = vpop.f32.mrb[19].mxu1  ;;  %9471 = vmatprep.subr.bf16.mxu1 %v18549_v22  ;;  %v18580_v53 = vld [vmem:[#allocation9 + $0x1968] ss:$16 sps:$4 sm:$0xff]   ;;  %v18585_v22 = vld [vmem:[#allocation9 + $0x984] ss:$16 sps:$4 sm:$0xff]  }
 0x881   : > { %v11439_v23 = vpop.f32.mrb[51].mxu0  ;;  %13312 = vmatprep.subr.bf16.mxu0 %v18552_v62  ;;  %v18588_v3 = vld [vmem:[#allocation9 + $0x198c] ss:$16 sps:$4 sm:$0xff]   ;;  %v18583_v62 = vld [vmem:[#allocation9 + $0x980] ss:$16 sps:$4 sm:$0xff]  }
 0x882   : > { %v18586_v50 = vld [vmem:[#allocation9 + $0x1988] ss:$16 sps:$4 sm:$0xff]   ;;  %v18591_v26 = vld [vmem:[#allocation9 + $0x9a4] ss:$16 sps:$4 sm:$0xff]   ;;  %v18589_v41 = vld [vmem:[#allocation9 + $0x9a0] ss:$16 sps:$4 sm:$0xff]  }
 0x883   : > { %9472 = vmatpush1.bf16.msra.mxu1 %v18547_v11  ;;  %v18594_v11 = vld [vmem:[#allocation9 + $0x19ac] ss:$16 sps:$4 sm:$0xff]   ;;  %v18592_v42 = vld [vmem:[#allocation9 + $0x19a8] ss:$16 sps:$4 sm:$0xff]   ;;  %v18595_v23 = vld [vmem:[#allocation9 + $0x9c0] ss:$16 sps:$4 sm:$0xff]  }
 0x884   : > { %13313 = vmatpush1.bf16.msra.mxu0 %v18550_v24  ;;  %9473 = vmatprep.subr.bf16.mxu1 %v18555_v33  ;;  %v18597_v24 = vld [vmem:[#allocation9 + $0x9c4] ss:$16 sps:$4 sm:$0xff]   ;;  %v18600_v33 = vld [vmem:[#allocation9 + $0x19cc] ss:$16 sps:$4 sm:$0xff]  }
 0x885   : > { %13314 = vmatprep.subr.bf16.mxu0 %v18558_v58  ;;  %v18598_v58 = vld [vmem:[#allocation9 + $0x19c8] ss:$16 sps:$4 sm:$0xff]  }
 0x887   : > { %9474 = vmatpush1.bf16.msra.mxu1 %v18553_v21  ;;  %v18603_v21 = vld [vmem:[#allocation9 + $0x9e4] ss:$16 sps:$4 sm:$0xff]  }
 0x888   : > { %13315 = vmatpush1.bf16.msra.mxu0 %v18556_v39  ;;  %9475 = vmatprep.subr.bf16.mxu1 %v18561_v17  ;;  %v18606_v39 = vld [vmem:[#allocation9 + $0x19ec] ss:$16 sps:$4 sm:$0xff]   ;;  %v18601_v17 = vld [vmem:[#allocation9 + $0x9e0] ss:$16 sps:$4 sm:$0xff]  }
 0x889   : > { %13316 = vmatprep.subr.bf16.mxu0 %v18564_v35  ;;  %v18604_v35 = vld [vmem:[#allocation9 + $0x19e8] ss:$16 sps:$4 sm:$0xff]  }
 0x88b   : > { %9476 = vmatpush1.bf16.msra.mxu1 %v18559_v46  ;;  %v18609_v46 = vld [vmem:[#allocation9 + $0xa04] ss:$16 sps:$4 sm:$0xff]  }
 0x88c   : > { %13317 = vmatpush1.bf16.msra.mxu0 %v18562_v57  ;;  %9477 = vmatprep.subr.bf16.mxu1 %v18567_v38  ;;  %v18612_v57 = vld [vmem:[#allocation9 + $0x1a0c] ss:$16 sps:$4 sm:$0xff]   ;;  %v18607_v38 = vld [vmem:[#allocation9 + $0xa00] ss:$16 sps:$4 sm:$0xff]  }
 0x88d   : > { %13318 = vmatprep.subr.bf16.mxu0 %v18570_v28  ;;  %v18610_v28 = vld [vmem:[#allocation9 + $0x1a08] ss:$16 sps:$4 sm:$0xff]  }
 0x88f   : > { %9478 = vmatpush1.bf16.msra.mxu1 %v18565_v19  ;;  %v12935_v19 = vrot.slane %v22866_v34, 6 }
 0x890   : > { %13319 = vmatpush1.bf16.msra.mxu0 %v18568_v63  ;;  %9479 = vmatprep.subr.bf16.mxu1 %v18573_v6  ;;  %v18615_v63 = vld [vmem:[#allocation9 + $0xa24] ss:$16 sps:$4 sm:$0xff]   ;;  %v18618_v6 = vld [vmem:[#allocation9 + $0x1a2c] ss:$16 sps:$4 sm:$0xff]  }
 0x891   : > { %13320 = vmatprep.subr.bf16.mxu0 %v18576_v16  ;;  %v13411_v16 = vrot.slane %v22871_v10, 6 }
 0x893   : > { %9480 = vmatpush1.bf16.msra.mxu1 %v18571_v18  ;;  %v18613_v18 = vld [vmem:[#allocation9 + $0xa20] ss:$16 sps:$4 sm:$0xff]  }
 0x894   : > { %13321 = vmatpush1.bf16.msra.mxu0 %v18574_v8  ;;  %9481 = vmatprep.subr.bf16.mxu1 %v18579_v36  ;;  %v18616_v8 = vld [vmem:[#allocation9 + $0x1a28] ss:$16 sps:$4 sm:$0xff]   ;;  %v18621_v36 = vld [vmem:[#allocation9 + $0xa44] ss:$16 sps:$4 sm:$0xff]  }
 0x895   : > { %13322 = vmatprep.subr.bf16.mxu0 %v18582_v15  ;;  %v18624_v15 = vld [vmem:[#allocation9 + $0x1a4c] ss:$16 sps:$4 sm:$0xff]  }
 0x897   : > { %9482 = vmatpush1.bf16.msra.mxu1 %v18577_v49  ;;  %v18622_v49 = vld [vmem:[#allocation9 + $0x1a48] ss:$16 sps:$4 sm:$0xff]  }
 0x898   : > { %13323 = vmatpush1.bf16.msra.mxu0 %v18580_v53  ;;  %9483 = vmatprep.subr.bf16.mxu1 %v18585_v22  ;;  %v18627_v53 = vld [vmem:[#allocation9 + $0xa64] ss:$16 sps:$4 sm:$0xff]   ;;  %v18630_v22 = vld [vmem:[#allocation9 + $0x1a6c] ss:$16 sps:$4 sm:$0xff]  }
 0x899   : > { %13324 = vmatprep.subr.bf16.mxu0 %v18588_v3  ;;  %v18625_v3 = vld [vmem:[#allocation9 + $0xa60] ss:$16 sps:$4 sm:$0xff]  }
 0x89b   : > { %9484 = vmatpush1.bf16.msra.mxu1 %v18583_v62  ;;  %v18633_v62 = vld [vmem:[#allocation9 + $0xa84] ss:$16 sps:$4 sm:$0xff]  }
 0x89c   : > { %13325 = vmatpush1.bf16.msra.mxu0 %v18586_v50  ;;  %9485 = vmatprep.subr.bf16.mxu1 %v18591_v26  ;;  %v18636_v50 = vld [vmem:[#allocation9 + $0x1a8c] ss:$16 sps:$4 sm:$0xff]   ;;  %v18631_v26 = vld [vmem:[#allocation9 + $0xa80] ss:$16 sps:$4 sm:$0xff]  }
 0x89d   : > { %13326 = vmatprep.subr.bf16.mxu0 %v18594_v11  ;;  %v18634_v11 = vld [vmem:[#allocation9 + $0x1a88] ss:$16 sps:$4 sm:$0xff]  }
 0x89f   : > { %9486 = vmatpush1.bf16.msra.mxu1 %v18589_v41  ;;  %v18639_v41 = vld [vmem:[#allocation9 + $0xaa4] ss:$16 sps:$4 sm:$0xff]  }
 0x8a0   : > { %13327 = vmatpush1.bf16.msra.mxu0 %v18592_v42  ;;  %9487 = vmatprep.subr.bf16.mxu1 %v18597_v24  ;;  %v18642_v42 = vld [vmem:[#allocation9 + $0x1aac] ss:$16 sps:$4 sm:$0xff]   ;;  %v18637_v24 = vld [vmem:[#allocation9 + $0xaa0] ss:$16 sps:$4 sm:$0xff]  }
 0x8a1   : > { %13328 = vmatprep.subr.bf16.mxu0 %v18600_v33  ;;  %v18640_v33 = vld [vmem:[#allocation9 + $0x1aa8] ss:$16 sps:$4 sm:$0xff]  }
 0x8a3   : > { %9488 = vmatpush1.bf16.msra.mxu1 %v18595_v23  ;;  %v18645_v23 = vld [vmem:[#allocation9 + $0xac4] ss:$16 sps:$4 sm:$0xff]  }
 0x8a4   : > { %13329 = vmatpush1.bf16.msra.mxu0 %v18598_v58  ;;  %9489 = vmatprep.subr.bf16.mxu1 %v18603_v21  ;;  %v18648_v21 = vld [vmem:[#allocation9 + $0x1acc] ss:$16 sps:$4 sm:$0xff]  }
 0x8a5   : > { %13330 = vmatprep.subr.bf16.mxu0 %v18606_v39 }
 0x8a7   : > { %9490 = vmatpush1.bf16.msra.mxu1 %v18601_v17 }
 0x8a8   : > { %13331 = vmatpush1.bf16.msra.mxu0 %v18604_v35  ;;  %9934 = vmatprep.subr.bf16.mxu1 %v18609_v46 }
 0x8a9   : > { %13775 = vmatprep.subr.bf16.mxu0 %v18612_v57 }
 0x8aa   : > { %9492 = vmatmul.mubr.bf16.vlgmr.msra.gmra.mrb[32].mxu1 %v9135_v51  ;;  %v18619_v51 = vld [vmem:[#allocation9 + $0xa40] ss:$16 sps:$4 sm:$0xff]  }
 0x8ab   : > { %13333 = vmatmul.mubr.bf16.vlgmr.msra.gmra.mrb[64].mxu0 %v12935_v19  ;;  %9935 = vmatpush1.bf16.msra.mxu1 %v18607_v38 }
 0x8ac   : > { %9966 = vmatprep.mubr.bf16.mxu1 %v9611_v40  ;;  %13776 = vmatpush1.bf16.msra.mxu0 %v18610_v28  ;;  %v18628_v40 = vld [vmem:[#allocation9 + $0x1a68] ss:$16 sps:$4 sm:$0xff]   ;;  %v18643_v28 = vld [vmem:[#allocation9 + $0xac0] ss:$16 sps:$4 sm:$0xff]  }
 0x8ad   : > { %13807 = vmatprep.mubr.bf16.mxu0 %v13411_v16  ;;  %9936 = vmatprep.subr.bf16.mxu1 %v18615_v63 }
 0x8ae   : > { %13777 = vmatprep.subr.bf16.mxu0 %v18618_v6 }
 0x8af   : > { %9937 = vmatpush1.bf16.msra.mxu1 %v18613_v18  ;;  %v18646_v18 = vld [vmem:[#allocation9 + $0x1ac8] ss:$16 sps:$4 sm:$0xff]  }
 0x8b0   : > { %13778 = vmatpush1.bf16.msra.mxu0 %v18616_v8  ;;  %9938 = vmatprep.subr.bf16.mxu1 %v18621_v36  ;;  %v18651_v8 = vld [vmem:[#allocation9 + $0xae4] ss:$16 sps:$4 sm:$0xff]  }
 0x8b1   : > { %13779 = vmatprep.subr.bf16.mxu0 %v18624_v15  ;;  %v18649_v15 = vld [vmem:[#allocation9 + $0xae0] ss:$16 sps:$4 sm:$0xff]  }
 0x8b3   : > { %9939 = vmatpush1.bf16.msra.mxu1 %v18619_v51  ;;  %v18657_v51 = vld [vmem:[#allocation9 + $0xb04] ss:$16 sps:$4 sm:$0xff]  }
 0x8b4   : > { %13780 = vmatpush1.bf16.msra.mxu0 %v18622_v49  ;;  %9940 = vmatprep.subr.bf16.mxu1 %v18627_v53  ;;  %v18660_v49 = vld [vmem:[#allocation9 + $0x1b0c] ss:$16 sps:$4 sm:$0xff]   ;;  %v18655_v53 = vld [vmem:[#allocation9 + $0xb00] ss:$16 sps:$4 sm:$0xff]  }
 0x8b5   : > { %13781 = vmatprep.subr.bf16.mxu0 %v18630_v22  ;;  %v18658_v22 = vld [vmem:[#allocation9 + $0x1b08] ss:$16 sps:$4 sm:$0xff]  }
 0x8b7   : > { %9941 = vmatpush1.bf16.msra.mxu1 %v18625_v3  ;;  %v18663_v3 = vld [vmem:[#allocation9 + $0xb24] ss:$16 sps:$4 sm:$0xff]  }
 0x8b8   : > { %13782 = vmatpush1.bf16.msra.mxu0 %v18628_v40  ;;  %9942 = vmatprep.subr.bf16.mxu1 %v18633_v62  ;;  %v18666_v40 = vld [vmem:[#allocation9 + $0x1b2c] ss:$16 sps:$4 sm:$0xff]   ;;  %v18661_v62 = vld [vmem:[#allocation9 + $0xb20] ss:$16 sps:$4 sm:$0xff]  }
 0x8b9   : > { %13783 = vmatprep.subr.bf16.mxu0 %v18636_v50  ;;  %v18664_v50 = vld [vmem:[#allocation9 + $0x1b28] ss:$16 sps:$4 sm:$0xff]  }
 0x8bb   : > { %9943 = vmatpush1.bf16.msra.mxu1 %v18631_v26  ;;  %v18669_v26 = vld [vmem:[#allocation9 + $0xb44] ss:$16 sps:$4 sm:$0xff]  }
 0x8bc   : > { %13784 = vmatpush1.bf16.msra.mxu0 %v18634_v11  ;;  %9944 = vmatprep.subr.bf16.mxu1 %v18639_v41  ;;  %v18672_v11 = vld [vmem:[#allocation9 + $0x1b4c] ss:$16 sps:$4 sm:$0xff]   ;;  %v18667_v41 = vld [vmem:[#allocation9 + $0xb40] ss:$16 sps:$4 sm:$0xff]  }
 0x8bd   : > { %v8584_v58 = vpop.f32.mrb[20].mxu1  ;;  %13785 = vmatprep.subr.bf16.mxu0 %v18642_v42  ;;  %v18670_v42 = vld [vmem:[#allocation9 + $0x1b48] ss:$16 sps:$4 sm:$0xff]  }
 0x8be   : > { %v23014_v39 = vadd.f32 %v8584_v58, %v22974_v47  ;;  %v23016_v17 = vpop.f32.mrb[52].mxu0  ;;  %v8586_v35 = vpop.f32.mrb[21].mxu1  ;;  %v18654_v47 = vld [vmem:[#allocation9 + $0x1aec] ss:$16 sps:$4 sm:$0xff]   ;;  %v18676_v58 = vld [vmem:[#allocation9 + $0x1b68] ss:$16 sps:$4 sm:$0xff]  }
 0x8bf   : > { %v23019_v46 = vadd.f32 %v8586_v35, %v22979_v31  ;;  %v23021_v57 = vpop.f32.mrb[53].mxu0  ;;  %v8588_v38 = vpop.f32.mrb[22].mxu1  ;;  %9945 = vmatpush1.bf16.msra.mxu1 %v18637_v24  ;;  %v18652_v31 = vld [vmem:[#allocation9 + $0x1ae8] ss:$16 sps:$4 sm:$0xff]   ;;  %v18675_v24 = vld [vmem:[#allocation9 + $0xb64] ss:$16 sps:$4 sm:$0xff]  }
 0x8c0   : > { %v11913_v63 = vpop.f32.mrb[54].mxu0  ;;  %13786 = vmatpush1.bf16.msra.mxu0 %v18640_v33  ;;  %v8589_v6 = vpop.f32.mrb[23].mxu1  ;;  %9946 = vmatprep.subr.bf16.mxu1 %v18645_v23  ;;  %v18678_v33 = vld [vmem:[#allocation9 + $0x1b6c] ss:$16 sps:$4 sm:$0xff]   ;;  %v18673_v23 = vld [vmem:[#allocation9 + $0xb60] ss:$16 sps:$4 sm:$0xff]  }
 0x8c1   : > { %v11914_v36 = vpop.f32.mrb[55].mxu0  ;;  %13787 = vmatprep.subr.bf16.mxu0 %v18648_v21  ;;  %v18681_v21 = vld [vmem:[#allocation9 + $0xb84] ss:$16 sps:$4 sm:$0xff]   ;;  %v18684_v35 = vld [vmem:[#allocation9 + $0x1b8c] ss:$16 sps:$4 sm:$0xff]  }
 0x8c2   : > { %v18679_v38 = vld [vmem:[#allocation9 + $0xb80] ss:$16 sps:$4 sm:$0xff]   ;;  %v18687_v63 = vld [vmem:[#allocation9 + $0xba4] ss:$16 sps:$4 sm:$0xff]   ;;  %v18690_v6 = vld [vmem:[#allocation9 + $0x1bac] ss:$16 sps:$4 sm:$0xff]  }
 0x8c3   : > { %9947 = vmatpush1.bf16.msra.mxu1 %v18643_v28  ;;  %v18682_v28 = vld [vmem:[#allocation9 + $0x1b88] ss:$16 sps:$4 sm:$0xff]   ;;  %v18693_v36 = vld [vmem:[#allocation9 + $0xbc4] ss:$16 sps:$4 sm:$0xff]  }
 0x8c4   : > { %13788 = vmatpush1.bf16.msra.mxu0 %v18646_v18  ;;  %9948 = vmatprep.subr.bf16.mxu1 %v18651_v8  ;;  %v18685_v18 = vld [vmem:[#allocation9 + $0xba0] ss:$16 sps:$4 sm:$0xff]   ;;  %v18688_v8 = vld [vmem:[#allocation9 + $0x1ba8] ss:$16 sps:$4 sm:$0xff]  }
 0x8c5   : > { %13789 = vmatprep.subr.bf16.mxu0 %v18654_v47  ;;  %v18696_v47 = vld [vmem:[#allocation9 + $0x1bcc] ss:$16 sps:$4 sm:$0xff]  }
 0x8c7   : > { %9949 = vmatpush1.bf16.msra.mxu1 %v18649_v15  ;;  %v18691_v15 = vld [vmem:[#allocation9 + $0xbc0] ss:$16 sps:$4 sm:$0xff]  }
 0x8c8   : > { %13790 = vmatpush1.bf16.msra.mxu0 %v18652_v31  ;;  %9950 = vmatprep.subr.bf16.mxu1 %v18657_v51  ;;  %v18694_v31 = vld [vmem:[#allocation9 + $0x1bc8] ss:$16 sps:$4 sm:$0xff]   ;;  %v18699_v51 = vld [vmem:[#allocation9 + $0xbe4] ss:$16 sps:$4 sm:$0xff]  }
 0x8c9   : > { %13791 = vmatprep.subr.bf16.mxu0 %v18660_v49  ;;  %v18702_v49 = vld [vmem:[#allocation9 + $0x1bec] ss:$16 sps:$4 sm:$0xff]  }
 0x8cb   : > { %9951 = vmatpush1.bf16.msra.mxu1 %v18655_v53  ;;  %v18697_v53 = vld [vmem:[#allocation9 + $0xbe0] ss:$16 sps:$4 sm:$0xff]  }
 0x8cc   : > { %13792 = vmatpush1.bf16.msra.mxu0 %v18658_v22  ;;  %9952 = vmatprep.subr.bf16.mxu1 %v18663_v3  ;;  %v18700_v22 = vld [vmem:[#allocation9 + $0x1be8] ss:$16 sps:$4 sm:$0xff]   ;;  %v18705_v3 = vld [vmem:[#allocation9 + $0xc04] ss:$16 sps:$4 sm:$0xff]  }
 0x8cd   : > { %13793 = vmatprep.subr.bf16.mxu0 %v18666_v40  ;;  %v18708_v40 = vld [vmem:[#allocation9 + $0x1c0c] ss:$16 sps:$4 sm:$0xff]  }
 0x8cf   : > { %9953 = vmatpush1.bf16.msra.mxu1 %v18661_v62  ;;  %v18703_v62 = vld [vmem:[#allocation9 + $0xc00] ss:$16 sps:$4 sm:$0xff]  }
 0x8d0   : > { %13794 = vmatpush1.bf16.msra.mxu0 %v18664_v50  ;;  %9954 = vmatprep.subr.bf16.mxu1 %v18669_v26  ;;  %v18706_v50 = vld [vmem:[#allocation9 + $0x1c08] ss:$16 sps:$4 sm:$0xff]   ;;  %v13410_v26 = vrot.slane %v22875_v43, 6 }
 0x8d1   : > { %13795 = vmatprep.subr.bf16.mxu0 %v18672_v11  ;;  %v18711_v11 = vld [vmem:[#allocation9 + $0xc24] ss:$16 sps:$4 sm:$0xff]  }
 0x8d3   : > { %9955 = vmatpush1.bf16.msra.mxu1 %v18667_v41  ;;  %v18714_v41 = vld [vmem:[#allocation9 + $0x1c2c] ss:$16 sps:$4 sm:$0xff]  }
 0x8d4   : > { %13796 = vmatpush1.bf16.msra.mxu0 %v18670_v42  ;;  %9956 = vmatprep.subr.bf16.mxu1 %v18675_v24  ;;  %v13886_v42 = vrot.slane %v22868_v12, 7  ;;  %v18709_v24 = vld [vmem:[#allocation9 + $0xc20] ss:$16 sps:$4 sm:$0xff]   ;;  %v19203_v12 = vld [vmem:[#allocation9 + $0x1cc4] ss:$16 sps:$4 sm:$0xff]  }
 0x8d5   : > { %13797 = vmatprep.subr.bf16.mxu0 %v18678_v33  ;;  %v18712_v33 = vld [vmem:[#allocation9 + $0x1c28] ss:$16 sps:$4 sm:$0xff]  }
 0x8d7   : > { %9957 = vmatpush1.bf16.msra.mxu1 %v18673_v23  ;;  %v18717_v23 = vld [vmem:[#allocation9 + $0xc44] ss:$16 sps:$4 sm:$0xff]  }
 0x8d8   : > { %13798 = vmatpush1.bf16.msra.mxu0 %v18676_v58  ;;  %9958 = vmatprep.subr.bf16.mxu1 %v18681_v21  ;;  %v18720_v58 = vld [vmem:[#allocation9 + $0x1c4c] ss:$16 sps:$4 sm:$0xff]   ;;  %v18718_v21 = vld [vmem:[#allocation9 + $0x1c48] ss:$16 sps:$4 sm:$0xff]  }
 0x8d9   : > { %13799 = vmatprep.subr.bf16.mxu0 %v18684_v35  ;;  %v18723_v35 = vld [vmem:[#allocation9 + $0xc64] ss:$16 sps:$4 sm:$0xff]  }
 0x8db   : > { %9959 = vmatpush1.bf16.msra.mxu1 %v18679_v38  ;;  %v18726_v38 = vld [vmem:[#allocation9 + $0x1c6c] ss:$16 sps:$4 sm:$0xff]  }
 0x8dc   : > { %13800 = vmatpush1.bf16.msra.mxu0 %v18682_v28  ;;  %9960 = vmatprep.subr.bf16.mxu1 %v18687_v63  ;;  %v18721_v28 = vld [vmem:[#allocation9 + $0xc60] ss:$16 sps:$4 sm:$0xff]   ;;  %v18729_v63 = vld [vmem:[#allocation9 + $0xc84] ss:$16 sps:$4 sm:$0xff]  }
 0x8dd   : > { %13801 = vmatprep.subr.bf16.mxu0 %v18690_v6  ;;  %v18732_v6 = vld [vmem:[#allocation9 + $0x1c8c] ss:$16 sps:$4 sm:$0xff]  }
 0x8df   : > { %9961 = vmatpush1.bf16.msra.mxu1 %v18685_v18  ;;  %v18727_v18 = vld [vmem:[#allocation9 + $0xc80] ss:$16 sps:$4 sm:$0xff]  }
 0x8e0   : > { %13802 = vmatpush1.bf16.msra.mxu0 %v18688_v8  ;;  %9962 = vmatprep.subr.bf16.mxu1 %v18693_v36  ;;  %v18730_v8 = vld [vmem:[#allocation9 + $0x1c88] ss:$16 sps:$4 sm:$0xff]   ;;  %v18735_v36 = vld [vmem:[#allocation9 + $0xca4] ss:$16 sps:$4 sm:$0xff]  }
 0x8e1   : > { %13803 = vmatprep.subr.bf16.mxu0 %v18696_v47  ;;  %v18738_v47 = vld [vmem:[#allocation9 + $0x1cac] ss:$16 sps:$4 sm:$0xff]  }
 0x8e3   : > { %9963 = vmatpush1.bf16.msra.mxu1 %v18691_v15  ;;  %v18733_v15 = vld [vmem:[#allocation9 + $0xca0] ss:$16 sps:$4 sm:$0xff]  }
 0x8e4   : > { %13804 = vmatpush1.bf16.msra.mxu0 %v18694_v31  ;;  %9964 = vmatprep.subr.bf16.mxu1 %v18699_v51  ;;  %v18736_v31 = vld [vmem:[#allocation9 + $0x1ca8] ss:$16 sps:$4 sm:$0xff]   ;;  %v18741_v51 = vld [vmem:[#allocation9 + $0xcc4] ss:$16 sps:$4 sm:$0xff]  }
 0x8e5   : > { %13805 = vmatprep.subr.bf16.mxu0 %v18702_v49 }
 0x8e7   : > { %9965 = vmatpush1.bf16.msra.mxu1 %v18697_v53  ;;  %v18744_v53 = vld [vmem:[#allocation9 + $0x1ccc] ss:$16 sps:$4 sm:$0xff]  }
 0x8e8   : > { %13806 = vmatpush1.bf16.msra.mxu0 %v18700_v22  ;;  %10409 = vmatprep.subr.bf16.mxu1 %v18705_v3 }
 0x8e9   : > { %14250 = vmatprep.subr.bf16.mxu0 %v18708_v40 }
 0x8ea   : > { %9967 = vmatmul.mubr.bf16.vlgmr.msra.gmra.mrb[36].mxu1 %v9610_v4  ;;  %v18715_v4 = vld [vmem:[#allocation9 + $0xc40] ss:$16 sps:$4 sm:$0xff]  }
 0x8eb   : > { %13808 = vmatmul.mubr.bf16.vlgmr.msra.gmra.mrb[68].mxu0 %v13410_v26  ;;  %10410 = vmatpush1.bf16.msra.mxu1 %v18703_v62 }
 0x8ec   : > { %10441 = vmatprep.mubr.bf16.mxu1 %v10086_v1  ;;  %14251 = vmatpush1.bf16.msra.mxu0 %v18706_v50  ;;  %v18724_v1 = vld [vmem:[#allocation9 + $0x1c68] ss:$16 sps:$4 sm:$0xff]  }
 0x8ed   : > { %14282 = vmatprep.mubr.bf16.mxu0 %v13886_v42  ;;  %10411 = vmatprep.subr.bf16.mxu1 %v18711_v11 }
 0x8ee   : > { %14252 = vmatprep.subr.bf16.mxu0 %v18714_v41  ;;  %v18739_v41 = vld [vmem:[#allocation9 + $0xcc0] ss:$16 sps:$4 sm:$0xff]  }
 0x8ef   : > { %10412 = vmatpush1.bf16.msra.mxu1 %v18709_v24 }
 0x8f0   : > { %14253 = vmatpush1.bf16.msra.mxu0 %v18712_v33  ;;  %10413 = vmatprep.subr.bf16.mxu1 %v18717_v23  ;;  %v18742_v23 = vld [vmem:[#allocation9 + $0x1cc8] ss:$16 sps:$4 sm:$0xff]  }
 0x8f1   : > { %14254 = vmatprep.subr.bf16.mxu0 %v18720_v58  ;;  %v18747_v58 = vld [vmem:[#allocation9 + $0xce4] ss:$16 sps:$4 sm:$0xff]  }
 0x8f3   : > { %10414 = vmatpush1.bf16.msra.mxu1 %v18715_v4 }
 0x8f4   : > { %14255 = vmatpush1.bf16.msra.mxu0 %v18718_v21  ;;  %10415 = vmatprep.subr.bf16.mxu1 %v18723_v35  ;;  %v18745_v21 = vld [vmem:[#allocation9 + $0xce0] ss:$16 sps:$4 sm:$0xff]   ;;  %v18753_v35 = vld [vmem:[#allocation9 + $0xd04] ss:$16 sps:$4 sm:$0xff]  }
 0x8f5   : > { %14256 = vmatprep.subr.bf16.mxu0 %v18726_v38  ;;  %v18756_v38 = vld [vmem:[#allocation9 + $0x1d0c] ss:$16 sps:$4 sm:$0xff]  }
 0x8f7   : > { %10416 = vmatpush1.bf16.msra.mxu1 %v18721_v28  ;;  %v18751_v28 = vld [vmem:[#allocation9 + $0xd00] ss:$16 sps:$4 sm:$0xff]  }
 0x8f8   : > { %14257 = vmatpush1.bf16.msra.mxu0 %v18724_v1  ;;  %10417 = vmatprep.subr.bf16.mxu1 %v18729_v63  ;;  %v18754_v1 = vld [vmem:[#allocation9 + $0x1d08] ss:$16 sps:$4 sm:$0xff]   ;;  %v18759_v63 = vld [vmem:[#allocation9 + $0xd24] ss:$16 sps:$4 sm:$0xff]  }
 0x8f9   : > { %14258 = vmatprep.subr.bf16.mxu0 %v18732_v6  ;;  %v18762_v6 = vld [vmem:[#allocation9 + $0x1d2c] ss:$16 sps:$4 sm:$0xff]  }
 0x8fb   : > { %10418 = vmatpush1.bf16.msra.mxu1 %v18727_v18  ;;  %v18757_v18 = vld [vmem:[#allocation9 + $0xd20] ss:$16 sps:$4 sm:$0xff]  }
 0x8fc   : > { %14259 = vmatpush1.bf16.msra.mxu0 %v18730_v8  ;;  %10419 = vmatprep.subr.bf16.mxu1 %v18735_v36  ;;  %v18760_v8 = vld [vmem:[#allocation9 + $0x1d28] ss:$16 sps:$4 sm:$0xff]   ;;  %v18765_v36 = vld [vmem:[#allocation9 + $0xd44] ss:$16 sps:$4 sm:$0xff]  }
 0x8fd   : > { %v9018_v49 = vpop.f32.mrb[24].mxu1  ;;  %14260 = vmatprep.subr.bf16.mxu0 %v18738_v47  ;;  %v18768_v47 = vld [vmem:[#allocation9 + $0x1d4c] ss:$16 sps:$4 sm:$0xff]  }
 0x8fe   : > { %v23034_v22 = vadd.f32 %v9018_v49, %v22994_v9  ;;  %v23036_v3 = vpop.f32.mrb[56].mxu0  ;;  %v9020_v40 = vpop.f32.mrb[25].mxu1  ;;  %v18750_v9 = vld [vmem:[#allocation9 + $0x1cec] ss:$16 sps:$4 sm:$0xff]  }
 0x8ff   : > { %v23039_v62 = vadd.f32 %v9020_v40, %v22999_v14  ;;  %v23041_v50 = vpop.f32.mrb[57].mxu0  ;;  %v9022_v11 = vpop.f32.mrb[26].mxu1  ;;  %10420 = vmatpush1.bf16.msra.mxu1 %v18733_v15  ;;  %v18748_v14 = vld [vmem:[#allocation9 + $0x1ce8] ss:$16 sps:$4 sm:$0xff]   ;;  %v18763_v15 = vld [vmem:[#allocation9 + $0xd40] ss:$16 sps:$4 sm:$0xff]  }
 0x900   : > { %v12388_v24 = vpop.f32.mrb[58].mxu0  ;;  %14261 = vmatpush1.bf16.msra.mxu0 %v18736_v31  ;;  %v9023_v33 = vpop.f32.mrb[27].mxu1  ;;  %10421 = vmatprep.subr.bf16.mxu1 %v18741_v51  ;;  %v18766_v31 = vld [vmem:[#allocation9 + $0x1d48] ss:$16 sps:$4 sm:$0xff]   ;;  %v18771_v51 = vld [vmem:[#allocation9 + $0xd64] ss:$16 sps:$4 sm:$0xff]  }
 0x901   : > { %v12389_v4 = vpop.f32.mrb[59].mxu0  ;;  %14262 = vmatprep.subr.bf16.mxu0 %v18744_v53  ;;  %v18774_v49 = vld [vmem:[#allocation9 + $0x1d6c] ss:$16 sps:$4 sm:$0xff]   ;;  %v18769_v53 = vld [vmem:[#allocation9 + $0xd60] ss:$16 sps:$4 sm:$0xff]  }
 0x902   : > { %v18772_v40 = vld [vmem:[#allocation9 + $0x1d68] ss:$16 sps:$4 sm:$0xff]   ;;  %v18777_v11 = vld [vmem:[#allocation9 + $0xd84] ss:$16 sps:$4 sm:$0xff]   ;;  %v18775_v24 = vld [vmem:[#allocation9 + $0xd80] ss:$16 sps:$4 sm:$0xff]  }
 0x903   : > { %10422 = vmatpush1.bf16.msra.mxu1 %v18739_v41  ;;  %v18780_v41 = vld [vmem:[#allocation9 + $0x1d8c] ss:$16 sps:$4 sm:$0xff]   ;;  %v18778_v33 = vld [vmem:[#allocation9 + $0x1d88] ss:$16 sps:$4 sm:$0xff]   ;;  %v18781_v4 = vld [vmem:[#allocation9 + $0xda0] ss:$16 sps:$4 sm:$0xff]  }
 0x904   : > { %14263 = vmatpush1.bf16.msra.mxu0 %v18742_v23  ;;  %10423 = vmatprep.subr.bf16.mxu1 %v18747_v58  ;;  %v18783_v23 = vld [vmem:[#allocation9 + $0xda4] ss:$16 sps:$4 sm:$0xff]   ;;  %v18786_v58 = vld [vmem:[#allocation9 + $0x1dac] ss:$16 sps:$4 sm:$0xff]  }
 0x905   : > { %14264 = vmatprep.subr.bf16.mxu0 %v18750_v9  ;;  %v18784_v9 = vld [vmem:[#allocation9 + $0x1da8] ss:$16 sps:$4 sm:$0xff]  }
 0x907   : > { %10424 = vmatpush1.bf16.msra.mxu1 %v18745_v21  ;;  %v18789_v21 = vld [vmem:[#allocation9 + $0xdc4] ss:$16 sps:$4 sm:$0xff]  }
 0x908   : > { %14265 = vmatpush1.bf16.msra.mxu0 %v18748_v14  ;;  %10425 = vmatprep.subr.bf16.mxu1 %v18753_v35  ;;  %v18792_v14 = vld [vmem:[#allocation9 + $0x1dcc] ss:$16 sps:$4 sm:$0xff]   ;;  %v18787_v35 = vld [vmem:[#allocation9 + $0xdc0] ss:$16 sps:$4 sm:$0xff]  }
 0x909   : > { %14266 = vmatprep.subr.bf16.mxu0 %v18756_v38  ;;  %v18790_v38 = vld [vmem:[#allocation9 + $0x1dc8] ss:$16 sps:$4 sm:$0xff]  }
 0x90b   : > { %10426 = vmatpush1.bf16.msra.mxu1 %v18751_v28  ;;  %v18795_v28 = vld [vmem:[#allocation9 + $0xde4] ss:$16 sps:$4 sm:$0xff]  }
 0x90c   : > { %14267 = vmatpush1.bf16.msra.mxu0 %v18754_v1  ;;  %10427 = vmatprep.subr.bf16.mxu1 %v18759_v63  ;;  %v18798_v1 = vld [vmem:[#allocation9 + $0x1dec] ss:$16 sps:$4 sm:$0xff]   ;;  %v18793_v63 = vld [vmem:[#allocation9 + $0xde0] ss:$16 sps:$4 sm:$0xff]  }
 0x90d   : > { %14268 = vmatprep.subr.bf16.mxu0 %v18762_v6  ;;  %v18796_v6 = vld [vmem:[#allocation9 + $0x1de8] ss:$16 sps:$4 sm:$0xff]  }
 0x90f   : > { %10428 = vmatpush1.bf16.msra.mxu1 %v18757_v18  ;;  %v18801_v18 = vld [vmem:[#allocation9 + $0xe04] ss:$16 sps:$4 sm:$0xff]  }
 0x910   : > { %14269 = vmatpush1.bf16.msra.mxu0 %v18760_v8  ;;  %10429 = vmatprep.subr.bf16.mxu1 %v18765_v36  ;;  %v18804_v8 = vld [vmem:[#allocation9 + $0x1e0c] ss:$16 sps:$4 sm:$0xff]   ;;  %v18799_v36 = vld [vmem:[#allocation9 + $0xe00] ss:$16 sps:$4 sm:$0xff]  }
 0x911   : > { %14270 = vmatprep.subr.bf16.mxu0 %v18768_v47  ;;  %v18802_v47 = vld [vmem:[#allocation9 + $0x1e08] ss:$16 sps:$4 sm:$0xff]  }
 0x913   : > { %10430 = vmatpush1.bf16.msra.mxu1 %v18763_v15  ;;  %v13885_v15 = vrot.slane %v22866_v34, 7  ;;  %v19248_v34 = vld [vmem:[#allocation9 + $0x1ea4] ss:$16 sps:$4 sm:$0xff]  }
 0x914   : > { %14271 = vmatpush1.bf16.msra.mxu0 %v18766_v31  ;;  %10431 = vmatprep.subr.bf16.mxu1 %v18771_v51  ;;  %v18807_v31 = vld [vmem:[#allocation9 + $0xe24] ss:$16 sps:$4 sm:$0xff]   ;;  %v18810_v51 = vld [vmem:[#allocation9 + $0x1e2c] ss:$16 sps:$4 sm:$0xff]  }
 0x915   : > { %14272 = vmatprep.subr.bf16.mxu0 %v18774_v49  ;;  %v14361_v49 = vrot.slane %v22871_v10, 7  ;;  %v19251_v10 = vld [vmem:[#allocation9 + $0x1ec4] ss:$16 sps:$4 sm:$0xff]  }
 0x917   : > { %10432 = vmatpush1.bf16.msra.mxu1 %v18769_v53  ;;  %v18805_v53 = vld [vmem:[#allocation9 + $0xe20] ss:$16 sps:$4 sm:$0xff]  }
 0x918   : > { %14273 = vmatpush1.bf16.msra.mxu0 %v18772_v40  ;;  %10433 = vmatprep.subr.bf16.mxu1 %v18777_v11  ;;  %v18808_v40 = vld [vmem:[#allocation9 + $0x1e28] ss:$16 sps:$4 sm:$0xff]   ;;  %v18813_v11 = vld [vmem:[#allocation9 + $0xe44] ss:$16 sps:$4 sm:$0xff]  }
 0x919   : > { %14274 = vmatprep.subr.bf16.mxu0 %v18780_v41  ;;  %v18816_v41 = vld [vmem:[#allocation9 + $0x1e4c] ss:$16 sps:$4 sm:$0xff]  }
 0x91b   : > { %10434 = vmatpush1.bf16.msra.mxu1 %v18775_v24  ;;  %v18814_v24 = vld [vmem:[#allocation9 + $0x1e48] ss:$16 sps:$4 sm:$0xff]  }
 0x91c   : > { %14275 = vmatpush1.bf16.msra.mxu0 %v18778_v33  ;;  %10435 = vmatprep.subr.bf16.mxu1 %v18783_v23  ;;  %v18819_v33 = vld [vmem:[#allocation9 + $0xe64] ss:$16 sps:$4 sm:$0xff]   ;;  %v18822_v23 = vld [vmem:[#allocation9 + $0x1e6c] ss:$16 sps:$4 sm:$0xff]  }
 0x91d   : > { %14276 = vmatprep.subr.bf16.mxu0 %v18786_v58  ;;  %v18817_v58 = vld [vmem:[#allocation9 + $0xe60] ss:$16 sps:$4 sm:$0xff]  }
 0x91f   : > { %10436 = vmatpush1.bf16.msra.mxu1 %v18781_v4  ;;  %v18825_v4 = vld [vmem:[#allocation9 + $0xe84] ss:$16 sps:$4 sm:$0xff]  }
 0x920   : > { %14277 = vmatpush1.bf16.msra.mxu0 %v18784_v9  ;;  %10437 = vmatprep.subr.bf16.mxu1 %v18789_v21  ;;  %v18828_v9 = vld [vmem:[#allocation9 + $0x1e8c] ss:$16 sps:$4 sm:$0xff]   ;;  %v18823_v21 = vld [vmem:[#allocation9 + $0xe80] ss:$16 sps:$4 sm:$0xff]  }
 0x921   : > { %14278 = vmatprep.subr.bf16.mxu0 %v18792_v14  ;;  %v18826_v14 = vld [vmem:[#allocation9 + $0x1e88] ss:$16 sps:$4 sm:$0xff]  }
 0x923   : > { %10438 = vmatpush1.bf16.msra.mxu1 %v18787_v35  ;;  %v18831_v35 = vld [vmem:[#allocation9 + $0xea4] ss:$16 sps:$4 sm:$0xff]  }
 0x924   : > { %14279 = vmatpush1.bf16.msra.mxu0 %v18790_v38  ;;  %10439 = vmatprep.subr.bf16.mxu1 %v18795_v28  ;;  %v18834_v38 = vld [vmem:[#allocation9 + $0x1eac] ss:$16 sps:$4 sm:$0xff]   ;;  %v18829_v28 = vld [vmem:[#allocation9 + $0xea0] ss:$16 sps:$4 sm:$0xff]  }
 0x925   : > { %14280 = vmatprep.subr.bf16.mxu0 %v18798_v1  ;;  %v18832_v1 = vld [vmem:[#allocation9 + $0x1ea8] ss:$16 sps:$4 sm:$0xff]  }
 0x927   : > { %10440 = vmatpush1.bf16.msra.mxu1 %v18793_v63  ;;  %v18837_v63 = vld [vmem:[#allocation9 + $0xec4] ss:$16 sps:$4 sm:$0xff]  }
 0x928   : > { %14281 = vmatpush1.bf16.msra.mxu0 %v18796_v6  ;;  %10884 = vmatprep.subr.bf16.mxu1 %v18801_v18  ;;  %v18840_v18 = vld [vmem:[#allocation9 + $0x1ecc] ss:$16 sps:$4 sm:$0xff]  }
 0x929   : > { %14725 = vmatprep.subr.bf16.mxu0 %v18804_v8 }
 0x92a   : > { %10442 = vmatmul.mubr.bf16.vlgmr.msra.gmra.mrb[40].mxu1 %v10085_v2  ;;  %v18811_v2 = vld [vmem:[#allocation9 + $0xe40] ss:$16 sps:$4 sm:$0xff]  }
 0x92b   : > { %14283 = vmatmul.mubr.bf16.vlgmr.msra.gmra.mrb[72].mxu0 %v13885_v15  ;;  %10885 = vmatpush1.bf16.msra.mxu1 %v18799_v36 }
 0x92c   : > { %10916 = vmatprep.mubr.bf16.mxu1 %v10561_v61  ;;  %14726 = vmatpush1.bf16.msra.mxu0 %v18802_v47  ;;  %v18820_v61 = vld [vmem:[#allocation9 + $0x1e68] ss:$16 sps:$4 sm:$0xff]  }
 0x92d   : > { %14757 = vmatprep.mubr.bf16.mxu0 %v14361_v49  ;;  %10886 = vmatprep.subr.bf16.mxu1 %v18807_v31 }
 0x92e   : > { %14727 = vmatprep.subr.bf16.mxu0 %v18810_v51 }
 0x92f   : > { %10887 = vmatpush1.bf16.msra.mxu1 %v18805_v53 }
 0x930   : > { %14728 = vmatpush1.bf16.msra.mxu0 %v18808_v40  ;;  %10888 = vmatprep.subr.bf16.mxu1 %v18813_v11  ;;  %v18835_v40 = vld [vmem:[#allocation9 + $0xec0] ss:$16 sps:$4 sm:$0xff]  }
 0x931   : > { %14729 = vmatprep.subr.bf16.mxu0 %v18816_v41 }
 0x933   : > { %10889 = vmatpush1.bf16.msra.mxu1 %v18811_v2 }
 0x934   : > { %14730 = vmatpush1.bf16.msra.mxu0 %v18814_v24  ;;  %10890 = vmatprep.subr.bf16.mxu1 %v18819_v33  ;;  %v18838_v24 = vld [vmem:[#allocation9 + $0x1ec8] ss:$16 sps:$4 sm:$0xff]   ;;  %v18843_v33 = vld [vmem:[#allocation9 + $0xee4] ss:$16 sps:$4 sm:$0xff]  }
 0x935   : > { %14731 = vmatprep.subr.bf16.mxu0 %v18822_v23 }
 0x937   : > { %10891 = vmatpush1.bf16.msra.mxu1 %v18817_v58 }
 0x938   : > { %14732 = vmatpush1.bf16.msra.mxu0 %v18820_v61  ;;  %10892 = vmatprep.subr.bf16.mxu1 %v18825_v4  ;;  %v18841_v4 = vld [vmem:[#allocation9 + $0xee0] ss:$16 sps:$4 sm:$0xff]  }
 0x939   : > { %14733 = vmatprep.subr.bf16.mxu0 %v18828_v9 }
 0x93b   : > { %10893 = vmatpush1.bf16.msra.mxu1 %v18823_v21  ;;  %v18849_v21 = vld [vmem:[#allocation9 + $0xf04] ss:$16 sps:$4 sm:$0xff]  }
 0x93c   : > { %14734 = vmatpush1.bf16.msra.mxu0 %v18826_v14  ;;  %10894 = vmatprep.subr.bf16.mxu1 %v18831_v35  ;;  %v18852_v35 = vld [vmem:[#allocation9 + $0x1f0c] ss:$16 sps:$4 sm:$0xff]  }
 0x93d   : > { %v9059_v6 = vpop.f32.mrb[28].mxu1  ;;  %14735 = vmatprep.subr.bf16.mxu0 %v18834_v38 }
 0x93e   : > { %v9068_v8 = vadd.f32 %v9059_v6, %v23014_v39  ;;  %v12859_v36 = vpop.f32.mrb[60].mxu0  ;;  %v9061_v47 = vpop.f32.mrb[29].mxu1  ;;  %v18846_v39 = vld [vmem:[#allocation9 + $0x1eec] ss:$16 sps:$4 sm:$0xff]  }
 0x93f   : > { %v9069_v31 = vadd.f32 %v9061_v47, %v23019_v46  ;;  %v12861_v51 = vpop.f32.mrb[61].mxu0  ;;  %v9063_v53 = vpop.f32.mrb[30].mxu1  ;;  %10895 = vmatpush1.bf16.msra.mxu1 %v18829_v28  ;;  %v18850_v28 = vld [vmem:[#allocation9 + $0x1f08] ss:$16 sps:$4 sm:$0xff]   ;;  %v18864_v47 = vld [vmem:[#allocation9 + $0x1f4c] ss:$16 sps:$4 sm:$0xff]  }
 0x940   : > { %v9543_v11 = vadd.f32 %v22916_v55, %v9068_v8  ;;  %v12863_v41 = vpop.f32.mrb[62].mxu0  ;;  %14736 = vmatpush1.bf16.msra.mxu0 %v18832_v1  ;;  %v9064_v2 = vpop.f32.mrb[31].mxu1  ;;  %10896 = vmatprep.subr.bf16.mxu1 %v18837_v63  ;;  %v18844_v55 = vld [vmem:[#allocation9 + $0x1ee8] ss:$16 sps:$4 sm:$0xff]   ;;  %v18858_v63 = vld [vmem:[#allocation9 + $0x1f2c] ss:$16 sps:$4 sm:$0xff]  }
 0x941   : > { %v9544_v23 = vadd.f32 %v22920_v0, %v9069_v31  ;;  %v12864_v58 = vpop.f32.mrb[63].mxu0  ;;  %14737 = vmatprep.subr.bf16.mxu0 %v18840_v18  ;;  %v18856_v18 = vld [vmem:[#allocation9 + $0x1f28] ss:$16 sps:$4 sm:$0xff]   ;;  %v18867_v53 = vld [vmem:[#allocation9 + $0xf64] ss:$16 sps:$4 sm:$0xff]  }
 0x942   : > { %v10018_v61 = vadd.f32 %v22935_v25, %v9543_v11  ;;  %v18847_v25 = vld [vmem:[#allocation9 + $0xf00] ss:$16 sps:$4 sm:$0xff]   ;;  %v18868_v11 = vld [vmem:[#allocation9 + $0x1f68] ss:$16 sps:$4 sm:$0xff]   ;;  %v18876_v41 = vld [vmem:[#allocation9 + $0x1f8c] ss:$16 sps:$4 sm:$0xff]  }
 0x943   : > { %v10019_v46 = vadd.f32 %v22939_v13, %v9544_v23  ;;  %10897 = vmatpush1.bf16.msra.mxu1 %v18835_v40  ;;  %v18865_v40 = vld [vmem:[#allocation9 + $0xf60] ss:$16 sps:$4 sm:$0xff]   ;;  %v18879_v2 = vld [vmem:[#allocation9 + $0xfa4] ss:$16 sps:$4 sm:$0xff]   ;;  %v18880_v23 = vld [vmem:[#allocation9 + $0x1fa8] ss:$16 sps:$4 sm:$0xff]  }
 0x944   : > { %v10493_v9 = vadd.f32 %v22955_v45, %v10018_v61  ;;  %14738 = vmatpush1.bf16.msra.mxu0 %v18838_v24  ;;  %10898 = vmatprep.subr.bf16.mxu1 %v18843_v33  ;;  %v18855_v45 = vld [vmem:[#allocation9 + $0xf24] ss:$16 sps:$4 sm:$0xff]   ;;  %v18882_v24 = vld [vmem:[#allocation9 + $0x1fac] ss:$16 sps:$4 sm:$0xff]   ;;  %v18877_v33 = vld [vmem:[#allocation9 + $0xfa0] ss:$16 sps:$4 sm:$0xff]  }
 0x945   : > { %v10494_v14 = vadd.f32 %v22960_v29, %v10019_v46  ;;  %14739 = vmatprep.subr.bf16.mxu0 %v18846_v39  ;;  %v18885_v58 = vld [vmem:[#allocation9 + $0xfc4] ss:$16 sps:$4 sm:$0xff]   ;;  %v18888_v39 = vld [vmem:[#allocation9 + $0x1fcc] ss:$16 sps:$4 sm:$0xff]   ;;  %v18883_v61 = vld [vmem:[#allocation9 + $0xfc0] ss:$16 sps:$4 sm:$0xff]  }
 0x946   : > { %v10968_v0 = vadd.f32 %v22976_v52, %v10493_v9  ;;  %v18853_v52 = vld [vmem:[#allocation9 + $0xf20] ss:$16 sps:$4 sm:$0xff]   ;;  %v18886_v46 = vld [vmem:[#allocation9 + $0x1fc8] ss:$16 sps:$4 sm:$0xff]   ;;  %v18894_v9 = vld [vmem:[#allocation9 + $0x1fec] ss:$16 sps:$4 sm:$0xff]  }
 0x947   : > { %v10969_v38 = vadd.f32 %v22981_v44, %v10494_v14  ;;  %10899 = vmatpush1.bf16.msra.mxu1 %v18841_v4  ;;  %v18891_v4 = vld [vmem:[#allocation9 + $0xfe4] ss:$16 sps:$4 sm:$0xff]  }
 0x948   : > { %v11443_v13 = vadd.f32 %v22996_v27, %v10968_v0  ;;  %14740 = vmatpush1.bf16.msra.mxu0 %v18844_v55  ;;  %10900 = vmatprep.subr.bf16.mxu1 %v18849_v21  ;;  %v18861_v27 = vld [vmem:[#allocation9 + $0xf44] ss:$16 sps:$4 sm:$0xff]   ;;  %v18889_v55 = vld [vmem:[#allocation9 + $0xfe0] ss:$16 sps:$4 sm:$0xff]   ;;  %v18892_v21 = vld [vmem:[#allocation9 + $0x1fe8] ss:$16 sps:$4 sm:$0xff]  }
 0x949   : > { %v11444_v1 = vadd.f32 %v23001_v30, %v10969_v38  ;;  %14741 = vmatprep.subr.bf16.mxu0 %v18852_v35  ;;  %v18897_v14 = vld [vmem:[#allocation9 + $0x1004] ss:$16 sps:$4 sm:$0xff]   ;;  %v18895_v35 = vld [vmem:[#allocation9 + $0x1000] ss:$16 sps:$4 sm:$0xff]   ;;  %v14360_v38 = vrot.slane %v22875_v43, 7 }
 0x94a   : > { %v11918_v29 = vadd.f32 %v23016_v17, %v11443_v13  ;;  %v18859_v17 = vld [vmem:[#allocation9 + $0xf40] ss:$16 sps:$4 sm:$0xff]   ;;  %v18900_v0 = vld [vmem:[#allocation9 + $0x1024] ss:$16 sps:$4 sm:$0xff]  }
 0x94b   : > { %v11919_v6 = vadd.f32 %v23021_v57, %v11444_v1  ;;  %10901 = vmatpush1.bf16.msra.mxu1 %v18847_v25  ;;  %v18862_v57 = vld [vmem:[#allocation9 + $0x1f48] ss:$16 sps:$4 sm:$0xff]   ;;  %v18898_v25 = vld [vmem:[#allocation9 + $0x1020] ss:$16 sps:$4 sm:$0xff]   ;;  %v18903_v13 = vld [vmem:[#allocation9 + $0x1044] ss:$16 sps:$4 sm:$0xff]  }
 0x94c   : > { %v12393_v44 = vadd.f32 %v23036_v3, %v11918_v29  ;;  %14742 = vmatpush1.bf16.msra.mxu0 %v18850_v28  ;;  %10902 = vmatprep.subr.bf16.mxu1 %v18855_v45  ;;  %v18870_v3 = vld [vmem:[#allocation9 + $0x1f6c] ss:$16 sps:$4 sm:$0xff]   ;;  %v18901_v28 = vld [vmem:[#allocation9 + $0x1040] ss:$16 sps:$4 sm:$0xff]   ;;  %v18906_v45 = vld [vmem:[#allocation9 + $0x1064] ss:$16 sps:$4 sm:$0xff]  }
 0x94d   : > { %v12394_v8 = vadd.f32 %v23041_v50, %v11919_v6  ;;  %14743 = vmatprep.subr.bf16.mxu0 %v18858_v63  ;;  %v18873_v50 = vld [vmem:[#allocation9 + $0xf84] ss:$16 sps:$4 sm:$0xff]   ;;  %v18904_v1 = vld [vmem:[#allocation9 + $0x1060] ss:$16 sps:$4 sm:$0xff]  }
 0x94e   : > { %v23069_v31 = vadd.f32 %v12859_v36, %v12393_v44  ;;  %v18871_v36 = vld [vmem:[#allocation9 + $0xf80] ss:$16 sps:$4 sm:$0xff]   ;;  %v18909_v63 = vld [vmem:[#allocation9 + $0x1084] ss:$16 sps:$4 sm:$0xff]  }
 0x94f   : > { %v23071_v30 = vadd.f32 %v12861_v51, %v12394_v8  ;;  %10903 = vmatpush1.bf16.msra.mxu1 %v18853_v52  ;;  %v18874_v51 = vld [vmem:[#allocation9 + $0x1f88] ss:$16 sps:$4 sm:$0xff]   ;;  %v18912_v29 = vld [vmem:[#allocation9 + $0x10a4] ss:$16 sps:$4 sm:$0xff]   ;;  %v18910_v6 = vld [vmem:[#allocation9 + $0x10a0] ss:$16 sps:$4 sm:$0xff]  }
 0x950   : > { %14744 = vmatpush1.bf16.msra.mxu0 %v18856_v18  ;;  %10904 = vmatprep.subr.bf16.mxu1 %v18861_v27  ;;  %v18915_v52 = vld [vmem:[#allocation9 + $0x10c4] ss:$16 sps:$4 sm:$0xff]  }
 0x951   : > { %14745 = vmatprep.subr.bf16.mxu0 %v18864_v47 }
 0x953   : > { %10905 = vmatpush1.bf16.msra.mxu1 %v18859_v17 }
 0x954   : > { %14746 = vmatpush1.bf16.msra.mxu0 %v18862_v57  ;;  %10906 = vmatprep.subr.bf16.mxu1 %v18867_v53  ;;  %v18913_v53 = vld [vmem:[#allocation9 + $0x10c0] ss:$16 sps:$4 sm:$0xff]  }
 0x955   : > { %14747 = vmatprep.subr.bf16.mxu0 %v18870_v3 }
 0x957   : > { %10907 = vmatpush1.bf16.msra.mxu1 %v18865_v40 }
 0x958   : > { %14748 = vmatpush1.bf16.msra.mxu0 %v18868_v11  ;;  %10908 = vmatprep.subr.bf16.mxu1 %v18873_v50 }
 0x959   : > { %14749 = vmatprep.subr.bf16.mxu0 %v18876_v41  ;;  %v18916_v41 = vld [vmem:[#allocation9 + $0x10e0] ss:$16 sps:$4 sm:$0xff]  }
 0x95b   : > { %10909 = vmatpush1.bf16.msra.mxu1 %v18871_v36  ;;  %v18919_v36 = vld [vmem:[#allocation9 + $0x1100] ss:$16 sps:$4 sm:$0xff]  }
 0x95c   : > { %14750 = vmatpush1.bf16.msra.mxu0 %v18874_v51  ;;  %10910 = vmatprep.subr.bf16.mxu1 %v18879_v2  ;;  %v18922_v51 = vld [vmem:[#allocation9 + $0x1120] ss:$16 sps:$4 sm:$0xff]   ;;  %v18927_v2 = vld [vmem:[#allocation9 + $0x1144] ss:$16 sps:$4 sm:$0xff]  }
 0x95d   : > { %14751 = vmatprep.subr.bf16.mxu0 %v18882_v24  ;;  %v18930_v24 = vld [vmem:[#allocation9 + $0x1164] ss:$16 sps:$4 sm:$0xff]  }
 0x95f   : > { %10911 = vmatpush1.bf16.msra.mxu1 %v18877_v33  ;;  %v18928_v33 = vld [vmem:[#allocation9 + $0x1160] ss:$16 sps:$4 sm:$0xff]  }
 0x960   : > { %14752 = vmatpush1.bf16.msra.mxu0 %v18880_v23  ;;  %10912 = vmatprep.subr.bf16.mxu1 %v18885_v58  ;;  %v18933_v23 = vld [vmem:[#allocation9 + $0x1184] ss:$16 sps:$4 sm:$0xff]   ;;  %v18931_v58 = vld [vmem:[#allocation9 + $0x1180] ss:$16 sps:$4 sm:$0xff]  }
 0x961   : > { %14753 = vmatprep.subr.bf16.mxu0 %v18888_v39  ;;  %v18936_v39 = vld [vmem:[#allocation9 + $0x11a4] ss:$16 sps:$4 sm:$0xff]  }
 0x963   : > { %10913 = vmatpush1.bf16.msra.mxu1 %v18883_v61  ;;  %v18934_v61 = vld [vmem:[#allocation9 + $0x11a0] ss:$16 sps:$4 sm:$0xff]  }
 0x964   : > { %14754 = vmatpush1.bf16.msra.mxu0 %v18886_v46  ;;  %10914 = vmatprep.subr.bf16.mxu1 %v18891_v4  ;;  %v18939_v46 = vld [vmem:[#allocation9 + $0x11c4] ss:$16 sps:$4 sm:$0xff]   ;;  %v18937_v4 = vld [vmem:[#allocation9 + $0x11c0] ss:$16 sps:$4 sm:$0xff]  }
 0x965   : > { %14755 = vmatprep.subr.bf16.mxu0 %v18894_v9  ;;  %v18942_v9 = vld [vmem:[#allocation9 + $0x11e4] ss:$16 sps:$4 sm:$0xff]  }
 0x967   : > { %10915 = vmatpush1.bf16.msra.mxu1 %v18889_v55  ;;  %v18940_v55 = vld [vmem:[#allocation9 + $0x11e0] ss:$16 sps:$4 sm:$0xff]  }
 0x968   : > { %14756 = vmatpush1.bf16.msra.mxu0 %v18892_v21  ;;  %11359 = vmatprep.subr.bf16.mxu1 %v18897_v14  ;;  %v18945_v21 = vld [vmem:[#allocation9 + $0x1204] ss:$16 sps:$4 sm:$0xff]   ;;  %v14848_v14 = vld [vmem:[%s23433_s7 + $0x180] sm:$0xff] }
 0x96a   : > { %10917 = vmatmul.mubr.bf16.vlgmr.msra.gmra.mrb[44].mxu1 %v10560_v5  ;;  %v18907_v5 = vld [vmem:[#allocation9 + $0x1080] ss:$16 sps:$4 sm:$0xff]  }
 0x96b   : > { %14758 = vmatmul.mubr.bf16.vlgmr.msra.gmra.mrb[76].mxu0 %v14360_v38  ;;  %11360 = vmatpush1.bf16.msra.mxu1 %v18895_v35  ;;  %v14849_v35 = vld [vmem:[%s23433_s7 + $0x188] sm:$0xff] }
 0x96c   : > { %11391 = vmatprep.mubr.bf16.mxu1 %v11036_v32  ;;  %11361 = vmatprep.subr.bf16.mxu1 %v18900_v0  ;;  %v17317_v0 = vpack.c.bf16 %v14849_v35, %v14848_v14  ;;  %v18958_v14 = vld [vmem:[#allocation9 + $0x12a0] ss:$16 sps:$4 sm:$0xff]  }
 0x96d   : > { %v14842_v35 = vld [vmem:[%s23433_s7 + $0x150] sm:$0xff] }
 0x96e   : > { %17318 = vmatprep.subr.bf16.mxu0 %v17317_v0  ;;  %v14843_v0 = vld [vmem:[%s23433_s7 + $0x158] sm:$0xff] }
 0x96f   : > { %11362 = vmatpush1.bf16.msra.mxu1 %v18898_v25  ;;  %v18943_v25 = vld [vmem:[#allocation9 + $0x1200] ss:$16 sps:$4 sm:$0xff]  }
 0x970   : > { %11363 = vmatprep.subr.bf16.mxu1 %v18903_v13  ;;  %v14832_v13 = vld [vmem:[%s23433_s7 + $0x100] sm:$0xff] }
 0x973   : > { %11364 = vmatpush1.bf16.msra.mxu1 %v18901_v28  ;;  %v14833_v28 = vld [vmem:[%s23433_s7 + $0x108] sm:$0xff] }
 0x974   : > { %11365 = vmatprep.subr.bf16.mxu1 %v18906_v45  ;;  %v18948_v45 = vld [vmem:[#allocation9 + $0x1224] ss:$16 sps:$4 sm:$0xff]  }
 0x977   : > { %11366 = vmatpush1.bf16.msra.mxu1 %v18904_v1  ;;  %v17319_v1 = vpack.c.bf16 %v14833_v28, %v14832_v13  ;;  %v17339_v13 = vpack.c.bf16 %v14843_v0, %v14842_v35  ;;  %v18993_v35 = vld [vmem:[#allocation9 + $0x1404] ss:$16 sps:$4 sm:$0xff]   ;;  %v18991_v0 = vld [vmem:[#allocation9 + $0x1400] ss:$16 sps:$4 sm:$0xff]  }
 0x978   : > { %11367 = vmatprep.subr.bf16.mxu1 %v18909_v63  ;;  %v18946_v63 = vld [vmem:[#allocation9 + $0x1220] ss:$16 sps:$4 sm:$0xff]  }
 0x979   : > { %17320 = vmatpush3.bf16.msra.mxu0 %v17319_v1 }
 0x97b   : > { %11368 = vmatpush1.bf16.msra.mxu1 %v18907_v5  ;;  %v14850_v5 = vld [vmem:[%s23433_s7 + $0x190] sm:$0xff] }
 0x97c   : > { %11369 = vmatprep.subr.bf16.mxu1 %v18912_v29  ;;  %v14851_v29 = vld [vmem:[%s23433_s7 + $0x198] sm:$0xff] }
 0x97d   : > { %v9493_v44 = vpop.f32.mrb[32].mxu1 }
 0x97e   : > { %v23081_v32 = vadd.f32 %v9493_v44, %v23034_v22  ;;  %v13334_v18 = vpop.f32.mrb[64].mxu0  ;;  %v9495_v27 = vpop.f32.mrb[33].mxu1  ;;  %v18918_v22 = vld [vmem:[#allocation9 + $0x10e4] ss:$16 sps:$4 sm:$0xff]   ;;  %v17321_v44 = vpack.c.bf16 %v14851_v29, %v14850_v5 }
 0x97f   : > { %v23084_v8 = vadd.f32 %v13334_v18, %v23069_v31  ;;  %v23087_v47 = vadd.f32 %v9495_v27, %v23039_v62  ;;  %v13336_v17 = vpop.f32.mrb[65].mxu0  ;;  %v9497_v57 = vpop.f32.mrb[34].mxu1  ;;  %11370 = vmatpush1.bf16.msra.mxu1 %v18910_v6  ;;  %v18921_v31 = vld [vmem:[#allocation9 + $0x1104] ss:$16 sps:$4 sm:$0xff]   ;;  %v14834_v6 = vld [vmem:[%s23433_s7 + $0x110] sm:$0xff] }
 0x980   : > { %v23090_v3 = vadd.f32 %v13336_v17, %v23071_v30  ;;  %v13338_v40 = vpop.f32.mrb[66].mxu0  ;;  %v9498_v11 = vpop.f32.mrb[35].mxu1  ;;  %11371 = vmatprep.subr.bf16.mxu1 %v18915_v52  ;;  %v18924_v62 = vld [vmem:[#allocation9 + $0x1124] ss:$16 sps:$4 sm:$0xff]   ;;  %v18925_v30 = vld [vmem:[#allocation9 + $0x1140] ss:$16 sps:$4 sm:$0xff]   ;;  %17322 = vmatprep.subr.bf16.mxu0 %v17321_v44 }
 0x981   : > { %v13339_v50 = vpop.f32.mrb[67].mxu0  ;;  %v18951_v52 = vld [vmem:[#allocation9 + $0x1244] ss:$16 sps:$4 sm:$0xff]   ;;  %v18949_v57 = vld [vmem:[#allocation9 + $0x1240] ss:$16 sps:$4 sm:$0xff]  }
 0x982   : > { %v14853_v27 = vld [vmem:[%s23433_s7 + $0x1a8] sm:$0xff]  ;;  %v14854_v50 = vld [vmem:[%s23433_s7 + $0x1b0] sm:$0xff] }
 0x983   : > { %11372 = vmatpush1.bf16.msra.mxu1 %v18913_v53  ;;  %v14836_v53 = vld [vmem:[%s23433_s7 + $0x120] sm:$0xff]  ;;  %v14837_v40 = vld [vmem:[%s23433_s7 + $0x128] sm:$0xff] }
 0x984   : > { %11373 = vmatprep.subr.bf16.mxu1 %v18918_v22  ;;  %v18954_v11 = vld [vmem:[#allocation9 + $0x1264] ss:$16 sps:$4 sm:$0xff]   ;;  %v17327_v22 = vpack.c.bf16 %v14837_v40, %v14836_v53 }
 0x985   : > { %v18969_v53 = vld [vmem:[#allocation9 + $0x1304] ss:$16 sps:$4 sm:$0xff]  }
 0x986   : > { %v14845_v40 = vld [vmem:[%s23433_s7 + $0x168] sm:$0xff] }
 0x987   : > { %11374 = vmatpush1.bf16.msra.mxu1 %v18916_v41  ;;  %v14855_v41 = vld [vmem:[%s23433_s7 + $0x1b8] sm:$0xff] }
 0x988   : > { %11375 = vmatprep.subr.bf16.mxu1 %v18921_v31  ;;  %v17329_v31 = vpack.c.bf16 %v14855_v41, %v14854_v50  ;;  %v14863_v50 = vld [vmem:[%s23433_s7 + $0x1f8] sm:$0xff]  ;;  %v14846_v41 = vld [vmem:[%s23433_s7 + $0x170] sm:$0xff] }
 0x98b   : > { %11376 = vmatpush1.bf16.msra.mxu1 %v18919_v36  ;;  %v18952_v36 = vld [vmem:[#allocation9 + $0x1260] ss:$16 sps:$4 sm:$0xff]  }
 0x98c   : > { %11377 = vmatprep.subr.bf16.mxu1 %v18924_v62  ;;  %v14838_v62 = vld [vmem:[%s23433_s7 + $0x130] sm:$0xff] }
 0x98f   : > { %11378 = vmatpush1.bf16.msra.mxu1 %v18922_v51  ;;  %v14839_v51 = vld [vmem:[%s23433_s7 + $0x138] sm:$0xff] }
 0x990   : > { %11379 = vmatprep.subr.bf16.mxu1 %v18927_v2  ;;  %v18957_v2 = vld [vmem:[#allocation9 + $0x1284] ss:$16 sps:$4 sm:$0xff]  }
 0x993   : > { %11380 = vmatpush1.bf16.msra.mxu1 %v18925_v30  ;;  %v17331_v30 = vpack.c.bf16 %v14839_v51, %v14838_v62  ;;  %v18967_v62 = vld [vmem:[#allocation9 + $0x1300] ss:$16 sps:$4 sm:$0xff]  }
 0x994   : > { %11381 = vmatprep.subr.bf16.mxu1 %v18930_v24  ;;  %v14856_v24 = vld [vmem:[%s23433_s7 + $0x1c0] sm:$0xff] }
 0x997   : > { %11382 = vmatpush1.bf16.msra.mxu1 %v18928_v33  ;;  %v14857_v33 = vld [vmem:[%s23433_s7 + $0x1c8] sm:$0xff] }
 0x998   : > { %11383 = vmatprep.subr.bf16.mxu1 %v18933_v23  ;;  %v17333_v23 = vpack.c.bf16 %v14857_v33, %v14856_v24  ;;  %v18975_v24 = vld [vmem:[#allocation9 + $0x1344] ss:$16 sps:$4 sm:$0xff]   ;;  %v18973_v33 = vld [vmem:[#allocation9 + $0x1340] ss:$16 sps:$4 sm:$0xff]  }
 0x99b   : > { %11384 = vmatpush1.bf16.msra.mxu1 %v18931_v58  ;;  %v18955_v58 = vld [vmem:[#allocation9 + $0x1280] ss:$16 sps:$4 sm:$0xff]  }
 0x99c   : > { %11385 = vmatprep.subr.bf16.mxu1 %v18936_v39  ;;  %v14840_v39 = vld [vmem:[%s23433_s7 + $0x140] sm:$0xff] }
 0x99f   : > { %11386 = vmatpush1.bf16.msra.mxu1 %v18934_v61  ;;  %v14841_v61 = vld [vmem:[%s23433_s7 + $0x148] sm:$0xff] }
 0x9a0   : > { %11387 = vmatprep.subr.bf16.mxu1 %v18939_v46  ;;  %v18960_v46 = vld [vmem:[#allocation9 + $0x12a4] ss:$16 sps:$4 sm:$0xff]  }
 0x9a3   : > { %11388 = vmatpush1.bf16.msra.mxu1 %v18937_v4  ;;  %v17335_v4 = vpack.c.bf16 %v14841_v61, %v14840_v39  ;;  %v18981_v39 = vld [vmem:[#allocation9 + $0x1384] ss:$16 sps:$4 sm:$0xff]   ;;  %v18979_v61 = vld [vmem:[#allocation9 + $0x1380] ss:$16 sps:$4 sm:$0xff]  }
 0x9a4   : > { %11389 = vmatprep.subr.bf16.mxu1 %v18942_v9  ;;  %v14858_v9 = vld [vmem:[%s23433_s7 + $0x1d0] sm:$0xff] }
 0x9a7   : > { %11390 = vmatpush1.bf16.msra.mxu1 %v18940_v55  ;;  %v14859_v55 = vld [vmem:[%s23433_s7 + $0x1d8] sm:$0xff] }
 0x9a8   : > { %11834 = vmatprep.subr.bf16.mxu1 %v18945_v21  ;;  %v17337_v21 = vpack.c.bf16 %v14859_v55, %v14858_v9  ;;  %v18987_v9 = vld [vmem:[#allocation9 + $0x13c4] ss:$16 sps:$4 sm:$0xff]   ;;  %v18985_v55 = vld [vmem:[#allocation9 + $0x13c0] ss:$16 sps:$4 sm:$0xff]  }
 0x9aa   : > { %11392 = vmatmul.mubr.bf16.vlgmr.msra.gmra.mrb[48].mxu1 %v11035_v54  ;;  %v14835_v54 = vld [vmem:[%s23433_s7 + $0x118] sm:$0xff] }
 0x9ab   : > { %11835 = vmatpush1.bf16.msra.mxu1 %v18943_v25  ;;  %11866 = vmatprep.mubr.bf16.mxu1 %v11511_v59  ;;  %v17323_v18 = vpack.c.bf16 %v14835_v54, %v14834_v6  ;;  %v14852_v59 = vld [vmem:[%s23433_s7 + $0x1a0] sm:$0xff]  ;;  %v18963_v25 = vld [vmem:[#allocation9 + $0x12c4] ss:$16 sps:$4 sm:$0xff]  }
 0x9ac   : > { %11836 = vmatprep.subr.bf16.mxu1 %v18948_v45  ;;  %v17325_v17 = vpack.c.bf16 %v14853_v27, %v14852_v59 }
 0x9ad   : > { %17324 = vmatpush3.bf16.msra.mxu0 %v17323_v18 }
 0x9ae   : > { %17326 = vmatprep.subr.bf16.mxu0 %v17325_v17  ;;  %v18964_v17 = vld [vmem:[#allocation9 + $0x12e0] ss:$16 sps:$4 sm:$0xff]  }
 0x9af   : > { %11837 = vmatpush1.bf16.msra.mxu1 %v18946_v63 }
 0x9b0   : > { %11838 = vmatprep.subr.bf16.mxu1 %v18951_v52  ;;  %v18961_v52 = vld [vmem:[#allocation9 + $0x12c0] ss:$16 sps:$4 sm:$0xff]  }
 0x9b1   : > { %17328 = vmatpush3.bf16.msra.mxu0 %v17327_v22  ;;  %v14862_v22 = vld [vmem:[%s23433_s7 + $0x1f0] sm:$0xff] }
 0x9b2   : > { %17330 = vmatprep.subr.bf16.mxu0 %v17329_v31  ;;  %v17345_v31 = vpack.c.bf16 %v14863_v50, %v14862_v22 }
 0x9b3   : > { %11839 = vmatpush1.bf16.msra.mxu1 %v18949_v57 }
 0x9b4   : > { %11840 = vmatprep.subr.bf16.mxu1 %v18954_v11 }
 0x9b5   : > { %17332 = vmatpush3.bf16.msra.mxu0 %v17331_v30  ;;  %v18970_v30 = vld [vmem:[#allocation9 + $0x1320] ss:$16 sps:$4 sm:$0xff]  }
 0x9b6   : > { %17334 = vmatprep.subr.bf16.mxu0 %v17333_v23  ;;  %v18978_v23 = vld [vmem:[#allocation9 + $0x1364] ss:$16 sps:$4 sm:$0xff]  }
 0x9b7   : > { %11841 = vmatpush1.bf16.msra.mxu1 %v18952_v36  ;;  %v14847_v36 = vld [vmem:[%s23433_s7 + $0x178] sm:$0xff] }
 0x9b8   : > { %11842 = vmatprep.subr.bf16.mxu1 %v18957_v2  ;;  %v17347_v51 = vpack.c.bf16 %v14847_v36, %v14846_v41  ;;  %v18972_v2 = vld [vmem:[#allocation9 + $0x1324] ss:$16 sps:$4 sm:$0xff]   ;;  %v19012_v41 = vld [vmem:[#allocation9 + $0x14e0] ss:$16 sps:$4 sm:$0xff]  }
 0x9b9   : > { %17336 = vmatpush3.bf16.msra.mxu0 %v17335_v4  ;;  %v18982_v4 = vld [vmem:[#allocation9 + $0x13a0] ss:$16 sps:$4 sm:$0xff]  }
 0x9ba   : > { %17338 = vmatprep.subr.bf16.mxu0 %v17337_v21  ;;  %v18990_v21 = vld [vmem:[#allocation9 + $0x13e4] ss:$16 sps:$4 sm:$0xff]   ;;  %v19018_v36 = vld [vmem:[#allocation9 + $0x1520] ss:$16 sps:$4 sm:$0xff]  }
 0x9bb   : > { %11843 = vmatpush1.bf16.msra.mxu1 %v18955_v58  ;;  %v18976_v58 = vld [vmem:[#allocation9 + $0x1360] ss:$16 sps:$4 sm:$0xff]  }
 0x9bc   : > { %11844 = vmatprep.subr.bf16.mxu1 %v18960_v46  ;;  %v18984_v46 = vld [vmem:[#allocation9 + $0x13a4] ss:$16 sps:$4 sm:$0xff]  }
 0x9bd   : > { %v9968_v28 = vpop.f32.mrb[36].mxu1  ;;  %17340 = vmatpush3.bf16.msra.mxu0 %v17339_v13  ;;  %v18994_v13 = vld [vmem:[#allocation9 + $0x1420] ss:$16 sps:$4 sm:$0xff]  }
 0x9be   : > { %v23169_v45 = vadd.f32 %v9968_v28, %v23081_v32  ;;  %v13809_v1 = vpop.f32.mrb[68].mxu0  ;;  %v9970_v63 = vpop.f32.mrb[37].mxu1  ;;  %v18966_v32 = vld [vmem:[#allocation9 + $0x12e4] ss:$16 sps:$4 sm:$0xff]  }
 0x9bf   : > { %v23172_v5 = vadd.f32 %v13809_v1, %v23084_v8  ;;  %v23175_v29 = vadd.f32 %v9970_v63, %v23087_v47  ;;  %v13811_v6 = vpop.f32.mrb[69].mxu0  ;;  %v9972_v54 = vpop.f32.mrb[38].mxu1  ;;  %11845 = vmatpush1.bf16.msra.mxu1 %v18958_v14  ;;  %v14860_v8 = vld [vmem:[%s23433_s7 + $0x1e0] sm:$0xff]  ;;  %v14861_v47 = vld [vmem:[%s23433_s7 + $0x1e8] sm:$0xff] }
 0x9c0   : > { %v23178_v44 = vadd.f32 %v13811_v6, %v23090_v3  ;;  %v13813_v18 = vpop.f32.mrb[70].mxu0  ;;  %v9973_v59 = vpop.f32.mrb[39].mxu1  ;;  %11846 = vmatprep.subr.bf16.mxu1 %v18963_v25  ;;  %v17341_v57 = vpack.c.bf16 %v14861_v47, %v14860_v8  ;;  %v14844_v3 = vld [vmem:[%s23433_s7 + $0x160] sm:$0xff]  ;;  %v18996_v25 = vld [vmem:[#allocation9 + $0x1424] ss:$16 sps:$4 sm:$0xff]  }
 0x9c1   : > { %v13814_v27 = vpop.f32.mrb[71].mxu0  ;;  %v17343_v11 = vpack.c.bf16 %v14845_v40, %v14844_v3  ;;  %v18988_v14 = vld [vmem:[#allocation9 + $0x13e0] ss:$16 sps:$4 sm:$0xff]   ;;  %v18999_v28 = vld [vmem:[#allocation9 + $0x1444] ss:$16 sps:$4 sm:$0xff]  }
 0x9c2   : > { %17342 = vmatprep.subr.bf16.mxu0 %v17341_v57  ;;  %v18997_v1 = vld [vmem:[#allocation9 + $0x1440] ss:$16 sps:$4 sm:$0xff]   ;;  %v19002_v63 = vld [vmem:[#allocation9 + $0x1464] ss:$16 sps:$4 sm:$0xff]  }
 0x9c3   : > { %11847 = vmatpush1.bf16.msra.mxu1 %v18961_v52  ;;  %17344 = vmatpush3.bf16.msra.mxu0 %v17343_v11  ;;  %v19000_v6 = vld [vmem:[#allocation9 + $0x1460] ss:$16 sps:$4 sm:$0xff]   ;;  %v19005_v54 = vld [vmem:[#allocation9 + $0x1484] ss:$16 sps:$4 sm:$0xff]  }
 0x9c4   : > { %11848 = vmatprep.subr.bf16.mxu1 %v18966_v32  ;;  %17346 = vmatprep.subr.bf16.mxu0 %v17345_v31  ;;  %v19003_v52 = vld [vmem:[#allocation9 + $0x1480] ss:$16 sps:$4 sm:$0xff]   ;;  %v19008_v18 = vld [vmem:[#allocation9 + $0x14a4] ss:$16 sps:$4 sm:$0xff]  }
 0x9c5   : > { %v19011_v59 = vld [vmem:[#allocation9 + $0x14c4] ss:$16 sps:$4 sm:$0xff]   ;;  %v19015_v31 = vld [vmem:[#allocation9 + $0x1500] ss:$16 sps:$4 sm:$0xff]  }
 0x9c7   : > { %11849 = vmatpush1.bf16.msra.mxu1 %v18964_v17  ;;  %17348 = vmatpush3.bf16.msra.mxu0 %v17347_v51  ;;  %v19026_v51 = vld [vmem:[#allocation9 + $0x1564] ss:$16 sps:$4 sm:$0xff]  }
 0x9c8   : > { %11850 = vmatprep.subr.bf16.mxu1 %v18969_v53  ;;  %v19009_v53 = vld [vmem:[#allocation9 + $0x14c0] ss:$16 sps:$4 sm:$0xff]  }
 0x9cb   : > { %11851 = vmatpush1.bf16.msra.mxu1 %v18967_v62  ;;  %v19023_v62 = vld [vmem:[#allocation9 + $0x1544] ss:$16 sps:$4 sm:$0xff]  }
 0x9cc   : > { %11852 = vmatprep.subr.bf16.mxu1 %v18972_v2  ;;  %v19024_v2 = vld [vmem:[#allocation9 + $0x1560] ss:$16 sps:$4 sm:$0xff]  }
 0x9cf   : > { %11853 = vmatpush1.bf16.msra.mxu1 %v18970_v30  ;;  %v19029_v30 = vld [vmem:[#allocation9 + $0x1584] ss:$16 sps:$4 sm:$0xff]  }
 0x9d0   : > { %11854 = vmatprep.subr.bf16.mxu1 %v18975_v24  ;;  %v19027_v24 = vld [vmem:[#allocation9 + $0x1580] ss:$16 sps:$4 sm:$0xff]  }
 0x9d3   : > { %11855 = vmatpush1.bf16.msra.mxu1 %v18973_v33  ;;  %v19032_v33 = vld [vmem:[#allocation9 + $0x15a4] ss:$16 sps:$4 sm:$0xff]  }
 0x9d4   : > { %11856 = vmatprep.subr.bf16.mxu1 %v18978_v23  ;;  %v19030_v23 = vld [vmem:[#allocation9 + $0x15a0] ss:$16 sps:$4 sm:$0xff]  }
 0x9d7   : > { %11857 = vmatpush1.bf16.msra.mxu1 %v18976_v58  ;;  %v19035_v58 = vld [vmem:[#allocation9 + $0x15c4] ss:$16 sps:$4 sm:$0xff]  }
 0x9d8   : > { %11858 = vmatprep.subr.bf16.mxu1 %v18981_v39  ;;  %v19033_v39 = vld [vmem:[#allocation9 + $0x15c0] ss:$16 sps:$4 sm:$0xff]  }
 0x9db   : > { %11859 = vmatpush1.bf16.msra.mxu1 %v18979_v61  ;;  %v19038_v61 = vld [vmem:[#allocation9 + $0x15e4] ss:$16 sps:$4 sm:$0xff]  }
 0x9dc   : > { %11860 = vmatprep.subr.bf16.mxu1 %v18984_v46  ;;  %v19036_v46 = vld [vmem:[#allocation9 + $0x15e0] ss:$16 sps:$4 sm:$0xff]  }
 0x9df   : > { %11861 = vmatpush1.bf16.msra.mxu1 %v18982_v4  ;;  %v19041_v4 = vld [vmem:[#allocation9 + $0x1604] ss:$16 sps:$4 sm:$0xff]  }
 0x9e0   : > { %11862 = vmatprep.subr.bf16.mxu1 %v18987_v9  ;;  %v19039_v9 = vld [vmem:[#allocation9 + $0x1600] ss:$16 sps:$4 sm:$0xff]  }
 0x9e3   : > { %11863 = vmatpush1.bf16.msra.mxu1 %v18985_v55  ;;  %v19044_v55 = vld [vmem:[#allocation9 + $0x1624] ss:$16 sps:$4 sm:$0xff]  }
 0x9e4   : > { %11864 = vmatprep.subr.bf16.mxu1 %v18990_v21  ;;  %v19042_v21 = vld [vmem:[#allocation9 + $0x1620] ss:$16 sps:$4 sm:$0xff]  }
 0x9e7   : > { %11865 = vmatpush1.bf16.msra.mxu1 %v18988_v14  ;;  %v19047_v14 = vld [vmem:[#allocation9 + $0x1644] ss:$16 sps:$4 sm:$0xff]  }
 0x9e8   : > { %12309 = vmatprep.subr.bf16.mxu1 %v18993_v35  ;;  %v19045_v35 = vld [vmem:[#allocation9 + $0x1640] ss:$16 sps:$4 sm:$0xff]  }
 0x9ea   : > { %11867 = vmatmul.mubr.bf16.vlgmr.msra.gmra.mrb[52].mxu1 %v11510_v7  ;;  %v19006_v7 = vld [vmem:[#allocation9 + $0x14a0] ss:$16 sps:$4 sm:$0xff]  }
 0x9eb   : > { %12310 = vmatpush1.bf16.msra.mxu1 %v18991_v0  ;;  %12341 = vmatprep.mubr.bf16.mxu1 %v11986_v48  ;;  %v19050_v0 = vld [vmem:[#allocation9 + $0x1664] ss:$16 sps:$4 sm:$0xff]  }
 0x9ec   : > { %12311 = vmatprep.subr.bf16.mxu1 %v18996_v25  ;;  %v19048_v25 = vld [vmem:[#allocation9 + $0x1660] ss:$16 sps:$4 sm:$0xff]  }
 0x9ef   : > { %12312 = vmatpush1.bf16.msra.mxu1 %v18994_v13  ;;  %v19053_v13 = vld [vmem:[#allocation9 + $0x1684] ss:$16 sps:$4 sm:$0xff]  }
 0x9f0   : > { %12313 = vmatprep.subr.bf16.mxu1 %v18999_v28  ;;  %v19051_v28 = vld [vmem:[#allocation9 + $0x1680] ss:$16 sps:$4 sm:$0xff]  }
 0x9f3   : > { %12314 = vmatpush1.bf16.msra.mxu1 %v18997_v1  ;;  %v19056_v1 = vld [vmem:[#allocation9 + $0x16a4] ss:$16 sps:$4 sm:$0xff]  }
 0x9f4   : > { %12315 = vmatprep.subr.bf16.mxu1 %v19002_v63 }
 0x9f7   : > { %12316 = vmatpush1.bf16.msra.mxu1 %v19000_v6  ;;  %v23225_v6 = vld [vmem:[#allocation10] sm:$0xf] }
 0x9f8   : > { %12317 = vmatprep.subr.bf16.mxu1 %v19005_v54  ;;  %v19054_v54 = vld [vmem:[#allocation9 + $0x16a0] ss:$16 sps:$4 sm:$0xff]  }
 0x9fb   : > { %12318 = vmatpush1.bf16.msra.mxu1 %v19003_v52  ;;  %v19059_v52 = vld [vmem:[#allocation9 + $0x16c4] ss:$16 sps:$4 sm:$0xff]  }
 0x9fc   : > { %12319 = vmatprep.subr.bf16.mxu1 %v19008_v18 }
 0x9fd   : > { %v10443_v48 = vpop.f32.mrb[40].mxu1 }
 0x9fe   : > { %v23209_v32 = vadd.f32 %v10443_v48, %v23169_v45  ;;  %v14284_v27 = vpop.f32.mrb[72].mxu0  ;;  %v10445_v8 = vpop.f32.mrb[41].mxu1  ;;  %v19014_v45 = vld [vmem:[#allocation9 + $0x14e4] ss:$16 sps:$4 sm:$0xff]  }
 0x9ff   : > { %v23212_v47 = vadd.f32 %v14284_v27, %v23172_v5  ;;  %v23215_v17 = vadd.f32 %v10445_v8, %v23175_v29  ;;  %v14286_v57 = vpop.f32.mrb[73].mxu0  ;;  %v10447_v3 = vpop.f32.mrb[42].mxu1  ;;  %12320 = vmatpush1.bf16.msra.mxu1 %v19006_v7  ;;  %v19017_v5 = vld [vmem:[#allocation9 + $0x1504] ss:$16 sps:$4 sm:$0xff]  }
 0xa00   : > { %v23218_v40 = vadd.f32 %v14286_v57, %v23178_v44  ;;  %v14288_v11 = vpop.f32.mrb[74].mxu0  ;;  %v10448_v22 = vpop.f32.mrb[43].mxu1  ;;  %12321 = vmatprep.subr.bf16.mxu1 %v19011_v59  ;;  %v19020_v29 = vld [vmem:[#allocation9 + $0x1524] ss:$16 sps:$4 sm:$0xff]   ;;  %v19021_v44 = vld [vmem:[#allocation9 + $0x1540] ss:$16 sps:$4 sm:$0xff]  }
 0xa01   : > { %v14289_v50 = vpop.f32.mrb[75].mxu0  ;;  %v19057_v22 = vld [vmem:[#allocation9 + $0x16c0] ss:$16 sps:$4 sm:$0xff]  }
 0xa03   : > { %12322 = vmatpush1.bf16.msra.mxu1 %v19009_v53 }
 0xa04   : > { %12323 = vmatprep.subr.bf16.mxu1 %v19014_v45 }
 0xa07   : > { %12324 = vmatpush1.bf16.msra.mxu1 %v19012_v41 }
 0xa08   : > { %12325 = vmatprep.subr.bf16.mxu1 %v19017_v5 }
 0xa0b   : > { %12326 = vmatpush1.bf16.msra.mxu1 %v19015_v31 }
 0xa0c   : > { %12327 = vmatprep.subr.bf16.mxu1 %v19020_v29 }
 0xa0f   : > { %12328 = vmatpush1.bf16.msra.mxu1 %v19018_v36  ;;  %v19060_v36 = vld [vmem:[#allocation9 + $0x16e0] ss:$16 sps:$4 sm:$0xff]  }
 0xa10   : > { %12329 = vmatprep.subr.bf16.mxu1 %v19023_v62 }
 0xa13   : > { %12330 = vmatpush1.bf16.msra.mxu1 %v19021_v44  ;;  %v19063_v44 = vld [vmem:[#allocation9 + $0x1700] ss:$16 sps:$4 sm:$0xff]  }
 0xa14   : > { %12331 = vmatprep.subr.bf16.mxu1 %v19026_v51  ;;  %v19068_v51 = vld [vmem:[#allocation9 + $0x1724] ss:$16 sps:$4 sm:$0xff]  }
 0xa17   : > { %12332 = vmatpush1.bf16.msra.mxu1 %v19024_v2  ;;  %v19071_v2 = vld [vmem:[#allocation9 + $0x1744] ss:$16 sps:$4 sm:$0xff]  }
 0xa18   : > { %12333 = vmatprep.subr.bf16.mxu1 %v19029_v30  ;;  %v19069_v30 = vld [vmem:[#allocation9 + $0x1740] ss:$16 sps:$4 sm:$0xff]  }
 0xa1b   : > { %12334 = vmatpush1.bf16.msra.mxu1 %v19027_v24  ;;  %v19074_v24 = vld [vmem:[#allocation9 + $0x1764] ss:$16 sps:$4 sm:$0xff]  }
 0xa1c   : > { %12335 = vmatprep.subr.bf16.mxu1 %v19032_v33  ;;  %v19072_v33 = vld [vmem:[#allocation9 + $0x1760] ss:$16 sps:$4 sm:$0xff]  }
 0xa1f   : > { %12336 = vmatpush1.bf16.msra.mxu1 %v19030_v23  ;;  %v19077_v23 = vld [vmem:[#allocation9 + $0x1784] ss:$16 sps:$4 sm:$0xff]  }
 0xa20   : > { %12337 = vmatprep.subr.bf16.mxu1 %v19035_v58  ;;  %v19075_v58 = vld [vmem:[#allocation9 + $0x1780] ss:$16 sps:$4 sm:$0xff]  }
 0xa23   : > { %12338 = vmatpush1.bf16.msra.mxu1 %v19033_v39  ;;  %v19080_v39 = vld [vmem:[#allocation9 + $0x17a4] ss:$16 sps:$4 sm:$0xff]  }
 0xa24   : > { %12339 = vmatprep.subr.bf16.mxu1 %v19038_v61  ;;  %v19078_v61 = vld [vmem:[#allocation9 + $0x17a0] ss:$16 sps:$4 sm:$0xff]  }
 0xa27   : > { %12340 = vmatpush1.bf16.msra.mxu1 %v19036_v46  ;;  %v19083_v46 = vld [vmem:[#allocation9 + $0x17c4] ss:$16 sps:$4 sm:$0xff]  }
 0xa28   : > { %12784 = vmatprep.subr.bf16.mxu1 %v19041_v4  ;;  %v19081_v4 = vld [vmem:[#allocation9 + $0x17c0] ss:$16 sps:$4 sm:$0xff]  }
 0xa2a   : > { %12342 = vmatmul.mubr.bf16.vlgmr.msra.gmra.mrb[56].mxu1 %v11985_v60  ;;  %v24304_v60 = vld [vmem:[#allocation21_spill] sm:$0xff] }
 0xa2b   : > { %12785 = vmatpush1.bf16.msra.mxu1 %v19039_v9  ;;  %12816 = vmatprep.mubr.bf16.mxu1 %v12461_v37  ;;  %v14782_v63 = vsub.s32 2, %v24304_v60  ;;  %v14786_v37 = vsub.s32 3, %v24304_v60  ;;  %v19086_v9 = vld [vmem:[#allocation9 + $0x17e4] ss:$16 sps:$4 sm:$0xff]  }
 0xa2c   : > { %12786 = vmatprep.subr.bf16.mxu1 %v19044_v55  ;;  %v19084_v55 = vld [vmem:[#allocation9 + $0x17e0] ss:$16 sps:$4 sm:$0xff]  }
 0xa2d   : > { %v14783_v7 = vrot.slane %v23225_v6, %v14782_v63  ;;  %v14787_v8 = vrot.slane %v23225_v6, %v14786_v37  ;;  %v19101_v63 = vld [vmem:[#allocation9 + $0x1884] ss:$16 sps:$4 sm:$0xff]   ;;  %v19099_v37 = vld [vmem:[#allocation9 + $0x1880] ss:$16 sps:$4 sm:$0xff]  }
 0xa2f   : > { %12787 = vmatpush1.bf16.msra.mxu1 %v19042_v21  ;;  %v19089_v21 = vld [vmem:[#allocation9 + $0x1804] ss:$16 sps:$4 sm:$0xff]  }
 0xa30   : > { %12788 = vmatprep.subr.bf16.mxu1 %v19047_v14  ;;  %v19087_v14 = vld [vmem:[#allocation9 + $0x1800] ss:$16 sps:$4 sm:$0xff]  }
 0xa33   : > { %12789 = vmatpush1.bf16.msra.mxu1 %v19045_v35  ;;  %v19092_v35 = vld [vmem:[#allocation9 + $0x1824] ss:$16 sps:$4 sm:$0xff]  }
 0xa34   : > { %12790 = vmatprep.subr.bf16.mxu1 %v19050_v0  ;;  %v19090_v0 = vld [vmem:[#allocation9 + $0x1820] ss:$16 sps:$4 sm:$0xff]  }
 0xa37   : > { %12791 = vmatpush1.bf16.msra.mxu1 %v19048_v25  ;;  %v19095_v25 = vld [vmem:[#allocation9 + $0x1844] ss:$16 sps:$4 sm:$0xff]  }
 0xa38   : > { %12792 = vmatprep.subr.bf16.mxu1 %v19053_v13  ;;  %v19093_v13 = vld [vmem:[#allocation9 + $0x1840] ss:$16 sps:$4 sm:$0xff]  }
 0xa3b   : > { %12793 = vmatpush1.bf16.msra.mxu1 %v19051_v28  ;;  %v19098_v28 = vld [vmem:[#allocation9 + $0x1864] ss:$16 sps:$4 sm:$0xff]  }
 0xa3c   : > { %12794 = vmatprep.subr.bf16.mxu1 %v19056_v1  ;;  %v19096_v1 = vld [vmem:[#allocation9 + $0x1860] ss:$16 sps:$4 sm:$0xff]  }
 0xa3d   : > { %v10918_v18 = vpop.f32.mrb[44].mxu1 }
 0xa3e   : > { %v23230_v59 = vadd.f32 %v10918_v18, %v23209_v32  ;;  %v14759_v48 = vpop.f32.mrb[76].mxu0  ;;  %v10920_v27 = vpop.f32.mrb[45].mxu1  ;;  %v19062_v32 = vld [vmem:[#allocation9 + $0x16e4] ss:$16 sps:$4 sm:$0xff]  }
 0xa3f   : > { %v14768_v57 = vadd.f32 %v14759_v48, %v23212_v47  ;;  %v23235_v3 = vadd.f32 %v10920_v27, %v23215_v17  ;;  %v14761_v53 = vpop.f32.mrb[77].mxu0  ;;  %v10922_v11 = vpop.f32.mrb[46].mxu1  ;;  %12795 = vmatpush1.bf16.msra.mxu1 %v19054_v54  ;;  %v19065_v47 = vld [vmem:[#allocation9 + $0x1704] ss:$16 sps:$4 sm:$0xff]  }
 0xa40   : > { %v14769_v45 = vadd.f32 %v14761_v53, %v23218_v40  ;;  %v14763_v50 = vpop.f32.mrb[78].mxu0  ;;  %v10923_v41 = vpop.f32.mrb[47].mxu1  ;;  %12796 = vmatprep.subr.bf16.mxu1 %v19059_v52  ;;  %v19066_v40 = vld [vmem:[#allocation9 + $0x1720] ss:$16 sps:$4 sm:$0xff]   ;;  %v19104_v54 = vld [vmem:[#allocation9 + $0x18a4] ss:$16 sps:$4 sm:$0xff]  }
 0xa41   : > { %v14794_v5 = vadd.f32 %v14783_v7, %v14768_v57  ;;  %v14764_v31 = vpop.f32.mrb[79].mxu0  ;;  %v19107_v52 = vld [vmem:[#allocation9 + $0x18c4] ss:$16 sps:$4 sm:$0xff]   ;;  %v19108_v11 = vld [vmem:[#allocation9 + $0x18e0] ss:$16 sps:$4 sm:$0xff]  }
 0xa42   : > { %v14795_v29 = vadd.f32 %v14787_v8, %v14769_v45  ;;  %v19105_v8 = vld [vmem:[#allocation9 + $0x18c0] ss:$16 sps:$4 sm:$0xff]   ;;  %v19110_v53 = vld [vmem:[#allocation9 + $0x18e4] ss:$16 sps:$4 sm:$0xff]  }
 0xa43   : > { %12797 = vmatpush1.bf16.msra.mxu1 %v19057_v22  ;;  %v14798_v17 = vmax.f32 %v14794_v5, 0.0  ;;  %v19113_v22 = vld [vmem:[#allocation9 + $0x1904] ss:$16 sps:$4 sm:$0xff]   ;;  %v19111_v45 = vld [vmem:[#allocation9 + $0x1900] ss:$16 sps:$4 sm:$0xff]  }
 0xa44   : > { %v14799_v62 = vmax.f32 %v14795_v29, 0.0  ;;  %12798 = vmatprep.subr.bf16.mxu1 %v19062_v32  ;;  %v19116_v50 = vld [vmem:[#allocation9 + $0x1924] ss:$16 sps:$4 sm:$0xff]   ;;  %v19120_v5 = vld [vmem:[#allocation9 + $0x1960] ss:$16 sps:$4 sm:$0xff]  }
 0xa45   : > { %v19119_v41 = vld [vmem:[#allocation9 + $0x1944] ss:$16 sps:$4 sm:$0xff]   ;;  %v19123_v29 = vld [vmem:[#allocation9 + $0x1980] ss:$16 sps:$4 sm:$0xff]  }
 0xa46   : > { %14999 = vmatprep.mubr.f32.mxu0 %v14799_v62  ;;  %v19122_v32 = vld [vmem:[#allocation9 + $0x1964] ss:$16 sps:$4 sm:$0xff]   ;;  %v19126_v62 = vld [vmem:[#allocation9 + $0x19a0] ss:$16 sps:$4 sm:$0xff]  }
 0xa47   : > { %15000 = vmatmul.mubr.f32.vlgmr.msra.gmra.mrb[80].mxu0 %v14798_v17  ;;  %12799 = vmatpush1.bf16.msra.mxu1 %v19060_v36  ;;  %v19125_v31 = vld [vmem:[#allocation9 + $0x1984] ss:$16 sps:$4 sm:$0xff]   ;;  %v19129_v17 = vld [vmem:[#allocation9 + $0x19c0] ss:$16 sps:$4 sm:$0xff]  }
 0xa48   : > { %12800 = vmatprep.subr.bf16.mxu1 %v19065_v47  ;;  %v19128_v36 = vld [vmem:[#allocation9 + $0x19a4] ss:$16 sps:$4 sm:$0xff]  }
 0xa49   : > { %v19131_v47 = vld [vmem:[#allocation9 + $0x19c4] ss:$16 sps:$4 sm:$0xff]  }
 0xa4b   : > { %12801 = vmatpush1.bf16.msra.mxu1 %v19063_v44  ;;  %v19134_v44 = vld [vmem:[#allocation9 + $0x19e4] ss:$16 sps:$4 sm:$0xff]  }
 0xa4c   : > { %12802 = vmatprep.subr.bf16.mxu1 %v19068_v51  ;;  %v19132_v51 = vld [vmem:[#allocation9 + $0x19e0] ss:$16 sps:$4 sm:$0xff]  }
 0xa4f   : > { %12803 = vmatpush1.bf16.msra.mxu1 %v19066_v40  ;;  %v19137_v40 = vld [vmem:[#allocation9 + $0x1a04] ss:$16 sps:$4 sm:$0xff]  }
 0xa50   : > { %12804 = vmatprep.subr.bf16.mxu1 %v19071_v2  ;;  %v19135_v2 = vld [vmem:[#allocation9 + $0x1a00] ss:$16 sps:$4 sm:$0xff]  }
 0xa53   : > { %12805 = vmatpush1.bf16.msra.mxu1 %v19069_v30  ;;  %v19140_v30 = vld [vmem:[#allocation9 + $0x1a24] ss:$16 sps:$4 sm:$0xff]  }
 0xa54   : > { %12806 = vmatprep.subr.bf16.mxu1 %v19074_v24  ;;  %v19138_v24 = vld [vmem:[#allocation9 + $0x1a20] ss:$16 sps:$4 sm:$0xff]  }
 0xa57   : > { %12807 = vmatpush1.bf16.msra.mxu1 %v19072_v33  ;;  %v19143_v33 = vld [vmem:[#allocation9 + $0x1a44] ss:$16 sps:$4 sm:$0xff]  }
 0xa58   : > { %12808 = vmatprep.subr.bf16.mxu1 %v19077_v23  ;;  %v19141_v23 = vld [vmem:[#allocation9 + $0x1a40] ss:$16 sps:$4 sm:$0xff]  }
 0xa5b   : > { %12809 = vmatpush1.bf16.msra.mxu1 %v19075_v58  ;;  %v19146_v58 = vld [vmem:[#allocation9 + $0x1a64] ss:$16 sps:$4 sm:$0xff]  }
 0xa5c   : > { %12810 = vmatprep.subr.bf16.mxu1 %v19080_v39  ;;  %v19144_v39 = vld [vmem:[#allocation9 + $0x1a60] ss:$16 sps:$4 sm:$0xff]  }
 0xa5f   : > { %12811 = vmatpush1.bf16.msra.mxu1 %v19078_v61  ;;  %v19149_v61 = vld [vmem:[#allocation9 + $0x1a84] ss:$16 sps:$4 sm:$0xff]  }
 0xa60   : > { %12812 = vmatprep.subr.bf16.mxu1 %v19083_v46  ;;  %v19147_v46 = vld [vmem:[#allocation9 + $0x1a80] ss:$16 sps:$4 sm:$0xff]  }
 0xa63   : > { %12813 = vmatpush1.bf16.msra.mxu1 %v19081_v4  ;;  %v19152_v4 = vld [vmem:[#allocation9 + $0x1aa4] ss:$16 sps:$4 sm:$0xff]  }
 0xa64   : > { %12814 = vmatprep.subr.bf16.mxu1 %v19086_v9  ;;  %v19155_v9 = vld [vmem:[#allocation9 + $0x1ac4] ss:$16 sps:$4 sm:$0xff]  }
 0xa67   : > { %12815 = vmatpush1.bf16.msra.mxu1 %v19084_v55 }
 0xa68   : > { %13259 = vmatprep.subr.bf16.mxu1 %v19089_v21 }
 0xa6a   : > { %12817 = vmatmul.mubr.bf16.vlgmr.msra.gmra.mrb[60].mxu1 %v12460_v56  ;;  %v19102_v56 = vld [vmem:[#allocation9 + $0x18a0] ss:$16 sps:$4 sm:$0xff]  }
 0xa6b   : > { %13260 = vmatpush1.bf16.msra.mxu1 %v19087_v14  ;;  %13291 = vmatprep.mubr.bf16.mxu1 %v12936_v20 }
 0xa6c   : > { %13261 = vmatprep.subr.bf16.mxu1 %v19092_v35 }
 0xa6f   : > { %13262 = vmatpush1.bf16.msra.mxu1 %v19090_v0  ;;  %v19153_v0 = vld [vmem:[#allocation9 + $0x1ac0] ss:$16 sps:$4 sm:$0xff]  }
 0xa70   : > { %13263 = vmatprep.subr.bf16.mxu1 %v19095_v25 }
 0xa73   : > { %13264 = vmatpush1.bf16.msra.mxu1 %v19093_v13  ;;  %v19158_v13 = vld [vmem:[#allocation9 + $0x1ae4] ss:$16 sps:$4 sm:$0xff]  }
 0xa74   : > { %13265 = vmatprep.subr.bf16.mxu1 %v19098_v28  ;;  %v19156_v28 = vld [vmem:[#allocation9 + $0x1ae0] ss:$16 sps:$4 sm:$0xff]  }
 0xa77   : > { %13266 = vmatpush1.bf16.msra.mxu1 %v19096_v1  ;;  %v19161_v1 = vld [vmem:[#allocation9 + $0x1b04] ss:$16 sps:$4 sm:$0xff]  }
 0xa78   : > { %13267 = vmatprep.subr.bf16.mxu1 %v19101_v63  ;;  %v19159_v63 = vld [vmem:[#allocation9 + $0x1b00] ss:$16 sps:$4 sm:$0xff]  }
 0xa7b   : > { %13268 = vmatpush1.bf16.msra.mxu1 %v19099_v37  ;;  %v19164_v37 = vld [vmem:[#allocation9 + $0x1b24] ss:$16 sps:$4 sm:$0xff]  }
 0xa7c   : > { %13269 = vmatprep.subr.bf16.mxu1 %v19104_v54  ;;  %v19162_v54 = vld [vmem:[#allocation9 + $0x1b20] ss:$16 sps:$4 sm:$0xff]  }
 0xa7d   : > { %v11393_v20 = vpop.f32.mrb[48].mxu1 }
 0xa7e   : > { %v23243_v18 = vadd.f32 %v11393_v20, %v23230_v59  ;;  %v11395_v7 = vpop.f32.mrb[49].mxu1  ;;  %v19114_v59 = vld [vmem:[#allocation9 + $0x1920] ss:$16 sps:$4 sm:$0xff]   ;;  %v19170_v20 = vld [vmem:[#allocation9 + $0x1b64] ss:$16 sps:$4 sm:$0xff]  }
 0xa7f   : > { %v23246_v48 = vadd.f32 %v11395_v7, %v23235_v3  ;;  %v11397_v27 = vpop.f32.mrb[50].mxu1  ;;  %13270 = vmatpush1.bf16.msra.mxu1 %v19102_v56  ;;  %v19117_v3 = vld [vmem:[#allocation9 + $0x1940] ss:$16 sps:$4 sm:$0xff]   ;;  %v19167_v56 = vld [vmem:[#allocation9 + $0x1b44] ss:$16 sps:$4 sm:$0xff]  }
 0xa80   : > { %v11398_v57 = vpop.f32.mrb[51].mxu1  ;;  %13271 = vmatprep.subr.bf16.mxu1 %v19107_v52  ;;  %v19165_v52 = vld [vmem:[#allocation9 + $0x1b40] ss:$16 sps:$4 sm:$0xff]   ;;  %v19173_v7 = vld [vmem:[#allocation9 + $0x1b84] ss:$16 sps:$4 sm:$0xff]  }
 0xa81   : > { %v19176_v27 = vld [vmem:[#allocation9 + $0x1ba4] ss:$16 sps:$4 sm:$0xff]  }
 0xa82   : > { %v19179_v57 = vld [vmem:[#allocation9 + $0x1bc4] ss:$16 sps:$4 sm:$0xff]  }
 0xa83   : > { %13272 = vmatpush1.bf16.msra.mxu1 %v19105_v8  ;;  %v19174_v8 = vld [vmem:[#allocation9 + $0x1ba0] ss:$16 sps:$4 sm:$0xff]  }
 0xa84   : > { %13273 = vmatprep.subr.bf16.mxu1 %v19110_v53  ;;  %v19177_v53 = vld [vmem:[#allocation9 + $0x1bc0] ss:$16 sps:$4 sm:$0xff]  }
 0xa87   : > { %13274 = vmatpush1.bf16.msra.mxu1 %v19108_v11  ;;  %v19182_v11 = vld [vmem:[#allocation9 + $0x1be4] ss:$16 sps:$4 sm:$0xff]  }
 0xa88   : > { %13275 = vmatprep.subr.bf16.mxu1 %v19113_v22  ;;  %v19180_v22 = vld [vmem:[#allocation9 + $0x1be0] ss:$16 sps:$4 sm:$0xff]  }
 0xa8b   : > { %13276 = vmatpush1.bf16.msra.mxu1 %v19111_v45  ;;  %v19185_v45 = vld [vmem:[#allocation9 + $0x1c04] ss:$16 sps:$4 sm:$0xff]  }
 0xa8c   : > { %13277 = vmatprep.subr.bf16.mxu1 %v19116_v50  ;;  %v19183_v50 = vld [vmem:[#allocation9 + $0x1c00] ss:$16 sps:$4 sm:$0xff]  }
 0xa8f   : > { %13278 = vmatpush1.bf16.msra.mxu1 %v19114_v59  ;;  %v19188_v59 = vld [vmem:[#allocation9 + $0x1c24] ss:$16 sps:$4 sm:$0xff]  }
 0xa90   : > { %13279 = vmatprep.subr.bf16.mxu1 %v19119_v41  ;;  %v19186_v41 = vld [vmem:[#allocation9 + $0x1c20] ss:$16 sps:$4 sm:$0xff]  }
 0xa93   : > { %13280 = vmatpush1.bf16.msra.mxu1 %v19117_v3  ;;  %v19191_v3 = vld [vmem:[#allocation9 + $0x1c44] ss:$16 sps:$4 sm:$0xff]  }
 0xa94   : > { %13281 = vmatprep.subr.bf16.mxu1 %v19122_v32  ;;  %v19189_v32 = vld [vmem:[#allocation9 + $0x1c40] ss:$16 sps:$4 sm:$0xff]  }
 0xa97   : > { %13282 = vmatpush1.bf16.msra.mxu1 %v19120_v5  ;;  %v19194_v5 = vld [vmem:[#allocation9 + $0x1c64] ss:$16 sps:$4 sm:$0xff]  }
 0xa98   : > { %13283 = vmatprep.subr.bf16.mxu1 %v19125_v31  ;;  %v19192_v31 = vld [vmem:[#allocation9 + $0x1c60] ss:$16 sps:$4 sm:$0xff]  }
 0xa9b   : > { %13284 = vmatpush1.bf16.msra.mxu1 %v19123_v29  ;;  %v19197_v29 = vld [vmem:[#allocation9 + $0x1c84] ss:$16 sps:$4 sm:$0xff]  }
 0xa9c   : > { %13285 = vmatprep.subr.bf16.mxu1 %v19128_v36  ;;  %v19195_v36 = vld [vmem:[#allocation9 + $0x1c80] ss:$16 sps:$4 sm:$0xff]  }
 0xa9f   : > { %13286 = vmatpush1.bf16.msra.mxu1 %v19126_v62  ;;  %v19200_v62 = vld [vmem:[#allocation9 + $0x1ca4] ss:$16 sps:$4 sm:$0xff]  }
 0xaa0   : > { %13287 = vmatprep.subr.bf16.mxu1 %v19131_v47 }
 0xaa3   : > { %13288 = vmatpush1.bf16.msra.mxu1 %v19129_v17 }
 0xaa4   : > { %13289 = vmatprep.subr.bf16.mxu1 %v19134_v44 }
 0xaa7   : > { %13290 = vmatpush1.bf16.msra.mxu1 %v19132_v51 }
 0xaa8   : > { %13734 = vmatprep.subr.bf16.mxu1 %v19137_v40  ;;  %v19201_v40 = vld [vmem:[#allocation9 + $0x1cc0] ss:$16 sps:$4 sm:$0xff]  }
 0xaaa   : > { %13292 = vmatmul.mubr.bf16.vlgmr.msra.gmra.mrb[64].mxu1 %v12935_v19  ;;  %v19150_v19 = vld [vmem:[#allocation9 + $0x1aa0] ss:$16 sps:$4 sm:$0xff]  }
 0xaab   : > { %13735 = vmatpush1.bf16.msra.mxu1 %v19135_v2  ;;  %13766 = vmatprep.mubr.bf16.mxu1 %v13411_v16 }
 0xaac   : > { %13736 = vmatprep.subr.bf16.mxu1 %v19140_v30  ;;  %v19206_v30 = vld [vmem:[#allocation9 + $0x1ce4] ss:$16 sps:$4 sm:$0xff]  }
 0xaaf   : > { %13737 = vmatpush1.bf16.msra.mxu1 %v19138_v24  ;;  %v19204_v24 = vld [vmem:[#allocation9 + $0x1ce0] ss:$16 sps:$4 sm:$0xff]  }
 0xab0   : > { %13738 = vmatprep.subr.bf16.mxu1 %v19143_v33  ;;  %v19209_v33 = vld [vmem:[#allocation9 + $0x1d04] ss:$16 sps:$4 sm:$0xff]  }
 0xab3   : > { %13739 = vmatpush1.bf16.msra.mxu1 %v19141_v23  ;;  %v19207_v23 = vld [vmem:[#allocation9 + $0x1d00] ss:$16 sps:$4 sm:$0xff]  }
 0xab4   : > { %13740 = vmatprep.subr.bf16.mxu1 %v19146_v58  ;;  %v19212_v58 = vld [vmem:[#allocation9 + $0x1d24] ss:$16 sps:$4 sm:$0xff]  }
 0xab7   : > { %13741 = vmatpush1.bf16.msra.mxu1 %v19144_v39  ;;  %v19210_v39 = vld [vmem:[#allocation9 + $0x1d20] ss:$16 sps:$4 sm:$0xff]  }
 0xab8   : > { %13742 = vmatprep.subr.bf16.mxu1 %v19149_v61  ;;  %v19215_v61 = vld [vmem:[#allocation9 + $0x1d44] ss:$16 sps:$4 sm:$0xff]  }
 0xabb   : > { %13743 = vmatpush1.bf16.msra.mxu1 %v19147_v46  ;;  %v19213_v46 = vld [vmem:[#allocation9 + $0x1d40] ss:$16 sps:$4 sm:$0xff]  }
 0xabc   : > { %13744 = vmatprep.subr.bf16.mxu1 %v19152_v4  ;;  %v19218_v4 = vld [vmem:[#allocation9 + $0x1d64] ss:$16 sps:$4 sm:$0xff]  }
 0xabd   : > { %v11868_v16 = vpop.f32.mrb[52].mxu1 }
 0xabe   : > { %v23253_v55 = vadd.f32 %v11868_v16, %v23243_v18  ;;  %v11870_v21 = vpop.f32.mrb[53].mxu1  ;;  %v19168_v18 = vld [vmem:[#allocation9 + $0x1b60] ss:$16 sps:$4 sm:$0xff]  }
 0xabf   : > { %v23256_v14 = vadd.f32 %v11870_v21, %v23246_v48  ;;  %v11872_v35 = vpop.f32.mrb[54].mxu1  ;;  %13745 = vmatpush1.bf16.msra.mxu1 %v19150_v19  ;;  %v19171_v48 = vld [vmem:[#allocation9 + $0x1b80] ss:$16 sps:$4 sm:$0xff]  }
 0xac0   : > { %v11873_v25 = vpop.f32.mrb[55].mxu1  ;;  %13746 = vmatprep.subr.bf16.mxu1 %v19155_v9  ;;  %v19216_v19 = vld [vmem:[#allocation9 + $0x1d60] ss:$16 sps:$4 sm:$0xff]   ;;  %v19221_v9 = vld [vmem:[#allocation9 + $0x1d84] ss:$16 sps:$4 sm:$0xff]  }
 0xac1   : > { %v19219_v16 = vld [vmem:[#allocation9 + $0x1d80] ss:$16 sps:$4 sm:$0xff]   ;;  %v19227_v25 = vld [vmem:[#allocation9 + $0x1dc4] ss:$16 sps:$4 sm:$0xff]  }
 0xac2   : > { %v19222_v35 = vld [vmem:[#allocation9 + $0x1da0] ss:$16 sps:$4 sm:$0xff]  }
 0xac3   : > { %13747 = vmatpush1.bf16.msra.mxu1 %v19153_v0 }
 0xac4   : > { %13748 = vmatprep.subr.bf16.mxu1 %v19158_v13  ;;  %v19225_v13 = vld [vmem:[#allocation9 + $0x1dc0] ss:$16 sps:$4 sm:$0xff]  }
 0xac7   : > { %13749 = vmatpush1.bf16.msra.mxu1 %v19156_v28  ;;  %v19230_v28 = vld [vmem:[#allocation9 + $0x1de4] ss:$16 sps:$4 sm:$0xff]  }
 0xac8   : > { %13750 = vmatprep.subr.bf16.mxu1 %v19161_v1  ;;  %v19228_v1 = vld [vmem:[#allocation9 + $0x1de0] ss:$16 sps:$4 sm:$0xff]  }
 0xacb   : > { %13751 = vmatpush1.bf16.msra.mxu1 %v19159_v63  ;;  %v19233_v63 = vld [vmem:[#allocation9 + $0x1e04] ss:$16 sps:$4 sm:$0xff]  }
 0xacc   : > { %13752 = vmatprep.subr.bf16.mxu1 %v19164_v37  ;;  %v19231_v37 = vld [vmem:[#allocation9 + $0x1e00] ss:$16 sps:$4 sm:$0xff]  }
 0xacf   : > { %13753 = vmatpush1.bf16.msra.mxu1 %v19162_v54  ;;  %v19236_v54 = vld [vmem:[#allocation9 + $0x1e24] ss:$16 sps:$4 sm:$0xff]  }
 0xad0   : > { %13754 = vmatprep.subr.bf16.mxu1 %v19167_v56  ;;  %v19234_v56 = vld [vmem:[#allocation9 + $0x1e20] ss:$16 sps:$4 sm:$0xff]  }
 0xad3   : > { %13755 = vmatpush1.bf16.msra.mxu1 %v19165_v52  ;;  %v19239_v52 = vld [vmem:[#allocation9 + $0x1e44] ss:$16 sps:$4 sm:$0xff]  }
 0xad4   : > { %13756 = vmatprep.subr.bf16.mxu1 %v19170_v20  ;;  %v19237_v20 = vld [vmem:[#allocation9 + $0x1e40] ss:$16 sps:$4 sm:$0xff]  }
 0xad7   : > { %13757 = vmatpush1.bf16.msra.mxu1 %v19168_v18  ;;  %v19242_v18 = vld [vmem:[#allocation9 + $0x1e64] ss:$16 sps:$4 sm:$0xff]  }
 0xad8   : > { %13758 = vmatprep.subr.bf16.mxu1 %v19173_v7  ;;  %v19240_v7 = vld [vmem:[#allocation9 + $0x1e60] ss:$16 sps:$4 sm:$0xff]  }
 0xadb   : > { %13759 = vmatpush1.bf16.msra.mxu1 %v19171_v48  ;;  %v19245_v48 = vld [vmem:[#allocation9 + $0x1e84] ss:$16 sps:$4 sm:$0xff]  }
 0xadc   : > { %13760 = vmatprep.subr.bf16.mxu1 %v19176_v27  ;;  %v19243_v27 = vld [vmem:[#allocation9 + $0x1e80] ss:$16 sps:$4 sm:$0xff]  }
 0xadf   : > { %13761 = vmatpush1.bf16.msra.mxu1 %v19174_v8 }
 0xae0   : > { %13762 = vmatprep.subr.bf16.mxu1 %v19179_v57 }
 0xae3   : > { %13763 = vmatpush1.bf16.msra.mxu1 %v19177_v53 }
 0xae4   : > { %13764 = vmatprep.subr.bf16.mxu1 %v19182_v11 }
 0xae7   : > { %13765 = vmatpush1.bf16.msra.mxu1 %v19180_v22  ;;  %v19249_v22 = vld [vmem:[#allocation9 + $0x1ec0] ss:$16 sps:$4 sm:$0xff]  }
 0xae8   : > { %14209 = vmatprep.subr.bf16.mxu1 %v19185_v45 }
 0xaea   : > { %13767 = vmatmul.mubr.bf16.vlgmr.msra.gmra.mrb[68].mxu1 %v13410_v26  ;;  %v19198_v26 = vld [vmem:[#allocation9 + $0x1ca0] ss:$16 sps:$4 sm:$0xff]  }
 0xaeb   : > { %14210 = vmatpush1.bf16.msra.mxu1 %v19183_v50  ;;  %14241 = vmatprep.mubr.bf16.mxu1 %v13886_v42  ;;  %v19254_v50 = vld [vmem:[#allocation9 + $0x1ee4] ss:$16 sps:$4 sm:$0xff]  }
 0xaec   : > { %14211 = vmatprep.subr.bf16.mxu1 %v19188_v59  ;;  %v19252_v59 = vld [vmem:[#allocation9 + $0x1ee0] ss:$16 sps:$4 sm:$0xff]  }
 0xaef   : > { %14212 = vmatpush1.bf16.msra.mxu1 %v19186_v41  ;;  %v19257_v41 = vld [vmem:[#allocation9 + $0x1f04] ss:$16 sps:$4 sm:$0xff]  }
 0xaf0   : > { %14213 = vmatprep.subr.bf16.mxu1 %v19191_v3  ;;  %v19255_v3 = vld [vmem:[#allocation9 + $0x1f00] ss:$16 sps:$4 sm:$0xff]  }
 0xaf3   : > { %14214 = vmatpush1.bf16.msra.mxu1 %v19189_v32  ;;  %v19260_v32 = vld [vmem:[#allocation9 + $0x1f24] ss:$16 sps:$4 sm:$0xff]  }
 0xaf4   : > { %14215 = vmatprep.subr.bf16.mxu1 %v19194_v5  ;;  %v19258_v5 = vld [vmem:[#allocation9 + $0x1f20] ss:$16 sps:$4 sm:$0xff]  }
 0xaf7   : > { %14216 = vmatpush1.bf16.msra.mxu1 %v19192_v31  ;;  %v19263_v31 = vld [vmem:[#allocation9 + $0x1f44] ss:$16 sps:$4 sm:$0xff]  }
 0xaf8   : > { %14217 = vmatprep.subr.bf16.mxu1 %v19197_v29  ;;  %v19261_v29 = vld [vmem:[#allocation9 + $0x1f40] ss:$16 sps:$4 sm:$0xff]  }
 0xafb   : > { %14218 = vmatpush1.bf16.msra.mxu1 %v19195_v36  ;;  %v19266_v36 = vld [vmem:[#allocation9 + $0x1f64] ss:$16 sps:$4 sm:$0xff]  }
 0xafc   : > { %14219 = vmatprep.subr.bf16.mxu1 %v19200_v62  ;;  %v19264_v62 = vld [vmem:[#allocation9 + $0x1f60] ss:$16 sps:$4 sm:$0xff]  }
 0xafd   : > { %v12343_v42 = vpop.f32.mrb[56].mxu1 }
 0xafe   : > { %v23263_v47 = vadd.f32 %v12343_v42, %v23253_v55  ;;  %v12345_v17 = vpop.f32.mrb[57].mxu1  ;;  %v19224_v55 = vld [vmem:[#allocation9 + $0x1da4] ss:$16 sps:$4 sm:$0xff]  }
 0xaff   : > { %v23266_v44 = vadd.f32 %v12345_v17, %v23256_v14  ;;  %v12347_v51 = vpop.f32.mrb[58].mxu1  ;;  %14220 = vmatpush1.bf16.msra.mxu1 %v19198_v26  ;;  %v19269_v26 = vld [vmem:[#allocation9 + $0x1f84] ss:$16 sps:$4 sm:$0xff]  }
 0xb00   : > { %v12348_v2 = vpop.f32.mrb[59].mxu1  ;;  %14221 = vmatprep.subr.bf16.mxu1 %v19203_v12  ;;  %v19267_v12 = vld [vmem:[#allocation9 + $0x1f80] ss:$16 sps:$4 sm:$0xff]   ;;  %v19272_v42 = vld [vmem:[#allocation9 + $0x1fa4] ss:$16 sps:$4 sm:$0xff]  }
 0xb01   : > { %v19275_v17 = vld [vmem:[#allocation9 + $0x1fc4] ss:$16 sps:$4 sm:$0xff]  }
 0xb02   : > { %v19278_v51 = vld [vmem:[#allocation9 + $0x1fe4] ss:$16 sps:$4 sm:$0xff]  }
 0xb03   : > { %14222 = vmatpush1.bf16.msra.mxu1 %v19201_v40  ;;  %v19276_v40 = vld [vmem:[#allocation9 + $0x1fe0] ss:$16 sps:$4 sm:$0xff]  }
 0xb04   : > { %14223 = vmatprep.subr.bf16.mxu1 %v19206_v30 }
 0xb07   : > { %14224 = vmatpush1.bf16.msra.mxu1 %v19204_v24 }
 0xb08   : > { %14225 = vmatprep.subr.bf16.mxu1 %v19209_v33 }
 0xb0b   : > { %14226 = vmatpush1.bf16.msra.mxu1 %v19207_v23 }
 0xb0c   : > { %14227 = vmatprep.subr.bf16.mxu1 %v19212_v58 }
 0xb0f   : > { %14228 = vmatpush1.bf16.msra.mxu1 %v19210_v39  ;;  %v14816_v39 = vld [vmem:[%s23433_s7 + $0x80] sm:$0xff] }
 0xb10   : > { %14229 = vmatprep.subr.bf16.mxu1 %v19215_v61  ;;  %v14817_v61 = vld [vmem:[%s23433_s7 + $0x88] sm:$0xff] }
 0xb11   : > { %v17285_v43 = vpack.c.bf16 %v14817_v61, %v14816_v39  ;;  %v14778_v39 = vsub.s32 1, %v24304_v60 }
 0xb13   : > { %14230 = vmatpush1.bf16.msra.mxu1 %v19213_v46  ;;  %v14800_v46 = vld [vmem:[%s23433_s7] sm:$0xff] }
 0xb14   : > { %14231 = vmatprep.subr.bf16.mxu1 %v19218_v4  ;;  %v14818_v4 = vld [vmem:[%s23433_s7 + $0x90] sm:$0xff] }
 0xb17   : > { %14232 = vmatpush1.bf16.msra.mxu1 %v19216_v19  ;;  %v14819_v19 = vld [vmem:[%s23433_s7 + $0x98] sm:$0xff] }
 0xb18   : > { %14233 = vmatprep.subr.bf16.mxu1 %v19221_v9 }
 0xb1a   : > { %v16832_v21 = vpop.f32.mrb[80].mxu0 }
 0xb1b   : > { %v16833_v14 = vpop.f32.mrb[81].mxu0  ;;  %14234 = vmatpush1.bf16.msra.mxu1 %v19219_v16  ;;  %v17289_v16 = vpack.c.bf16 %v14819_v19, %v14818_v4 }
 0xb1c   : > { %v23268_v0 = vadd.f32 %v16833_v14, %v16832_v21  ;;  %14235 = vmatprep.subr.bf16.mxu1 %v19224_v55  ;;  %v14802_v55 = vld [vmem:[%s23433_s7 + $0x10] sm:$0xff]  ;;  %v14803_v21 = vld [vmem:[%s23433_s7 + $0x18] sm:$0xff]  ;;  %v14820_v14 = vld [vmem:[%s23433_s7 + $0xa0] sm:$0xff] }
 0xb1f   : > { %14236 = vmatpush1.bf16.msra.mxu1 %v19222_v35  ;;  %v14821_v35 = vld [vmem:[%s23433_s7 + $0xa8] sm:$0xff] }
 0xb20   : > { %14237 = vmatprep.subr.bf16.mxu1 %v19227_v25  ;;  %v17291_v25 = vpack.c.bf16 %v14803_v21, %v14802_v55 }
 0xb23   : > { %14238 = vmatpush1.bf16.msra.mxu1 %v19225_v13  ;;  %v17293_v13 = vpack.c.bf16 %v14821_v35, %v14820_v14 }
 0xb24   : > { %14239 = vmatprep.subr.bf16.mxu1 %v19230_v28  ;;  %v14804_v28 = vld [vmem:[%s23433_s7 + $0x20] sm:$0xff] }
 0xb27   : > { %14240 = vmatpush1.bf16.msra.mxu1 %v19228_v1  ;;  %v14805_v1 = vld [vmem:[%s23433_s7 + $0x28] sm:$0xff] }
 0xb28   : > { %14684 = vmatprep.subr.bf16.mxu1 %v19233_v63  ;;  %v14822_v63 = vld [vmem:[%s23433_s7 + $0xb0] sm:$0xff] }
 0xb2a   : > { %14242 = vmatmul.mubr.bf16.vlgmr.msra.gmra.mrb[72].mxu1 %v13885_v15  ;;  %v19246_v15 = vld [vmem:[#allocation9 + $0x1ea0] ss:$16 sps:$4 sm:$0xff]  }
 0xb2b   : > { %14685 = vmatpush1.bf16.msra.mxu1 %v19231_v37  ;;  %14716 = vmatprep.mubr.bf16.mxu1 %v14361_v49  ;;  %v14823_v37 = vld [vmem:[%s23433_s7 + $0xb8] sm:$0xff] }
 0xb2c   : > { %14686 = vmatprep.subr.bf16.mxu1 %v19236_v54  ;;  %v17295_v54 = vpack.c.bf16 %v14805_v1, %v14804_v28 }
 0xb2f   : > { %14687 = vmatpush1.bf16.msra.mxu1 %v19234_v56  ;;  %v17297_v56 = vpack.c.bf16 %v14823_v37, %v14822_v63 }
 0xb30   : > { %14688 = vmatprep.subr.bf16.mxu1 %v19239_v52  ;;  %v14806_v52 = vld [vmem:[%s23433_s7 + $0x30] sm:$0xff] }
 0xb33   : > { %14689 = vmatpush1.bf16.msra.mxu1 %v19237_v20  ;;  %v14807_v20 = vld [vmem:[%s23433_s7 + $0x38] sm:$0xff] }
 0xb34   : > { %14690 = vmatprep.subr.bf16.mxu1 %v19242_v18  ;;  %v14824_v18 = vld [vmem:[%s23433_s7 + $0xc0] sm:$0xff] }
 0xb37   : > { %14691 = vmatpush1.bf16.msra.mxu1 %v19240_v7  ;;  %v14825_v7 = vld [vmem:[%s23433_s7 + $0xc8] sm:$0xff] }
 0xb38   : > { %14692 = vmatprep.subr.bf16.mxu1 %v19245_v48  ;;  %v17299_v48 = vpack.c.bf16 %v14807_v20, %v14806_v52 }
 0xb3b   : > { %14693 = vmatpush1.bf16.msra.mxu1 %v19243_v27  ;;  %v17301_v27 = vpack.c.bf16 %v14825_v7, %v14824_v18 }
 0xb3c   : > { %14694 = vmatprep.subr.bf16.mxu1 %v19248_v34  ;;  %v14808_v34 = vld [vmem:[%s23433_s7 + $0x40] sm:$0xff] }
 0xb3d   : > { %v12818_v49 = vpop.f32.mrb[60].mxu1 }
 0xb3e   : > { %v12866_v8 = vadd.f32 %v12818_v49, %v23263_v47  ;;  %v12820_v57 = vpop.f32.mrb[61].mxu1  ;;  %v19270_v47 = vld [vmem:[#allocation9 + $0x1fa0] ss:$16 sps:$4 sm:$0xff]   ;;  %v14827_v49 = vld [vmem:[%s23433_s7 + $0xd8] sm:$0xff] }
 0xb3f   : > { %v12867_v53 = vadd.f32 %v12820_v57, %v23266_v44  ;;  %v12822_v11 = vpop.f32.mrb[62].mxu1  ;;  %14695 = vmatpush1.bf16.msra.mxu1 %v19246_v15  ;;  %v19273_v44 = vld [vmem:[#allocation9 + $0x1fc0] ss:$16 sps:$4 sm:$0xff]   ;;  %v14809_v15 = vld [vmem:[%s23433_s7 + $0x48] sm:$0xff] }
 0xb40   : > { %v12823_v45 = vpop.f32.mrb[63].mxu1  ;;  %14696 = vmatprep.subr.bf16.mxu1 %v19251_v10  ;;  %v14826_v10 = vld [vmem:[%s23433_s7 + $0xd0] sm:$0xff]  ;;  %v14811_v11 = vld [vmem:[%s23433_s7 + $0x58] sm:$0xff] }
 0xb41   : > { %v17305_v57 = vpack.c.bf16 %v14827_v49, %v14826_v10 }
 0xb43   : > { %14697 = vmatpush1.bf16.msra.mxu1 %v19249_v22 }
 0xb44   : > { %14698 = vmatprep.subr.bf16.mxu1 %v19254_v50 }
 0xb47   : > { %14699 = vmatpush1.bf16.msra.mxu1 %v19252_v59 }
 0xb48   : > { %14700 = vmatprep.subr.bf16.mxu1 %v19257_v41 }
 0xb4b   : > { %14701 = vmatpush1.bf16.msra.mxu1 %v19255_v3 }
 0xb4c   : > { %14702 = vmatprep.subr.bf16.mxu1 %v19260_v32 }
 0xb4f   : > { %14703 = vmatpush1.bf16.msra.mxu1 %v19258_v5  ;;  %v14828_v5 = vld [vmem:[%s23433_s7 + $0xe0] sm:$0xff] }
 0xb50   : > { %14704 = vmatprep.subr.bf16.mxu1 %v19263_v31  ;;  %v14829_v31 = vld [vmem:[%s23433_s7 + $0xe8] sm:$0xff] }
 0xb53   : > { %14705 = vmatpush1.bf16.msra.mxu1 %v19261_v29  ;;  %v17309_v29 = vpack.c.bf16 %v14829_v31, %v14828_v5 }
 0xb54   : > { %14706 = vmatprep.subr.bf16.mxu1 %v19266_v36  ;;  %v14812_v36 = vld [vmem:[%s23433_s7 + $0x60] sm:$0xff] }
 0xb57   : > { %14707 = vmatpush1.bf16.msra.mxu1 %v19264_v62  ;;  %v14813_v62 = vld [vmem:[%s23433_s7 + $0x68] sm:$0xff] }
 0xb58   : > { %14708 = vmatprep.subr.bf16.mxu1 %v19269_v26  ;;  %v14830_v26 = vld [vmem:[%s23433_s7 + $0xf0] sm:$0xff] }
 0xb5b   : > { %14709 = vmatpush1.bf16.msra.mxu1 %v19267_v12  ;;  %v17311_v12 = vpack.c.bf16 %v14813_v62, %v14812_v36 }
 0xb5c   : > { %14710 = vmatprep.subr.bf16.mxu1 %v19272_v42  ;;  %v14831_v42 = vld [vmem:[%s23433_s7 + $0xf8] sm:$0xff] }
 0xb5f   : > { %14711 = vmatpush1.bf16.msra.mxu1 %v19270_v47  ;;  %v14814_v47 = vld [vmem:[%s23433_s7 + $0x70] sm:$0xff] }
 0xb60   : > { %14712 = vmatprep.subr.bf16.mxu1 %v19275_v17  ;;  %v14815_v17 = vld [vmem:[%s23433_s7 + $0x78] sm:$0xff] }
 0xb63   : > { %14713 = vmatpush1.bf16.msra.mxu1 %v19273_v44  ;;  %v17313_v44 = vpack.c.bf16 %v14831_v42, %v14830_v26 }
 0xb64   : > { %14714 = vmatprep.subr.bf16.mxu1 %v19278_v51  ;;  %v17315_v51 = vpack.c.bf16 %v14815_v17, %v14814_v47 }
 0xb67   : > { %14715 = vmatpush1.bf16.msra.mxu1 %v19276_v40 }
 0xb68   : > { %17286 = vmatprep.subr.bf16.mxu1 %v17285_v43  ;;  %v14779_v43 = vrot.slane %v23225_v6, %v14778_v39 }
 0xb6a   : > { %14717 = vmatmul.mubr.bf16.vlgmr.msra.gmra.mrb[76].mxu1 %v14360_v38  ;;  %v14801_v38 = vld [vmem:[%s23433_s7 + $0x8] sm:$0xff] }
 0xb6b   : > { %v17287_v9 = vpack.c.bf16 %v14801_v38, %v14800_v46 }
 0xb6d   : > { %17288 = vmatpush3.bf16.msra.mxu1 %v17287_v9 }
 0xb6e   : > { %17290 = vmatprep.subr.bf16.mxu1 %v17289_v16 }
 0xb71   : > { %17292 = vmatpush3.bf16.msra.mxu1 %v17291_v25 }
 0xb72   : > { %17294 = vmatprep.subr.bf16.mxu1 %v17293_v13 }
 0xb75   : > { %17296 = vmatpush3.bf16.msra.mxu1 %v17295_v54 }
 0xb76   : > { %17298 = vmatprep.subr.bf16.mxu1 %v17297_v56 }
 0xb79   : > { %17300 = vmatpush3.bf16.msra.mxu1 %v17299_v48 }
 0xb7a   : > { %17302 = vmatprep.subr.bf16.mxu1 %v17301_v27 }
 0xb7d   : > { %v13293_v2 = vpop.f32.mrb[64].mxu1 }
 0xb7e   : > { %v13341_v30 = vadd.f32 %v13293_v2, %v12866_v8  ;;  %v13295_v24 = vpop.f32.mrb[65].mxu1  ;;  %v17303_v8 = vpack.c.bf16 %v14809_v15, %v14808_v34 }
 0xb7f   : > { %v13342_v33 = vadd.f32 %v13295_v24, %v12867_v53  ;;  %v13297_v23 = vpop.f32.mrb[66].mxu1  ;;  %v14810_v53 = vld [vmem:[%s23433_s7 + $0x50] sm:$0xff] }
 0xb80   : > { %v13298_v58 = vpop.f32.mrb[67].mxu1  ;;  %17304 = vmatpush3.bf16.msra.mxu1 %v17303_v8  ;;  %v17307_v22 = vpack.c.bf16 %v14811_v11, %v14810_v53 }
 0xb81   : > { %17306 = vmatprep.subr.bf16.mxu1 %v17305_v57  ;;  %v14774_v58 = vsub.s32 0, %v24304_v60  ;;  %v14864_v60 = vld [vmem:[#allocation12] sm:$0x1] }
 0xb83   : > { %v14775_v61 = vrot.slane %v23225_v6, %v14774_v58 }
 0xb84   : > { %17308 = vmatpush3.bf16.msra.mxu1 %v17307_v22 }
 0xb85   : > { %17310 = vmatprep.subr.bf16.mxu1 %v17309_v29 }
 0xb88   : > { %17312 = vmatpush3.bf16.msra.mxu1 %v17311_v12 }
 0xb89   : > { %17314 = vmatprep.subr.bf16.mxu1 %v17313_v44 }
 0xb8c   : > { %17316 = vmatpush3.bf16.msra.mxu1 %v17315_v51 }
 0xbbd   : > { %v13768_v45 = vpop.f32.mrb[68].mxu1 }
 0xbbe   : > { %v13816_v50 = vadd.f32 %v13768_v45, %v13341_v30  ;;  %v13770_v59 = vpop.f32.mrb[69].mxu1 }
 0xbbf   : > { %v13817_v41 = vadd.f32 %v13770_v59, %v13342_v33  ;;  %v13772_v3 = vpop.f32.mrb[70].mxu1 }
 0xbc0   : > { %v13773_v32 = vpop.f32.mrb[71].mxu1 }
 0xbfd   : > { %v14243_v40 = vpop.f32.mrb[72].mxu1 }
 0xbfe   : > { %v14291_v2 = vadd.f32 %v14243_v40, %v13816_v50  ;;  %v14245_v30 = vpop.f32.mrb[73].mxu1 }
 0xbff   : > { %v14292_v24 = vadd.f32 %v14245_v30, %v13817_v41  ;;  %v14247_v33 = vpop.f32.mrb[74].mxu1 }
 0xc00   : > { %v14248_v23 = vpop.f32.mrb[75].mxu1 }
 0xc3d   : > { %v14718_v46 = vpop.f32.mrb[76].mxu1 }
 0xc3e   : > { %v14766_v38 = vadd.f32 %v14718_v46, %v14291_v2  ;;  %v14720_v4 = vpop.f32.mrb[77].mxu1 }
 0xc3f   : > { %v14767_v19 = vadd.f32 %v14720_v4, %v14292_v24  ;;  %v14722_v9 = vpop.f32.mrb[78].mxu1 }
 0xc40   : > { %v14792_v16 = vadd.f32 %v14775_v61, %v14766_v38  ;;  %v14723_v55 = vpop.f32.mrb[79].mxu1 }
 0xc41   : > { %v14793_v21 = vadd.f32 %v14779_v43, %v14767_v19 }
 0xc42   : > { %v14796_v35 = vmax.f32 %v14792_v16, 0.0 }
 0xc43   : > { %v14797_v14 = vmax.f32 %v14793_v21, 0.0 }
 0xc45   : > { %14929 = vmatprep.mubr.f32.mxu1 %v14797_v14 }
 0xc46   : > { %14930 = vmatmul.mubr.f32.vlgmr.msra.gmra.mrb[80].mxu1 %v14796_v35 }
 0xd19   : > { %v16797_v25 = vpop.f32.mrb[80].mxu1 }
 0xd1a   : > { %v16798_v13 = vpop.f32.mrb[81].mxu1 }
 0xd1b   : > { %v16799_v28 = vadd.f32 %v16798_v13, %v16797_v25 }
 0xd1d   : > { %v14932_v6 = vadd.f32 %v16799_v28, %v14864_v60 }
 0xd1f   : > { %v15002_v1 = vadd.f32 %v23268_v0, %v14932_v6 }
 0xd21   : > { %15006 = vst.msk [vmem:[%s389_s16] sm:$0x1] %vm15005_vm7, %v15002_v1 }
 0xd22   : > { %19462 = shalt.err (!%p19459_p1)
}
 0xd23   : > { %s19463_s11 = scalar_lea.hbm %s23384_s25, 16  ;;  %s19467_s2 = scalar_lea.hbm %s23435_s9, 32 }
 0xd24   : > { %p19464_p0 = scmp.ne.s32.totalorder %s23384_s25, %s19463_s11  ;;  %p19468_p9 = scmp.lt.u32.totalorder %s23384_s25, %s23435_s9 }
 0xd25   : > { %p19469_p12 = scmp.lt.u32.totalorder %s19467_s2, %s19463_s11  ;;  %p19471_p2 = scmp.lt.u32.totalorder %s19463_s11, %s23384_s25 }
 0xd26   : > { %p19465_p6 = pnand %p19464_p0, %p24305_p3 }
 0xd27   : > { %p19470_p10 = por %p19469_p12, %p19468_p9 }
 0xd28   : > { %p19466_p5 = pneg %p19465_p6 }
 0xd29   : > { %p19472_p4 = por %p19471_p2, %p19470_p10 }
 0xd2b   : > { %p19473_p7 = pnand %p19472_p4, %p19466_p5 }
 0xd2d   : > { %19476 = shalt.err (!%p19473_p7)
}
 0xd2e   : > { %17625 = dma.vmem_to_hbm [thread:$0]  (%p24305_p3), %s23386_s27, 16, %s23384_s25, %s15008_s24  }
 0xd2f PF: > { %p17657_p8 = scmp.ge.s32.totalorder %s19523_s12, 2  ;;  %s15032_s26 = sand.u32 1, %s19511_s30  }
 0xd30   : > { %p24306_p11 = scmp.ne.s32.totalorder %s23646_s20, 0  ;;  %s15033_s18 = scalar_lea.sflag [#allocation6], %s15032_s26 }
 0xd32   : > { %p17644_p13 = pnand %p17657_p8, %p24306_p11 }
 0xd34   : > { %19506 = dma.done.wait (!%p17644_p13), %s15033_s18, 16  }
 0xd35   : > { %19508 = vsyncadd (!%p17644_p13), %s15033_s18, 4294967280  ;;  %s24307_s12 = sld [smem:[#allocation19_spill]]  ;;  %s24308_s16 = sld [smem:[#allocation18_spill]] }
 0xd36   : > { %s24309_s11 = sld [smem:[#allocation20_spill]]  ;;  %s24310_s30 = smov %s19515_s10 }
 0xd3b   : > { %p22_p1 = scmp.ge.s32.totalorder %s24307_s12, 4   ;;  %s24311_s10 = smov %s24308_s16 }
 0xd3d   :  { %24 = sbr.rel (!%p22_p1) target bundleno = 9 (0x9), region = 127 }
 0xd44   :  { %15037 = vsyncpa [#allocation5], 1 }
 0xd45   :  { %15039 = vsyncpa [#allocation5 + $0x1], 1 }
 0xd46   :  { %15040 = vsyncpa [#allocation8], 1 }
 0xd47   :  { %15041 = vsyncpa [#allocation11], 1 }
 0xd48   :  { %15042 = vsyncpa [#allocation6], 1 }
 0xd49   :  { %15044 = vsyncpa [#allocation6 + $0x1], 1 }

</bundles_post_ra>
